<compile_context>
chip_gen: v5e
topology: v5e:2x2
jax: 0.10.0
libtpu: 0.0.40
codegen_flags: <defaults>
</compile_context>

<pallas_src>
import numpy as np
import jax
import jax.numpy as jnp
from jax import lax
from jax.experimental import pallas as pl
from jax.experimental.pallas import tpu as pltpu

LANE = 128
_GRID = 10                    # per-image lane grid is 10x10 (valid 7x7 outputs)
_PIX = _GRID * _GRID          # 100 lanes per image
_L1_OFFS = (0, 1, 10, 11)                                   # (dy,dx) in {0,1}^2
_L2_OFFS = tuple(dy * _GRID + dx for dy in range(3) for dx in range(3))


def _round_up(x, m):
    return ((x + m - 1) // m) * m


# ---------------------------------------------------------------------------
# Static index maps used to zero-expand the 5x5 conv weights onto the fused
# (parity-block, pool-phase, lane-shift) structure.  Computed once with numpy.
# ---------------------------------------------------------------------------
def _build_l1_maps():
    # rows r = bk*64 + ph*16 + co  (bk = output parity block, ph = pool phase)
    # cols c = d*16 + class        (d = lane-shift index, class = mod-4 class)
    co_idx = np.zeros((256, 64), np.int32)
    tap_idx = np.zeros((256, 64), np.int32)
    val = np.zeros((256, 64), np.float32)
    for py in range(2):
        for px in range(2):
            bk = py * 2 + px
            for di in range(2):
                for dj in range(2):
                    ph = di * 2 + dj
                    for co in range(16):
                        r = bk * 64 + ph * 16 + co
                        co_idx[r, :] = co
                        for oy in range(8):
                            for ox in range(8):
                                col = (oy // 4) * 32 + (ox // 4) * 16 + (oy % 4) * 4 + (ox % 4)
                                ky = oy - 2 * py - di
                                kx = ox - 2 * px - dj
                                if 0 <= ky < 5 and 0 <= kx < 5:
                                    tap_idx[r, col] = ky * 5 + kx
                                    val[r, col] = 1.0
    return co_idx, tap_idx, val


def _build_l2_maps():
    # part d = dy2*3 + dx2 (lane shift), rows r = ph*32 + co, cols = bk*16 + c
    co_idx = np.zeros((9, 128, 64), np.int32)
    ci_idx = np.zeros((9, 128, 64), np.int32)
    tap_idx = np.zeros((9, 128, 64), np.int32)
    val = np.zeros((9, 128, 64), np.float32)
    for dy2 in range(3):
        for dx2 in range(3):
            d = dy2 * 3 + dx2
            for di in range(2):
                for dj in range(2):
                    ph = di * 2 + dj
                    for co in range(32):
                        r = ph * 32 + co
                        for py in range(2):
                            for px in range(2):
                                bk = py * 2 + px
                                for c in range(16):
                                    col = bk * 16 + c
                                    co_idx[d, r, col] = co
                                    ci_idx[d, r, col] = c
                                    ky = 2 * dy2 + py - di
                                    kx = 2 * dx2 + px - dj
                                    if 0 <= ky < 5 and 0 <= kx < 5:
                                        tap_idx[d, r, col] = ky * 5 + kx
                                        val[d, r, col] = 1.0
    return co_idx, ci_idx, tap_idx, val


_L1_CO, _L1_TAP, _L1_VAL = _build_l1_maps()
_L2_CO, _L2_CI, _L2_TAP, _L2_VAL = _build_l2_maps()


# ---------------------------------------------------------------------------
# Fused conv1+ReLU+pool1 -> conv2+ReLU+pool2 kernel.
# Lane axis = flattened (image, u, v) on a 10x10 per-image grid; spatial
# shifts are flat lane offsets taken as static slices of a lane-padded value.
# ---------------------------------------------------------------------------
def _fused_cnn_kernel(xq_ref, w1_ref, b1_ref, w2_ref, b2_ref, mask_ref, o_ref):
    n = o_ref.shape[-1]
    f32 = jnp.float32

    # ---- layer 1: 4 accumulating MXU dots (M=256, K=16) over lane shifts ----
    xq = xq_ref[...]                                              # (16, n)
    xqp = jnp.concatenate([xq, jnp.zeros((16, LANE), f32)], axis=1)
    acc1 = None
    for d, off in enumerate(_L1_OFFS):
        src = xq if off == 0 else xqp[:, off:off + n]
        t = jnp.dot(w1_ref[d], src, preferred_element_type=f32)   # (256, n)
        acc1 = t if acc1 is None else acc1 + t
    h = jnp.maximum(acc1 + b1_ref[...], 0.0)                      # bias + ReLU

    # 2x2 max-pool = max over the 4 phase row-groups inside each parity block
    blocks = []
    for bk in range(4):
        base = bk * 64
        m = h[base:base + 16]
        for ph in range(1, 4):
            m = jnp.maximum(m, h[base + ph * 16: base + ph * 16 + 16])
        blocks.append(m)
    # zero the out-of-image lanes so they act as layer-2 zero padding
    h1 = jnp.concatenate(blocks, axis=0) * mask_ref[...]          # (64, n)

    # ---- layer 2: 9 accumulating MXU dots (M=128, K=64) over lane shifts ----
    h1p = jnp.concatenate([h1, jnp.zeros((64, LANE), f32)], axis=1)
    acc2 = None
    for d, off in enumerate(_L2_OFFS):
        src = h1 if off == 0 else h1p[:, off:off + n]
        t = jnp.dot(w2_ref[d], src, preferred_element_type=f32)   # (128, n)
        acc2 = t if acc2 is None else acc2 + t
    g = jnp.maximum(acc2 + b2_ref[...], 0.0)                      # bias + ReLU

    out = g[0:32]
    for ph in range(1, 4):                                        # 2x2 max-pool
        out = jnp.maximum(out, g[ph * 32: ph * 32 + 32])
    o_ref[...] = out                                              # (32, n)


def _prep_input(x_nchw, b_pad, n_lanes):
    """(B,1,28,28) -> mod-4 parity repack (16, n_lanes); pure permutation + zeros."""
    B = x_nchw.shape[0]
    x = x_nchw[:, 0]
    x = jnp.pad(x, ((0, b_pad - B), (6, 6), (6, 6)))              # (b_pad, 40, 40)
    xq = jnp.stack([x[:, ry::4, rx::4] for ry in range(4) for rx in range(4)],
                   axis=0)                                        # (16, b_pad, 10, 10)
    xq = xq.reshape(16, b_pad * _PIX)
    if n_lanes != b_pad * _PIX:
        xq = jnp.pad(xq, ((0, 0), (0, n_lanes - b_pad * _PIX)))
    return xq


def _prep_weights(params):
    w1flat = params["w1"].reshape(16, 25)
    w1big = w1flat[_L1_CO, _L1_TAP] * _L1_VAL                     # (256, 64)
    w1parts = w1big.reshape(256, 4, 16).transpose(1, 0, 2)        # (4, 256, 16)
    w2flat = params["w2"].reshape(32, 16, 25)
    w2parts = w2flat[_L2_CO, _L2_CI, _L2_TAP] * _L2_VAL           # (9, 128, 64)
    b1big = jnp.tile(params["b1"], 16).reshape(256, 1)            # rows = (bk,ph,co)
    b2big = jnp.tile(params["b2"], 4).reshape(128, 1)             # rows = (ph,co)
    return w1parts, b1big, w2parts, b2big


def _valid_mask(lane_tile):
    m = np.zeros((_GRID, _GRID), np.float32)
    m[1:8, 1:8] = 1.0
    flat = np.tile(m.reshape(-1), (lane_tile + _PIX - 1) // _PIX)[:lane_tile]
    return jnp.asarray(flat.reshape(1, lane_tile))


def conv_layers(x_nchw, params):
    """Fused conv1/pool1/conv2/pool2; returns feat (B, 32*7*7) in torch order."""
    B = x_nchw.shape[0]
    assert x_nchw.shape[1:] == (1, 28, 28)
    if B > 32:                       # whole-image batch tiles of 32 (3200 lanes)
        tb = 32
        b_pad = _round_up(B, tb)
        lane_tile = tb * _PIX
        n_lanes = b_pad * _PIX
    else:                            # single block; lanes padded to 128-multiple
        b_pad = B
        lane_tile = _round_up(B * _PIX, LANE)
        n_lanes = lane_tile
    grid_n = n_lanes // lane_tile

    xq = _prep_input(x_nchw, b_pad, n_lanes)
    w1p, b1big, w2p, b2big = _prep_weights(params)
    mask = _valid_mask(lane_tile)

    h2 = pl.pallas_call(
        _fused_cnn_kernel,
        grid=(grid_n,),
        out_shape=jax.ShapeDtypeStruct((32, n_lanes), jnp.float32),
        in_specs=[
            pl.BlockSpec((16, lane_tile), lambda i: (0, i)),
            pl.BlockSpec((4, 256, 16), lambda i: (0, 0, 0)),
            pl.BlockSpec((256, 1), lambda i: (0, 0)),
            pl.BlockSpec((9, 128, 64), lambda i: (0, 0, 0)),
            pl.BlockSpec((128, 1), lambda i: (0, 0)),
            pl.BlockSpec((1, lane_tile), lambda i: (0, 0)),
        ],
        out_specs=pl.BlockSpec((32, lane_tile), lambda i: (0, i)),
        compiler_params=pltpu.CompilerParams(
            dimension_semantics=("parallel",),
            vmem_limit_bytes=32 * 1024 * 1024),
    )(xq, w1p, b1big, w2p, b2big, mask)

    # XLA glue: drop padded/garbage lanes and flatten in torch (c, h, w) order.
    h2 = h2[:, :B * _PIX].reshape(32, B, _GRID, _GRID)[:, :, :7, :7]
    feat = jnp.transpose(h2, (1, 0, 2, 3)).reshape(B, 32 * 7 * 7)
    return feat


# ---------------------------------------------------------------------------
# Linear layer kernel (batch-gridded).
# ---------------------------------------------------------------------------
def _linear_kernel(x_ref, w_ref, b_ref, o_ref):
    o_ref[...] = jnp.dot(x_ref[...], w_ref[...],
                         preferred_element_type=jnp.float32) + b_ref[...]


def linear(x, w_torch, b):
    """x: (B, F); w_torch: (out, F) PyTorch layout; b: (out,)."""
    B, F = x.shape
    out_dim = w_torch.shape[0]
    out_pad = _round_up(out_dim, LANE)
    b_tile = min(128, _round_up(B, 8))
    b_pad = _round_up(B, b_tile)
    xp = jnp.pad(x, ((0, b_pad - B), (0, 0)))
    wt = jnp.pad(w_torch.T, ((0, 0), (0, out_pad - out_dim)))
    bb = jnp.pad(b.reshape(1, out_dim), ((0, 0), (0, out_pad - out_dim)))
    y = pl.pallas_call(
        _linear_kernel,
        grid=(b_pad // b_tile,),
        out_shape=jax.ShapeDtypeStruct((b_pad, out_pad), jnp.float32),
        in_specs=[pl.BlockSpec((b_tile, F), lambda i: (i, 0)),
                  pl.BlockSpec((F, out_pad), lambda i: (0, 0)),
                  pl.BlockSpec((1, out_pad), lambda i: (0, 0))],
        out_specs=pl.BlockSpec((b_tile, out_pad), lambda i: (i, 0)),
        compiler_params=pltpu.CompilerParams(
            dimension_semantics=("parallel",)),
    )(xp, wt, bb)
    return y[:B, :out_dim]


def cnn_forward(x_nchw, params):
    feat = conv_layers(x_nchw, params)                    # (B, 1568)
    logits = linear(feat, params["wl"], params["bl"])     # (B, 10)
    return logits, feat


def reference_forward(x_nchw, params):
    """Pure-JAX/XLA reference (NCHW, same math as the PyTorch module)."""
    def block(x, w, b):
        y = lax.conv_general_dilated(x, w, (1, 1), ((2, 2), (2, 2)),
                                     dimension_numbers=("NCHW", "OIHW", "NCHW"))
        y = jnp.maximum(y + b[None, :, None, None], 0.0)
        return lax.reduce_window(y, -jnp.inf, lax.max,
                                 (1, 1, 2, 2), (1, 1, 2, 2), "VALID")
    y = block(x_nchw, params["w1"], params["b1"])
    y = block(y, params["w2"], params["b2"])
    feat = y.reshape(y.shape[0], -1)
    logits = feat @ params["wl"].T + params["bl"][None, :]
    return logits, feat


if __name__ == "__main__":
    key = jax.random.PRNGKey(0)
    ks = jax.random.split(key, 7)
    B = 2
    # The Linear(32*7*7, 10) forces 28x28 single-channel input (MNIST shape).
    x = jax.random.normal(ks[0], (B, 1, 28, 28), jnp.float32)
    params = {
        "w1": jax.random.normal(ks[1], (16, 1, 5, 5), jnp.float32) * 0.1,
        "b1": jax.random.normal(ks[2], (16,), jnp.float32) * 0.1,
        "w2": jax.random.normal(ks[3], (32, 16, 5, 5), jnp.float32) * 0.05,
        "b2": jax.random.normal(ks[4], (32,), jnp.float32) * 0.05,
        "wl": jax.random.normal(ks[5], (10, 32 * 7 * 7), jnp.float32) * 0.02,
        "bl": jax.random.normal(ks[6], (10,), jnp.float32) * 0.02,
    }

    logits, feat = jax.jit(cnn_forward)(x, params)
    jax.block_until_ready((logits, feat))

    ref_logits, ref_feat = jax.jit(reference_forward)(x, params)
    jax.block_until_ready((ref_logits, ref_feat))

    assert logits.shape == (B, 10) and feat.shape == (B, 32 * 7 * 7)
    assert bool(jnp.allclose(feat, ref_feat, atol=1e-3, rtol=1e-3))
    assert bool(jnp.allclose(logits, ref_logits, atol=1e-3, rtol=1e-3))
    print("KERNEL_OK")
</pallas_src>

<mosaic_0001>
module attributes {stable_mosaic.version = 11 : i64} {
  func.func @_fused_cnn_kernel(%arg0: i32, %arg1: memref<16x256xf32, #tpu.memory_space<vmem>>, %arg2: memref<4x256x16xf32, #tpu.memory_space<vmem>>, %arg3: memref<256x1xf32, #tpu.memory_space<vmem>>, %arg4: memref<9x128x64xf32, #tpu.memory_space<vmem>>, %arg5: memref<128x1xf32, #tpu.memory_space<vmem>>, %arg6: memref<1x256xf32, #tpu.memory_space<vmem>>, %arg7: memref<32x256xf32, #tpu.memory_space<vmem>>) attributes {dimension_semantics = [#tpu.dimension_semantics<parallel>], iteration_bounds = array<i64: 1>, scalar_prefetch = 0 : i64, scratch_operands = 0 : i64, tpu.core_type = #tpu.core_type<tc>, window_params = [{transform_indices = @transform_0, window_bounds = array<i64: 16, 256>}, {pipeline_mode = #tpu.pipeline_mode<synchronous>, transform_indices = @transform_1, window_bounds = array<i64: 4, 256, 16>}, {pipeline_mode = #tpu.pipeline_mode<synchronous>, transform_indices = @transform_2, window_bounds = array<i64: 256, 1>}, {pipeline_mode = #tpu.pipeline_mode<synchronous>, transform_indices = @transform_3, window_bounds = array<i64: 9, 128, 64>}, {pipeline_mode = #tpu.pipeline_mode<synchronous>, transform_indices = @transform_4, window_bounds = array<i64: 128, 1>}, {pipeline_mode = #tpu.pipeline_mode<synchronous>, transform_indices = @transform_5, window_bounds = array<i64: 1, 256>}, {transform_indices = @transform_6, window_bounds = array<i64: 32, 256>}]} {
    %c0 = arith.constant 0 : index
    %c0_0 = arith.constant 0 : index
    %0 = vector.load %arg1[%c0, %c0_0] : memref<16x256xf32, #tpu.memory_space<vmem>>, vector<16x256xf32>
    %cst = arith.constant 0.000000e+00 : f32
    %1 = vector.broadcast %cst : f32 to vector<16x128xf32>
    %2 = tpu.concatenate %0, %1 in 1 : vector<16x256xf32>, vector<16x128xf32> -> vector<16x384xf32>
    %c0_1 = arith.constant 0 : index
    %c0_2 = arith.constant 0 : index
    %c0_3 = arith.constant 0 : index
    %3 = vector.load %arg2[%c0_1, %c0_2, %c0_3] : memref<4x256x16xf32, #tpu.memory_space<vmem>>, vector<1x256x16xf32>
    %4 = vector.shape_cast %3 : vector<1x256x16xf32> to vector<256x16xf32>
    %cst_4 = arith.constant dense<0.000000e+00> : vector<256x256xf32>
    %5 = tpu.matmul %4, %0, %cst_4 {dimension_numbers = #tpu.dot_dimension_numbers<[1], [0], [0], [1], [0, 0, 1, 1], [], []>} : vector<256x16xf32>, vector<16x256xf32>, vector<256x256xf32> -> vector<256x256xf32>
    %6 = vector.extract_strided_slice %2 {offsets = [0, 1], sizes = [16, 256], strides = [1, 1]} : vector<16x384xf32> to vector<16x256xf32>
    %c1 = arith.constant 1 : index
    %c0_5 = arith.constant 0 : index
    %c0_6 = arith.constant 0 : index
    %7 = vector.load %arg2[%c1, %c0_5, %c0_6] : memref<4x256x16xf32, #tpu.memory_space<vmem>>, vector<1x256x16xf32>
    %8 = vector.shape_cast %7 : vector<1x256x16xf32> to vector<256x16xf32>
    %cst_7 = arith.constant dense<0.000000e+00> : vector<256x256xf32>
    %9 = tpu.matmul %8, %6, %cst_7 {dimension_numbers = #tpu.dot_dimension_numbers<[1], [0], [0], [1], [0, 0, 1, 1], [], []>} : vector<256x16xf32>, vector<16x256xf32>, vector<256x256xf32> -> vector<256x256xf32>
    %10 = arith.addf %5, %9 : vector<256x256xf32>
    %11 = vector.extract_strided_slice %2 {offsets = [0, 10], sizes = [16, 256], strides = [1, 1]} : vector<16x384xf32> to vector<16x256xf32>
    %c2 = arith.constant 2 : index
    %c0_8 = arith.constant 0 : index
    %c0_9 = arith.constant 0 : index
    %12 = vector.load %arg2[%c2, %c0_8, %c0_9] : memref<4x256x16xf32, #tpu.memory_space<vmem>>, vector<1x256x16xf32>
    %13 = vector.shape_cast %12 : vector<1x256x16xf32> to vector<256x16xf32>
    %cst_10 = arith.constant dense<0.000000e+00> : vector<256x256xf32>
    %14 = tpu.matmul %13, %11, %cst_10 {dimension_numbers = #tpu.dot_dimension_numbers<[1], [0], [0], [1], [0, 0, 1, 1], [], []>} : vector<256x16xf32>, vector<16x256xf32>, vector<256x256xf32> -> vector<256x256xf32>
    %15 = arith.addf %10, %14 : vector<256x256xf32>
    %16 = vector.extract_strided_slice %2 {offsets = [0, 11], sizes = [16, 256], strides = [1, 1]} : vector<16x384xf32> to vector<16x256xf32>
    %c3 = arith.constant 3 : index
    %c0_11 = arith.constant 0 : index
    %c0_12 = arith.constant 0 : index
    %17 = vector.load %arg2[%c3, %c0_11, %c0_12] : memref<4x256x16xf32, #tpu.memory_space<vmem>>, vector<1x256x16xf32>
    %18 = vector.shape_cast %17 : vector<1x256x16xf32> to vector<256x16xf32>
    %cst_13 = arith.constant dense<0.000000e+00> : vector<256x256xf32>
    %19 = tpu.matmul %18, %16, %cst_13 {dimension_numbers = #tpu.dot_dimension_numbers<[1], [0], [0], [1], [0, 0, 1, 1], [], []>} : vector<256x16xf32>, vector<16x256xf32>, vector<256x256xf32> -> vector<256x256xf32>
    %20 = arith.addf %15, %19 : vector<256x256xf32>
    %c0_14 = arith.constant 0 : index
    %c0_15 = arith.constant 0 : index
    %21 = vector.load %arg3[%c0_14, %c0_15] : memref<256x1xf32, #tpu.memory_space<vmem>>, vector<256x1xf32>
    %22 = vector.broadcast %21 : vector<256x1xf32> to vector<256x256xf32>
    %23 = arith.addf %20, %22 : vector<256x256xf32>
    %cst_16 = arith.constant 0.000000e+00 : f32
    %24 = vector.broadcast %cst_16 : f32 to vector<256x256xf32>
    %25 = arith.maximumf %23, %24 : vector<256x256xf32>
    %26 = vector.extract_strided_slice %25 {offsets = [0, 0], sizes = [16, 256], strides = [1, 1]} : vector<256x256xf32> to vector<16x256xf32>
    %27 = vector.extract_strided_slice %25 {offsets = [16, 0], sizes = [16, 256], strides = [1, 1]} : vector<256x256xf32> to vector<16x256xf32>
    %28 = arith.maximumf %26, %27 : vector<16x256xf32>
    %29 = vector.extract_strided_slice %25 {offsets = [32, 0], sizes = [16, 256], strides = [1, 1]} : vector<256x256xf32> to vector<16x256xf32>
    %30 = arith.maximumf %28, %29 : vector<16x256xf32>
    %31 = vector.extract_strided_slice %25 {offsets = [48, 0], sizes = [16, 256], strides = [1, 1]} : vector<256x256xf32> to vector<16x256xf32>
    %32 = arith.maximumf %30, %31 : vector<16x256xf32>
    %33 = vector.extract_strided_slice %25 {offsets = [64, 0], sizes = [16, 256], strides = [1, 1]} : vector<256x256xf32> to vector<16x256xf32>
    %34 = vector.extract_strided_slice %25 {offsets = [80, 0], sizes = [16, 256], strides = [1, 1]} : vector<256x256xf32> to vector<16x256xf32>
    %35 = arith.maximumf %33, %34 : vector<16x256xf32>
    %36 = vector.extract_strided_slice %25 {offsets = [96, 0], sizes = [16, 256], strides = [1, 1]} : vector<256x256xf32> to vector<16x256xf32>
    %37 = arith.maximumf %35, %36 : vector<16x256xf32>
    %38 = vector.extract_strided_slice %25 {offsets = [112, 0], sizes = [16, 256], strides = [1, 1]} : vector<256x256xf32> to vector<16x256xf32>
    %39 = arith.maximumf %37, %38 : vector<16x256xf32>
    %40 = vector.extract_strided_slice %25 {offsets = [128, 0], sizes = [16, 256], strides = [1, 1]} : vector<256x256xf32> to vector<16x256xf32>
    %41 = vector.extract_strided_slice %25 {offsets = [144, 0], sizes = [16, 256], strides = [1, 1]} : vector<256x256xf32> to vector<16x256xf32>
    %42 = arith.maximumf %40, %41 : vector<16x256xf32>
    %43 = vector.extract_strided_slice %25 {offsets = [160, 0], sizes = [16, 256], strides = [1, 1]} : vector<256x256xf32> to vector<16x256xf32>
    %44 = arith.maximumf %42, %43 : vector<16x256xf32>
    %45 = vector.extract_strided_slice %25 {offsets = [176, 0], sizes = [16, 256], strides = [1, 1]} : vector<256x256xf32> to vector<16x256xf32>
    %46 = arith.maximumf %44, %45 : vector<16x256xf32>
    %47 = vector.extract_strided_slice %25 {offsets = [192, 0], sizes = [16, 256], strides = [1, 1]} : vector<256x256xf32> to vector<16x256xf32>
    %48 = vector.extract_strided_slice %25 {offsets = [208, 0], sizes = [16, 256], strides = [1, 1]} : vector<256x256xf32> to vector<16x256xf32>
    %49 = arith.maximumf %47, %48 : vector<16x256xf32>
    %50 = vector.extract_strided_slice %25 {offsets = [224, 0], sizes = [16, 256], strides = [1, 1]} : vector<256x256xf32> to vector<16x256xf32>
    %51 = arith.maximumf %49, %50 : vector<16x256xf32>
    %52 = vector.extract_strided_slice %25 {offsets = [240, 0], sizes = [16, 256], strides = [1, 1]} : vector<256x256xf32> to vector<16x256xf32>
    %53 = arith.maximumf %51, %52 : vector<16x256xf32>
    %54 = tpu.concatenate %32, %39, %46, %53 in 0 : vector<16x256xf32>, vector<16x256xf32>, vector<16x256xf32>, vector<16x256xf32> -> vector<64x256xf32>
    %c0_17 = arith.constant 0 : index
    %c0_18 = arith.constant 0 : index
    %55 = vector.load %arg6[%c0_17, %c0_18] : memref<1x256xf32, #tpu.memory_space<vmem>>, vector<1x256xf32>
    %56 = vector.broadcast %55 : vector<1x256xf32> to vector<64x256xf32>
    %57 = arith.mulf %54, %56 : vector<64x256xf32>
    %cst_19 = arith.constant 0.000000e+00 : f32
    %58 = vector.broadcast %cst_19 : f32 to vector<64x128xf32>
    %59 = tpu.concatenate %57, %58 in 1 : vector<64x256xf32>, vector<64x128xf32> -> vector<64x384xf32>
    %c0_20 = arith.constant 0 : index
    %c0_21 = arith.constant 0 : index
    %c0_22 = arith.constant 0 : index
    %60 = vector.load %arg4[%c0_20, %c0_21, %c0_22] : memref<9x128x64xf32, #tpu.memory_space<vmem>>, vector<1x128x64xf32>
    %61 = vector.shape_cast %60 : vector<1x128x64xf32> to vector<128x64xf32>
    %cst_23 = arith.constant dense<0.000000e+00> : vector<128x256xf32>
    %62 = tpu.matmul %61, %57, %cst_23 {dimension_numbers = #tpu.dot_dimension_numbers<[1], [0], [0], [1], [0, 0, 1, 1], [], []>} : vector<128x64xf32>, vector<64x256xf32>, vector<128x256xf32> -> vector<128x256xf32>
    %63 = vector.extract_strided_slice %59 {offsets = [0, 1], sizes = [64, 256], strides = [1, 1]} : vector<64x384xf32> to vector<64x256xf32>
    %c1_24 = arith.constant 1 : index
    %c0_25 = arith.constant 0 : index
    %c0_26 = arith.constant 0 : index
    %64 = vector.load %arg4[%c1_24, %c0_25, %c0_26] : memref<9x128x64xf32, #tpu.memory_space<vmem>>, vector<1x128x64xf32>
    %65 = vector.shape_cast %64 : vector<1x128x64xf32> to vector<128x64xf32>
    %cst_27 = arith.constant dense<0.000000e+00> : vector<128x256xf32>
    %66 = tpu.matmul %65, %63, %cst_27 {dimension_numbers = #tpu.dot_dimension_numbers<[1], [0], [0], [1], [0, 0, 1, 1], [], []>} : vector<128x64xf32>, vector<64x256xf32>, vector<128x256xf32> -> vector<128x256xf32>
    %67 = arith.addf %62, %66 : vector<128x256xf32>
    %68 = vector.extract_strided_slice %59 {offsets = [0, 2], sizes = [64, 256], strides = [1, 1]} : vector<64x384xf32> to vector<64x256xf32>
    %c2_28 = arith.constant 2 : index
    %c0_29 = arith.constant 0 : index
    %c0_30 = arith.constant 0 : index
    %69 = vector.load %arg4[%c2_28, %c0_29, %c0_30] : memref<9x128x64xf32, #tpu.memory_space<vmem>>, vector<1x128x64xf32>
    %70 = vector.shape_cast %69 : vector<1x128x64xf32> to vector<128x64xf32>
    %cst_31 = arith.constant dense<0.000000e+00> : vector<128x256xf32>
    %71 = tpu.matmul %70, %68, %cst_31 {dimension_numbers = #tpu.dot_dimension_numbers<[1], [0], [0], [1], [0, 0, 1, 1], [], []>} : vector<128x64xf32>, vector<64x256xf32>, vector<128x256xf32> -> vector<128x256xf32>
    %72 = arith.addf %67, %71 : vector<128x256xf32>
    %73 = vector.extract_strided_slice %59 {offsets = [0, 10], sizes = [64, 256], strides = [1, 1]} : vector<64x384xf32> to vector<64x256xf32>
    %c3_32 = arith.constant 3 : index
    %c0_33 = arith.constant 0 : index
    %c0_34 = arith.constant 0 : index
    %74 = vector.load %arg4[%c3_32, %c0_33, %c0_34] : memref<9x128x64xf32, #tpu.memory_space<vmem>>, vector<1x128x64xf32>
    %75 = vector.shape_cast %74 : vector<1x128x64xf32> to vector<128x64xf32>
    %cst_35 = arith.constant dense<0.000000e+00> : vector<128x256xf32>
    %76 = tpu.matmul %75, %73, %cst_35 {dimension_numbers = #tpu.dot_dimension_numbers<[1], [0], [0], [1], [0, 0, 1, 1], [], []>} : vector<128x64xf32>, vector<64x256xf32>, vector<128x256xf32> -> vector<128x256xf32>
    %77 = arith.addf %72, %76 : vector<128x256xf32>
    %78 = vector.extract_strided_slice %59 {offsets = [0, 11], sizes = [64, 256], strides = [1, 1]} : vector<64x384xf32> to vector<64x256xf32>
    %c4 = arith.constant 4 : index
    %c0_36 = arith.constant 0 : index
    %c0_37 = arith.constant 0 : index
    %79 = vector.load %arg4[%c4, %c0_36, %c0_37] : memref<9x128x64xf32, #tpu.memory_space<vmem>>, vector<1x128x64xf32>
    %80 = vector.shape_cast %79 : vector<1x128x64xf32> to vector<128x64xf32>
    %cst_38 = arith.constant dense<0.000000e+00> : vector<128x256xf32>
    %81 = tpu.matmul %80, %78, %cst_38 {dimension_numbers = #tpu.dot_dimension_numbers<[1], [0], [0], [1], [0, 0, 1, 1], [], []>} : vector<128x64xf32>, vector<64x256xf32>, vector<128x256xf32> -> vector<128x256xf32>
    %82 = arith.addf %77, %81 : vector<128x256xf32>
    %83 = vector.extract_strided_slice %59 {offsets = [0, 12], sizes = [64, 256], strides = [1, 1]} : vector<64x384xf32> to vector<64x256xf32>
    %c5 = arith.constant 5 : index
    %c0_39 = arith.constant 0 : index
    %c0_40 = arith.constant 0 : index
    %84 = vector.load %arg4[%c5, %c0_39, %c0_40] : memref<9x128x64xf32, #tpu.memory_space<vmem>>, vector<1x128x64xf32>
    %85 = vector.shape_cast %84 : vector<1x128x64xf32> to vector<128x64xf32>
    %cst_41 = arith.constant dense<0.000000e+00> : vector<128x256xf32>
    %86 = tpu.matmul %85, %83, %cst_41 {dimension_numbers = #tpu.dot_dimension_numbers<[1], [0], [0], [1], [0, 0, 1, 1], [], []>} : vector<128x64xf32>, vector<64x256xf32>, vector<128x256xf32> -> vector<128x256xf32>
    %87 = arith.addf %82, %86 : vector<128x256xf32>
    %88 = vector.extract_strided_slice %59 {offsets = [0, 20], sizes = [64, 256], strides = [1, 1]} : vector<64x384xf32> to vector<64x256xf32>
    %c6 = arith.constant 6 : index
    %c0_42 = arith.constant 0 : index
    %c0_43 = arith.constant 0 : index
    %89 = vector.load %arg4[%c6, %c0_42, %c0_43] : memref<9x128x64xf32, #tpu.memory_space<vmem>>, vector<1x128x64xf32>
    %90 = vector.shape_cast %89 : vector<1x128x64xf32> to vector<128x64xf32>
    %cst_44 = arith.constant dense<0.000000e+00> : vector<128x256xf32>
    %91 = tpu.matmul %90, %88, %cst_44 {dimension_numbers = #tpu.dot_dimension_numbers<[1], [0], [0], [1], [0, 0, 1, 1], [], []>} : vector<128x64xf32>, vector<64x256xf32>, vector<128x256xf32> -> vector<128x256xf32>
    %92 = arith.addf %87, %91 : vector<128x256xf32>
    %93 = vector.extract_strided_slice %59 {offsets = [0, 21], sizes = [64, 256], strides = [1, 1]} : vector<64x384xf32> to vector<64x256xf32>
    %c7 = arith.constant 7 : index
    %c0_45 = arith.constant 0 : index
    %c0_46 = arith.constant 0 : index
    %94 = vector.load %arg4[%c7, %c0_45, %c0_46] : memref<9x128x64xf32, #tpu.memory_space<vmem>>, vector<1x128x64xf32>
    %95 = vector.shape_cast %94 : vector<1x128x64xf32> to vector<128x64xf32>
    %cst_47 = arith.constant dense<0.000000e+00> : vector<128x256xf32>
    %96 = tpu.matmul %95, %93, %cst_47 {dimension_numbers = #tpu.dot_dimension_numbers<[1], [0], [0], [1], [0, 0, 1, 1], [], []>} : vector<128x64xf32>, vector<64x256xf32>, vector<128x256xf32> -> vector<128x256xf32>
    %97 = arith.addf %92, %96 : vector<128x256xf32>
    %98 = vector.extract_strided_slice %59 {offsets = [0, 22], sizes = [64, 256], strides = [1, 1]} : vector<64x384xf32> to vector<64x256xf32>
    %c8 = arith.constant 8 : index
    %c0_48 = arith.constant 0 : index
    %c0_49 = arith.constant 0 : index
    %99 = vector.load %arg4[%c8, %c0_48, %c0_49] : memref<9x128x64xf32, #tpu.memory_space<vmem>>, vector<1x128x64xf32>
    %100 = vector.shape_cast %99 : vector<1x128x64xf32> to vector<128x64xf32>
    %cst_50 = arith.constant dense<0.000000e+00> : vector<128x256xf32>
    %101 = tpu.matmul %100, %98, %cst_50 {dimension_numbers = #tpu.dot_dimension_numbers<[1], [0], [0], [1], [0, 0, 1, 1], [], []>} : vector<128x64xf32>, vector<64x256xf32>, vector<128x256xf32> -> vector<128x256xf32>
    %102 = arith.addf %97, %101 : vector<128x256xf32>
    %c0_51 = arith.constant 0 : index
    %c0_52 = arith.constant 0 : index
    %103 = vector.load %arg5[%c0_51, %c0_52] : memref<128x1xf32, #tpu.memory_space<vmem>>, vector<128x1xf32>
    %104 = vector.broadcast %103 : vector<128x1xf32> to vector<128x256xf32>
    %105 = arith.addf %102, %104 : vector<128x256xf32>
    %cst_53 = arith.constant 0.000000e+00 : f32
    %106 = vector.broadcast %cst_53 : f32 to vector<128x256xf32>
    %107 = arith.maximumf %105, %106 : vector<128x256xf32>
    %108 = vector.extract_strided_slice %107 {offsets = [0, 0], sizes = [32, 256], strides = [1, 1]} : vector<128x256xf32> to vector<32x256xf32>
    %109 = vector.extract_strided_slice %107 {offsets = [32, 0], sizes = [32, 256], strides = [1, 1]} : vector<128x256xf32> to vector<32x256xf32>
    %110 = arith.maximumf %108, %109 : vector<32x256xf32>
    %111 = vector.extract_strided_slice %107 {offsets = [64, 0], sizes = [32, 256], strides = [1, 1]} : vector<128x256xf32> to vector<32x256xf32>
    %112 = arith.maximumf %110, %111 : vector<32x256xf32>
    %113 = vector.extract_strided_slice %107 {offsets = [96, 0], sizes = [32, 256], strides = [1, 1]} : vector<128x256xf32> to vector<32x256xf32>
    %114 = arith.maximumf %112, %113 : vector<32x256xf32>
    %c0_54 = arith.constant 0 : index
    %c0_55 = arith.constant 0 : index
    %115 = vector.load %arg7[%c0_54, %c0_55] : memref<32x256xf32, #tpu.memory_space<vmem>>, vector<32x256xf32>
    tpu.vector_store %arg7[%c0_54, %c0_55], %114 {strides = array<i32>} : memref<32x256xf32, #tpu.memory_space<vmem>>, vector<32x256xf32>,
    return
  }
  func.func @transform_0(%arg0: i32) -> (i32, i32) {
    %c0_i32 = arith.constant 0 : i32
    %c0_i32_0 = arith.constant 0 : i32
    return %c0_i32, %arg0 : i32, i32
  }
  func.func @transform_1(%arg0: i32) -> (i32, i32, i32) {
    %c0_i32 = arith.constant 0 : i32
    %c0_i32_0 = arith.constant 0 : i32
    %c0_i32_1 = arith.constant 0 : i32
    %c0_i32_2 = arith.constant 0 : i32
    return %c0_i32, %c0_i32_0, %c0_i32_1 : i32, i32, i32
  }
  func.func @transform_2(%arg0: i32) -> (i32, i32) {
    %c0_i32 = arith.constant 0 : i32
    %c0_i32_0 = arith.constant 0 : i32
    %c0_i32_1 = arith.constant 0 : i32
    return %c0_i32, %c0_i32_0 : i32, i32
  }
  func.func @transform_3(%arg0: i32) -> (i32, i32, i32) {
    %c0_i32 = arith.constant 0 : i32
    %c0_i32_0 = arith.constant 0 : i32
    %c0_i32_1 = arith.constant 0 : i32
    %c0_i32_2 = arith.constant 0 : i32
    return %c0_i32, %c0_i32_0, %c0_i32_1 : i32, i32, i32
  }
  func.func @transform_4(%arg0: i32) -> (i32, i32) {
    %c0_i32 = arith.constant 0 : i32
    %c0_i32_0 = arith.constant 0 : i32
    %c0_i32_1 = arith.constant 0 : i32
    return %c0_i32, %c0_i32_0 : i32, i32
  }
  func.func @transform_5(%arg0: i32) -> (i32, i32) {
    %c0_i32 = arith.constant 0 : i32
    %c0_i32_0 = arith.constant 0 : i32
    %c0_i32_1 = arith.constant 0 : i32
    return %c0_i32, %c0_i32_0 : i32, i32
  }
  func.func @transform_6(%arg0: i32) -> (i32, i32) {
    %c0_i32 = arith.constant 0 : i32
    %c0_i32_0 = arith.constant 0 : i32
    return %c0_i32, %arg0 : i32, i32
  }
}

module attributes {stable_mosaic.version = 11 : i64} {
  func.func @_linear_kernel(%arg0: i32, %arg1: memref<8x1568xf32, #tpu.memory_space<vmem>>, %arg2: memref<1568x128xf32, #tpu.memory_space<vmem>>, %arg3: memref<1x128xf32, #tpu.memory_space<vmem>>, %arg4: memref<8x128xf32, #tpu.memory_space<vmem>>) attributes {dimension_semantics = [#tpu.dimension_semantics<parallel>], iteration_bounds = array<i64: 1>, scalar_prefetch = 0 : i64, scratch_operands = 0 : i64, tpu.core_type = #tpu.core_type<tc>, window_params = [{transform_indices = @transform_0, window_bounds = array<i64: 8, 1568>}, {pipeline_mode = #tpu.pipeline_mode<synchronous>, transform_indices = @transform_1, window_bounds = array<i64: 1568, 128>}, {pipeline_mode = #tpu.pipeline_mode<synchronous>, transform_indices = @transform_2, window_bounds = array<i64: 1, 128>}, {transform_indices = @transform_3, window_bounds = array<i64: 8, 128>}]} {
    %c0 = arith.constant 0 : index
    %c0_0 = arith.constant 0 : index
    %0 = vector.load %arg1[%c0, %c0_0] : memref<8x1568xf32, #tpu.memory_space<vmem>>, vector<8x1568xf32>
    %c0_1 = arith.constant 0 : index
    %c0_2 = arith.constant 0 : index
    %1 = vector.load %arg2[%c0_1, %c0_2] : memref<1568x128xf32, #tpu.memory_space<vmem>>, vector<1568x128xf32>
    %cst = arith.constant dense<0.000000e+00> : vector<8x128xf32>
    %2 = tpu.matmul %0, %1, %cst {dimension_numbers = #tpu.dot_dimension_numbers<[1], [0], [0], [1], [0, 0, 1, 1], [], []>} : vector<8x1568xf32>, vector<1568x128xf32>, vector<8x128xf32> -> vector<8x128xf32>
    %c0_3 = arith.constant 0 : index
    %c0_4 = arith.constant 0 : index
    %3 = vector.load %arg3[%c0_3, %c0_4] : memref<1x128xf32, #tpu.memory_space<vmem>>, vector<1x128xf32>
    %4 = vector.broadcast %3 : vector<1x128xf32> to vector<8x128xf32>
    %5 = arith.addf %2, %4 : vector<8x128xf32>
    %c0_5 = arith.constant 0 : index
    %c0_6 = arith.constant 0 : index
    %6 = vector.load %arg4[%c0_5, %c0_6] : memref<8x128xf32, #tpu.memory_space<vmem>>, vector<8x128xf32>
    tpu.vector_store %arg4[%c0_5, %c0_6], %5 {strides = array<i32>} : memref<8x128xf32, #tpu.memory_space<vmem>>, vector<8x128xf32>,
    return
  }
  func.func @transform_0(%arg0: i32) -> (i32, i32) {
    %c0_i32 = arith.constant 0 : i32
    %c0_i32_0 = arith.constant 0 : i32
    return %arg0, %c0_i32 : i32, i32
  }
  func.func @transform_1(%arg0: i32) -> (i32, i32) {
    %c0_i32 = arith.constant 0 : i32
    %c0_i32_0 = arith.constant 0 : i32
    %c0_i32_1 = arith.constant 0 : i32
    return %c0_i32, %c0_i32_0 : i32, i32
  }
  func.func @transform_2(%arg0: i32) -> (i32, i32) {
    %c0_i32 = arith.constant 0 : i32
    %c0_i32_0 = arith.constant 0 : i32
    %c0_i32_1 = arith.constant 0 : i32
    return %c0_i32, %c0_i32_0 : i32, i32
  }
  func.func @transform_3(%arg0: i32) -> (i32, i32) {
    %c0_i32 = arith.constant 0 : i32
    %c0_i32_0 = arith.constant 0 : i32
    return %arg0, %c0_i32 : i32, i32
  }
}

</mosaic_0001>

<bundles_post_ra>
// kernel: mul.5
= control target key start
LH: loop header
LB: loop body
LE: loop exit
PB: predicated region body
PF: predicated region fallthrough
CT: control target
= control target key end

     0   :  { %s364_s0 = inlined_call_operand.vmem [shape: f32[16384], index: 0, kind: input, shape index: {}]   ;;  %s365_s1 = inlined_call_operand.vmem [shape: f32[16384], index: 1, kind: input, shape index: {}]   ;;  %s366_s2 = inlined_call_operand.vmem [shape: f32[16384], index: 2, kind: output, shape index: {}]  }
   0x1   :  { %v3_v0 = vld [vmem:[%s364_s0] sm:$0xff]  ;;  %v160_v2 = vld [vmem:[%s364_s0 + $0x8] sm:$0xff]  ;;  %v163_v5 = vld [vmem:[%s364_s0 + $0x10] sm:$0xff] }
   0x2   :  { %v4_v1 = vld [vmem:[%s365_s1] sm:$0xff]  ;;  %v161_v4 = vld [vmem:[%s365_s1 + $0x8] sm:$0xff]  ;;  %v164_v6 = vld [vmem:[%s365_s1 + $0x10] sm:$0xff] }
   0x3   :  { %v7_v3 = vmul.f32 %v4_v1, %v3_v0  ;;  %v16_v7 = vmul.f32 %v161_v4, %v160_v2  ;;  %v26_v8 = vmul.f32 %v164_v6, %v163_v5  ;;  %v166_v9 = vld [vmem:[%s364_s0 + $0x18] sm:$0xff]  ;;  %v169_v11 = vld [vmem:[%s364_s0 + $0x20] sm:$0xff]  ;;  %v172_v14 = vld [vmem:[%s364_s0 + $0x28] sm:$0xff] }
   0x4   :  { %v167_v10 = vld [vmem:[%s365_s1 + $0x18] sm:$0xff]  ;;  %v170_v13 = vld [vmem:[%s365_s1 + $0x20] sm:$0xff]  ;;  %v173_v15 = vld [vmem:[%s365_s1 + $0x28] sm:$0xff] }
   0x5   :  { %9 = vst [vmem:[%s366_s2] sm:$0xff] %v7_v3  ;;  %v36_v12 = vmul.f32 %v167_v10, %v166_v9  ;;  %v46_v16 = vmul.f32 %v170_v13, %v169_v11  ;;  %v56_v17 = vmul.f32 %v173_v15, %v172_v14  ;;  %v175_v18 = vld [vmem:[%s364_s0 + $0x30] sm:$0xff]  ;;  %v178_v20 = vld [vmem:[%s364_s0 + $0x38] sm:$0xff]  ;;  %v181_v23 = vld [vmem:[%s364_s0 + $0x40] sm:$0xff] }
   0x6   :  { %162 = vst [vmem:[%s366_s2 + $0x8] sm:$0xff] %v16_v7  ;;  %v176_v19 = vld [vmem:[%s365_s1 + $0x30] sm:$0xff]  ;;  %v179_v22 = vld [vmem:[%s365_s1 + $0x38] sm:$0xff]  ;;  %v182_v24 = vld [vmem:[%s365_s1 + $0x40] sm:$0xff] }
   0x7   :  { %165 = vst [vmem:[%s366_s2 + $0x10] sm:$0xff] %v26_v8  ;;  %v66_v21 = vmul.f32 %v176_v19, %v175_v18  ;;  %v76_v25 = vmul.f32 %v179_v22, %v178_v20  ;;  %v86_v26 = vmul.f32 %v182_v24, %v181_v23  ;;  %v184_v27 = vld [vmem:[%s364_s0 + $0x48] sm:$0xff]  ;;  %v187_v29 = vld [vmem:[%s364_s0 + $0x50] sm:$0xff]  ;;  %v190_v32 = vld [vmem:[%s364_s0 + $0x58] sm:$0xff] }
   0x8   :  { %168 = vst [vmem:[%s366_s2 + $0x18] sm:$0xff] %v36_v12  ;;  %v185_v28 = vld [vmem:[%s365_s1 + $0x48] sm:$0xff]  ;;  %v188_v31 = vld [vmem:[%s365_s1 + $0x50] sm:$0xff]  ;;  %v191_v33 = vld [vmem:[%s365_s1 + $0x58] sm:$0xff] }
   0x9   :  { %171 = vst [vmem:[%s366_s2 + $0x20] sm:$0xff] %v46_v16  ;;  %v96_v30 = vmul.f32 %v185_v28, %v184_v27  ;;  %v106_v34 = vmul.f32 %v188_v31, %v187_v29  ;;  %v116_v35 = vmul.f32 %v191_v33, %v190_v32  ;;  %v193_v36 = vld [vmem:[%s364_s0 + $0x60] sm:$0xff]  ;;  %v196_v38 = vld [vmem:[%s364_s0 + $0x68] sm:$0xff]  ;;  %v199_v41 = vld [vmem:[%s364_s0 + $0x70] sm:$0xff] }
   0xa   :  { %174 = vst [vmem:[%s366_s2 + $0x28] sm:$0xff] %v56_v17  ;;  %v194_v37 = vld [vmem:[%s365_s1 + $0x60] sm:$0xff]  ;;  %v197_v40 = vld [vmem:[%s365_s1 + $0x68] sm:$0xff]  ;;  %v200_v42 = vld [vmem:[%s365_s1 + $0x70] sm:$0xff] }
   0xb   :  { %177 = vst [vmem:[%s366_s2 + $0x30] sm:$0xff] %v66_v21  ;;  %v126_v39 = vmul.f32 %v194_v37, %v193_v36  ;;  %v136_v43 = vmul.f32 %v197_v40, %v196_v38  ;;  %v146_v44 = vmul.f32 %v200_v42, %v199_v41  ;;  %v202_v45 = vld [vmem:[%s364_s0 + $0x78] sm:$0xff] }
   0xc   :  { %180 = vst [vmem:[%s366_s2 + $0x38] sm:$0xff] %v76_v25  ;;  %v203_v46 = vld [vmem:[%s365_s1 + $0x78] sm:$0xff] }
   0xd   :  { %183 = vst [vmem:[%s366_s2 + $0x40] sm:$0xff] %v86_v26  ;;  %v156_v47 = vmul.f32 %v203_v46, %v202_v45 }
   0xe   :  { %186 = vst [vmem:[%s366_s2 + $0x48] sm:$0xff] %v96_v30 }
   0xf   :  { %189 = vst [vmem:[%s366_s2 + $0x50] sm:$0xff] %v106_v34 }
  0x10   :  { %192 = vst [vmem:[%s366_s2 + $0x58] sm:$0xff] %v116_v35 }
  0x11   :  { %195 = vst [vmem:[%s366_s2 + $0x60] sm:$0xff] %v126_v39 }
  0x12   :  { %198 = vst [vmem:[%s366_s2 + $0x68] sm:$0xff] %v136_v43 }
  0x13   :  { %201 = vst [vmem:[%s366_s2 + $0x70] sm:$0xff] %v146_v44 }
  0x14   :  { %204 = vst [vmem:[%s366_s2 + $0x78] sm:$0xff] %v156_v47 }

// kernel: mul.4
= control target key start
LH: loop header
LB: loop body
LE: loop exit
PB: predicated region body
PF: predicated region fallthrough
CT: control target
= control target key end

     0   :  { %s1680_s0 = inlined_call_operand.vmem [shape: f32[73728], index: 0, kind: input, shape index: {}]   ;;  %s1681_s1 = inlined_call_operand.vmem [shape: f32[73728], index: 1, kind: input, shape index: {}]   ;;  %s1682_s2 = inlined_call_operand.vmem [shape: f32[73728], index: 2, kind: output, shape index: {}]  }
   0x1   :  { %v3_v0 = vld [vmem:[%s1680_s0] sm:$0xff]  ;;  %v720_v2 = vld [vmem:[%s1680_s0 + $0x8] sm:$0xff]  ;;  %v723_v5 = vld [vmem:[%s1680_s0 + $0x10] sm:$0xff] }
   0x2   :  { %v4_v1 = vld [vmem:[%s1681_s1] sm:$0xff]  ;;  %v721_v4 = vld [vmem:[%s1681_s1 + $0x8] sm:$0xff]  ;;  %v724_v6 = vld [vmem:[%s1681_s1 + $0x10] sm:$0xff] }
   0x3   :  { %v7_v3 = vmul.f32 %v4_v1, %v3_v0  ;;  %v16_v7 = vmul.f32 %v721_v4, %v720_v2  ;;  %v26_v8 = vmul.f32 %v724_v6, %v723_v5  ;;  %v726_v9 = vld [vmem:[%s1680_s0 + $0x18] sm:$0xff]  ;;  %v729_v11 = vld [vmem:[%s1680_s0 + $0x20] sm:$0xff]  ;;  %v732_v14 = vld [vmem:[%s1680_s0 + $0x28] sm:$0xff] }
   0x4   :  { %v727_v10 = vld [vmem:[%s1681_s1 + $0x18] sm:$0xff]  ;;  %v730_v13 = vld [vmem:[%s1681_s1 + $0x20] sm:$0xff]  ;;  %v733_v15 = vld [vmem:[%s1681_s1 + $0x28] sm:$0xff] }
   0x5   :  { %9 = vst [vmem:[%s1682_s2] sm:$0xff] %v7_v3  ;;  %v36_v12 = vmul.f32 %v727_v10, %v726_v9  ;;  %v46_v16 = vmul.f32 %v730_v13, %v729_v11  ;;  %v56_v17 = vmul.f32 %v733_v15, %v732_v14  ;;  %v735_v18 = vld [vmem:[%s1680_s0 + $0x30] sm:$0xff]  ;;  %v738_v20 = vld [vmem:[%s1680_s0 + $0x38] sm:$0xff]  ;;  %v741_v23 = vld [vmem:[%s1680_s0 + $0x40] sm:$0xff] }
   0x6   :  { %722 = vst [vmem:[%s1682_s2 + $0x8] sm:$0xff] %v16_v7  ;;  %v736_v19 = vld [vmem:[%s1681_s1 + $0x30] sm:$0xff]  ;;  %v739_v22 = vld [vmem:[%s1681_s1 + $0x38] sm:$0xff]  ;;  %v742_v24 = vld [vmem:[%s1681_s1 + $0x40] sm:$0xff] }
   0x7   :  { %725 = vst [vmem:[%s1682_s2 + $0x10] sm:$0xff] %v26_v8  ;;  %v66_v21 = vmul.f32 %v736_v19, %v735_v18  ;;  %v76_v25 = vmul.f32 %v739_v22, %v738_v20  ;;  %v86_v26 = vmul.f32 %v742_v24, %v741_v23  ;;  %v744_v27 = vld [vmem:[%s1680_s0 + $0x48] sm:$0xff]  ;;  %v747_v29 = vld [vmem:[%s1680_s0 + $0x50] sm:$0xff]  ;;  %v750_v32 = vld [vmem:[%s1680_s0 + $0x58] sm:$0xff] }
   0x8   :  { %728 = vst [vmem:[%s1682_s2 + $0x18] sm:$0xff] %v36_v12  ;;  %v745_v28 = vld [vmem:[%s1681_s1 + $0x48] sm:$0xff]  ;;  %v748_v31 = vld [vmem:[%s1681_s1 + $0x50] sm:$0xff]  ;;  %v751_v33 = vld [vmem:[%s1681_s1 + $0x58] sm:$0xff] }
   0x9   :  { %731 = vst [vmem:[%s1682_s2 + $0x20] sm:$0xff] %v46_v16  ;;  %v96_v30 = vmul.f32 %v745_v28, %v744_v27  ;;  %v106_v34 = vmul.f32 %v748_v31, %v747_v29  ;;  %v116_v35 = vmul.f32 %v751_v33, %v750_v32  ;;  %v753_v36 = vld [vmem:[%s1680_s0 + $0x60] sm:$0xff]  ;;  %v756_v38 = vld [vmem:[%s1680_s0 + $0x68] sm:$0xff]  ;;  %v759_v41 = vld [vmem:[%s1680_s0 + $0x70] sm:$0xff] }
   0xa   :  { %734 = vst [vmem:[%s1682_s2 + $0x28] sm:$0xff] %v56_v17  ;;  %v754_v37 = vld [vmem:[%s1681_s1 + $0x60] sm:$0xff]  ;;  %v757_v40 = vld [vmem:[%s1681_s1 + $0x68] sm:$0xff]  ;;  %v760_v42 = vld [vmem:[%s1681_s1 + $0x70] sm:$0xff] }
   0xb   :  { %737 = vst [vmem:[%s1682_s2 + $0x30] sm:$0xff] %v66_v21  ;;  %v126_v39 = vmul.f32 %v754_v37, %v753_v36  ;;  %v136_v43 = vmul.f32 %v757_v40, %v756_v38  ;;  %v146_v44 = vmul.f32 %v760_v42, %v759_v41  ;;  %v762_v45 = vld [vmem:[%s1680_s0 + $0x78] sm:$0xff]  ;;  %v765_v47 = vld [vmem:[%s1680_s0 + $0x80] sm:$0xff]  ;;  %v768_v50 = vld [vmem:[%s1680_s0 + $0x88] sm:$0xff] }
   0xc   :  { %740 = vst [vmem:[%s1682_s2 + $0x38] sm:$0xff] %v76_v25  ;;  %v763_v46 = vld [vmem:[%s1681_s1 + $0x78] sm:$0xff]  ;;  %v766_v49 = vld [vmem:[%s1681_s1 + $0x80] sm:$0xff]  ;;  %v769_v51 = vld [vmem:[%s1681_s1 + $0x88] sm:$0xff] }
   0xd   :  { %743 = vst [vmem:[%s1682_s2 + $0x40] sm:$0xff] %v86_v26  ;;  %v156_v48 = vmul.f32 %v763_v46, %v762_v45  ;;  %v166_v52 = vmul.f32 %v766_v49, %v765_v47  ;;  %v176_v53 = vmul.f32 %v769_v51, %v768_v50  ;;  %v771_v54 = vld [vmem:[%s1680_s0 + $0x90] sm:$0xff]  ;;  %v774_v56 = vld [vmem:[%s1680_s0 + $0x98] sm:$0xff]  ;;  %v777_v59 = vld [vmem:[%s1680_s0 + $0xa0] sm:$0xff] }
   0xe   :  { %746 = vst [vmem:[%s1682_s2 + $0x48] sm:$0xff] %v96_v30  ;;  %v772_v55 = vld [vmem:[%s1681_s1 + $0x90] sm:$0xff]  ;;  %v775_v58 = vld [vmem:[%s1681_s1 + $0x98] sm:$0xff]  ;;  %v778_v60 = vld [vmem:[%s1681_s1 + $0xa0] sm:$0xff] }
   0xf   :  { %749 = vst [vmem:[%s1682_s2 + $0x50] sm:$0xff] %v106_v34  ;;  %v186_v57 = vmul.f32 %v772_v55, %v771_v54  ;;  %v196_v61 = vmul.f32 %v775_v58, %v774_v56  ;;  %v206_v62 = vmul.f32 %v778_v60, %v777_v59  ;;  %v780_v63 = vld [vmem:[%s1680_s0 + $0xa8] sm:$0xff]  ;;  %v783_v1 = vld [vmem:[%s1680_s0 + $0xb0] sm:$0xff]  ;;  %v786_v4 = vld [vmem:[%s1680_s0 + $0xb8] sm:$0xff] }
  0x10   :  { %752 = vst [vmem:[%s1682_s2 + $0x58] sm:$0xff] %v116_v35  ;;  %v781_v0 = vld [vmem:[%s1681_s1 + $0xa8] sm:$0xff]  ;;  %v784_v3 = vld [vmem:[%s1681_s1 + $0xb0] sm:$0xff]  ;;  %v787_v5 = vld [vmem:[%s1681_s1 + $0xb8] sm:$0xff] }
  0x11   :  { %755 = vst [vmem:[%s1682_s2 + $0x60] sm:$0xff] %v126_v39  ;;  %v216_v2 = vmul.f32 %v781_v0, %v780_v63  ;;  %v226_v6 = vmul.f32 %v784_v3, %v783_v1  ;;  %v236_v7 = vmul.f32 %v787_v5, %v786_v4  ;;  %v789_v8 = vld [vmem:[%s1680_s0 + $0xc0] sm:$0xff]  ;;  %v792_v10 = vld [vmem:[%s1680_s0 + $0xc8] sm:$0xff]  ;;  %v795_v13 = vld [vmem:[%s1680_s0 + $0xd0] sm:$0xff] }
  0x12   :  { %758 = vst [vmem:[%s1682_s2 + $0x68] sm:$0xff] %v136_v43  ;;  %v790_v9 = vld [vmem:[%s1681_s1 + $0xc0] sm:$0xff]  ;;  %v793_v12 = vld [vmem:[%s1681_s1 + $0xc8] sm:$0xff]  ;;  %v796_v14 = vld [vmem:[%s1681_s1 + $0xd0] sm:$0xff] }
  0x13   :  { %761 = vst [vmem:[%s1682_s2 + $0x70] sm:$0xff] %v146_v44  ;;  %v246_v11 = vmul.f32 %v790_v9, %v789_v8  ;;  %v256_v15 = vmul.f32 %v793_v12, %v792_v10  ;;  %v266_v16 = vmul.f32 %v796_v14, %v795_v13  ;;  %v798_v17 = vld [vmem:[%s1680_s0 + $0xd8] sm:$0xff]  ;;  %v801_v19 = vld [vmem:[%s1680_s0 + $0xe0] sm:$0xff]  ;;  %v804_v22 = vld [vmem:[%s1680_s0 + $0xe8] sm:$0xff] }
  0x14   :  { %764 = vst [vmem:[%s1682_s2 + $0x78] sm:$0xff] %v156_v48  ;;  %v799_v18 = vld [vmem:[%s1681_s1 + $0xd8] sm:$0xff]  ;;  %v802_v21 = vld [vmem:[%s1681_s1 + $0xe0] sm:$0xff]  ;;  %v805_v23 = vld [vmem:[%s1681_s1 + $0xe8] sm:$0xff] }
  0x15   :  { %767 = vst [vmem:[%s1682_s2 + $0x80] sm:$0xff] %v166_v52  ;;  %v276_v20 = vmul.f32 %v799_v18, %v798_v17  ;;  %v286_v24 = vmul.f32 %v802_v21, %v801_v19  ;;  %v1182_v25 = vmul.f32 %v805_v23, %v804_v22  ;;  %v807_v26 = vld [vmem:[%s1680_s0 + $0xf0] sm:$0xff]  ;;  %v810_v28 = vld [vmem:[%s1680_s0 + $0xf8] sm:$0xff]  ;;  %v813_v31 = vld [vmem:[%s1680_s0 + $0x100] sm:$0xff] }
  0x16   :  { %770 = vst [vmem:[%s1682_s2 + $0x88] sm:$0xff] %v176_v53  ;;  %v808_v27 = vld [vmem:[%s1681_s1 + $0xf0] sm:$0xff]  ;;  %v811_v30 = vld [vmem:[%s1681_s1 + $0xf8] sm:$0xff]  ;;  %v814_v32 = vld [vmem:[%s1681_s1 + $0x100] sm:$0xff] }
  0x17   :  { %773 = vst [vmem:[%s1682_s2 + $0x90] sm:$0xff] %v186_v57  ;;  %v1196_v29 = vmul.f32 %v808_v27, %v807_v26  ;;  %v1210_v33 = vmul.f32 %v811_v30, %v810_v28  ;;  %v1212_v34 = vmul.f32 %v814_v32, %v813_v31  ;;  %v816_v35 = vld [vmem:[%s1680_s0 + $0x108] sm:$0xff]  ;;  %v819_v37 = vld [vmem:[%s1680_s0 + $0x110] sm:$0xff]  ;;  %v822_v40 = vld [vmem:[%s1680_s0 + $0x118] sm:$0xff] }
  0x18   :  { %776 = vst [vmem:[%s1682_s2 + $0x98] sm:$0xff] %v196_v61  ;;  %v817_v36 = vld [vmem:[%s1681_s1 + $0x108] sm:$0xff]  ;;  %v820_v39 = vld [vmem:[%s1681_s1 + $0x110] sm:$0xff]  ;;  %v823_v41 = vld [vmem:[%s1681_s1 + $0x118] sm:$0xff] }
  0x19   :  { %779 = vst [vmem:[%s1682_s2 + $0xa0] sm:$0xff] %v206_v62  ;;  %v1226_v38 = vmul.f32 %v817_v36, %v816_v35  ;;  %v1240_v42 = vmul.f32 %v820_v39, %v819_v37  ;;  %v1242_v43 = vmul.f32 %v823_v41, %v822_v40  ;;  %v825_v44 = vld [vmem:[%s1680_s0 + $0x120] sm:$0xff]  ;;  %v828_v46 = vld [vmem:[%s1680_s0 + $0x128] sm:$0xff]  ;;  %v831_v49 = vld [vmem:[%s1680_s0 + $0x130] sm:$0xff] }
  0x1a   :  { %782 = vst [vmem:[%s1682_s2 + $0xa8] sm:$0xff] %v216_v2  ;;  %v826_v45 = vld [vmem:[%s1681_s1 + $0x120] sm:$0xff]  ;;  %v829_v48 = vld [vmem:[%s1681_s1 + $0x128] sm:$0xff]  ;;  %v832_v50 = vld [vmem:[%s1681_s1 + $0x130] sm:$0xff] }
  0x1b   :  { %785 = vst [vmem:[%s1682_s2 + $0xb0] sm:$0xff] %v226_v6  ;;  %v1256_v47 = vmul.f32 %v826_v45, %v825_v44  ;;  %v1270_v51 = vmul.f32 %v829_v48, %v828_v46  ;;  %v1272_v52 = vmul.f32 %v832_v50, %v831_v49  ;;  %v834_v53 = vld [vmem:[%s1680_s0 + $0x138] sm:$0xff]  ;;  %v837_v55 = vld [vmem:[%s1680_s0 + $0x140] sm:$0xff]  ;;  %v840_v58 = vld [vmem:[%s1680_s0 + $0x148] sm:$0xff] }
  0x1c   :  { %788 = vst [vmem:[%s1682_s2 + $0xb8] sm:$0xff] %v236_v7  ;;  %v835_v54 = vld [vmem:[%s1681_s1 + $0x138] sm:$0xff]  ;;  %v838_v57 = vld [vmem:[%s1681_s1 + $0x140] sm:$0xff]  ;;  %v841_v59 = vld [vmem:[%s1681_s1 + $0x148] sm:$0xff] }
  0x1d   :  { %791 = vst [vmem:[%s1682_s2 + $0xc0] sm:$0xff] %v246_v11  ;;  %v1286_v56 = vmul.f32 %v835_v54, %v834_v53  ;;  %v1300_v60 = vmul.f32 %v838_v57, %v837_v55  ;;  %v1302_v61 = vmul.f32 %v841_v59, %v840_v58  ;;  %v843_v62 = vld [vmem:[%s1680_s0 + $0x150] sm:$0xff]  ;;  %v846_v0 = vld [vmem:[%s1680_s0 + $0x158] sm:$0xff]  ;;  %v849_v3 = vld [vmem:[%s1680_s0 + $0x160] sm:$0xff] }
  0x1e   :  { %794 = vst [vmem:[%s1682_s2 + $0xc8] sm:$0xff] %v256_v15  ;;  %v844_v63 = vld [vmem:[%s1681_s1 + $0x150] sm:$0xff]  ;;  %v847_v2 = vld [vmem:[%s1681_s1 + $0x158] sm:$0xff]  ;;  %v850_v4 = vld [vmem:[%s1681_s1 + $0x160] sm:$0xff] }
  0x1f   :  { %797 = vst [vmem:[%s1682_s2 + $0xd0] sm:$0xff] %v266_v16  ;;  %v1316_v1 = vmul.f32 %v844_v63, %v843_v62  ;;  %v1330_v5 = vmul.f32 %v847_v2, %v846_v0  ;;  %v1332_v6 = vmul.f32 %v850_v4, %v849_v3  ;;  %v852_v7 = vld [vmem:[%s1680_s0 + $0x168] sm:$0xff]  ;;  %v855_v9 = vld [vmem:[%s1680_s0 + $0x170] sm:$0xff]  ;;  %v858_v12 = vld [vmem:[%s1680_s0 + $0x178] sm:$0xff] }
  0x20   :  { %800 = vst [vmem:[%s1682_s2 + $0xd8] sm:$0xff] %v276_v20  ;;  %v853_v8 = vld [vmem:[%s1681_s1 + $0x168] sm:$0xff]  ;;  %v856_v11 = vld [vmem:[%s1681_s1 + $0x170] sm:$0xff]  ;;  %v859_v13 = vld [vmem:[%s1681_s1 + $0x178] sm:$0xff] }
  0x21   :  { %803 = vst [vmem:[%s1682_s2 + $0xe0] sm:$0xff] %v286_v24  ;;  %v1346_v10 = vmul.f32 %v853_v8, %v852_v7  ;;  %v1361_v14 = vmul.f32 %v856_v11, %v855_v9  ;;  %v1363_v15 = vmul.f32 %v859_v13, %v858_v12  ;;  %v861_v16 = vld [vmem:[%s1680_s0 + $0x180] sm:$0xff]  ;;  %v864_v18 = vld [vmem:[%s1680_s0 + $0x188] sm:$0xff]  ;;  %v867_v21 = vld [vmem:[%s1680_s0 + $0x190] sm:$0xff] }
  0x22   :  { %806 = vst [vmem:[%s1682_s2 + $0xe8] sm:$0xff] %v1182_v25  ;;  %v862_v17 = vld [vmem:[%s1681_s1 + $0x180] sm:$0xff]  ;;  %v865_v20 = vld [vmem:[%s1681_s1 + $0x188] sm:$0xff]  ;;  %v868_v22 = vld [vmem:[%s1681_s1 + $0x190] sm:$0xff] }
  0x23   :  { %809 = vst [vmem:[%s1682_s2 + $0xf0] sm:$0xff] %v1196_v29  ;;  %v1378_v19 = vmul.f32 %v862_v17, %v861_v16  ;;  %v1393_v23 = vmul.f32 %v865_v20, %v864_v18  ;;  %v1395_v24 = vmul.f32 %v868_v22, %v867_v21  ;;  %v870_v25 = vld [vmem:[%s1680_s0 + $0x198] sm:$0xff]  ;;  %v873_v27 = vld [vmem:[%s1680_s0 + $0x1a0] sm:$0xff]  ;;  %v876_v30 = vld [vmem:[%s1680_s0 + $0x1a8] sm:$0xff] }
  0x24   :  { %812 = vst [vmem:[%s1682_s2 + $0xf8] sm:$0xff] %v1210_v33  ;;  %v871_v26 = vld [vmem:[%s1681_s1 + $0x198] sm:$0xff]  ;;  %v874_v29 = vld [vmem:[%s1681_s1 + $0x1a0] sm:$0xff]  ;;  %v877_v31 = vld [vmem:[%s1681_s1 + $0x1a8] sm:$0xff] }
  0x25   :  { %815 = vst [vmem:[%s1682_s2 + $0x100] sm:$0xff] %v1212_v34  ;;  %v1410_v28 = vmul.f32 %v871_v26, %v870_v25  ;;  %v1425_v32 = vmul.f32 %v874_v29, %v873_v27  ;;  %v1427_v33 = vmul.f32 %v877_v31, %v876_v30  ;;  %v879_v34 = vld [vmem:[%s1680_s0 + $0x1b0] sm:$0xff]  ;;  %v882_v36 = vld [vmem:[%s1680_s0 + $0x1b8] sm:$0xff]  ;;  %v885_v39 = vld [vmem:[%s1680_s0 + $0x1c0] sm:$0xff] }
  0x26   :  { %818 = vst [vmem:[%s1682_s2 + $0x108] sm:$0xff] %v1226_v38  ;;  %v880_v35 = vld [vmem:[%s1681_s1 + $0x1b0] sm:$0xff]  ;;  %v883_v38 = vld [vmem:[%s1681_s1 + $0x1b8] sm:$0xff]  ;;  %v886_v40 = vld [vmem:[%s1681_s1 + $0x1c0] sm:$0xff] }
  0x27   :  { %821 = vst [vmem:[%s1682_s2 + $0x110] sm:$0xff] %v1240_v42  ;;  %v1442_v37 = vmul.f32 %v880_v35, %v879_v34  ;;  %v1457_v41 = vmul.f32 %v883_v38, %v882_v36  ;;  %v1459_v42 = vmul.f32 %v886_v40, %v885_v39  ;;  %v889_v44 = vld [vmem:[%s1681_s1 + $0x1c8] sm:$0xff]  ;;  %v891_v45 = vld [vmem:[%s1680_s0 + $0x1d0] sm:$0xff]  ;;  %v894_v48 = vld [vmem:[%s1680_s0 + $0x1d8] sm:$0xff] }
  0x28   :  { %824 = vst [vmem:[%s1682_s2 + $0x118] sm:$0xff] %v1242_v43  ;;  %v888_v43 = vld [vmem:[%s1680_s0 + $0x1c8] sm:$0xff]  ;;  %v895_v49 = vld [vmem:[%s1681_s1 + $0x1d8] sm:$0xff]  ;;  %v897_v53 = vld [vmem:[%s1680_s0 + $0x1e0] sm:$0xff] }
  0x29   :  { %827 = vst [vmem:[%s1682_s2 + $0x120] sm:$0xff] %v1256_v47  ;;  %v576_v46 = vmul.f32 %v889_v44, %v888_v43  ;;  %v892_v47 = vld [vmem:[%s1681_s1 + $0x1d0] sm:$0xff]  ;;  %v898_v54 = vld [vmem:[%s1681_s1 + $0x1e0] sm:$0xff]  ;;  %v900_v55 = vld [vmem:[%s1680_s0 + $0x1e8] sm:$0xff] }
  0x2a   :  { %830 = vst [vmem:[%s1682_s2 + $0x128] sm:$0xff] %v1270_v51  ;;  %v586_v50 = vmul.f32 %v892_v47, %v891_v45  ;;  %v596_v51 = vmul.f32 %v895_v49, %v894_v48  ;;  %v901_v57 = vld [vmem:[%s1681_s1 + $0x1e8] sm:$0xff]  ;;  %v903_v58 = vld [vmem:[%s1680_s0 + $0x1f0] sm:$0xff]  ;;  %v906_v63 = vld [vmem:[%s1680_s0 + $0x1f8] sm:$0xff] }
  0x2b   :  { %833 = vst [vmem:[%s1682_s2 + $0x130] sm:$0xff] %v1272_v52  ;;  %v606_v52 = vmul.f32 %v898_v54, %v897_v53  ;;  %v904_v59 = vld [vmem:[%s1681_s1 + $0x1f0] sm:$0xff]  ;;  %v907_v0 = vld [vmem:[%s1681_s1 + $0x1f8] sm:$0xff]  ;;  %v909_v2 = vld [vmem:[%s1680_s0 + $0x200] sm:$0xff] }
  0x2c   :  { %836 = vst [vmem:[%s1682_s2 + $0x138] sm:$0xff] %v1286_v56  ;;  %v616_v56 = vmul.f32 %v901_v57, %v900_v55  ;;  %v626_v62 = vmul.f32 %v904_v59, %v903_v58  ;;  %v910_v3 = vld [vmem:[%s1681_s1 + $0x200] sm:$0xff]  ;;  %v912_v4 = vld [vmem:[%s1680_s0 + $0x208] sm:$0xff]  ;;  %v915_v9 = vld [vmem:[%s1680_s0 + $0x210] sm:$0xff] }
  0x2d   :  { %839 = vst [vmem:[%s1682_s2 + $0x140] sm:$0xff] %v1300_v60  ;;  %v636_v60 = vmul.f32 %v907_v0, %v906_v63  ;;  %v913_v7 = vld [vmem:[%s1681_s1 + $0x208] sm:$0xff]  ;;  %v916_v11 = vld [vmem:[%s1681_s1 + $0x210] sm:$0xff]  ;;  %v918_v12 = vld [vmem:[%s1680_s0 + $0x218] sm:$0xff] }
  0x2e   :  { %842 = vst [vmem:[%s1682_s2 + $0x148] sm:$0xff] %v1302_v61  ;;  %v646_v61 = vmul.f32 %v910_v3, %v909_v2  ;;  %v656_v8 = vmul.f32 %v913_v7, %v912_v4  ;;  %v919_v13 = vld [vmem:[%s1681_s1 + $0x218] sm:$0xff]  ;;  %v921_v16 = vld [vmem:[%s1680_s0 + $0x220] sm:$0xff]  ;;  %v924_v20 = vld [vmem:[%s1680_s0 + $0x228] sm:$0xff] }
  0x2f   :  { %845 = vst [vmem:[%s1682_s2 + $0x150] sm:$0xff] %v1316_v1  ;;  %v666_v1 = vmul.f32 %v916_v11, %v915_v9  ;;  %v922_v17 = vld [vmem:[%s1681_s1 + $0x220] sm:$0xff]  ;;  %v925_v21 = vld [vmem:[%s1681_s1 + $0x228] sm:$0xff]  ;;  %v927_v22 = vld [vmem:[%s1680_s0 + $0x230] sm:$0xff] }
  0x30   :  { %848 = vst [vmem:[%s1682_s2 + $0x158] sm:$0xff] %v1330_v5  ;;  %v676_v5 = vmul.f32 %v919_v13, %v918_v12  ;;  %v686_v18 = vmul.f32 %v922_v17, %v921_v16  ;;  %v928_v25 = vld [vmem:[%s1681_s1 + $0x230] sm:$0xff]  ;;  %v930_v26 = vld [vmem:[%s1680_s0 + $0x238] sm:$0xff] }
  0x31   :  { %851 = vst [vmem:[%s1682_s2 + $0x160] sm:$0xff] %v1332_v6  ;;  %v696_v6 = vmul.f32 %v925_v21, %v924_v20  ;;  %v931_v27 = vld [vmem:[%s1681_s1 + $0x238] sm:$0xff] }
  0x32   :  { %854 = vst [vmem:[%s1682_s2 + $0x168] sm:$0xff] %v1346_v10  ;;  %v706_v10 = vmul.f32 %v928_v25, %v927_v22  ;;  %v716_v29 = vmul.f32 %v931_v27, %v930_v26 }
  0x33   :  { %857 = vst [vmem:[%s1682_s2 + $0x170] sm:$0xff] %v1361_v14 }
  0x34   :  { %860 = vst [vmem:[%s1682_s2 + $0x178] sm:$0xff] %v1363_v15 }
  0x35   :  { %863 = vst [vmem:[%s1682_s2 + $0x180] sm:$0xff] %v1378_v19 }
  0x36   :  { %866 = vst [vmem:[%s1682_s2 + $0x188] sm:$0xff] %v1393_v23 }
  0x37   :  { %869 = vst [vmem:[%s1682_s2 + $0x190] sm:$0xff] %v1395_v24 }
  0x38   :  { %872 = vst [vmem:[%s1682_s2 + $0x198] sm:$0xff] %v1410_v28 }
  0x39   :  { %875 = vst [vmem:[%s1682_s2 + $0x1a0] sm:$0xff] %v1425_v32 }
  0x3a   :  { %878 = vst [vmem:[%s1682_s2 + $0x1a8] sm:$0xff] %v1427_v33 }
  0x3b   :  { %881 = vst [vmem:[%s1682_s2 + $0x1b0] sm:$0xff] %v1442_v37 }
  0x3c   :  { %884 = vst [vmem:[%s1682_s2 + $0x1b8] sm:$0xff] %v1457_v41 }
  0x3d   :  { %887 = vst [vmem:[%s1682_s2 + $0x1c0] sm:$0xff] %v1459_v42 }
  0x3e   :  { %890 = vst [vmem:[%s1682_s2 + $0x1c8] sm:$0xff] %v576_v46 }
  0x3f   :  { %893 = vst [vmem:[%s1682_s2 + $0x1d0] sm:$0xff] %v586_v50 }
  0x40   :  { %896 = vst [vmem:[%s1682_s2 + $0x1d8] sm:$0xff] %v596_v51 }
  0x41   :  { %899 = vst [vmem:[%s1682_s2 + $0x1e0] sm:$0xff] %v606_v52 }
  0x42   :  { %902 = vst [vmem:[%s1682_s2 + $0x1e8] sm:$0xff] %v616_v56 }
  0x43   :  { %905 = vst [vmem:[%s1682_s2 + $0x1f0] sm:$0xff] %v626_v62 }
  0x44   :  { %908 = vst [vmem:[%s1682_s2 + $0x1f8] sm:$0xff] %v636_v60 }
  0x45   :  { %911 = vst [vmem:[%s1682_s2 + $0x200] sm:$0xff] %v646_v61 }
  0x46   :  { %914 = vst [vmem:[%s1682_s2 + $0x208] sm:$0xff] %v656_v8 }
  0x47   :  { %917 = vst [vmem:[%s1682_s2 + $0x210] sm:$0xff] %v666_v1 }
  0x48   :  { %920 = vst [vmem:[%s1682_s2 + $0x218] sm:$0xff] %v676_v5 }
  0x49   :  { %923 = vst [vmem:[%s1682_s2 + $0x220] sm:$0xff] %v686_v18 }
  0x4a   :  { %926 = vst [vmem:[%s1682_s2 + $0x228] sm:$0xff] %v696_v6 }
  0x4b   :  { %929 = vst [vmem:[%s1682_s2 + $0x230] sm:$0xff] %v706_v10 }
  0x4c   :  { %932 = vst [vmem:[%s1682_s2 + $0x238] sm:$0xff] %v716_v29 }

// kernel: tile.13
= control target key start
LH: loop header
LB: loop body
LE: loop exit
PB: predicated region body
PF: predicated region fallthrough
CT: control target
= control target key end

     0   :  { %s28_s0 = inlined_call_operand.vmem [shape: f32[16], index: 0, kind: input, shape index: {}]   ;;  %s29_s1 = inlined_call_operand.vmem [shape: f32[16,16], index: 1, kind: output, shape index: {}]  }
   0x1   :  { %v4_v0 = vld [vmem:[%s28_s0] ss:$0 sm:$0xff] }
   0x2   :  { %5 = vst [vmem:[%s29_s1] sm:$0xff] %v4_v0 }
   0x3   :  { %8 = vst [vmem:[%s29_s1 + $0x8] sm:$0xff] %v4_v0 }

// kernel: tile.0
= control target key start
LH: loop header
LB: loop body
LE: loop exit
PB: predicated region body
PF: predicated region fallthrough
CT: control target
= control target key end

     0   :  { %s549_s8 = smov 126   ;;  %s550_s9 = smov 127   ;;  %vm3_vm0 = vcmask 7168   ;;  %s1092_s0 = inlined_call_operand.vmem [shape: f32[16,16], index: 0, kind: input, shape index: {}]   ;;  %s1093_s1 = inlined_call_operand.vmem [shape: f32[256,1], index: 1, kind: output, shape index: {}]  }
   0x1   :  { %v44_v0 = vld [vmem:[%s1092_s0] sm:$0xff]   ;;  %s551_s10 = smov 125   ;;  %v412_v1 = vld [vmem:[%s1092_s0 + $0x8] sm:$0xff]   ;;  %s552_s0 = smov 124  }
   0x2   :  { %45 = vrot.lane.b32.xlu1 %v44_v0, %s549_s8  ;;  %20 = vrot.lane.b32.xlu0 %v44_v0, %s550_s9  ;;  %s553_s13 = smov 123   ;;  %s554_s14 = smov 122   ;;  %4 = vst.msk [vmem:[%s1093_s1] ss:$16 sm:$0x3] %vm3_vm0, %v44_v0  }
   0x3   :  { %70 = vrot.lane.b32.xlu2 %v44_v0, %s551_s10  ;;  %s555_s15 = smov 121   ;;  %s556_s16 = smov 120   ;;  %5 = vst.msk [vmem:[%s1093_s1] ss:$16 sm:$0xc] %vm3_vm0, %v44_v0  }
   0x4   :  { %s557_s17 = smov 119   ;;  %6 = vst.msk [vmem:[%s1093_s1] ss:$16 sm:$0x30] %vm3_vm0, %v44_v0   ;;  %s558_s30 = smov 118  }
   0x5   :  { %7 = vst.msk [vmem:[%s1093_s1] ss:$16 sm:$0xc0] %vm3_vm0, %v44_v0   ;;  %s559_s4 = smov 117   ;;  %s560_s7 = smov 116  }
   0x6   :  { %395 = vst.msk [vmem:[%s1093_s1 + $0x80] ss:$16 sm:$0x3] %vm3_vm0, %v412_v1  }
   0x7   :  { %396 = vst.msk [vmem:[%s1093_s1 + $0x80] ss:$16 sm:$0xc] %vm3_vm0, %v412_v1  }
   0x8   :  { %397 = vst.msk [vmem:[%s1093_s1 + $0x80] ss:$16 sm:$0x30] %vm3_vm0, %v412_v1  }
   0x9   :  { %398 = vst.msk [vmem:[%s1093_s1 + $0x80] ss:$16 sm:$0xc0] %vm3_vm0, %v412_v1  }
   0xa   :  { %58 = vrot.lane.b32.xlu1 %v412_v1, %s549_s8  ;;  %33 = vrot.lane.b32.xlu0 %v412_v1, %s550_s9  ;;  %s561_s8 = smov 115   ;;  %s562_s9 = smov 114  }
   0xb   :  { %83 = vrot.lane.b32.xlu2 %v412_v1, %s551_s10  ;;  %s563_s10 = smov 113  }
  0x12   :  { %108 = vrot.lane.b32.xlu1 %v412_v1, %s552_s0  ;;  %95 = vrot.lane.b32.xlu0 %v44_v0, %s552_s0 }
  0x13   :  { %120 = vrot.lane.b32.xlu2 %v44_v0, %s553_s13 }
  0x1a   :  { %145 = vrot.lane.b32.xlu1 %v44_v0, %s554_s14  ;;  %133 = vrot.lane.b32.xlu0 %v412_v1, %s553_s13 }
  0x1b   :  { %158 = vrot.lane.b32.xlu2 %v412_v1, %s554_s14 }
  0x22   :  { %183 = vrot.lane.b32.xlu1 %v412_v1, %s555_s15  ;;  %170 = vrot.lane.b32.xlu0 %v44_v0, %s555_s15 }
  0x23   :  { %195 = vrot.lane.b32.xlu2 %v44_v0, %s556_s16 }
  0x2a   :  { %220 = vrot.lane.b32.xlu1 %v44_v0, %s557_s17  ;;  %208 = vrot.lane.b32.xlu0 %v412_v1, %s556_s16 }
  0x2b   :  { %233 = vrot.lane.b32.xlu2 %v412_v1, %s557_s17 }
  0x32   :  { %258 = vrot.lane.b32.xlu1 %v412_v1, %s558_s30  ;;  %245 = vrot.lane.b32.xlu0 %v44_v0, %s558_s30 }
  0x33   :  { %270 = vrot.lane.b32.xlu2 %v44_v0, %s559_s4 }
  0x3a   :  { %295 = vrot.lane.b32.xlu1 %v44_v0, %s560_s7  ;;  %283 = vrot.lane.b32.xlu0 %v412_v1, %s559_s4 }
  0x3b   :  { %308 = vrot.lane.b32.xlu2 %v412_v1, %s560_s7 }
  0x42   :  { %333 = vrot.lane.b32.xlu1 %v412_v1, %s561_s8  ;;  %320 = vrot.lane.b32.xlu0 %v44_v0, %s561_s8 }
  0x43   :  { %345 = vrot.lane.b32.xlu2 %v44_v0, %s562_s9 }
  0x4a   :  { %370 = vrot.lane.b32.xlu1 %v44_v0, %s563_s10  ;;  %358 = vrot.lane.b32.xlu0 %v412_v1, %s562_s9 }
  0x4b   :  { %383 = vrot.lane.b32.xlu2 %v412_v1, %s563_s10 }
  0x5d   :  { %v71_v2 = vpop.permute.xlu2 %70  }
  0x5e   :  { %417 = vst.msk [vmem:[%s1093_s1 + $0x3] ss:$16 sm:$0x3] %vm3_vm0, %v71_v2  }
  0x5f   :  { %418 = vst.msk [vmem:[%s1093_s1 + $0x3] ss:$16 sm:$0xc] %vm3_vm0, %v71_v2  }
  0x60   :  { %419 = vst.msk [vmem:[%s1093_s1 + $0x3] ss:$16 sm:$0x30] %vm3_vm0, %v71_v2  }
  0x61   :  { %420 = vst.msk [vmem:[%s1093_s1 + $0x3] ss:$16 sm:$0xc0] %vm3_vm0, %v71_v2  }
  0x65   :  { %v84_v3 = vpop.permute.xlu2 %83  }
  0x66   :  { %422 = vst.msk [vmem:[%s1093_s1 + $0x83] ss:$16 sm:$0x3] %vm3_vm0, %v84_v3  }
  0x67   :  { %423 = vst.msk [vmem:[%s1093_s1 + $0x83] ss:$16 sm:$0xc] %vm3_vm0, %v84_v3  }
  0x68   :  { %424 = vst.msk [vmem:[%s1093_s1 + $0x83] ss:$16 sm:$0x30] %vm3_vm0, %v84_v3  }
  0x69   :  { %425 = vst.msk [vmem:[%s1093_s1 + $0x83] ss:$16 sm:$0xc0] %vm3_vm0, %v84_v3  }
  0x6d   :  { %v121_v4 = vpop.permute.xlu2 %120  }
  0x6e   :  { %435 = vst.msk [vmem:[%s1093_s1 + $0x5] ss:$16 sm:$0x3] %vm3_vm0, %v121_v4  }
  0x6f   :  { %436 = vst.msk [vmem:[%s1093_s1 + $0x5] ss:$16 sm:$0xc] %vm3_vm0, %v121_v4  }
  0x70   :  { %437 = vst.msk [vmem:[%s1093_s1 + $0x5] ss:$16 sm:$0x30] %vm3_vm0, %v121_v4  }
  0x71   :  { %438 = vst.msk [vmem:[%s1093_s1 + $0x5] ss:$16 sm:$0xc0] %vm3_vm0, %v121_v4  }
  0x74   :  { %v46_v5 = vpop.permute.xlu1 %45   ;;  %v21_v6 = vpop.permute.xlu0 %20  }
  0x75   :  { %408 = vst.msk [vmem:[%s1093_s1 + $0x2] ss:$16 sm:$0x3] %vm3_vm0, %v46_v5   ;;  %v159_v7 = vpop.permute.xlu2 %158  }
  0x76   :  { %409 = vst.msk [vmem:[%s1093_s1 + $0x2] ss:$16 sm:$0xc] %vm3_vm0, %v46_v5  }
  0x77   :  { %410 = vst.msk [vmem:[%s1093_s1 + $0x2] ss:$16 sm:$0x30] %vm3_vm0, %v46_v5  }
  0x78   :  { %411 = vst.msk [vmem:[%s1093_s1 + $0x2] ss:$16 sm:$0xc0] %vm3_vm0, %v46_v5  }
  0x79   :  { %399 = vst.msk [vmem:[%s1093_s1 + $0x1] ss:$16 sm:$0x3] %vm3_vm0, %v21_v6  }
  0x7a   :  { %400 = vst.msk [vmem:[%s1093_s1 + $0x1] ss:$16 sm:$0xc] %vm3_vm0, %v21_v6  }
  0x7b   :  { %401 = vst.msk [vmem:[%s1093_s1 + $0x1] ss:$16 sm:$0x30] %vm3_vm0, %v21_v6  }
  0x7c   :  { %402 = vst.msk [vmem:[%s1093_s1 + $0x1] ss:$16 sm:$0xc0] %vm3_vm0, %v21_v6   ;;  %v59_v8 = vpop.permute.xlu1 %58   ;;  %v34_v9 = vpop.permute.xlu0 %33  }
  0x7d   :  { %413 = vst.msk [vmem:[%s1093_s1 + $0x82] ss:$16 sm:$0x3] %vm3_vm0, %v59_v8   ;;  %v196_v10 = vpop.permute.xlu2 %195  }
  0x7e   :  { %414 = vst.msk [vmem:[%s1093_s1 + $0x82] ss:$16 sm:$0xc] %vm3_vm0, %v59_v8  }
  0x7f   :  { %415 = vst.msk [vmem:[%s1093_s1 + $0x82] ss:$16 sm:$0x30] %vm3_vm0, %v59_v8  }
  0x80   :  { %416 = vst.msk [vmem:[%s1093_s1 + $0x82] ss:$16 sm:$0xc0] %vm3_vm0, %v59_v8  }
  0x81   :  { %404 = vst.msk [vmem:[%s1093_s1 + $0x81] ss:$16 sm:$0x3] %vm3_vm0, %v34_v9  }
  0x82   :  { %405 = vst.msk [vmem:[%s1093_s1 + $0x81] ss:$16 sm:$0xc] %vm3_vm0, %v34_v9  }
  0x83   :  { %406 = vst.msk [vmem:[%s1093_s1 + $0x81] ss:$16 sm:$0x30] %vm3_vm0, %v34_v9  }
  0x84   :  { %407 = vst.msk [vmem:[%s1093_s1 + $0x81] ss:$16 sm:$0xc0] %vm3_vm0, %v34_v9   ;;  %v109_v11 = vpop.permute.xlu1 %108   ;;  %v96_v12 = vpop.permute.xlu0 %95  }
  0x85   :  { %431 = vst.msk [vmem:[%s1093_s1 + $0x84] ss:$16 sm:$0x3] %vm3_vm0, %v109_v11   ;;  %v234_v13 = vpop.permute.xlu2 %233  }
  0x86   :  { %432 = vst.msk [vmem:[%s1093_s1 + $0x84] ss:$16 sm:$0xc] %vm3_vm0, %v109_v11  }
  0x87   :  { %433 = vst.msk [vmem:[%s1093_s1 + $0x84] ss:$16 sm:$0x30] %vm3_vm0, %v109_v11  }
  0x88   :  { %434 = vst.msk [vmem:[%s1093_s1 + $0x84] ss:$16 sm:$0xc0] %vm3_vm0, %v109_v11  }
  0x89   :  { %426 = vst.msk [vmem:[%s1093_s1 + $0x4] ss:$16 sm:$0x3] %vm3_vm0, %v96_v12  }
  0x8a   :  { %427 = vst.msk [vmem:[%s1093_s1 + $0x4] ss:$16 sm:$0xc] %vm3_vm0, %v96_v12  }
  0x8b   :  { %428 = vst.msk [vmem:[%s1093_s1 + $0x4] ss:$16 sm:$0x30] %vm3_vm0, %v96_v12  }
  0x8c   :  { %429 = vst.msk [vmem:[%s1093_s1 + $0x4] ss:$16 sm:$0xc0] %vm3_vm0, %v96_v12   ;;  %v146_v14 = vpop.permute.xlu1 %145   ;;  %v134_v15 = vpop.permute.xlu0 %133  }
  0x8d   :  { %449 = vst.msk [vmem:[%s1093_s1 + $0x86] ss:$16 sm:$0x3] %vm3_vm0, %v159_v7   ;;  %v271_v16 = vpop.permute.xlu2 %270  }
  0x8e   :  { %450 = vst.msk [vmem:[%s1093_s1 + $0x86] ss:$16 sm:$0xc] %vm3_vm0, %v159_v7  }
  0x8f   :  { %451 = vst.msk [vmem:[%s1093_s1 + $0x86] ss:$16 sm:$0x30] %vm3_vm0, %v159_v7  }
  0x90   :  { %452 = vst.msk [vmem:[%s1093_s1 + $0x86] ss:$16 sm:$0xc0] %vm3_vm0, %v159_v7  }
  0x91   :  { %444 = vst.msk [vmem:[%s1093_s1 + $0x6] ss:$16 sm:$0x3] %vm3_vm0, %v146_v14  }
  0x92   :  { %445 = vst.msk [vmem:[%s1093_s1 + $0x6] ss:$16 sm:$0xc] %vm3_vm0, %v146_v14  }
  0x93   :  { %446 = vst.msk [vmem:[%s1093_s1 + $0x6] ss:$16 sm:$0x30] %vm3_vm0, %v146_v14  }
  0x94   :  { %447 = vst.msk [vmem:[%s1093_s1 + $0x6] ss:$16 sm:$0xc0] %vm3_vm0, %v146_v14   ;;  %v184_v17 = vpop.permute.xlu1 %183   ;;  %v171_v18 = vpop.permute.xlu0 %170  }
  0x95   :  { %440 = vst.msk [vmem:[%s1093_s1 + $0x85] ss:$16 sm:$0x3] %vm3_vm0, %v134_v15   ;;  %v309_v21 = vpop.permute.xlu2 %308  }
  0x96   :  { %441 = vst.msk [vmem:[%s1093_s1 + $0x85] ss:$16 sm:$0xc] %vm3_vm0, %v134_v15  }
  0x97   :  { %442 = vst.msk [vmem:[%s1093_s1 + $0x85] ss:$16 sm:$0x30] %vm3_vm0, %v134_v15  }
  0x98   :  { %443 = vst.msk [vmem:[%s1093_s1 + $0x85] ss:$16 sm:$0xc0] %vm3_vm0, %v134_v15  }
  0x99   :  { %462 = vst.msk [vmem:[%s1093_s1 + $0x8] ss:$16 sm:$0x3] %vm3_vm0, %v196_v10  }
  0x9a   :  { %463 = vst.msk [vmem:[%s1093_s1 + $0x8] ss:$16 sm:$0xc] %vm3_vm0, %v196_v10  }
  0x9b   :  { %464 = vst.msk [vmem:[%s1093_s1 + $0x8] ss:$16 sm:$0x30] %vm3_vm0, %v196_v10  }
  0x9c   :  { %465 = vst.msk [vmem:[%s1093_s1 + $0x8] ss:$16 sm:$0xc0] %vm3_vm0, %v196_v10   ;;  %v221_v19 = vpop.permute.xlu1 %220   ;;  %v209_v20 = vpop.permute.xlu0 %208  }
  0x9d   :  { %458 = vst.msk [vmem:[%s1093_s1 + $0x87] ss:$16 sm:$0x3] %vm3_vm0, %v184_v17   ;;  %v346_v24 = vpop.permute.xlu2 %345  }
  0x9e   :  { %459 = vst.msk [vmem:[%s1093_s1 + $0x87] ss:$16 sm:$0xc] %vm3_vm0, %v184_v17  }
  0x9f   :  { %460 = vst.msk [vmem:[%s1093_s1 + $0x87] ss:$16 sm:$0x30] %vm3_vm0, %v184_v17  }
  0xa0   :  { %461 = vst.msk [vmem:[%s1093_s1 + $0x87] ss:$16 sm:$0xc0] %vm3_vm0, %v184_v17  }
  0xa1   :  { %453 = vst.msk [vmem:[%s1093_s1 + $0x7] ss:$16 sm:$0x3] %vm3_vm0, %v171_v18  }
  0xa2   :  { %454 = vst.msk [vmem:[%s1093_s1 + $0x7] ss:$16 sm:$0xc] %vm3_vm0, %v171_v18  }
  0xa3   :  { %455 = vst.msk [vmem:[%s1093_s1 + $0x7] ss:$16 sm:$0x30] %vm3_vm0, %v171_v18  }
  0xa4   :  { %456 = vst.msk [vmem:[%s1093_s1 + $0x7] ss:$16 sm:$0xc0] %vm3_vm0, %v171_v18   ;;  %v259_v22 = vpop.permute.xlu1 %258   ;;  %v246_v23 = vpop.permute.xlu0 %245  }
  0xa5   :  { %476 = vst.msk [vmem:[%s1093_s1 + $0x89] ss:$16 sm:$0x3] %vm3_vm0, %v234_v13   ;;  %v384_v29 = vpop.permute.xlu2 %383  }
  0xa6   :  { %477 = vst.msk [vmem:[%s1093_s1 + $0x89] ss:$16 sm:$0xc] %vm3_vm0, %v234_v13  }
  0xa7   :  { %478 = vst.msk [vmem:[%s1093_s1 + $0x89] ss:$16 sm:$0x30] %vm3_vm0, %v234_v13  }
  0xa8   :  { %479 = vst.msk [vmem:[%s1093_s1 + $0x89] ss:$16 sm:$0xc0] %vm3_vm0, %v234_v13  }
  0xa9   :  { %471 = vst.msk [vmem:[%s1093_s1 + $0x9] ss:$16 sm:$0x3] %vm3_vm0, %v221_v19  }
  0xaa   :  { %472 = vst.msk [vmem:[%s1093_s1 + $0x9] ss:$16 sm:$0xc] %vm3_vm0, %v221_v19  }
  0xab   :  { %473 = vst.msk [vmem:[%s1093_s1 + $0x9] ss:$16 sm:$0x30] %vm3_vm0, %v221_v19  }
  0xac   :  { %474 = vst.msk [vmem:[%s1093_s1 + $0x9] ss:$16 sm:$0xc0] %vm3_vm0, %v221_v19   ;;  %v296_v25 = vpop.permute.xlu1 %295   ;;  %v284_v26 = vpop.permute.xlu0 %283  }
  0xad   :  { %467 = vst.msk [vmem:[%s1093_s1 + $0x88] ss:$16 sm:$0x3] %vm3_vm0, %v209_v20  }
  0xae   :  { %468 = vst.msk [vmem:[%s1093_s1 + $0x88] ss:$16 sm:$0xc] %vm3_vm0, %v209_v20  }
  0xaf   :  { %469 = vst.msk [vmem:[%s1093_s1 + $0x88] ss:$16 sm:$0x30] %vm3_vm0, %v209_v20  }
  0xb0   :  { %470 = vst.msk [vmem:[%s1093_s1 + $0x88] ss:$16 sm:$0xc0] %vm3_vm0, %v209_v20  }
  0xb1   :  { %489 = vst.msk [vmem:[%s1093_s1 + $0xb] ss:$16 sm:$0x3] %vm3_vm0, %v271_v16  }
  0xb2   :  { %490 = vst.msk [vmem:[%s1093_s1 + $0xb] ss:$16 sm:$0xc] %vm3_vm0, %v271_v16  }
  0xb3   :  { %491 = vst.msk [vmem:[%s1093_s1 + $0xb] ss:$16 sm:$0x30] %vm3_vm0, %v271_v16  }
  0xb4   :  { %492 = vst.msk [vmem:[%s1093_s1 + $0xb] ss:$16 sm:$0xc0] %vm3_vm0, %v271_v16   ;;  %v334_v27 = vpop.permute.xlu1 %333   ;;  %v321_v28 = vpop.permute.xlu0 %320  }
  0xb5   :  { %485 = vst.msk [vmem:[%s1093_s1 + $0x8a] ss:$16 sm:$0x3] %vm3_vm0, %v259_v22  }
  0xb6   :  { %486 = vst.msk [vmem:[%s1093_s1 + $0x8a] ss:$16 sm:$0xc] %vm3_vm0, %v259_v22  }
  0xb7   :  { %487 = vst.msk [vmem:[%s1093_s1 + $0x8a] ss:$16 sm:$0x30] %vm3_vm0, %v259_v22  }
  0xb8   :  { %488 = vst.msk [vmem:[%s1093_s1 + $0x8a] ss:$16 sm:$0xc0] %vm3_vm0, %v259_v22  }
  0xb9   :  { %480 = vst.msk [vmem:[%s1093_s1 + $0xa] ss:$16 sm:$0x3] %vm3_vm0, %v246_v23  }
  0xba   :  { %481 = vst.msk [vmem:[%s1093_s1 + $0xa] ss:$16 sm:$0xc] %vm3_vm0, %v246_v23  }
  0xbb   :  { %482 = vst.msk [vmem:[%s1093_s1 + $0xa] ss:$16 sm:$0x30] %vm3_vm0, %v246_v23  }
  0xbc   :  { %483 = vst.msk [vmem:[%s1093_s1 + $0xa] ss:$16 sm:$0xc0] %vm3_vm0, %v246_v23   ;;  %v371_v30 = vpop.permute.xlu1 %370   ;;  %v359_v31 = vpop.permute.xlu0 %358  }
  0xbd   :  { %503 = vst.msk [vmem:[%s1093_s1 + $0x8c] ss:$16 sm:$0x3] %vm3_vm0, %v309_v21  }
  0xbe   :  { %504 = vst.msk [vmem:[%s1093_s1 + $0x8c] ss:$16 sm:$0xc] %vm3_vm0, %v309_v21  }
  0xbf   :  { %505 = vst.msk [vmem:[%s1093_s1 + $0x8c] ss:$16 sm:$0x30] %vm3_vm0, %v309_v21  }
  0xc0   :  { %506 = vst.msk [vmem:[%s1093_s1 + $0x8c] ss:$16 sm:$0xc0] %vm3_vm0, %v309_v21  }
  0xc1   :  { %498 = vst.msk [vmem:[%s1093_s1 + $0xc] ss:$16 sm:$0x3] %vm3_vm0, %v296_v25  }
  0xc2   :  { %499 = vst.msk [vmem:[%s1093_s1 + $0xc] ss:$16 sm:$0xc] %vm3_vm0, %v296_v25  }
  0xc3   :  { %500 = vst.msk [vmem:[%s1093_s1 + $0xc] ss:$16 sm:$0x30] %vm3_vm0, %v296_v25  }
  0xc4   :  { %501 = vst.msk [vmem:[%s1093_s1 + $0xc] ss:$16 sm:$0xc0] %vm3_vm0, %v296_v25  }
  0xc5   :  { %494 = vst.msk [vmem:[%s1093_s1 + $0x8b] ss:$16 sm:$0x3] %vm3_vm0, %v284_v26  }
  0xc6   :  { %495 = vst.msk [vmem:[%s1093_s1 + $0x8b] ss:$16 sm:$0xc] %vm3_vm0, %v284_v26  }
  0xc7   :  { %496 = vst.msk [vmem:[%s1093_s1 + $0x8b] ss:$16 sm:$0x30] %vm3_vm0, %v284_v26  }
  0xc8   :  { %497 = vst.msk [vmem:[%s1093_s1 + $0x8b] ss:$16 sm:$0xc0] %vm3_vm0, %v284_v26  }
  0xc9   :  { %516 = vst.msk [vmem:[%s1093_s1 + $0xe] ss:$16 sm:$0x3] %vm3_vm0, %v346_v24  }
  0xca   :  { %517 = vst.msk [vmem:[%s1093_s1 + $0xe] ss:$16 sm:$0xc] %vm3_vm0, %v346_v24  }
  0xcb   :  { %518 = vst.msk [vmem:[%s1093_s1 + $0xe] ss:$16 sm:$0x30] %vm3_vm0, %v346_v24  }
  0xcc   :  { %519 = vst.msk [vmem:[%s1093_s1 + $0xe] ss:$16 sm:$0xc0] %vm3_vm0, %v346_v24  }
  0xcd   :  { %512 = vst.msk [vmem:[%s1093_s1 + $0x8d] ss:$16 sm:$0x3] %vm3_vm0, %v334_v27  }
  0xce   :  { %513 = vst.msk [vmem:[%s1093_s1 + $0x8d] ss:$16 sm:$0xc] %vm3_vm0, %v334_v27  }
  0xcf   :  { %514 = vst.msk [vmem:[%s1093_s1 + $0x8d] ss:$16 sm:$0x30] %vm3_vm0, %v334_v27  }
  0xd0   :  { %515 = vst.msk [vmem:[%s1093_s1 + $0x8d] ss:$16 sm:$0xc0] %vm3_vm0, %v334_v27  }
  0xd1   :  { %507 = vst.msk [vmem:[%s1093_s1 + $0xd] ss:$16 sm:$0x3] %vm3_vm0, %v321_v28  }
  0xd2   :  { %508 = vst.msk [vmem:[%s1093_s1 + $0xd] ss:$16 sm:$0xc] %vm3_vm0, %v321_v28  }
  0xd3   :  { %509 = vst.msk [vmem:[%s1093_s1 + $0xd] ss:$16 sm:$0x30] %vm3_vm0, %v321_v28  }
  0xd4   :  { %510 = vst.msk [vmem:[%s1093_s1 + $0xd] ss:$16 sm:$0xc0] %vm3_vm0, %v321_v28  }
  0xd5   :  { %530 = vst.msk [vmem:[%s1093_s1 + $0x8f] ss:$16 sm:$0x3] %vm3_vm0, %v384_v29  }
  0xd6   :  { %531 = vst.msk [vmem:[%s1093_s1 + $0x8f] ss:$16 sm:$0xc] %vm3_vm0, %v384_v29  }
  0xd7   :  { %532 = vst.msk [vmem:[%s1093_s1 + $0x8f] ss:$16 sm:$0x30] %vm3_vm0, %v384_v29  }
  0xd8   :  { %533 = vst.msk [vmem:[%s1093_s1 + $0x8f] ss:$16 sm:$0xc0] %vm3_vm0, %v384_v29  }
  0xd9   :  { %525 = vst.msk [vmem:[%s1093_s1 + $0xf] ss:$16 sm:$0x3] %vm3_vm0, %v371_v30  }
  0xda   :  { %526 = vst.msk [vmem:[%s1093_s1 + $0xf] ss:$16 sm:$0xc] %vm3_vm0, %v371_v30  }
  0xdb   :  { %527 = vst.msk [vmem:[%s1093_s1 + $0xf] ss:$16 sm:$0x30] %vm3_vm0, %v371_v30  }
  0xdc   :  { %528 = vst.msk [vmem:[%s1093_s1 + $0xf] ss:$16 sm:$0xc0] %vm3_vm0, %v371_v30  }
  0xdd   :  { %521 = vst.msk [vmem:[%s1093_s1 + $0x8e] ss:$16 sm:$0x3] %vm3_vm0, %v359_v31  }
  0xde   :  { %522 = vst.msk [vmem:[%s1093_s1 + $0x8e] ss:$16 sm:$0xc] %vm3_vm0, %v359_v31  }
  0xdf   :  { %523 = vst.msk [vmem:[%s1093_s1 + $0x8e] ss:$16 sm:$0x30] %vm3_vm0, %v359_v31  }
  0xe0   :  { %524 = vst.msk [vmem:[%s1093_s1 + $0x8e] ss:$16 sm:$0xc0] %vm3_vm0, %v359_v31  }

// kernel: tile.18
= control target key start
LH: loop header
LB: loop body
LE: loop exit
PB: predicated region body
PF: predicated region fallthrough
CT: control target
= control target key end

     0   :  { %s22_s0 = inlined_call_operand.vmem [shape: f32[32], index: 0, kind: input, shape index: {}]   ;;  %s23_s1 = inlined_call_operand.vmem [shape: f32[4,32], index: 1, kind: output, shape index: {}]  }
   0x1   :  { %v4_v0 = vld [vmem:[%s22_s0] ss:$0 sm:$0xff] }
   0x2   :  { %5 = vst [vmem:[%s23_s1] sm:$0xf] %v4_v0 }

// kernel: tile.1
= control target key start
LH: loop header
LB: loop body
LE: loop exit
PB: predicated region body
PF: predicated region fallthrough
CT: control target
= control target key end

     0   :  { %s546_s8 = smov 125   ;;  %s547_s9 = smov 123   ;;  %vm7_vm0 = vcmask 7168   ;;  %s1101_s0 = inlined_call_operand.vmem [shape: f32[4,32], index: 0, kind: input, shape index: {}]   ;;  %s1102_s1 = inlined_call_operand.vmem [shape: f32[128,1], index: 1, kind: output, shape index: {}]  }
   0x1   :  { %v4_v0 = vld [vmem:[%s1101_s0] sm:$0xf]  ;;  %s545_s0 = smov 127   ;;  %s548_s10 = smov 126  }
   0x2   :  { %5 = vst [vmem:[#allocation0] sm:$0xf] %v4_v0  ;;  %s549_s11 = smov 124   ;;  %s550_s12 = smov 122  }
   0x3   :  { %s551_s13 = smov 121   ;;  %s552_s14 = smov 120  }
   0x4   :  { %s553_s15 = smov 119   ;;  %s554_s16 = smov 118  }
   0x5   :  { %s555_s17 = smov 117   ;;  %s556_s18 = smov 116  }
   0x6   :  { %s557_s19 = smov 115   ;;  %s558_s20 = smov 114  }
   0x7   :  { %s559_s21 = smov 113   ;;  %s560_s22 = smov 112  }
   0x8   :  { %s561_s23 = smov 111   ;;  %s562_s24 = smov 110  }
   0x9   :  { %v15_v1 = vld [vmem:[#allocation0] sm:$0xf]   ;;  %s563_s25 = smov 109   ;;  %s564_s26 = smov 108  }
   0xa   :  { %v39_v2 = vld [vmem:[#allocation0] sm:$0xf]   ;;  %16 = vrot.lane.b32.xlu0 %v15_v1, %s545_s0  ;;  %s565_s27 = smov 107   ;;  %s566_s28 = smov 106  }
   0xb   :  { %40 = vrot.lane.b32.xlu1 %v39_v2, %s546_s8  ;;  %v63_v3 = vld [vmem:[#allocation0] sm:$0xf]   ;;  %s567_s29 = smov 105   ;;  %s568_s30 = smov 104  }
   0xc   :  { %64 = vrot.lane.b32.xlu2 %v63_v3, %s547_s9  ;;  %v27_v4 = vld [vmem:[#allocation0] sm:$0xf]   ;;  %s569_s2 = smov 103   ;;  %s570_s3 = smov 102  }
   0xd   :  { %v51_v5 = vld [vmem:[#allocation0] sm:$0xf]   ;;  %s571_s4 = smov 101   ;;  %s572_s5 = smov 100  }
   0xe   :  { %v75_v6 = vld [vmem:[#allocation0] sm:$0xf]   ;;  %s573_s6 = smov 99   ;;  %s574_s7 = smov 98  }
   0xf   :  { %v87_v7 = vld [vmem:[#allocation0] sm:$0xf]   ;;  %s575_s0 = smov 97  }
  0x10   :  { %v99_v8 = vld [vmem:[#allocation0] sm:$0xf]  }
  0x11   :  { %v111_v9 = vld [vmem:[#allocation0] sm:$0xf]  }
  0x12   :  { %28 = vrot.lane.b32.xlu0 %v27_v4, %s548_s10  ;;  %v123_v10 = vld [vmem:[#allocation0] sm:$0xf]  }
  0x13   :  { %52 = vrot.lane.b32.xlu1 %v51_v5, %s549_s11  ;;  %v135_v11 = vld [vmem:[#allocation0] sm:$0xf]  }
  0x14   :  { %76 = vrot.lane.b32.xlu2 %v75_v6, %s550_s12  ;;  %v147_v12 = vld [vmem:[#allocation0] sm:$0xf]  }
  0x15   :  { %v159_v13 = vld [vmem:[#allocation0] sm:$0xf]  }
  0x16   :  { %v171_v14 = vld [vmem:[#allocation0] sm:$0xf]  }
  0x17   :  { %v183_v15 = vld [vmem:[#allocation0] sm:$0xf]  }
  0x18   :  { %v195_v16 = vld [vmem:[#allocation0] sm:$0xf]  }
  0x19   :  { %v207_v17 = vld [vmem:[#allocation0] sm:$0xf]  }
  0x1a   :  { %88 = vrot.lane.b32.xlu0 %v87_v7, %s551_s13  ;;  %v219_v18 = vld [vmem:[#allocation0] sm:$0xf]  }
  0x1b   :  { %100 = vrot.lane.b32.xlu1 %v99_v8, %s552_s14  ;;  %v231_v19 = vld [vmem:[#allocation0] sm:$0xf]  }
  0x1c   :  { %112 = vrot.lane.b32.xlu2 %v111_v9, %s553_s15  ;;  %v243_v20 = vld [vmem:[#allocation0] sm:$0xf]  }
  0x1d   :  { %v255_v21 = vld [vmem:[#allocation0] sm:$0xf]  }
  0x1e   :  { %v267_v22 = vld [vmem:[#allocation0] sm:$0xf]  }
  0x1f   :  { %v279_v23 = vld [vmem:[#allocation0] sm:$0xf]  }
  0x20   :  { %v291_v24 = vld [vmem:[#allocation0] sm:$0xf]  }
  0x21   :  { %v303_v25 = vld [vmem:[#allocation0] sm:$0xf]  }
  0x22   :  { %124 = vrot.lane.b32.xlu0 %v123_v10, %s554_s16  ;;  %v315_v26 = vld [vmem:[#allocation0] sm:$0xf]  }
  0x23   :  { %136 = vrot.lane.b32.xlu1 %v135_v11, %s555_s17  ;;  %v327_v27 = vld [vmem:[#allocation0] sm:$0xf]  }
  0x24   :  { %148 = vrot.lane.b32.xlu2 %v147_v12, %s556_s18  ;;  %v339_v28 = vld [vmem:[#allocation0] sm:$0xf]  }
  0x25   :  { %v351_v29 = vld [vmem:[#allocation0] sm:$0xf]  }
  0x26   :  { %v363_v30 = vld [vmem:[#allocation0] sm:$0xf]  }
  0x27   :  { %v375_v31 = vld [vmem:[#allocation0] sm:$0xf]  }
  0x28   :  { %v6_v63 = vld [vmem:[#allocation0] sm:$0xf]  }
  0x29   :  { %8 = vst.msk [vmem:[%s1102_s1] sm:$0x1] %vm7_vm0, %v6_v63  }
  0x2a   :  { %160 = vrot.lane.b32.xlu0 %v159_v13, %s557_s19  ;;  %387 = vst.msk [vmem:[%s1102_s1 + $0x1f] sm:$0x2] %vm7_vm0, %v6_v63  }
  0x2b   :  { %172 = vrot.lane.b32.xlu1 %v171_v14, %s558_s20  ;;  %388 = vst.msk [vmem:[%s1102_s1 + $0x3e] sm:$0x4] %vm7_vm0, %v6_v63  }
  0x2c   :  { %184 = vrot.lane.b32.xlu2 %v183_v15, %s559_s21  ;;  %389 = vst.msk [vmem:[%s1102_s1 + $0x5d] sm:$0x8] %vm7_vm0, %v6_v63  }
  0x32   :  { %196 = vrot.lane.b32.xlu0 %v195_v16, %s560_s22 }
  0x33   :  { %208 = vrot.lane.b32.xlu1 %v207_v17, %s561_s23 }
  0x34   :  { %220 = vrot.lane.b32.xlu2 %v219_v18, %s562_s24 }
  0x3a   :  { %232 = vrot.lane.b32.xlu0 %v231_v19, %s563_s25 }
  0x3b   :  { %244 = vrot.lane.b32.xlu1 %v243_v20, %s564_s26 }
  0x3c   :  { %256 = vrot.lane.b32.xlu2 %v255_v21, %s565_s27 }
  0x42   :  { %268 = vrot.lane.b32.xlu0 %v267_v22, %s566_s28 }
  0x43   :  { %280 = vrot.lane.b32.xlu1 %v279_v23, %s567_s29 }
  0x44   :  { %292 = vrot.lane.b32.xlu2 %v291_v24, %s568_s30 }
  0x4a   :  { %304 = vrot.lane.b32.xlu0 %v303_v25, %s569_s2 }
  0x4b   :  { %316 = vrot.lane.b32.xlu1 %v315_v26, %s570_s3 }
  0x4c   :  { %328 = vrot.lane.b32.xlu2 %v327_v27, %s571_s4 }
  0x52   :  { %340 = vrot.lane.b32.xlu0 %v339_v28, %s572_s5 }
  0x53   :  { %352 = vrot.lane.b32.xlu1 %v351_v29, %s573_s6 }
  0x54   :  { %364 = vrot.lane.b32.xlu2 %v363_v30, %s574_s7 }
  0x5a   :  { %376 = vrot.lane.b32.xlu0 %v375_v31, %s575_s0 }
  0x66   :  { %v65_v32 = vpop.permute.xlu2 %64  }
  0x67   :  { %406 = vst.msk [vmem:[%s1102_s1 + $0x5] sm:$0x1] %vm7_vm0, %v65_v32  }
  0x68   :  { %407 = vst.msk [vmem:[%s1102_s1 + $0x24] sm:$0x2] %vm7_vm0, %v65_v32  }
  0x69   :  { %408 = vst.msk [vmem:[%s1102_s1 + $0x43] sm:$0x4] %vm7_vm0, %v65_v32  }
  0x6a   :  { %409 = vst.msk [vmem:[%s1102_s1 + $0x62] sm:$0x8] %vm7_vm0, %v65_v32  }
  0x6e   :  { %v77_v33 = vpop.permute.xlu2 %76  }
  0x6f   :  { %410 = vst.msk [vmem:[%s1102_s1 + $0x6] sm:$0x1] %vm7_vm0, %v77_v33  }
  0x70   :  { %411 = vst.msk [vmem:[%s1102_s1 + $0x25] sm:$0x2] %vm7_vm0, %v77_v33  }
  0x71   :  { %412 = vst.msk [vmem:[%s1102_s1 + $0x44] sm:$0x4] %vm7_vm0, %v77_v33  }
  0x72   :  { %413 = vst.msk [vmem:[%s1102_s1 + $0x63] sm:$0x8] %vm7_vm0, %v77_v33  }
  0x76   :  { %v113_v34 = vpop.permute.xlu2 %112  }
  0x77   :  { %422 = vst.msk [vmem:[%s1102_s1 + $0x9] sm:$0x1] %vm7_vm0, %v113_v34  }
  0x78   :  { %423 = vst.msk [vmem:[%s1102_s1 + $0x28] sm:$0x2] %vm7_vm0, %v113_v34  }
  0x79   :  { %424 = vst.msk [vmem:[%s1102_s1 + $0x47] sm:$0x4] %vm7_vm0, %v113_v34  }
  0x7a   :  { %425 = vst.msk [vmem:[%s1102_s1 + $0x66] sm:$0x8] %vm7_vm0, %v113_v34  }
  0x7c   :  { %v17_v35 = vpop.permute.xlu0 %16  }
  0x7d   :  { %v41_v36 = vpop.permute.xlu1 %40   ;;  %390 = vst.msk [vmem:[%s1102_s1 + $0x1] sm:$0x1] %vm7_vm0, %v17_v35  }
  0x7e   :  { %391 = vst.msk [vmem:[%s1102_s1 + $0x20] sm:$0x2] %vm7_vm0, %v17_v35   ;;  %v149_v37 = vpop.permute.xlu2 %148  }
  0x7f   :  { %392 = vst.msk [vmem:[%s1102_s1 + $0x3f] sm:$0x4] %vm7_vm0, %v17_v35  }
  0x80   :  { %393 = vst.msk [vmem:[%s1102_s1 + $0x5e] sm:$0x8] %vm7_vm0, %v17_v35  }
  0x81   :  { %398 = vst.msk [vmem:[%s1102_s1 + $0x3] sm:$0x1] %vm7_vm0, %v41_v36  }
  0x82   :  { %399 = vst.msk [vmem:[%s1102_s1 + $0x22] sm:$0x2] %vm7_vm0, %v41_v36  }
  0x83   :  { %400 = vst.msk [vmem:[%s1102_s1 + $0x41] sm:$0x4] %vm7_vm0, %v41_v36  }
  0x84   :  { %401 = vst.msk [vmem:[%s1102_s1 + $0x60] sm:$0x8] %vm7_vm0, %v41_v36   ;;  %v29_v38 = vpop.permute.xlu0 %28  }
  0x85   :  { %v53_v39 = vpop.permute.xlu1 %52   ;;  %394 = vst.msk [vmem:[%s1102_s1 + $0x2] sm:$0x1] %vm7_vm0, %v29_v38  }
  0x86   :  { %395 = vst.msk [vmem:[%s1102_s1 + $0x21] sm:$0x2] %vm7_vm0, %v29_v38   ;;  %v185_v40 = vpop.permute.xlu2 %184  }
  0x87   :  { %396 = vst.msk [vmem:[%s1102_s1 + $0x40] sm:$0x4] %vm7_vm0, %v29_v38  }
  0x88   :  { %397 = vst.msk [vmem:[%s1102_s1 + $0x5f] sm:$0x8] %vm7_vm0, %v29_v38  }
  0x89   :  { %402 = vst.msk [vmem:[%s1102_s1 + $0x4] sm:$0x1] %vm7_vm0, %v53_v39  }
  0x8a   :  { %403 = vst.msk [vmem:[%s1102_s1 + $0x23] sm:$0x2] %vm7_vm0, %v53_v39  }
  0x8b   :  { %404 = vst.msk [vmem:[%s1102_s1 + $0x42] sm:$0x4] %vm7_vm0, %v53_v39  }
  0x8c   :  { %405 = vst.msk [vmem:[%s1102_s1 + $0x61] sm:$0x8] %vm7_vm0, %v53_v39   ;;  %v89_v41 = vpop.permute.xlu0 %88  }
  0x8d   :  { %v101_v42 = vpop.permute.xlu1 %100   ;;  %414 = vst.msk [vmem:[%s1102_s1 + $0x7] sm:$0x1] %vm7_vm0, %v89_v41  }
  0x8e   :  { %415 = vst.msk [vmem:[%s1102_s1 + $0x26] sm:$0x2] %vm7_vm0, %v89_v41   ;;  %v221_v43 = vpop.permute.xlu2 %220  }
  0x8f   :  { %416 = vst.msk [vmem:[%s1102_s1 + $0x45] sm:$0x4] %vm7_vm0, %v89_v41  }
  0x90   :  { %417 = vst.msk [vmem:[%s1102_s1 + $0x64] sm:$0x8] %vm7_vm0, %v89_v41  }
  0x91   :  { %418 = vst.msk [vmem:[%s1102_s1 + $0x8] sm:$0x1] %vm7_vm0, %v101_v42  }
  0x92   :  { %419 = vst.msk [vmem:[%s1102_s1 + $0x27] sm:$0x2] %vm7_vm0, %v101_v42  }
  0x93   :  { %420 = vst.msk [vmem:[%s1102_s1 + $0x46] sm:$0x4] %vm7_vm0, %v101_v42  }
  0x94   :  { %421 = vst.msk [vmem:[%s1102_s1 + $0x65] sm:$0x8] %vm7_vm0, %v101_v42   ;;  %v125_v44 = vpop.permute.xlu0 %124  }
  0x95   :  { %v137_v45 = vpop.permute.xlu1 %136   ;;  %426 = vst.msk [vmem:[%s1102_s1 + $0xa] sm:$0x1] %vm7_vm0, %v125_v44  }
  0x96   :  { %427 = vst.msk [vmem:[%s1102_s1 + $0x29] sm:$0x2] %vm7_vm0, %v125_v44   ;;  %v257_v48 = vpop.permute.xlu2 %256  }
  0x97   :  { %428 = vst.msk [vmem:[%s1102_s1 + $0x48] sm:$0x4] %vm7_vm0, %v125_v44  }
  0x98   :  { %429 = vst.msk [vmem:[%s1102_s1 + $0x67] sm:$0x8] %vm7_vm0, %v125_v44  }
  0x99   :  { %434 = vst.msk [vmem:[%s1102_s1 + $0xc] sm:$0x1] %vm7_vm0, %v149_v37  }
  0x9a   :  { %435 = vst.msk [vmem:[%s1102_s1 + $0x2b] sm:$0x2] %vm7_vm0, %v149_v37  }
  0x9b   :  { %436 = vst.msk [vmem:[%s1102_s1 + $0x4a] sm:$0x4] %vm7_vm0, %v149_v37  }
  0x9c   :  { %437 = vst.msk [vmem:[%s1102_s1 + $0x69] sm:$0x8] %vm7_vm0, %v149_v37   ;;  %v161_v46 = vpop.permute.xlu0 %160  }
  0x9d   :  { %v173_v47 = vpop.permute.xlu1 %172   ;;  %430 = vst.msk [vmem:[%s1102_s1 + $0xb] sm:$0x1] %vm7_vm0, %v137_v45  }
  0x9e   :  { %431 = vst.msk [vmem:[%s1102_s1 + $0x2a] sm:$0x2] %vm7_vm0, %v137_v45   ;;  %v293_v51 = vpop.permute.xlu2 %292  }
  0x9f   :  { %432 = vst.msk [vmem:[%s1102_s1 + $0x49] sm:$0x4] %vm7_vm0, %v137_v45  }
  0xa0   :  { %433 = vst.msk [vmem:[%s1102_s1 + $0x68] sm:$0x8] %vm7_vm0, %v137_v45  }
  0xa1   :  { %438 = vst.msk [vmem:[%s1102_s1 + $0xd] sm:$0x1] %vm7_vm0, %v161_v46  }
  0xa2   :  { %439 = vst.msk [vmem:[%s1102_s1 + $0x2c] sm:$0x2] %vm7_vm0, %v161_v46  }
  0xa3   :  { %440 = vst.msk [vmem:[%s1102_s1 + $0x4b] sm:$0x4] %vm7_vm0, %v161_v46  }
  0xa4   :  { %441 = vst.msk [vmem:[%s1102_s1 + $0x6a] sm:$0x8] %vm7_vm0, %v161_v46   ;;  %v197_v49 = vpop.permute.xlu0 %196  }
  0xa5   :  { %v209_v50 = vpop.permute.xlu1 %208   ;;  %446 = vst.msk [vmem:[%s1102_s1 + $0xf] sm:$0x1] %vm7_vm0, %v185_v40  }
  0xa6   :  { %447 = vst.msk [vmem:[%s1102_s1 + $0x2e] sm:$0x2] %vm7_vm0, %v185_v40   ;;  %v329_v56 = vpop.permute.xlu2 %328  }
  0xa7   :  { %448 = vst.msk [vmem:[%s1102_s1 + $0x4d] sm:$0x4] %vm7_vm0, %v185_v40  }
  0xa8   :  { %449 = vst.msk [vmem:[%s1102_s1 + $0x6c] sm:$0x8] %vm7_vm0, %v185_v40  }
  0xa9   :  { %442 = vst.msk [vmem:[%s1102_s1 + $0xe] sm:$0x1] %vm7_vm0, %v173_v47  }
  0xaa   :  { %443 = vst.msk [vmem:[%s1102_s1 + $0x2d] sm:$0x2] %vm7_vm0, %v173_v47  }
  0xab   :  { %444 = vst.msk [vmem:[%s1102_s1 + $0x4c] sm:$0x4] %vm7_vm0, %v173_v47  }
  0xac   :  { %445 = vst.msk [vmem:[%s1102_s1 + $0x6b] sm:$0x8] %vm7_vm0, %v173_v47   ;;  %v233_v52 = vpop.permute.xlu0 %232  }
  0xad   :  { %v245_v53 = vpop.permute.xlu1 %244   ;;  %450 = vst.msk [vmem:[%s1102_s1 + $0x10] sm:$0x1] %vm7_vm0, %v197_v49  }
  0xae   :  { %451 = vst.msk [vmem:[%s1102_s1 + $0x2f] sm:$0x2] %vm7_vm0, %v197_v49   ;;  %v365_v59 = vpop.permute.xlu2 %364  }
  0xaf   :  { %452 = vst.msk [vmem:[%s1102_s1 + $0x4e] sm:$0x4] %vm7_vm0, %v197_v49  }
  0xb0   :  { %453 = vst.msk [vmem:[%s1102_s1 + $0x6d] sm:$0x8] %vm7_vm0, %v197_v49  }
  0xb1   :  { %458 = vst.msk [vmem:[%s1102_s1 + $0x12] sm:$0x1] %vm7_vm0, %v221_v43  }
  0xb2   :  { %459 = vst.msk [vmem:[%s1102_s1 + $0x31] sm:$0x2] %vm7_vm0, %v221_v43  }
  0xb3   :  { %460 = vst.msk [vmem:[%s1102_s1 + $0x50] sm:$0x4] %vm7_vm0, %v221_v43  }
  0xb4   :  { %461 = vst.msk [vmem:[%s1102_s1 + $0x6f] sm:$0x8] %vm7_vm0, %v221_v43   ;;  %v269_v54 = vpop.permute.xlu0 %268  }
  0xb5   :  { %v281_v55 = vpop.permute.xlu1 %280   ;;  %454 = vst.msk [vmem:[%s1102_s1 + $0x11] sm:$0x1] %vm7_vm0, %v209_v50  }
  0xb6   :  { %455 = vst.msk [vmem:[%s1102_s1 + $0x30] sm:$0x2] %vm7_vm0, %v209_v50  }
  0xb7   :  { %456 = vst.msk [vmem:[%s1102_s1 + $0x4f] sm:$0x4] %vm7_vm0, %v209_v50  }
  0xb8   :  { %457 = vst.msk [vmem:[%s1102_s1 + $0x6e] sm:$0x8] %vm7_vm0, %v209_v50  }
  0xb9   :  { %462 = vst.msk [vmem:[%s1102_s1 + $0x13] sm:$0x1] %vm7_vm0, %v233_v52  }
  0xba   :  { %463 = vst.msk [vmem:[%s1102_s1 + $0x32] sm:$0x2] %vm7_vm0, %v233_v52  }
  0xbb   :  { %464 = vst.msk [vmem:[%s1102_s1 + $0x51] sm:$0x4] %vm7_vm0, %v233_v52  }
  0xbc   :  { %465 = vst.msk [vmem:[%s1102_s1 + $0x70] sm:$0x8] %vm7_vm0, %v233_v52   ;;  %v305_v57 = vpop.permute.xlu0 %304  }
  0xbd   :  { %v317_v58 = vpop.permute.xlu1 %316   ;;  %470 = vst.msk [vmem:[%s1102_s1 + $0x15] sm:$0x1] %vm7_vm0, %v257_v48  }
  0xbe   :  { %471 = vst.msk [vmem:[%s1102_s1 + $0x34] sm:$0x2] %vm7_vm0, %v257_v48  }
  0xbf   :  { %472 = vst.msk [vmem:[%s1102_s1 + $0x53] sm:$0x4] %vm7_vm0, %v257_v48  }
  0xc0   :  { %473 = vst.msk [vmem:[%s1102_s1 + $0x72] sm:$0x8] %vm7_vm0, %v257_v48  }
  0xc1   :  { %466 = vst.msk [vmem:[%s1102_s1 + $0x14] sm:$0x1] %vm7_vm0, %v245_v53  }
  0xc2   :  { %467 = vst.msk [vmem:[%s1102_s1 + $0x33] sm:$0x2] %vm7_vm0, %v245_v53  }
  0xc3   :  { %468 = vst.msk [vmem:[%s1102_s1 + $0x52] sm:$0x4] %vm7_vm0, %v245_v53  }
  0xc4   :  { %469 = vst.msk [vmem:[%s1102_s1 + $0x71] sm:$0x8] %vm7_vm0, %v245_v53   ;;  %v341_v60 = vpop.permute.xlu0 %340  }
  0xc5   :  { %v353_v61 = vpop.permute.xlu1 %352   ;;  %474 = vst.msk [vmem:[%s1102_s1 + $0x16] sm:$0x1] %vm7_vm0, %v269_v54  }
  0xc6   :  { %475 = vst.msk [vmem:[%s1102_s1 + $0x35] sm:$0x2] %vm7_vm0, %v269_v54  }
  0xc7   :  { %476 = vst.msk [vmem:[%s1102_s1 + $0x54] sm:$0x4] %vm7_vm0, %v269_v54  }
  0xc8   :  { %477 = vst.msk [vmem:[%s1102_s1 + $0x73] sm:$0x8] %vm7_vm0, %v269_v54  }
  0xc9   :  { %482 = vst.msk [vmem:[%s1102_s1 + $0x18] sm:$0x1] %vm7_vm0, %v293_v51  }
  0xca   :  { %483 = vst.msk [vmem:[%s1102_s1 + $0x37] sm:$0x2] %vm7_vm0, %v293_v51  }
  0xcb   :  { %484 = vst.msk [vmem:[%s1102_s1 + $0x56] sm:$0x4] %vm7_vm0, %v293_v51  }
  0xcc   :  { %485 = vst.msk [vmem:[%s1102_s1 + $0x75] sm:$0x8] %vm7_vm0, %v293_v51   ;;  %v377_v62 = vpop.permute.xlu0 %376  }
  0xcd   :  { %478 = vst.msk [vmem:[%s1102_s1 + $0x17] sm:$0x1] %vm7_vm0, %v281_v55  }
  0xce   :  { %479 = vst.msk [vmem:[%s1102_s1 + $0x36] sm:$0x2] %vm7_vm0, %v281_v55  }
  0xcf   :  { %480 = vst.msk [vmem:[%s1102_s1 + $0x55] sm:$0x4] %vm7_vm0, %v281_v55  }
  0xd0   :  { %481 = vst.msk [vmem:[%s1102_s1 + $0x74] sm:$0x8] %vm7_vm0, %v281_v55  }
  0xd1   :  { %486 = vst.msk [vmem:[%s1102_s1 + $0x19] sm:$0x1] %vm7_vm0, %v305_v57  }
  0xd2   :  { %487 = vst.msk [vmem:[%s1102_s1 + $0x38] sm:$0x2] %vm7_vm0, %v305_v57  }
  0xd3   :  { %488 = vst.msk [vmem:[%s1102_s1 + $0x57] sm:$0x4] %vm7_vm0, %v305_v57  }
  0xd4   :  { %489 = vst.msk [vmem:[%s1102_s1 + $0x76] sm:$0x8] %vm7_vm0, %v305_v57  }
  0xd5   :  { %494 = vst.msk [vmem:[%s1102_s1 + $0x1b] sm:$0x1] %vm7_vm0, %v329_v56  }
  0xd6   :  { %495 = vst.msk [vmem:[%s1102_s1 + $0x3a] sm:$0x2] %vm7_vm0, %v329_v56  }
  0xd7   :  { %496 = vst.msk [vmem:[%s1102_s1 + $0x59] sm:$0x4] %vm7_vm0, %v329_v56  }
  0xd8   :  { %497 = vst.msk [vmem:[%s1102_s1 + $0x78] sm:$0x8] %vm7_vm0, %v329_v56  }
  0xd9   :  { %490 = vst.msk [vmem:[%s1102_s1 + $0x1a] sm:$0x1] %vm7_vm0, %v317_v58  }
  0xda   :  { %491 = vst.msk [vmem:[%s1102_s1 + $0x39] sm:$0x2] %vm7_vm0, %v317_v58  }
  0xdb   :  { %492 = vst.msk [vmem:[%s1102_s1 + $0x58] sm:$0x4] %vm7_vm0, %v317_v58  }
  0xdc   :  { %493 = vst.msk [vmem:[%s1102_s1 + $0x77] sm:$0x8] %vm7_vm0, %v317_v58  }
  0xdd   :  { %498 = vst.msk [vmem:[%s1102_s1 + $0x1c] sm:$0x1] %vm7_vm0, %v341_v60  }
  0xde   :  { %499 = vst.msk [vmem:[%s1102_s1 + $0x3b] sm:$0x2] %vm7_vm0, %v341_v60  }
  0xdf   :  { %500 = vst.msk [vmem:[%s1102_s1 + $0x5a] sm:$0x4] %vm7_vm0, %v341_v60  }
  0xe0   :  { %501 = vst.msk [vmem:[%s1102_s1 + $0x79] sm:$0x8] %vm7_vm0, %v341_v60  }
  0xe1   :  { %506 = vst.msk [vmem:[%s1102_s1 + $0x1e] sm:$0x1] %vm7_vm0, %v365_v59  }
  0xe2   :  { %507 = vst.msk [vmem:[%s1102_s1 + $0x3d] sm:$0x2] %vm7_vm0, %v365_v59  }
  0xe3   :  { %508 = vst.msk [vmem:[%s1102_s1 + $0x5c] sm:$0x4] %vm7_vm0, %v365_v59  }
  0xe4   :  { %509 = vst.msk [vmem:[%s1102_s1 + $0x7b] sm:$0x8] %vm7_vm0, %v365_v59  }
  0xe5   :  { %502 = vst.msk [vmem:[%s1102_s1 + $0x1d] sm:$0x1] %vm7_vm0, %v353_v61  }
  0xe6   :  { %503 = vst.msk [vmem:[%s1102_s1 + $0x3c] sm:$0x2] %vm7_vm0, %v353_v61  }
  0xe7   :  { %504 = vst.msk [vmem:[%s1102_s1 + $0x5b] sm:$0x4] %vm7_vm0, %v353_v61  }
  0xe8   :  { %505 = vst.msk [vmem:[%s1102_s1 + $0x7a] sm:$0x8] %vm7_vm0, %v353_v61  }
  0xe9   :  { %510 = vst.msk [vmem:[%s1102_s1 + $0x1f] sm:$0x1] %vm7_vm0, %v377_v62  }
  0xea   :  { %511 = vst.msk [vmem:[%s1102_s1 + $0x3e] sm:$0x2] %vm7_vm0, %v377_v62  }
  0xeb   :  { %512 = vst.msk [vmem:[%s1102_s1 + $0x5d] sm:$0x4] %vm7_vm0, %v377_v62  }
  0xec   :  { %513 = vst.msk [vmem:[%s1102_s1 + $0x7c] sm:$0x8] %vm7_vm0, %v377_v62  }

// kernel: cnn_forward.3
= control target key start
LH: loop header
LB: loop body
LE: loop exit
PB: predicated region body
PF: predicated region fallthrough
CT: control target
= control target key end

     0   :  { %vm227_vm0 = vcmask 261120   ;;  %s1151_s1 = inlined_call_operand.vmem [shape: f32[1568,128], index: 1, kind: input, shape index: {}]   ;;  %s1152_s0 = inlined_call_operand.vmem [shape: f32[8,1568], index: 0, kind: input, shape index: {}]   ;;  %s1153_s2 = inlined_call_operand.vmem [shape: f32[1,128], index: 2, kind: input, shape index: {}]   ;;  %s1154_s3 = inlined_call_operand.vmem [shape: f32[8,128], index: 3, kind: output, shape index: {}]  }
   0x1   :  { %v42_v0 = vld [vmem:[%s1151_s1 + $0x78] sm:$0xff]  ;;  %v41_v2 = vld [vmem:[%s1151_s1 + $0x70] sm:$0xff]  ;;  %v40_v6 = vld [vmem:[%s1151_s1 + $0x68] sm:$0xff] }
   0x2   :  { %v74_v1 = vld [vmem:[%s1151_s1 + $0x178] sm:$0xff]  ;;  %231 = vmatpush.msra.mxu0 %v42_v0  ;;  %v73_v4 = vld [vmem:[%s1151_s1 + $0x170] sm:$0xff]  ;;  %v72_v8 = vld [vmem:[%s1151_s1 + $0x168] sm:$0xff] }
   0x3   :  { %271 = vmatpush.msra.mxu2 %v74_v1  ;;  %v58_v3 = vld [vmem:[%s1151_s1 + $0xf8] sm:$0xff]  ;;  %v57_v7 = vld [vmem:[%s1151_s1 + $0xf0] sm:$0xff]  ;;  %v56_v10 = vld [vmem:[%s1151_s1 + $0xe8] sm:$0xff] }
   0x4   :  { %v90_v5 = vld [vmem:[%s1151_s1 + $0x1f8] sm:$0xff]  ;;  %251 = vmatpush.msra.mxu1 %v58_v3  ;;  %232 = vmatpush.msra.mxu0 %v41_v2  ;;  %v89_v9 = vld [vmem:[%s1151_s1 + $0x1f0] sm:$0xff]  ;;  %v39_v11 = vld [vmem:[%s1151_s1 + $0x60] sm:$0xff] }
   0x5   :  { %291 = vmatpush.msra.mxu3 %v90_v5  ;;  %272 = vmatpush.msra.mxu2 %v73_v4  ;;  %v71_v12 = vld [vmem:[%s1151_s1 + $0x160] sm:$0xff]  ;;  %v88_v13 = vld [vmem:[%s1151_s1 + $0x1e8] sm:$0xff]  ;;  %v38_v16 = vld [vmem:[%s1151_s1 + $0x58] sm:$0xff] }
   0x6   :  { %252 = vmatpush.msra.mxu1 %v57_v7  ;;  %233 = vmatpush.msra.mxu0 %v40_v6  ;;  %v55_v14 = vld [vmem:[%s1151_s1 + $0xe0] sm:$0xff]  ;;  %v70_v17 = vld [vmem:[%s1151_s1 + $0x158] sm:$0xff]  ;;  %v37_v20 = vld [vmem:[%s1151_s1 + $0x50] sm:$0xff] }
   0x7   :  { %292 = vmatpush.msra.mxu3 %v89_v9  ;;  %273 = vmatpush.msra.mxu2 %v72_v8  ;;  %v87_v15 = vld [vmem:[%s1151_s1 + $0x1e0] sm:$0xff]  ;;  %v54_v18 = vld [vmem:[%s1151_s1 + $0xd8] sm:$0xff]  ;;  %v69_v21 = vld [vmem:[%s1151_s1 + $0x150] sm:$0xff] }
   0x8   :  { %253 = vmatpush.msra.mxu1 %v56_v10  ;;  %234 = vmatpush.msra.mxu0 %v39_v11  ;;  %v86_v19 = vld [vmem:[%s1151_s1 + $0x1d8] sm:$0xff]  ;;  %v53_v22 = vld [vmem:[%s1151_s1 + $0xd0] sm:$0xff]  ;;  %v36_v24 = vld [vmem:[%s1151_s1 + $0x48] sm:$0xff] }
   0x9   :  { %293 = vmatpush.msra.mxu3 %v88_v13  ;;  %274 = vmatpush.msra.mxu2 %v71_v12  ;;  %v85_v23 = vld [vmem:[%s1151_s1 + $0x1d0] sm:$0xff]  ;;  %v68_v25 = vld [vmem:[%s1151_s1 + $0x148] sm:$0xff]  ;;  %v35_v28 = vld [vmem:[%s1151_s1 + $0x40] sm:$0xff] }
   0xa   :  { %254 = vmatpush.msra.mxu1 %v55_v14  ;;  %235 = vmatpush.msra.mxu0 %v38_v16  ;;  %v52_v26 = vld [vmem:[%s1151_s1 + $0xc8] sm:$0xff]  ;;  %v67_v29 = vld [vmem:[%s1151_s1 + $0x140] sm:$0xff]  ;;  %v34_v32 = vld [vmem:[%s1151_s1 + $0x38] sm:$0xff] }
   0xb   :  { %294 = vmatpush.msra.mxu3 %v87_v15  ;;  %275 = vmatpush.msra.mxu2 %v70_v17  ;;  %v84_v27 = vld [vmem:[%s1151_s1 + $0x1c8] sm:$0xff]  ;;  %v51_v30 = vld [vmem:[%s1151_s1 + $0xc0] sm:$0xff]  ;;  %v66_v33 = vld [vmem:[%s1151_s1 + $0x138] sm:$0xff] }
   0xc   :  { %255 = vmatpush.msra.mxu1 %v54_v18  ;;  %236 = vmatpush.msra.mxu0 %v37_v20  ;;  %v83_v31 = vld [vmem:[%s1151_s1 + $0x1c0] sm:$0xff]  ;;  %v50_v34 = vld [vmem:[%s1151_s1 + $0xb8] sm:$0xff]  ;;  %v33_v36 = vld [vmem:[%s1151_s1 + $0x30] sm:$0xff] }
   0xd   :  { %295 = vmatpush.msra.mxu3 %v86_v19  ;;  %276 = vmatpush.msra.mxu2 %v69_v21  ;;  %v82_v35 = vld [vmem:[%s1151_s1 + $0x1b8] sm:$0xff]  ;;  %v65_v37 = vld [vmem:[%s1151_s1 + $0x130] sm:$0xff]  ;;  %v32_v40 = vld [vmem:[%s1151_s1 + $0x28] sm:$0xff] }
   0xe   :  { %256 = vmatpush.msra.mxu1 %v53_v22  ;;  %237 = vmatpush.msra.mxu0 %v36_v24  ;;  %v49_v38 = vld [vmem:[%s1151_s1 + $0xb0] sm:$0xff]  ;;  %v64_v41 = vld [vmem:[%s1151_s1 + $0x128] sm:$0xff]  ;;  %v31_v44 = vld [vmem:[%s1151_s1 + $0x20] sm:$0xff] }
   0xf   :  { %296 = vmatpush.msra.mxu3 %v85_v23  ;;  %277 = vmatpush.msra.mxu2 %v68_v25  ;;  %v81_v39 = vld [vmem:[%s1151_s1 + $0x1b0] sm:$0xff]  ;;  %v48_v42 = vld [vmem:[%s1151_s1 + $0xa8] sm:$0xff]  ;;  %v63_v45 = vld [vmem:[%s1151_s1 + $0x120] sm:$0xff] }
  0x10   :  { %257 = vmatpush.msra.mxu1 %v52_v26  ;;  %238 = vmatpush.msra.mxu0 %v35_v28  ;;  %v80_v43 = vld [vmem:[%s1151_s1 + $0x1a8] sm:$0xff]  ;;  %v47_v46 = vld [vmem:[%s1151_s1 + $0xa0] sm:$0xff]  ;;  %v30_v48 = vld [vmem:[%s1151_s1 + $0x18] sm:$0xff] }
  0x11   :  { %297 = vmatpush.msra.mxu3 %v84_v27  ;;  %278 = vmatpush.msra.mxu2 %v67_v29  ;;  %v79_v47 = vld [vmem:[%s1151_s1 + $0x1a0] sm:$0xff]  ;;  %v62_v49 = vld [vmem:[%s1151_s1 + $0x118] sm:$0xff]  ;;  %v29_v52 = vld [vmem:[%s1151_s1 + $0x10] sm:$0xff] }
  0x12   :  { %258 = vmatpush.msra.mxu1 %v51_v30  ;;  %239 = vmatpush.msra.mxu0 %v34_v32  ;;  %v46_v50 = vld [vmem:[%s1151_s1 + $0x98] sm:$0xff]  ;;  %v61_v53 = vld [vmem:[%s1151_s1 + $0x110] sm:$0xff]  ;;  %v28_v56 = vld [vmem:[%s1151_s1 + $0x8] sm:$0xff] }
  0x13   :  { %298 = vmatpush.msra.mxu3 %v83_v31  ;;  %279 = vmatpush.msra.mxu2 %v66_v33  ;;  %v78_v51 = vld [vmem:[%s1151_s1 + $0x198] sm:$0xff]  ;;  %v45_v54 = vld [vmem:[%s1151_s1 + $0x90] sm:$0xff]  ;;  %v60_v57 = vld [vmem:[%s1151_s1 + $0x108] sm:$0xff] }
  0x14   :  { %259 = vmatpush.msra.mxu1 %v50_v34  ;;  %240 = vmatpush.msra.mxu0 %v33_v36  ;;  %v77_v55 = vld [vmem:[%s1151_s1 + $0x190] sm:$0xff]  ;;  %v44_v58 = vld [vmem:[%s1151_s1 + $0x88] sm:$0xff]  ;;  %v27_v60 = vld [vmem:[%s1151_s1] sm:$0xff] }
  0x15   :  { %299 = vmatpush.msra.mxu3 %v82_v35  ;;  %280 = vmatpush.msra.mxu2 %v65_v37  ;;  %v76_v59 = vld [vmem:[%s1151_s1 + $0x188] sm:$0xff]  ;;  %v59_v61 = vld [vmem:[%s1151_s1 + $0x100] sm:$0xff]  ;;  %v106_v62 = vld [vmem:[%s1151_s1 + $0x278] sm:$0xff] }
  0x16   :  { %260 = vmatpush.msra.mxu1 %v49_v38  ;;  %241 = vmatpush.msra.mxu0 %v32_v40  ;;  %v138_v63 = vld [vmem:[%s1151_s1 + $0x378] sm:$0xff]  ;;  %v43_v0 = vld [vmem:[%s1151_s1 + $0x80] sm:$0xff]  ;;  %v105_v2 = vld [vmem:[%s1151_s1 + $0x270] sm:$0xff] }
  0x17   :  { %300 = vmatpush.msra.mxu3 %v81_v39  ;;  %281 = vmatpush.msra.mxu2 %v64_v41  ;;  %v75_v1 = vld [vmem:[%s1151_s1 + $0x180] sm:$0xff]  ;;  %v122_v3 = vld [vmem:[%s1151_s1 + $0x2f8] sm:$0xff]  ;;  %v137_v4 = vld [vmem:[%s1151_s1 + $0x370] sm:$0xff] }
  0x18   :  { %261 = vmatpush.msra.mxu1 %v48_v42  ;;  %242 = vmatpush.msra.mxu0 %v31_v44  ;;  %v154_v5 = vld [vmem:[%s1151_s1 + $0x3f8] sm:$0xff]  ;;  %v104_v6 = vld [vmem:[%s1151_s1 + $0x268] sm:$0xff]  ;;  %v121_v7 = vld [vmem:[%s1151_s1 + $0x2f0] sm:$0xff] }
  0x19   :  { %301 = vmatpush.msra.mxu3 %v80_v43  ;;  %282 = vmatpush.msra.mxu2 %v63_v45  ;;  %v136_v8 = vld [vmem:[%s1151_s1 + $0x368] sm:$0xff]  ;;  %v153_v9 = vld [vmem:[%s1151_s1 + $0x3f0] sm:$0xff]  ;;  %v103_v10 = vld [vmem:[%s1151_s1 + $0x260] sm:$0xff] }
  0x1a   :  { %262 = vmatpush.msra.mxu1 %v47_v46  ;;  %243 = vmatpush.msra.mxu0 %v30_v48  ;;  %v120_v11 = vld [vmem:[%s1151_s1 + $0x2e8] sm:$0xff]  ;;  %v135_v12 = vld [vmem:[%s1151_s1 + $0x360] sm:$0xff]  ;;  %v102_v14 = vld [vmem:[%s1151_s1 + $0x258] sm:$0xff] }
  0x1b   :  { %302 = vmatpush.msra.mxu3 %v79_v47  ;;  %283 = vmatpush.msra.mxu2 %v62_v49  ;;  %v152_v13 = vld [vmem:[%s1151_s1 + $0x3e8] sm:$0xff]  ;;  %v119_v15 = vld [vmem:[%s1151_s1 + $0x2e0] sm:$0xff]  ;;  %v134_v16 = vld [vmem:[%s1151_s1 + $0x358] sm:$0xff] }
  0x1c   :  { %263 = vmatpush.msra.mxu1 %v46_v50  ;;  %244 = vmatpush.msra.mxu0 %v29_v52  ;;  %v151_v17 = vld [vmem:[%s1151_s1 + $0x3e0] sm:$0xff]  ;;  %v101_v18 = vld [vmem:[%s1151_s1 + $0x250] sm:$0xff]  ;;  %v118_v19 = vld [vmem:[%s1151_s1 + $0x2d8] sm:$0xff] }
  0x1d   :  { %303 = vmatpush.msra.mxu3 %v78_v51  ;;  %284 = vmatpush.msra.mxu2 %v61_v53  ;;  %v133_v20 = vld [vmem:[%s1151_s1 + $0x350] sm:$0xff]  ;;  %v150_v21 = vld [vmem:[%s1151_s1 + $0x3d8] sm:$0xff]  ;;  %v100_v22 = vld [vmem:[%s1151_s1 + $0x248] sm:$0xff] }
  0x1e   :  { %264 = vmatpush.msra.mxu1 %v45_v54  ;;  %245 = vmatpush.msra.mxu0 %v28_v56  ;;  %v117_v23 = vld [vmem:[%s1151_s1 + $0x2d0] sm:$0xff]  ;;  %v132_v24 = vld [vmem:[%s1151_s1 + $0x348] sm:$0xff]  ;;  %v99_v26 = vld [vmem:[%s1151_s1 + $0x240] sm:$0xff] }
  0x1f   :  { %304 = vmatpush.msra.mxu3 %v77_v55  ;;  %285 = vmatpush.msra.mxu2 %v60_v57  ;;  %v149_v25 = vld [vmem:[%s1151_s1 + $0x3d0] sm:$0xff]  ;;  %v116_v27 = vld [vmem:[%s1151_s1 + $0x2c8] sm:$0xff]  ;;  %v131_v28 = vld [vmem:[%s1151_s1 + $0x340] sm:$0xff] }
  0x20   :  { %265 = vmatpush.msra.mxu1 %v44_v58  ;;  %246 = vmatpush.msra.mxu0 %v27_v60  ;;  %v148_v29 = vld [vmem:[%s1151_s1 + $0x3c8] sm:$0xff]  ;;  %v98_v30 = vld [vmem:[%s1151_s1 + $0x238] sm:$0xff]  ;;  %v115_v31 = vld [vmem:[%s1151_s1 + $0x2c0] sm:$0xff] }
  0x21   :  { %305 = vmatpush.msra.mxu3 %v76_v59  ;;  %286 = vmatpush.msra.mxu2 %v59_v61  ;;  %v130_v32 = vld [vmem:[%s1151_s1 + $0x338] sm:$0xff]  ;;  %v147_v33 = vld [vmem:[%s1151_s1 + $0x3c0] sm:$0xff]  ;;  %v97_v34 = vld [vmem:[%s1151_s1 + $0x230] sm:$0xff] }
  0x22   :  { %311 = vmatpush.msrb.mxu0 %v106_v62  ;;  %266 = vmatpush.msra.mxu1 %v43_v0  ;;  %v114_v35 = vld [vmem:[%s1151_s1 + $0x2b8] sm:$0xff]  ;;  %v129_v36 = vld [vmem:[%s1151_s1 + $0x330] sm:$0xff]  ;;  %v96_v38 = vld [vmem:[%s1151_s1 + $0x228] sm:$0xff] }
  0x23   :  { %351 = vmatpush.msrb.mxu2 %v138_v63  ;;  %306 = vmatpush.msra.mxu3 %v75_v1  ;;  %v146_v37 = vld [vmem:[%s1151_s1 + $0x3b8] sm:$0xff]  ;;  %v113_v39 = vld [vmem:[%s1151_s1 + $0x2b0] sm:$0xff]  ;;  %v128_v40 = vld [vmem:[%s1151_s1 + $0x328] sm:$0xff] }
  0x24   :  { %312 = vmatpush.msrb.mxu0 %v105_v2  ;;  %331 = vmatpush.msrb.mxu1 %v122_v3  ;;  %v145_v41 = vld [vmem:[%s1151_s1 + $0x3b0] sm:$0xff]  ;;  %v95_v42 = vld [vmem:[%s1151_s1 + $0x220] sm:$0xff]  ;;  %v112_v43 = vld [vmem:[%s1151_s1 + $0x2a8] sm:$0xff] }
  0x25   :  { %352 = vmatpush.msrb.mxu2 %v137_v4  ;;  %371 = vmatpush.msrb.mxu3 %v154_v5  ;;  %v127_v44 = vld [vmem:[%s1151_s1 + $0x320] sm:$0xff]  ;;  %v144_v45 = vld [vmem:[%s1151_s1 + $0x3a8] sm:$0xff]  ;;  %v94_v46 = vld [vmem:[%s1151_s1 + $0x218] sm:$0xff] }
  0x26   :  { %313 = vmatpush.msrb.mxu0 %v104_v6  ;;  %332 = vmatpush.msrb.mxu1 %v121_v7  ;;  %v111_v47 = vld [vmem:[%s1151_s1 + $0x2a0] sm:$0xff]  ;;  %v126_v48 = vld [vmem:[%s1151_s1 + $0x318] sm:$0xff]  ;;  %v93_v50 = vld [vmem:[%s1151_s1 + $0x210] sm:$0xff] }
  0x27   :  { %353 = vmatpush.msrb.mxu2 %v136_v8  ;;  %372 = vmatpush.msrb.mxu3 %v153_v9  ;;  %v143_v49 = vld [vmem:[%s1151_s1 + $0x3a0] sm:$0xff]  ;;  %v110_v51 = vld [vmem:[%s1151_s1 + $0x298] sm:$0xff]  ;;  %v125_v52 = vld [vmem:[%s1151_s1 + $0x310] sm:$0xff] }
  0x28   :  { %314 = vmatpush.msrb.mxu0 %v103_v10  ;;  %333 = vmatpush.msrb.mxu1 %v120_v11  ;;  %v142_v53 = vld [vmem:[%s1151_s1 + $0x398] sm:$0xff]  ;;  %v92_v54 = vld [vmem:[%s1151_s1 + $0x208] sm:$0xff]  ;;  %v109_v55 = vld [vmem:[%s1151_s1 + $0x290] sm:$0xff] }
  0x29   :  { %354 = vmatpush.msrb.mxu2 %v135_v12  ;;  %373 = vmatpush.msrb.mxu3 %v152_v13  ;;  %v124_v56 = vld [vmem:[%s1151_s1 + $0x308] sm:$0xff]  ;;  %v141_v57 = vld [vmem:[%s1151_s1 + $0x390] sm:$0xff]  ;;  %v91_v58 = vld [vmem:[%s1151_s1 + $0x200] sm:$0xff] }
  0x2a   :  { %315 = vmatpush.msrb.mxu0 %v102_v14  ;;  %334 = vmatpush.msrb.mxu1 %v119_v15  ;;  %v108_v59 = vld [vmem:[%s1151_s1 + $0x288] sm:$0xff]  ;;  %v123_v60 = vld [vmem:[%s1151_s1 + $0x300] sm:$0xff]  ;;  %v16_v63 = vld [vmem:[%s1152_s0 + $0x10] sm:$0xff] }
  0x2b   :  { %355 = vmatpush.msrb.mxu2 %v134_v16  ;;  %374 = vmatpush.msrb.mxu3 %v151_v17  ;;  %v140_v61 = vld [vmem:[%s1151_s1 + $0x388] sm:$0xff]  ;;  %v14_v62 = vld [vmem:[%s1152_s0] sm:$0xff]  ;;  %v170_v0 = vld [vmem:[%s1151_s1 + $0x478] sm:$0xff] }
  0x2c   :  { %316 = vmatpush.msrb.mxu0 %v101_v18  ;;  %335 = vmatpush.msrb.mxu1 %v118_v19  ;;  %v202_v1 = vld [vmem:[%s1151_s1 + $0x578] sm:$0xff]  ;;  %v107_v2 = vld [vmem:[%s1151_s1 + $0x280] sm:$0xff]  ;;  %v15_v4 = vld [vmem:[%s1152_s0 + $0x8] sm:$0xff] }
  0x2d   :  { %356 = vmatpush.msrb.mxu2 %v133_v20  ;;  %375 = vmatpush.msrb.mxu3 %v150_v21  ;;  %v139_v3 = vld [vmem:[%s1151_s1 + $0x380] sm:$0xff]  ;;  %v17_v5 = vld [vmem:[%s1152_s0 + $0x18] sm:$0xff]  ;;  %v169_v6 = vld [vmem:[%s1151_s1 + $0x470] sm:$0xff] }
  0x2e   :  { %317 = vmatpush.msrb.mxu0 %v100_v22  ;;  %336 = vmatpush.msrb.mxu1 %v117_v23  ;;  %v186_v7 = vld [vmem:[%s1151_s1 + $0x4f8] sm:$0xff]  ;;  %v201_v8 = vld [vmem:[%s1151_s1 + $0x570] sm:$0xff]  ;;  %v168_v10 = vld [vmem:[%s1151_s1 + $0x468] sm:$0xff] }
  0x2f   :  { %357 = vmatpush.msrb.mxu2 %v132_v24  ;;  %376 = vmatpush.msrb.mxu3 %v149_v25  ;;  %v218_v9 = vld [vmem:[%s1151_s1 + $0x5f8] sm:$0xff]  ;;  %v185_v11 = vld [vmem:[%s1151_s1 + $0x4f0] sm:$0xff]  ;;  %v200_v12 = vld [vmem:[%s1151_s1 + $0x568] sm:$0xff] }
  0x30   :  { %318 = vmatpush.msrb.mxu0 %v99_v26  ;;  %337 = vmatpush.msrb.mxu1 %v116_v27  ;;  %v217_v13 = vld [vmem:[%s1151_s1 + $0x5f0] sm:$0xff]  ;;  %v167_v14 = vld [vmem:[%s1151_s1 + $0x460] sm:$0xff]  ;;  %v184_v15 = vld [vmem:[%s1151_s1 + $0x4e8] sm:$0xff] }
  0x31   :  { %358 = vmatpush.msrb.mxu2 %v131_v28  ;;  %377 = vmatpush.msrb.mxu3 %v148_v29  ;;  %v199_v16 = vld [vmem:[%s1151_s1 + $0x560] sm:$0xff]  ;;  %v216_v17 = vld [vmem:[%s1151_s1 + $0x5e8] sm:$0xff]  ;;  %v20_v18 = vld [vmem:[%s1152_s0 + $0x30] sm:$0xff] }
  0x32   :  { %319 = vmatpush.msrb.mxu0 %v98_v30  ;;  %338 = vmatpush.msrb.mxu1 %v115_v31  ;;  %v166_v19 = vld [vmem:[%s1151_s1 + $0x458] sm:$0xff]  ;;  %v183_v20 = vld [vmem:[%s1151_s1 + $0x4e0] sm:$0xff]  ;;  %v165_v25 = vld [vmem:[%s1151_s1 + $0x450] sm:$0xff] }
  0x33   :  { %359 = vmatpush.msrb.mxu2 %v130_v32  ;;  %378 = vmatpush.msrb.mxu3 %v147_v33  ;;  %v198_v21 = vld [vmem:[%s1151_s1 + $0x558] sm:$0xff]  ;;  %v215_v22 = vld [vmem:[%s1151_s1 + $0x5e0] sm:$0xff]  ;;  %v197_v27 = vld [vmem:[%s1151_s1 + $0x550] sm:$0xff] }
  0x34   :  { %320 = vmatpush.msrb.mxu0 %v97_v34  ;;  %339 = vmatpush.msrb.mxu1 %v114_v35  ;;  %v18_v23 = vld [vmem:[%s1152_s0 + $0x20] sm:$0xff]  ;;  %v21_v24 = vld [vmem:[%s1152_s0 + $0x38] sm:$0xff]  ;;  %v19_v29 = vld [vmem:[%s1152_s0 + $0x28] sm:$0xff] }
  0x35   :  { %360 = vmatpush.msrb.mxu2 %v129_v36  ;;  %379 = vmatpush.msrb.mxu3 %v146_v37  ;;  %v182_v26 = vld [vmem:[%s1151_s1 + $0x4d8] sm:$0xff]  ;;  %v164_v30 = vld [vmem:[%s1151_s1 + $0x448] sm:$0xff]  ;;  %v181_v31 = vld [vmem:[%s1151_s1 + $0x4d0] sm:$0xff] }
  0x36   :  { %321 = vmatpush.msrb.mxu0 %v96_v38  ;;  %340 = vmatpush.msrb.mxu1 %v113_v39  ;;  %v214_v28 = vld [vmem:[%s1151_s1 + $0x5d8] sm:$0xff]  ;;  %v196_v32 = vld [vmem:[%s1151_s1 + $0x548] sm:$0xff]  ;;  %v213_v33 = vld [vmem:[%s1151_s1 + $0x5d0] sm:$0xff] }
  0x37   :  { %361 = vmatpush.msrb.mxu2 %v128_v40  ;;  %380 = vmatpush.msrb.mxu3 %v145_v41  ;;  %v163_v34 = vld [vmem:[%s1151_s1 + $0x440] sm:$0xff]  ;;  %v180_v35 = vld [vmem:[%s1151_s1 + $0x4c8] sm:$0xff]  ;;  %v162_v38 = vld [vmem:[%s1151_s1 + $0x438] sm:$0xff] }
  0x38   :  { %322 = vmatpush.msrb.mxu0 %v95_v42  ;;  %341 = vmatpush.msrb.mxu1 %v112_v43  ;;  %v195_v36 = vld [vmem:[%s1151_s1 + $0x540] sm:$0xff]  ;;  %v212_v37 = vld [vmem:[%s1151_s1 + $0x5c8] sm:$0xff]  ;;  %v194_v40 = vld [vmem:[%s1151_s1 + $0x538] sm:$0xff] }
  0x39   :  { %362 = vmatpush.msrb.mxu2 %v127_v44  ;;  %381 = vmatpush.msrb.mxu3 %v144_v45  ;;  %v179_v39 = vld [vmem:[%s1151_s1 + $0x4c0] sm:$0xff]  ;;  %v161_v42 = vld [vmem:[%s1151_s1 + $0x430] sm:$0xff]  ;;  %v178_v43 = vld [vmem:[%s1151_s1 + $0x4b8] sm:$0xff] }
  0x3a   :  { %323 = vmatpush.msrb.mxu0 %v94_v46  ;;  %342 = vmatpush.msrb.mxu1 %v111_v47  ;;  %v211_v41 = vld [vmem:[%s1151_s1 + $0x5c0] sm:$0xff]  ;;  %v193_v44 = vld [vmem:[%s1151_s1 + $0x530] sm:$0xff]  ;;  %v210_v45 = vld [vmem:[%s1151_s1 + $0x5b8] sm:$0xff] }
  0x3b   :  { %363 = vmatpush.msrb.mxu2 %v126_v48  ;;  %382 = vmatpush.msrb.mxu3 %v143_v49  ;;  %v160_v46 = vld [vmem:[%s1151_s1 + $0x428] sm:$0xff]  ;;  %v177_v47 = vld [vmem:[%s1151_s1 + $0x4b0] sm:$0xff] }
  0x3c   :  { %324 = vmatpush.msrb.mxu0 %v93_v50  ;;  %343 = vmatpush.msrb.mxu1 %v110_v51  ;;  %v192_v48 = vld [vmem:[%s1151_s1 + $0x528] sm:$0xff]  ;;  %v209_v49 = vld [vmem:[%s1151_s1 + $0x5b0] sm:$0xff]  ;;  %v159_v50 = vld [vmem:[%s1151_s1 + $0x420] sm:$0xff] }
  0x3d   :  { %364 = vmatpush.msrb.mxu2 %v125_v52  ;;  %383 = vmatpush.msrb.mxu3 %v142_v53  ;;  %v176_v51 = vld [vmem:[%s1151_s1 + $0x4a8] sm:$0xff]  ;;  %v191_v52 = vld [vmem:[%s1151_s1 + $0x520] sm:$0xff] }
  0x3e   :  { %325 = vmatpush.msrb.mxu0 %v92_v54  ;;  %344 = vmatpush.msrb.mxu1 %v109_v55  ;;  %v208_v53 = vld [vmem:[%s1151_s1 + $0x5a8] sm:$0xff]  ;;  %v158_v54 = vld [vmem:[%s1151_s1 + $0x418] sm:$0xff]  ;;  %v175_v55 = vld [vmem:[%s1151_s1 + $0x4a0] sm:$0xff] }
  0x3f   :  { %365 = vmatpush.msrb.mxu2 %v124_v56  ;;  %384 = vmatpush.msrb.mxu3 %v141_v57  ;;  %v190_v56 = vld [vmem:[%s1151_s1 + $0x518] sm:$0xff]  ;;  %v207_v57 = vld [vmem:[%s1151_s1 + $0x5a0] sm:$0xff] }
  0x40   :  { %326 = vmatpush.msrb.mxu0 %v91_v58  ;;  %345 = vmatpush.msrb.mxu1 %v108_v59  ;;  %v157_v58 = vld [vmem:[%s1151_s1 + $0x410] sm:$0xff]  ;;  %v174_v59 = vld [vmem:[%s1151_s1 + $0x498] sm:$0xff] }
  0x41   :  { %366 = vmatpush.msrb.mxu2 %v123_v60  ;;  %385 = vmatpush.msrb.mxu3 %v140_v61  ;;  %v189_v60 = vld [vmem:[%s1151_s1 + $0x510] sm:$0xff]  ;;  %v206_v61 = vld [vmem:[%s1151_s1 + $0x598] sm:$0xff] }
  0x42   :  { %247 = vmatmul.f32.vlgmr.msra.gmra.mxu0 %v14_v62  ;;  %287 = vmatmul.f32.vlgmr.msra.gmra.mxu2 %v16_v63  ;;  %v156_v62 = vld [vmem:[%s1151_s1 + $0x408] sm:$0xff]  ;;  %v173_v63 = vld [vmem:[%s1151_s1 + $0x490] sm:$0xff] }
  0x43   :  { %391 = vmatpush.msra.mxu0 %v170_v0  ;;  %431 = vmatpush.msra.mxu2 %v202_v1  ;;  %v188_v0 = vld [vmem:[%s1151_s1 + $0x508] sm:$0xff]  ;;  %v205_v1 = vld [vmem:[%s1151_s1 + $0x590] sm:$0xff] }
  0x44   :  { %346 = vmatpush.msrb.mxu1 %v107_v2  ;;  %386 = vmatpush.msrb.mxu3 %v139_v3  ;;  %v155_v2 = vld [vmem:[%s1151_s1 + $0x400] sm:$0xff]  ;;  %v172_v3 = vld [vmem:[%s1151_s1 + $0x488] sm:$0xff] }
  0x45   :  { %267 = vmatmul.f32.vlgmr.msra.gmra.mxu1 %v15_v4  ;;  %307 = vmatmul.f32.vlgmr.msra.gmra.mxu3 %v17_v5  ;;  %v187_v4 = vld [vmem:[%s1151_s1 + $0x500] sm:$0xff]  ;;  %v204_v5 = vld [vmem:[%s1151_s1 + $0x588] sm:$0xff] }
  0x46   :  { %392 = vmatpush.msra.mxu0 %v169_v6  ;;  %411 = vmatpush.msra.mxu1 %v186_v7  ;;  %v22_v6 = vld [vmem:[%s1152_s0 + $0x40] sm:$0xff]  ;;  %v24_v7 = vld [vmem:[%s1152_s0 + $0x50] sm:$0xff] }
  0x47   :  { %432 = vmatpush.msra.mxu2 %v201_v8  ;;  %451 = vmatpush.msra.mxu3 %v218_v9  ;;  %v171_v8 = vld [vmem:[%s1151_s1 + $0x480] sm:$0xff] }
  0x48   :  { %393 = vmatpush.msra.mxu0 %v168_v10  ;;  %412 = vmatpush.msra.mxu1 %v185_v11  ;;  %v203_v9 = vld [vmem:[%s1151_s1 + $0x580] sm:$0xff]  ;;  %v23_v10 = vld [vmem:[%s1152_s0 + $0x48] sm:$0xff]  ;;  %v25_v11 = vld [vmem:[%s1152_s0 + $0x58] sm:$0xff] }
  0x49   :  { %433 = vmatpush.msra.mxu2 %v200_v12  ;;  %452 = vmatpush.msra.mxu3 %v217_v13  ;;  %v222_v12 = vld [vmem:[%s1151_s1 + $0x618] sm:$0xff]  ;;  %v221_v13 = vld [vmem:[%s1151_s1 + $0x610] sm:$0xff] }
  0x4a   :  { %394 = vmatpush.msra.mxu0 %v167_v14  ;;  %413 = vmatpush.msra.mxu1 %v184_v15  ;;  %v220_v14 = vld [vmem:[%s1151_s1 + $0x608] sm:$0xff]  ;;  %v219_v15 = vld [vmem:[%s1151_s1 + $0x600] sm:$0xff] }
  0x4b   :  { %434 = vmatpush.msra.mxu2 %v199_v16  ;;  %453 = vmatpush.msra.mxu3 %v216_v17  ;;  %v26_v16 = vld [vmem:[%s1152_s0 + $0x60] sm:$0xff] }
  0x4c   :  { %367 = vmatmul.f32.vlgmr.msrb.gmra.mxu2 %v20_v18  ;;  %395 = vmatpush.msra.mxu0 %v166_v19  ;;  %v497_v17 = vld [vmem:[%s1153_s2] ss:$0 sm:$0xff] }
  0x4d   :  { %414 = vmatpush.msra.mxu1 %v183_v20  ;;  %435 = vmatpush.msra.mxu2 %v198_v21 }
  0x4e   :  { %454 = vmatpush.msra.mxu3 %v215_v22  ;;  %327 = vmatmul.f32.vlgmr.msrb.gmra.mxu0 %v18_v23 }
  0x4f   :  { %387 = vmatmul.f32.vlgmr.msrb.gmra.mxu3 %v21_v24  ;;  %396 = vmatpush.msra.mxu0 %v165_v25 }
  0x50   :  { %415 = vmatpush.msra.mxu1 %v182_v26  ;;  %436 = vmatpush.msra.mxu2 %v197_v27 }
  0x51   :  { %455 = vmatpush.msra.mxu3 %v214_v28  ;;  %347 = vmatmul.f32.vlgmr.msrb.gmra.mxu1 %v19_v29 }
  0x52   :  { %397 = vmatpush.msra.mxu0 %v164_v30  ;;  %416 = vmatpush.msra.mxu1 %v181_v31 }
  0x53   :  { %437 = vmatpush.msra.mxu2 %v196_v32  ;;  %456 = vmatpush.msra.mxu3 %v213_v33 }
  0x54   :  { %398 = vmatpush.msra.mxu0 %v163_v34  ;;  %417 = vmatpush.msra.mxu1 %v180_v35 }
  0x55   :  { %438 = vmatpush.msra.mxu2 %v195_v36  ;;  %457 = vmatpush.msra.mxu3 %v212_v37 }
  0x56   :  { %399 = vmatpush.msra.mxu0 %v162_v38  ;;  %418 = vmatpush.msra.mxu1 %v179_v39 }
  0x57   :  { %439 = vmatpush.msra.mxu2 %v194_v40  ;;  %458 = vmatpush.msra.mxu3 %v211_v41 }
  0x58   :  { %400 = vmatpush.msra.mxu0 %v161_v42  ;;  %419 = vmatpush.msra.mxu1 %v178_v43 }
  0x59   :  { %440 = vmatpush.msra.mxu2 %v193_v44  ;;  %459 = vmatpush.msra.mxu3 %v210_v45 }
  0x5a   :  { %401 = vmatpush.msra.mxu0 %v160_v46  ;;  %420 = vmatpush.msra.mxu1 %v177_v47 }
  0x5b   :  { %441 = vmatpush.msra.mxu2 %v192_v48  ;;  %460 = vmatpush.msra.mxu3 %v209_v49 }
  0x5c   :  { %402 = vmatpush.msra.mxu0 %v159_v50  ;;  %421 = vmatpush.msra.mxu1 %v176_v51 }
  0x5d   :  { %442 = vmatpush.msra.mxu2 %v191_v52  ;;  %461 = vmatpush.msra.mxu3 %v208_v53 }
  0x5e   :  { %403 = vmatpush.msra.mxu0 %v158_v54  ;;  %422 = vmatpush.msra.mxu1 %v175_v55 }
  0x5f   :  { %443 = vmatpush.msra.mxu2 %v190_v56  ;;  %462 = vmatpush.msra.mxu3 %v207_v57 }
  0x60   :  { %404 = vmatpush.msra.mxu0 %v157_v58  ;;  %423 = vmatpush.msra.mxu1 %v174_v59 }
  0x61   :  { %444 = vmatpush.msra.mxu2 %v189_v60  ;;  %463 = vmatpush.msra.mxu3 %v206_v61 }
  0x62   :  { %405 = vmatpush.msra.mxu0 %v156_v62  ;;  %424 = vmatpush.msra.mxu1 %v173_v63 }
  0x63   :  { %445 = vmatpush.msra.mxu2 %v188_v0  ;;  %464 = vmatpush.msra.mxu3 %v205_v1 }
  0x64   :  { %406 = vmatpush.msra.mxu0 %v155_v2  ;;  %425 = vmatpush.msra.mxu1 %v172_v3 }
  0x65   :  { %446 = vmatpush.msra.mxu2 %v187_v4  ;;  %465 = vmatpush.msra.mxu3 %v204_v5 }
  0x66   :  { %407 = vmatmul.f32.vlgmr.msra.gmra.mxu0 %v22_v6  ;;  %447 = vmatmul.f32.vlgmr.msra.gmra.mxu2 %v24_v7 }
  0x67   :  { %426 = vmatpush.msra.mxu1 %v171_v8  ;;  %466 = vmatpush.msra.mxu3 %v203_v9 }
  0x68   :  { %427 = vmatmul.f32.vlgmr.msra.gmra.mxu1 %v23_v10  ;;  %467 = vmatmul.f32.vlgmr.msra.gmra.mxu3 %v25_v11 }
  0x69   :  { %483 = vmatpush.msrb.mxu0 %v222_v12 }
  0x6b   :  { %484 = vmatpush.msrb.mxu0 %v221_v13 }
  0x6d   :  { %485 = vmatpush.msrb.mxu0 %v220_v14 }
  0x6f   :  { %486 = vmatpush.msrb.mxu0 %v219_v15 }
  0x70   :  { %496 = vmatmul.msk.f32.vlgmr.msrb.gmra.mxu0 %vm227_vm0, %v26_v16 }
  0xbf   :  { %v248_v18 = vpop.f32.mrf.mxu0 }
  0xc0   :  { %v249_v19 = vadd.f32 %v497_v17, %v248_v18 }
  0xc2   :  { %v268_v20 = vpop.f32.mrf.mxu1 }
  0xc3   :  { %v269_v21 = vadd.f32 %v268_v20, %v249_v19 }
  0xc5   :  { %v288_v22 = vpop.f32.mrf.mxu2 }
  0xc6   :  { %v289_v23 = vadd.f32 %v288_v22, %v269_v21 }
  0xc8   :  { %v308_v24 = vpop.f32.mrf.mxu3 }
  0xc9   :  { %v309_v25 = vadd.f32 %v308_v24, %v289_v23 }
  0xcb   :  { %v328_v26 = vpop.f32.mrf.mxu0 }
  0xcc   :  { %v329_v27 = vadd.f32 %v328_v26, %v309_v25 }
  0xce   :  { %v348_v28 = vpop.f32.mrf.mxu1 }
  0xcf   :  { %v349_v29 = vadd.f32 %v348_v28, %v329_v27  ;;  %v368_v30 = vpop.f32.mrf.mxu2 }
  0xd1   :  { %v369_v31 = vadd.f32 %v368_v30, %v349_v29 }
  0xd2   :  { %v388_v32 = vpop.f32.mrf.mxu3 }
  0xd3   :  { %v389_v33 = vadd.f32 %v388_v32, %v369_v31 }
  0xe3   :  { %v408_v34 = vpop.f32.mrf.mxu0 }
  0xe4   :  { %v409_v35 = vadd.f32 %v408_v34, %v389_v33 }
  0xe5   :  { %v428_v36 = vpop.f32.mrf.mxu1 }
  0xe6   :  { %v429_v37 = vadd.f32 %v428_v36, %v409_v35 }
  0xe9   :  { %v448_v38 = vpop.f32.mrf.mxu2 }
  0xea   :  { %v449_v39 = vadd.f32 %v448_v38, %v429_v37 }
  0xeb   :  { %v468_v40 = vpop.f32.mrf.mxu3 }
  0xec   :  { %v469_v41 = vadd.f32 %v468_v40, %v449_v39 }
  0xed   :  { %v488_v42 = vpop.f32.mrf.mxu0 }
  0xee   :  { %v489_v43 = vadd.f32 %v488_v42, %v469_v41 }
  0xf0   :  { %491 = vst [vmem:[%s1154_s3] sm:$0xff] %v489_v43 }

// kernel: cnn_forward.2
= control target key start
LH: loop header
LB: loop body
LE: loop exit
PB: predicated region body
PF: predicated region fallthrough
CT: control target
= control target key end

     0   :  { %v9223_v2 = vmov 0.0   ;;  %s5881_s25 = smov 127   ;;  %vm107_vm0 = vcmask 1039360   ;;  %vm116_vm1 = vcmask 130048   ;;  %s5882_s21 = smov 117   ;;  %vm804_vm2 = vcmask 965632   ;;  %s9216_s0 = inlined_call_operand.vmem [shape: f32[16,256], index: 0, kind: input, shape index: {}]   ;;  %s9217_s1 = inlined_call_operand.vmem [shape: f32[4,256,16], index: 1, kind: input, shape index: {}]   ;;  %s9218_s2 = inlined_call_operand.vmem [shape: f32[256,1], index: 2, kind: input, shape index: {}]   ;;  %s9219_s5 = inlined_call_operand.vmem [shape: f32[1,256], index: 5, kind: input, shape index: {}]   ;;  %s9220_s3 = inlined_call_operand.vmem [shape: f32[9,128,64], index: 3, kind: input, shape index: {}]   ;;  %s9221_s4 = inlined_call_operand.vmem [shape: f32[128,1], index: 4, kind: input, shape index: {}]   ;;  %s9222_s6 = inlined_call_operand.vmem [shape: f32[32,256], index: 6, kind: output, shape index: {}]  }
   0x1   :  { %v25_v0 = vld [vmem:[%s9216_s0 + $0x10] sm:$0xff]  ;;  %v5931_v1 = vld [vmem:[%s9216_s0 + $0x8] sm:$0xff]  ;;  %v23_v4 = vld [vmem:[%s9216_s0] sm:$0xff]  ;;  %s5883_s27 = smov 118   ;;  %vm1242_vm3 = vcmask 957440   ;;  %vm2140_vm4 = vcmask 523264  }
   0x2   :  { %v5934_v3 = vpack.i.bf16 %v25_v0, %v9223_v2  ;;  %99 = vrot.lane.b32.xlu1 %v5931_v1, %s5881_s25  ;;  %v26_v5 = vld [vmem:[%s9216_s0 + $0x18] sm:$0xff]  ;;  %v4745_v17 = vld [vmem:[%s9217_s1 + $0x100] sm:$0xff]  ;;  %v4746_v20 = vld [vmem:[%s9217_s1 + $0x108] sm:$0xff]  ;;  %s5888_s20 = smov 107   ;;  %vm2548_vm5 = vcmask 1031168   ;;  %s5889_s8 = smov 106  }
   0x3   :  { %v5946_v6 = vpack.i.bf16 %v23_v4, %v26_v5  ;;  %v4769_v18 = vld [vmem:[%s9217_s1 + $0x1c0] sm:$0xff]  ;;  %v4770_v21 = vld [vmem:[%s9217_s1 + $0x1c8] sm:$0xff]  ;;  %v4747_v22 = vld [vmem:[%s9217_s1 + $0x110] sm:$0xff]  ;;  %vm3424_vm6 = vcmask 949248   ;;  %vm3718_vm7 = vcmask 883712   ;;  %vm4012_vm8 = vcmask 875520  }
   0x4   :  { %5528 = vrot.lane.b32.xlu0 %v5934_v3, %s5881_s25  ;;  %v4771_v23 = vld [vmem:[%s9217_s1 + $0x1d0] sm:$0xff]  ;;  %v4748_v24 = vld [vmem:[%s9217_s1 + $0x118] sm:$0xff]  ;;  %v4749_v26 = vld [vmem:[%s9217_s1 + $0x120] sm:$0xff]  ;;  %vm4306_vm9 = vcmask 867328  }
   0x5   :  { %v4772_v25 = vld [vmem:[%s9217_s1 + $0x1d8] sm:$0xff]  ;;  %v4773_v27 = vld [vmem:[%s9217_s1 + $0x1e0] sm:$0xff]  ;;  %v4750_v28 = vld [vmem:[%s9217_s1 + $0x128] sm:$0xff]  ;;  %5543 = vrot.lane.b32.xlu2 %v5946_v6, %s5882_s21 }
   0x6   :  { %v4774_v29 = vld [vmem:[%s9217_s1 + $0x1e8] sm:$0xff]  ;;  %v4751_v30 = vld [vmem:[%s9217_s1 + $0x130] sm:$0xff]  ;;  %v4752_v32 = vld [vmem:[%s9217_s1 + $0x138] sm:$0xff] }
   0x7   :  { %v4775_v31 = vld [vmem:[%s9217_s1 + $0x1f0] sm:$0xff]  ;;  %v4776_v33 = vld [vmem:[%s9217_s1 + $0x1f8] sm:$0xff]  ;;  %v4753_v34 = vld [vmem:[%s9217_s1 + $0x140] sm:$0xff] }
   0x8   :  { %v27_v35 = vld [vmem:[%s9217_s1] sm:$0xff]  ;;  %v4754_v36 = vld [vmem:[%s9217_s1 + $0x148] sm:$0xff]  ;;  %v4755_v38 = vld [vmem:[%s9217_s1 + $0x150] sm:$0xff] }
   0x9   :  { %v28_v37 = vld [vmem:[%s9217_s1 + $0x8] sm:$0xff]  ;;  %v29_v39 = vld [vmem:[%s9217_s1 + $0x10] sm:$0xff]  ;;  %v4756_v40 = vld [vmem:[%s9217_s1 + $0x158] sm:$0xff] }
   0xa   :  { %5538 = vrot.lane.b32.xlu1 %v5934_v3, %s5882_s21  ;;  %v30_v41 = vld [vmem:[%s9217_s1 + $0x18] sm:$0xff]  ;;  %v4757_v42 = vld [vmem:[%s9217_s1 + $0x160] sm:$0xff]  ;;  %v4758_v44 = vld [vmem:[%s9217_s1 + $0x168] sm:$0xff] }
   0xb   :  { %v31_v43 = vld [vmem:[%s9217_s1 + $0x20] sm:$0xff]  ;;  %v32_v45 = vld [vmem:[%s9217_s1 + $0x28] sm:$0xff]  ;;  %v4759_v46 = vld [vmem:[%s9217_s1 + $0x170] sm:$0xff] }
   0xc   :  { %5533 = vrot.lane.b32.xlu0 %v5946_v6, %s5881_s25  ;;  %v33_v47 = vld [vmem:[%s9217_s1 + $0x30] sm:$0xff]  ;;  %v4760_v48 = vld [vmem:[%s9217_s1 + $0x178] sm:$0xff]  ;;  %v4761_v50 = vld [vmem:[%s9217_s1 + $0x180] sm:$0xff] }
   0xd   :  { %1234 = vrot.lane.b32.xlu2 %v5931_v1, %s5882_s21  ;;  %v34_v49 = vld [vmem:[%s9217_s1 + $0x38] sm:$0xff]  ;;  %v35_v51 = vld [vmem:[%s9217_s1 + $0x40] sm:$0xff]  ;;  %v4762_v56 = vld [vmem:[%s9217_s1 + $0x188] sm:$0xff] }
   0xe   :  { %v36_v57 = vld [vmem:[%s9217_s1 + $0x48] sm:$0xff]  ;;  %v4763_v62 = vld [vmem:[%s9217_s1 + $0x190] sm:$0xff] }
   0xf   :  { %v37_v63 = vld [vmem:[%s9217_s1 + $0x50] sm:$0xff] }
  0x10   :  { %v4919_v2 = vld [vmem:[%s9217_s1 + $0x270] sm:$0xff] }
  0x12   :  { %5553 = vrot.lane.b32.xlu1 %v5946_v6, %s5883_s27  ;;  %v4764_v6 = vld [vmem:[%s9217_s1 + $0x198] sm:$0xff] }
  0x14   :  { %5548 = vrot.lane.b32.xlu0 %v5934_v3, %s5883_s27 }
  0x15   :  { %796 = vrot.lane.b32.xlu2 %v5931_v1, %s5883_s27 }
  0x74   :  { %v100_v13 = vpop.permute.xlu1 %99 }
  0x76   :  { %v5529_v7 = vpop.permute.xlu0 %5528 }
  0x77   :  { %v5531_v9 = vunpack.i.h.bf16 %v5529_v7  ;;  %v5950_v10 = vunpack.i.l.bf16 %v5529_v7  ;;  %v38_v7 = vld [vmem:[%s9217_s1 + $0x58] sm:$0xff] }
  0x79   :  { %9247 = vst [vmem:[#allocation2_spill] sm:$0xff] %v5950_v10  ;;  %v109_v19 = vsel %vm107_vm0, %v100_v13, %v5950_v10 }
  0x7e   :  { %v5534_v8 = vpop.permute.xlu0 %5533 }
  0x7f   :  { %v5536_v11 = vunpack.i.h.bf16 %v5534_v8  ;;  %v5535_v12 = vunpack.i.l.bf16 %v5534_v8 }
  0x81   :  { %v110_v14 = vsel %vm107_vm0, %v5531_v9, %v5535_v12  ;;  %v111_v15 = vsel %vm107_vm0, %v5535_v12, %v5950_v10  ;;  %v108_v16 = vsel %vm107_vm0, %v5536_v11, %v100_v13 }
  0x82   :  { %227 = vmatpush.msra.mxu0 %v110_v14  ;;  %5513 = vmatpush.msra.mxu2 %v110_v14 }
  0x83   :  { %340 = vmatpush.msra.mxu1 %v111_v15  ;;  %5515 = vmatpush.msra.mxu3 %v111_v15 }
  0x84   :  { %228 = vmatpush.msra.mxu0 %v108_v16  ;;  %5514 = vmatpush.msra.mxu2 %v108_v16 }
  0x85   :  { %341 = vmatpush.msra.mxu1 %v109_v19  ;;  %5516 = vmatpush.msra.mxu3 %v109_v19  ;;  %v4765_v19 = vld [vmem:[%s9217_s1 + $0x1a0] sm:$0xff] }
  0x86   :  { %4777 = vmatmul.msk.f32.vlgmr.msra.gmra.mxu0 %vm116_vm1, %v4745_v17  ;;  %4801 = vmatmul.msk.f32.vlgmr.msra.gmra.mxu2 %vm116_vm1, %v4769_v18  ;;  %v5549_v12 = vpop.permute.xlu0 %5548 }
  0x87   :  { %4809 = vmatmul.msk.f32.vlgmr.msra.gmra.mxu1 %vm116_vm1, %v4745_v17  ;;  %4833 = vmatmul.msk.f32.vlgmr.msra.gmra.mxu3 %vm116_vm1, %v4769_v18  ;;  %v5551_v14 = vunpack.i.h.bf16 %v5549_v12  ;;  %v6201_v15 = vunpack.i.l.bf16 %v5549_v12 }
  0x88   :  { %549 = vmatpush.msrb.mxu2 %v25_v0  ;;  %662 = vmatpush.msrb.mxu3 %v26_v5  ;;  %v6173_v0 = vpop.permute.xlu2 %5543 }
  0x89   :  { %9254 = vst [vmem:[#allocation9_spill] sm:$0xff] %v6201_v15 }
  0x8a   :  { %550 = vmatpush.msrb.mxu2 %v23_v4  ;;  %663 = vmatpush.msrb.mxu3 %v5931_v1  ;;  %v6179_v1 = vpop.permute.xlu1 %5538 }
  0x8e   :  { %4778 = vmatmul.msk.f32.gmra.mxu0 %vm116_vm1, %v4746_v20  ;;  %4802 = vmatmul.msk.f32.gmra.mxu2 %vm116_vm1, %v4770_v21 }
  0x8f   :  { %4810 = vmatmul.msk.f32.gmra.mxu1 %vm116_vm1, %v4746_v20  ;;  %4834 = vmatmul.msk.f32.gmra.mxu3 %vm116_vm1, %v4770_v21  ;;  %v39_v20 = vld [vmem:[%s9217_s1 + $0x60] sm:$0xff] }
  0x90   :  { %v6193_v8 = vpop.permute.xlu2 %1234 }
  0x92   :  { %v5554_v11 = vpop.permute.xlu1 %5553 }
  0x93   :  { %v5555_v13 = vunpack.i.l.bf16 %v5554_v11  ;;  %v5556_v17 = vunpack.i.h.bf16 %v5554_v11 }
  0x96   :  { %4779 = vmatmul.msk.f32.gmra.mxu0 %vm116_vm1, %v4747_v22  ;;  %4803 = vmatmul.msk.f32.gmra.mxu2 %vm116_vm1, %v4771_v23 }
  0x97   :  { %4811 = vmatmul.msk.f32.gmra.mxu1 %vm116_vm1, %v4747_v22  ;;  %4835 = vmatmul.msk.f32.gmra.mxu3 %vm116_vm1, %v4771_v23  ;;  %v807_v22 = vsel %vm804_vm2, %v5551_v14, %v5555_v13  ;;  %v808_v23 = vsel %vm804_vm2, %v5555_v13, %v6201_v15  ;;  %v45_v13 = vld [vmem:[%s9217_s1 + $0x90] sm:$0xff] }
  0x98   :  { %v797_v21 = vpop.permute.xlu2 %796  ;;  %923 = vmatpush.msrb.mxu0 %v807_v22  ;;  %1036 = vmatpush.msrb.mxu1 %v808_v23  ;;  %v4907_v14 = vld [vmem:[%s9217_s1 + $0x210] sm:$0xff]  ;;  %v46_v22 = vld [vmem:[%s9217_s1 + $0x98] sm:$0xff] }
  0x99   :  { %v4908_v23 = vld [vmem:[%s9217_s1 + $0x218] sm:$0xff] }
  0x9e   :  { %4780 = vmatmul.msk.f32.gmra.mxu0 %vm116_vm1, %v4748_v24  ;;  %4804 = vmatmul.msk.f32.gmra.mxu2 %vm116_vm1, %v4772_v25 }
  0x9f   :  { %4812 = vmatmul.msk.f32.gmra.mxu1 %vm116_vm1, %v4748_v24  ;;  %4836 = vmatmul.msk.f32.gmra.mxu3 %vm116_vm1, %v4772_v25  ;;  %v805_v25 = vsel %vm804_vm2, %v5556_v17, %v797_v21 }
  0xa0   :  { %924 = vmatpush.msrb.mxu0 %v805_v25 }
  0xa6   :  { %4781 = vmatmul.msk.f32.gmra.mxu0 %vm116_vm1, %v4749_v26  ;;  %4805 = vmatmul.msk.f32.gmra.mxu2 %vm116_vm1, %v4773_v27 }
  0xa7   :  { %4813 = vmatmul.msk.f32.gmra.mxu1 %vm116_vm1, %v4749_v26  ;;  %4837 = vmatmul.msk.f32.gmra.mxu3 %vm116_vm1, %v4773_v27  ;;  %v806_v26 = vsel %vm804_vm2, %v797_v21, %v6201_v15 }
  0xa8   :  { %1037 = vmatpush.msrb.mxu1 %v806_v26 }
  0xae   :  { %4782 = vmatmul.msk.f32.gmra.mxu0 %vm116_vm1, %v4750_v28  ;;  %4806 = vmatmul.msk.f32.gmra.mxu2 %vm116_vm1, %v4774_v29 }
  0xaf   :  { %4814 = vmatmul.msk.f32.gmra.mxu1 %vm116_vm1, %v4750_v28  ;;  %4838 = vmatmul.msk.f32.gmra.mxu3 %vm116_vm1, %v4774_v29 }
  0xb6   :  { %4783 = vmatmul.msk.f32.gmra.mxu0 %vm116_vm1, %v4751_v30  ;;  %4807 = vmatmul.msk.f32.gmra.mxu2 %vm116_vm1, %v4775_v31 }
  0xb7   :  { %4815 = vmatmul.msk.f32.gmra.mxu1 %vm116_vm1, %v4751_v30  ;;  %4839 = vmatmul.msk.f32.gmra.mxu3 %vm116_vm1, %v4775_v31  ;;  %v4766_v30 = vld [vmem:[%s9217_s1 + $0x1a8] sm:$0xff] }
  0xb8   :  { %v40_v31 = vld [vmem:[%s9217_s1 + $0x68] sm:$0xff] }
  0xbe   :  { %4784 = vmatmul.msk.f32.gmra.mxu0 %vm116_vm1, %v4752_v32  ;;  %4808 = vmatmul.msk.f32.gmra.mxu2 %vm116_vm1, %v4776_v33 }
  0xbf   :  { %4816 = vmatmul.msk.f32.gmra.mxu1 %vm116_vm1, %v4752_v32  ;;  %4840 = vmatmul.msk.f32.gmra.mxu3 %vm116_vm1, %v4776_v33 }
  0xc6   :  { %4785 = vmatmul.msk.f32.gmra.mxu0 %vm116_vm1, %v4753_v34  ;;  %4841 = vmatmul.msk.f32.vlgmr.msrb.gmra.mxu2 %vm116_vm1, %v27_v35 }
  0xc7   :  { %4817 = vmatmul.msk.f32.gmra.mxu1 %vm116_vm1, %v4753_v34  ;;  %4873 = vmatmul.msk.f32.vlgmr.msrb.gmra.mxu3 %vm116_vm1, %v27_v35 }
  0xce   :  { %4786 = vmatmul.msk.f32.gmra.mxu0 %vm116_vm1, %v4754_v36  ;;  %4842 = vmatmul.msk.f32.gmra.mxu2 %vm116_vm1, %v28_v37 }
  0xcf   :  { %4818 = vmatmul.msk.f32.gmra.mxu1 %vm116_vm1, %v4754_v36  ;;  %4874 = vmatmul.msk.f32.gmra.mxu3 %vm116_vm1, %v28_v37  ;;  %v4767_v36 = vld [vmem:[%s9217_s1 + $0x1b0] sm:$0xff] }
  0xd0   :  { %v41_v37 = vld [vmem:[%s9217_s1 + $0x70] sm:$0xff] }
  0xd6   :  { %4787 = vmatmul.msk.f32.gmra.mxu0 %vm116_vm1, %v4755_v38  ;;  %4843 = vmatmul.msk.f32.gmra.mxu2 %vm116_vm1, %v29_v39 }
  0xd7   :  { %4819 = vmatmul.msk.f32.gmra.mxu1 %vm116_vm1, %v4755_v38  ;;  %4875 = vmatmul.msk.f32.gmra.mxu3 %vm116_vm1, %v29_v39 }
  0xde   :  { %4788 = vmatmul.msk.f32.gmra.mxu0 %vm116_vm1, %v4756_v40  ;;  %4844 = vmatmul.msk.f32.gmra.mxu2 %vm116_vm1, %v30_v41 }
  0xdf   :  { %4820 = vmatmul.msk.f32.gmra.mxu1 %vm116_vm1, %v4756_v40  ;;  %4876 = vmatmul.msk.f32.gmra.mxu3 %vm116_vm1, %v30_v41 }
  0xe6   :  { %4789 = vmatmul.msk.f32.gmra.mxu0 %vm116_vm1, %v4757_v42  ;;  %4845 = vmatmul.msk.f32.gmra.mxu2 %vm116_vm1, %v31_v43 }
  0xe7   :  { %4821 = vmatmul.msk.f32.gmra.mxu1 %vm116_vm1, %v4757_v42  ;;  %4877 = vmatmul.msk.f32.gmra.mxu3 %vm116_vm1, %v31_v43  ;;  %v4768_v42 = vld [vmem:[%s9217_s1 + $0x1b8] sm:$0xff] }
  0xe8   :  { %v42_v43 = vld [vmem:[%s9217_s1 + $0x78] sm:$0xff] }
  0xee   :  { %4790 = vmatmul.msk.f32.gmra.mxu0 %vm116_vm1, %v4758_v44  ;;  %4846 = vmatmul.msk.f32.gmra.mxu2 %vm116_vm1, %v32_v45 }
  0xef   :  { %4822 = vmatmul.msk.f32.gmra.mxu1 %vm116_vm1, %v4758_v44  ;;  %4878 = vmatmul.msk.f32.gmra.mxu3 %vm116_vm1, %v32_v45 }
  0xf6   :  { %4791 = vmatmul.msk.f32.gmra.mxu0 %vm116_vm1, %v4759_v46  ;;  %4847 = vmatmul.msk.f32.gmra.mxu2 %vm116_vm1, %v33_v47 }
  0xf7   :  { %4823 = vmatmul.msk.f32.gmra.mxu1 %vm116_vm1, %v4759_v46  ;;  %4879 = vmatmul.msk.f32.gmra.mxu3 %vm116_vm1, %v33_v47  ;;  %v43_v47 = vld [vmem:[%s9217_s1 + $0x80] sm:$0xff] }
  0xfe   :  { %4792 = vmatmul.msk.f32.gmra.mxu0 %vm116_vm1, %v4760_v48  ;;  %4848 = vmatmul.msk.f32.gmra.mxu2 %vm116_vm1, %v34_v49 }
  0xff   :  { %4824 = vmatmul.msk.f32.gmra.mxu1 %vm116_vm1, %v4760_v48  ;;  %4880 = vmatmul.msk.f32.gmra.mxu3 %vm116_vm1, %v34_v49  ;;  %v4905_v48 = vld [vmem:[%s9217_s1 + $0x200] sm:$0xff] }
 0x103   :  { %v6139_v52 = vpop.f32.mrf.mxu0 }
 0x104   :  { %v6143_v53 = vpop.f32.mrf.mxu1 }
 0x106   :  { %4793 = vmatmul.msk.f32.gmra.mxu0 %vm116_vm1, %v4761_v50  ;;  %4849 = vmatmul.msk.f32.gmra.mxu2 %vm116_vm1, %v35_v51 }
 0x107   :  { %4825 = vmatmul.msk.f32.gmra.mxu1 %vm116_vm1, %v4761_v50  ;;  %4881 = vmatmul.msk.f32.gmra.mxu3 %vm116_vm1, %v35_v51 }
 0x109   :  { %v6145_v54 = vpop.f32.mrf.mxu2 }
 0x10a   :  { %9248 = vst [vmem:[#allocation3_spill] sm:$0xff] %v6145_v54  ;;  %v6147_v55 = vpop.f32.mrf.mxu3  ;;  %v4932_v54 = vld [vmem:[%s9217_s1 + $0x2d8] sm:$0xff] }
 0x10b   :  { %9249 = vst [vmem:[#allocation4_spill] sm:$0xff] %v6147_v55  ;;  %v6159_v58 = vpop.f32.mrf.mxu0 }
 0x10c   :  { %v6163_v60 = vpop.f32.mrf.mxu1 }
 0x10e   :  { %4794 = vmatmul.msk.f32.gmra.mxu0 %vm116_vm1, %v4762_v56  ;;  %4850 = vmatmul.msk.f32.gmra.mxu2 %vm116_vm1, %v36_v57 }
 0x10f   :  { %4826 = vmatmul.msk.f32.gmra.mxu1 %vm116_vm1, %v4762_v56  ;;  %4882 = vmatmul.msk.f32.gmra.mxu3 %vm116_vm1, %v36_v57 }
 0x111   :  { %v6161_v59 = vpop.f32.mrf.mxu2 }
 0x112   :  { %9250 = vst [vmem:[#allocation5_spill] sm:$0xff] %v6161_v59  ;;  %v6165_v61 = vpop.f32.mrf.mxu3 }
 0x113   :  { %9251 = vst [vmem:[#allocation6_spill] sm:$0xff] %v6165_v61  ;;  %v6185_v5 = vpop.f32.mrf.mxu0 }
 0x114   :  { %v6195_v9 = vpop.f32.mrf.mxu1 }
 0x116   :  { %4795 = vmatmul.msk.f32.gmra.mxu0 %vm116_vm1, %v4763_v62  ;;  %4851 = vmatmul.msk.f32.gmra.mxu2 %vm116_vm1, %v37_v63 }
 0x117   :  { %4827 = vmatmul.msk.f32.gmra.mxu1 %vm116_vm1, %v4763_v62  ;;  %4883 = vmatmul.msk.f32.gmra.mxu3 %vm116_vm1, %v37_v63  ;;  %v44_v62 = vld [vmem:[%s9217_s1 + $0x88] sm:$0xff] }
 0x118   :  { %v4906_v63 = vld [vmem:[%s9217_s1 + $0x208] sm:$0xff] }
 0x119   :  { %v6181_v3 = vpop.f32.mrf.mxu2 }
 0x11a   :  { %9252 = vst [vmem:[#allocation7_spill] sm:$0xff] %v6181_v3  ;;  %v6183_v4 = vpop.f32.mrf.mxu3  ;;  %v4931_v3 = vld [vmem:[%s9217_s1 + $0x2d0] sm:$0xff] }
 0x11b   :  { %9253 = vst [vmem:[#allocation8_spill] sm:$0xff] %v6183_v4  ;;  %v6216_v24 = vpop.f32.mrf.mxu0 }
 0x11c   :  { %v6221_v27 = vpop.f32.mrf.mxu1 }
 0x11e   :  { %4796 = vmatmul.msk.f32.gmra.mxu0 %vm116_vm1, %v4764_v6  ;;  %4852 = vmatmul.msk.f32.gmra.mxu2 %vm116_vm1, %v38_v7 }
 0x11f   :  { %4828 = vmatmul.msk.f32.gmra.mxu1 %vm116_vm1, %v4764_v6  ;;  %4884 = vmatmul.msk.f32.gmra.mxu3 %vm116_vm1, %v38_v7 }
 0x121   :  { %v6203_v16 = vpop.f32.mrf.mxu2 }
 0x122   :  { %9255 = vst [vmem:[#allocation10_spill] sm:$0xff] %v6203_v16  ;;  %v6205_v18 = vpop.f32.mrf.mxu3 }
 0x123   :  { %9256 = vst [vmem:[#allocation11_spill] sm:$0xff] %v6205_v18  ;;  %v6239_v32 = vpop.f32.mrf.mxu0 }
 0x124   :  { %v6243_v33 = vpop.f32.mrf.mxu1 }
 0x126   :  { %4797 = vmatmul.msk.f32.gmra.mxu0 %vm116_vm1, %v4765_v19  ;;  %4853 = vmatmul.msk.f32.gmra.mxu2 %vm116_vm1, %v39_v20 }
 0x127   :  { %4829 = vmatmul.msk.f32.gmra.mxu1 %vm116_vm1, %v4765_v19  ;;  %4885 = vmatmul.msk.f32.gmra.mxu3 %vm116_vm1, %v39_v20 }
 0x129   :  { %v6227_v28 = vpop.f32.mrf.mxu2 }
 0x12a   :  { %9257 = vst [vmem:[#allocation12_spill] sm:$0xff] %v6227_v28  ;;  %v6229_v29 = vpop.f32.mrf.mxu3 }
 0x12b   :  { %9258 = vst [vmem:[#allocation13_spill] sm:$0xff] %v6229_v29  ;;  %v6259_v38 = vpop.f32.mrf.mxu0 }
 0x12c   :  { %v6263_v40 = vpop.f32.mrf.mxu1 }
 0x12e   :  { %4798 = vmatmul.msk.f32.gmra.mxu0 %vm116_vm1, %v4766_v30  ;;  %4854 = vmatmul.msk.f32.gmra.mxu2 %vm116_vm1, %v40_v31 }
 0x12f   :  { %4830 = vmatmul.msk.f32.gmra.mxu1 %vm116_vm1, %v4766_v30  ;;  %4886 = vmatmul.msk.f32.gmra.mxu3 %vm116_vm1, %v40_v31 }
 0x131   :  { %v6245_v34 = vpop.f32.mrf.mxu2 }
 0x132   :  { %9259 = vst [vmem:[#allocation14_spill] sm:$0xff] %v6245_v34  ;;  %v6247_v35 = vpop.f32.mrf.mxu3  ;;  %v5006_v34 = vld [vmem:[%s9217_s1 + $0x328] sm:$0xff] }
 0x133   :  { %9260 = vst [vmem:[#allocation15_spill] sm:$0xff] %v6247_v35  ;;  %v6281_v46 = vpop.f32.mrf.mxu0  ;;  %v4925_v35 = vld [vmem:[%s9217_s1 + $0x2a0] sm:$0xff] }
 0x134   :  { %v6289_v49 = vpop.f32.mrf.mxu1 }
 0x136   :  { %4799 = vmatmul.msk.f32.gmra.mxu0 %vm116_vm1, %v4767_v36  ;;  %4855 = vmatmul.msk.f32.gmra.mxu2 %vm116_vm1, %v41_v37 }
 0x137   :  { %4831 = vmatmul.msk.f32.gmra.mxu1 %vm116_vm1, %v4767_v36  ;;  %4887 = vmatmul.msk.f32.gmra.mxu3 %vm116_vm1, %v41_v37  ;;  %v47_v36 = vld [vmem:[%s9217_s1 + $0xa0] sm:$0xff] }
 0x138   :  { %v4909_v37 = vld [vmem:[%s9217_s1 + $0x220] sm:$0xff] }
 0x139   :  { %v6261_v39 = vpop.f32.mrf.mxu2 }
 0x13a   :  { %9261 = vst [vmem:[#allocation16_spill] sm:$0xff] %v6261_v39  ;;  %v6265_v41 = vpop.f32.mrf.mxu3 }
 0x13b   :  { %9262 = vst [vmem:[#allocation17_spill] sm:$0xff] %v6265_v41  ;;  %v6307_v6 = vpop.f32.mrf.mxu0 }
 0x13c   :  { %v6309_v7 = vpop.f32.mrf.mxu1 }
 0x13e   :  { %4800 = vmatmul.msk.f32.gmra.mxu0 %vm116_vm1, %v4768_v42  ;;  %4856 = vmatmul.msk.f32.gmra.mxu2 %vm116_vm1, %v42_v43 }
 0x13f   :  { %4832 = vmatmul.msk.f32.gmra.mxu1 %vm116_vm1, %v4768_v42  ;;  %4888 = vmatmul.msk.f32.gmra.mxu3 %vm116_vm1, %v42_v43 }
 0x141   :  { %v6277_v44 = vpop.f32.mrf.mxu2 }
 0x142   :  { %9263 = vst [vmem:[#allocation18_spill] sm:$0xff] %v6277_v44  ;;  %v6279_v45 = vpop.f32.mrf.mxu3 }
 0x143   :  { %9264 = vst [vmem:[#allocation19_spill] sm:$0xff] %v6279_v45  ;;  %v6329_v17 = vpop.f32.mrf.mxu0 }
 0x146   :  { %4857 = vmatmul.msk.f32.gmra.mxu2 %vm116_vm1, %v43_v47  ;;  %4937 = vmatmul.msk.f32.vlgmr.msrb.gmra.mxu0 %vm116_vm1, %v4905_v48 }
 0x147   :  { %4889 = vmatmul.msk.f32.gmra.mxu3 %vm116_vm1, %v43_v47  ;;  %4969 = vmatmul.msk.f32.vlgmr.msrb.gmra.mxu1 %vm116_vm1, %v4905_v48  ;;  %v48_v48 = vld [vmem:[%s9217_s1 + $0xa8] sm:$0xff] }
 0x149   :  { %v552_v50 = vpop.f32.mrf.mxu2 }
 0x14a   :  { %v6296_v51 = vadd.f32 %v552_v50, %v6139_v52  ;;  %v665_v56 = vpop.f32.mrf.mxu3  ;;  %v4910_v50 = vld [vmem:[%s9217_s1 + $0x228] sm:$0xff] }
 0x14b   :  { %v6299_v57 = vadd.f32 %v665_v56, %v6143_v53 }
 0x14e   :  { %4858 = vmatmul.msk.f32.gmra.mxu2 %vm116_vm1, %v44_v62  ;;  %4938 = vmatmul.msk.f32.gmra.mxu0 %vm116_vm1, %v4906_v63 }
 0x14f   :  { %4890 = vmatmul.msk.f32.gmra.mxu3 %vm116_vm1, %v44_v62  ;;  %4970 = vmatmul.msk.f32.gmra.mxu1 %vm116_vm1, %v4906_v63 }
 0x151   :  { %v555_v52 = vpop.f32.mrf.mxu2 }
 0x152   :  { %v6316_v53 = vadd.f32 %v555_v52, %v6159_v58  ;;  %v668_v11 = vpop.f32.mrf.mxu3  ;;  %v6333_v58 = vpop.f32.mrf.mxu1  ;;  %v49_v52 = vld [vmem:[%s9217_s1 + $0xb0] sm:$0xff] }
 0x153   :  { %v6319_v12 = vadd.f32 %v668_v11, %v6163_v60  ;;  %v4911_v11 = vld [vmem:[%s9217_s1 + $0x230] sm:$0xff] }
 0x156   :  { %4859 = vmatmul.msk.f32.gmra.mxu2 %vm116_vm1, %v45_v13  ;;  %4939 = vmatmul.msk.f32.gmra.mxu0 %vm116_vm1, %v4907_v14 }
 0x157   :  { %4891 = vmatmul.msk.f32.gmra.mxu3 %vm116_vm1, %v45_v13  ;;  %4971 = vmatmul.msk.f32.gmra.mxu1 %vm116_vm1, %v4907_v14 }
 0x159   :  { %v558_v60 = vpop.f32.mrf.mxu2 }
 0x15a   :  { %v6336_v19 = vadd.f32 %v558_v60, %v6185_v5  ;;  %v671_v20 = vpop.f32.mrf.mxu3  ;;  %v6351_v5 = vpop.f32.mrf.mxu0 }
 0x15b   :  { %v6339_v21 = vadd.f32 %v671_v20, %v6195_v9  ;;  %v6353_v25 = vpop.f32.mrf.mxu1 }
 0x15e   :  { %4860 = vmatmul.msk.f32.gmra.mxu2 %vm116_vm1, %v46_v22  ;;  %4940 = vmatmul.msk.f32.gmra.mxu0 %vm116_vm1, %v4908_v23 }
 0x15f   :  { %4892 = vmatmul.msk.f32.gmra.mxu3 %vm116_vm1, %v46_v22  ;;  %4972 = vmatmul.msk.f32.gmra.mxu1 %vm116_vm1, %v4908_v23  ;;  %v50_v22 = vld [vmem:[%s9217_s1 + $0xb8] sm:$0xff] }
 0x160   :  { %v4912_v23 = vld [vmem:[%s9217_s1 + $0x238] sm:$0xff] }
 0x161   :  { %v561_v9 = vpop.f32.mrf.mxu2 }
 0x162   :  { %v6356_v26 = vadd.f32 %v561_v9, %v6216_v24  ;;  %v674_v30 = vpop.f32.mrf.mxu3  ;;  %v6374_v43 = vpop.f32.mrf.mxu0 }
 0x163   :  { %v6359_v31 = vadd.f32 %v674_v30, %v6221_v27  ;;  %v6385_v56 = vpop.f32.mrf.mxu1 }
 0x166   :  { %4861 = vmatmul.msk.f32.gmra.mxu2 %vm116_vm1, %v47_v36  ;;  %4941 = vmatmul.msk.f32.gmra.mxu0 %vm116_vm1, %v4909_v37 }
 0x167   :  { %4893 = vmatmul.msk.f32.gmra.mxu3 %vm116_vm1, %v47_v36  ;;  %4973 = vmatmul.msk.f32.gmra.mxu1 %vm116_vm1, %v4909_v37 }
 0x169   :  { %v564_v24 = vpop.f32.mrf.mxu2 }
 0x16a   :  { %v6372_v27 = vadd.f32 %v564_v24, %v6239_v32  ;;  %v677_v42 = vpop.f32.mrf.mxu3  ;;  %v6403_v13 = vpop.f32.mrf.mxu0  ;;  %v51_v24 = vld [vmem:[%s9217_s1 + $0xc0] sm:$0xff] }
 0x16b   :  { %v6377_v47 = vadd.f32 %v677_v42, %v6243_v33  ;;  %v6405_v14 = vpop.f32.mrf.mxu1  ;;  %v4913_v42 = vld [vmem:[%s9217_s1 + $0x240] sm:$0xff] }
 0x16e   :  { %4862 = vmatmul.msk.f32.gmra.mxu2 %vm116_vm1, %v48_v48  ;;  %4942 = vmatmul.msk.f32.gmra.mxu0 %vm116_vm1, %v4910_v50 }
 0x16f   :  { %4894 = vmatmul.msk.f32.gmra.mxu3 %vm116_vm1, %v48_v48  ;;  %4974 = vmatmul.msk.f32.gmra.mxu1 %vm116_vm1, %v4910_v50  ;;  %v5884_v48 = vmov 0  }
 0x170   :  { %5558 = vset.pattern.permute.xlu1 %v5884_v48  ;;  %5557 = vset.pattern.permute.xlu0 %v5884_v48 }
 0x171   :  { %v567_v32 = vpop.f32.mrf.mxu2  ;;  %5559 = vset.pattern.permute.xlu2 %v5884_v48 }
 0x172   :  { %v6392_v33 = vadd.f32 %v567_v32, %v6259_v38  ;;  %v680_v62 = vpop.f32.mrf.mxu3  ;;  %v6425_v9 = vpop.f32.mrf.mxu0 }
 0x173   :  { %v6395_v63 = vadd.f32 %v680_v62, %v6263_v40 }
 0x176   :  { %4863 = vmatmul.msk.f32.gmra.mxu2 %vm116_vm1, %v49_v52  ;;  %4943 = vmatmul.msk.f32.gmra.mxu0 %vm116_vm1, %v4911_v11 }
 0x177   :  { %4895 = vmatmul.msk.f32.gmra.mxu3 %vm116_vm1, %v49_v52  ;;  %4975 = vmatmul.msk.f32.gmra.mxu1 %vm116_vm1, %v4911_v11 }
 0x179   :  { %v570_v38 = vpop.f32.mrf.mxu2 }
 0x17a   :  { %v6412_v40 = vadd.f32 %v570_v38, %v6281_v46  ;;  %v683_v60 = vpop.f32.mrf.mxu3  ;;  %v6429_v46 = vpop.f32.mrf.mxu1 }
 0x17b   :  { %v6415_v20 = vadd.f32 %v683_v60, %v6289_v49  ;;  %v6453_v50 = vpop.f32.mrf.mxu0  ;;  %v52_v60 = vld [vmem:[%s9217_s1 + $0xc8] sm:$0xff] }
 0x17e   :  { %4864 = vmatmul.msk.f32.gmra.mxu2 %vm116_vm1, %v50_v22  ;;  %4944 = vmatmul.msk.f32.gmra.mxu0 %vm116_vm1, %v4912_v23 }
 0x17f   :  { %4896 = vmatmul.msk.f32.gmra.mxu3 %vm116_vm1, %v50_v22  ;;  %4976 = vmatmul.msk.f32.gmra.mxu1 %vm116_vm1, %v4912_v23  ;;  %v4914_v22 = vld [vmem:[%s9217_s1 + $0x248] sm:$0xff] }
 0x180   :  { %v1654_v23 = vld [vmem:[%s9218_s2 + $0x88] sm:$0xff] }
 0x181   :  { %v573_v49 = vpop.f32.mrf.mxu2 }
 0x182   :  { %v6432_v30 = vadd.f32 %v573_v49, %v6307_v6  ;;  %v686_v36 = vpop.f32.mrf.mxu3  ;;  %v1664_v6 = vld [vmem:[%s9218_s2 + $0xd8] sm:$0xff]  ;;  %v6455_v62 = vpop.f32.mrf.mxu1  ;;  %v5545_v49 = vunpack.i.l.bf16 %v6173_v0 }
 0x183   :  { %v6435_v37 = vadd.f32 %v686_v36, %v6309_v7  ;;  %v1662_v7 = vld [vmem:[%s9218_s2 + $0xc8] sm:$0xff]  ;;  %1806 = vperm.xlu1 %5558, %v1664_v6   ;;  %v5541_v36 = vunpack.i.h.bf16 %v6179_v1 }
 0x184   :  { %1796 = vperm.xlu0 %5557, %v1662_v7  }
 0x186   :  { %4865 = vmatmul.msk.f32.gmra.mxu2 %vm116_vm1, %v51_v24  ;;  %4945 = vmatmul.msk.f32.gmra.mxu0 %vm116_vm1, %v4913_v42 }
 0x187   :  { %4897 = vmatmul.msk.f32.gmra.mxu3 %vm116_vm1, %v51_v24  ;;  %4977 = vmatmul.msk.f32.gmra.mxu1 %vm116_vm1, %v4913_v42  ;;  %v6485_v24 = vunpack.i.l.bf16 %v6179_v1  ;;  %v5546_v42 = vunpack.i.h.bf16 %v6173_v0  ;;  %v53_v1 = vld [vmem:[%s9217_s1 + $0xd0] sm:$0xff] }
 0x188   :  { %v4915_v0 = vld [vmem:[%s9217_s1 + $0x250] sm:$0xff] }
 0x189   :  { %v576_v32 = vpop.f32.mrf.mxu2  ;;  %9265 = vst [vmem:[#allocation20_spill] sm:$0xff] %v6485_v24 }
 0x18a   :  { %v6458_v52 = vadd.f32 %v576_v32, %v6329_v17  ;;  %v689_v11 = vpop.f32.mrf.mxu3  ;;  %v1663_v17 = vld [vmem:[%s9218_s2 + $0xd0] sm:$0xff]  ;;  %v6491_v32 = vpop.f32.mrf.mxu0 }
 0x18b   :  { %v6461_v38 = vadd.f32 %v689_v11, %v6333_v58  ;;  %v1661_v58 = vld [vmem:[%s9218_s2 + $0xc0] sm:$0xff]  ;;  %1801 = vperm.xlu1 %5558, %v1663_v17   ;;  %v1244_v17 = vsel %vm1242_vm3, %v6193_v8, %v6485_v24 }
 0x18c   :  { %1791 = vperm.xlu2 %5559, %v1661_v58   ;;  %1756 = vperm.xlu0 %5557, %v1654_v23   ;;  %v1656_v58 = vld [vmem:[%s9218_s2 + $0x98] sm:$0xff]  ;;  %v1666_v23 = vld [vmem:[%s9218_s2 + $0xe8] sm:$0xff] }
 0x18e   :  { %4866 = vmatmul.msk.f32.gmra.mxu2 %vm116_vm1, %v52_v60  ;;  %4946 = vmatmul.msk.f32.gmra.mxu0 %vm116_vm1, %v4914_v22 }
 0x18f   :  { %4898 = vmatmul.msk.f32.gmra.mxu3 %vm116_vm1, %v52_v60  ;;  %4978 = vmatmul.msk.f32.gmra.mxu1 %vm116_vm1, %v4914_v22  ;;  %v6502_v60 = vpop.f32.mrf.mxu1  ;;  %v1246_v22 = vsel %vm1242_vm3, %v5545_v49, %v6485_v24  ;;  %v4920_v24 = vld [vmem:[%s9217_s1 + $0x278] sm:$0xff] }
 0x190   :  { %1474 = vmatpush.msra.mxu3 %v1246_v22  ;;  %v1658_v22 = vld [vmem:[%s9218_s2 + $0xa8] sm:$0xff] }
 0x191   :  { %v579_v6 = vpop.f32.mrf.mxu2 }
 0x192   :  { %v6489_v7 = vadd.f32 %v579_v6, %v6351_v5  ;;  %v692_v48 = vpop.f32.mrf.mxu3  ;;  %v1245_v5 = vsel %vm1242_vm3, %v5541_v36, %v5545_v49  ;;  %1475 = vmatpush.msra.mxu3 %v1244_v17 }
 0x193   :  { %v6494_v11 = vadd.f32 %v692_v48, %v6353_v25  ;;  %1361 = vmatpush.msra.mxu2 %v1245_v5  ;;  %v1243_v25 = vsel %vm1242_vm3, %v5546_v42, %v6193_v8  ;;  %v1668_v8 = vld [vmem:[%s9218_s2 + $0xf8] sm:$0xff]  ;;  %1766 = vperm.xlu1 %5558, %v1656_v58  }
 0x194   :  { %1816 = vperm.xlu2 %5559, %v1666_v23   ;;  %1826 = vperm.xlu0 %5557, %v1668_v8   ;;  %v54_v48 = vld [vmem:[%s9217_s1 + $0xd8] sm:$0xff]  ;;  %v55_v8 = vld [vmem:[%s9217_s1 + $0xe0] sm:$0xff] }
 0x195   :  { %1362 = vmatpush.msra.mxu2 %v1243_v25 }
 0x196   :  { %4867 = vmatmul.msk.f32.gmra.mxu2 %vm116_vm1, %v53_v1  ;;  %4947 = vmatmul.msk.f32.gmra.mxu0 %vm116_vm1, %v4915_v0 }
 0x197   :  { %4899 = vmatmul.msk.f32.gmra.mxu3 %vm116_vm1, %v53_v1  ;;  %4979 = vmatmul.msk.f32.gmra.mxu1 %vm116_vm1, %v4915_v0  ;;  %v4916_v1 = vld [vmem:[%s9217_s1 + $0x258] sm:$0xff]  ;;  %v6537_v0 = vpop.f32.mrf.mxu0  ;;  %v6539_v5 = vpop.f32.mrf.mxu1 }
 0x199   :  { %v582_v49 = vpop.f32.mrf.mxu2 }
 0x19a   :  { %v6526_v36 = vadd.f32 %v582_v49, %v6374_v43  ;;  %v695_v42 = vpop.f32.mrf.mxu3  ;;  %v1653_v43 = vld [vmem:[%s9218_s2 + $0x80] sm:$0xff] }
 0x19b   :  { %v6529_v6 = vadd.f32 %v695_v42, %v6385_v56  ;;  %v1665_v56 = vld [vmem:[%s9218_s2 + $0xe0] sm:$0xff]  ;;  %1751 = vperm.xlu1 %5558, %v1653_v43  }
 0x19c   :  { %1811 = vperm.xlu2 %5559, %v1665_v56   ;;  %1776 = vperm.xlu0 %5557, %v1658_v22   ;;  %v4917_v49 = vld [vmem:[%s9217_s1 + $0x260] sm:$0xff] }
 0x19e   :  { %4868 = vmatmul.msk.f32.gmra.mxu2 %vm116_vm1, %v54_v48  ;;  %4948 = vmatmul.msk.f32.gmra.mxu0 %vm116_vm1, %v4916_v1 }
 0x19f   :  { %4900 = vmatmul.msk.f32.gmra.mxu3 %vm116_vm1, %v54_v48  ;;  %4980 = vmatmul.msk.f32.gmra.mxu1 %vm116_vm1, %v4916_v1  ;;  %v6568_v42 = vpop.f32.mrf.mxu0  ;;  %v1648_v48 = vld [vmem:[%s9218_s2 + $0x58] sm:$0xff]  ;;  %v6581_v1 = vpop.f32.mrf.mxu1 }
 0x1a1   :  { %v585_v25 = vpop.f32.mrf.mxu2 }
 0x1a2   :  { %v6555_v17 = vadd.f32 %v585_v25, %v6403_v13  ;;  %v698_v58 = vpop.f32.mrf.mxu3  ;;  %v1667_v13 = vld [vmem:[%s9218_s2 + $0xf0] sm:$0xff] }
 0x1a3   :  { %v6558_v23 = vadd.f32 %v698_v58, %v6405_v14  ;;  %v1655_v14 = vld [vmem:[%s9218_s2 + $0x90] sm:$0xff]  ;;  %1821 = vperm.xlu1 %5558, %v1667_v13   ;;  %v56_v58 = vld [vmem:[%s9217_s1 + $0xe8] sm:$0xff] }
 0x1a4   :  { %1761 = vperm.xlu2 %5559, %v1655_v14   ;;  %1726 = vperm.xlu0 %5557, %v1648_v48  }
 0x1a6   :  { %4869 = vmatmul.msk.f32.gmra.mxu2 %vm116_vm1, %v55_v8  ;;  %4949 = vmatmul.msk.f32.gmra.mxu0 %vm116_vm1, %v4917_v49 }
 0x1a7   :  { %4901 = vmatmul.msk.f32.gmra.mxu3 %vm116_vm1, %v55_v8  ;;  %4981 = vmatmul.msk.f32.gmra.mxu1 %vm116_vm1, %v4917_v49  ;;  %v4918_v8 = vld [vmem:[%s9217_s1 + $0x268] sm:$0xff]  ;;  %v1645_v49 = vld [vmem:[%s9218_s2 + $0x40] sm:$0xff]  ;;  %v6608_v13 = vpop.f32.mrf.mxu0  ;;  %v6610_v48 = vpop.f32.mrf.mxu1 }
 0x1a9   :  { %v588_v43 = vpop.f32.mrf.mxu2 }
 0x1aa   :  { %v6584_v56 = vadd.f32 %v588_v43, %v6425_v9  ;;  %v701_v22 = vpop.f32.mrf.mxu3  ;;  %v1657_v9 = vld [vmem:[%s9218_s2 + $0xa0] sm:$0xff] }
 0x1ab   :  { %v6587_v25 = vadd.f32 %v701_v22, %v6429_v46  ;;  %v1646_v46 = vld [vmem:[%s9218_s2 + $0x48] sm:$0xff]  ;;  %1771 = vperm.xlu1 %5558, %v1657_v9   ;;  %v1659_v9 = vld [vmem:[%s9218_s2 + $0xb0] sm:$0xff] }
 0x1ac   :  { %1716 = vperm.xlu2 %5559, %v1646_v46   ;;  %1711 = vperm.xlu0 %5557, %v1645_v49  }
 0x1ae   :  { %4870 = vmatmul.msk.f32.gmra.mxu2 %vm116_vm1, %v56_v58  ;;  %4950 = vmatmul.msk.f32.gmra.mxu0 %vm116_vm1, %v4918_v8 }
 0x1af   :  { %4902 = vmatmul.msk.f32.gmra.mxu3 %vm116_vm1, %v56_v58  ;;  %4982 = vmatmul.msk.f32.gmra.mxu1 %vm116_vm1, %v4918_v8  ;;  %v57_v8 = vld [vmem:[%s9217_s1 + $0xf0] sm:$0xff]  ;;  %v397_v15 = vpop.f32.mrf.mxu1 }
 0x1b1   :  { %v591_v14 = vpop.f32.mrf.mxu2 }
 0x1b2   :  { %v6613_v43 = vadd.f32 %v591_v14, %v6453_v50  ;;  %v704_v22 = vpop.f32.mrf.mxu3  ;;  %v1647_v50 = vld [vmem:[%s9218_s2 + $0x50] sm:$0xff] }
 0x1b3   :  { %v6616_v58 = vadd.f32 %v704_v22, %v6455_v62  ;;  %v1660_v62 = vld [vmem:[%s9218_s2 + $0xb8] sm:$0xff]  ;;  %1721 = vperm.xlu1 %5558, %v1647_v50   ;;  %v1649_v50 = vld [vmem:[%s9218_s2 + $0x60] sm:$0xff] }
 0x1b4   :  { %1786 = vperm.xlu2 %5559, %v1660_v62   ;;  %1781 = vperm.xlu0 %5557, %v1659_v9  }
 0x1b6   :  { %4871 = vmatmul.msk.f32.gmra.mxu2 %vm116_vm1, %v57_v8  ;;  %4951 = vmatmul.msk.f32.gmra.mxu0 %vm116_vm1, %v4919_v2 }
 0x1b7   :  { %4903 = vmatmul.msk.f32.gmra.mxu3 %vm116_vm1, %v57_v8  ;;  %4983 = vmatmul.msk.f32.gmra.mxu1 %vm116_vm1, %v4919_v2  ;;  %v284_v2 = vpop.f32.mrf.mxu0  ;;  %v58_v8 = vld [vmem:[%s9217_s1 + $0xf8] sm:$0xff]  ;;  %v400_v45 = vpop.f32.mrf.mxu1 }
 0x1b9   :  { %v594_v46 = vpop.f32.mrf.mxu2 }
 0x1ba   :  { %v6638_v49 = vadd.f32 %v594_v46, %v6491_v32  ;;  %v707_v14 = vpop.f32.mrf.mxu3  ;;  %v1638_v32 = vld [vmem:[%s9218_s2 + $0x8] sm:$0xff] }
 0x1bb   :  { %v6641_v22 = vadd.f32 %v707_v14, %v6502_v60  ;;  %v1650_v60 = vld [vmem:[%s9218_s2 + $0x68] sm:$0xff]  ;;  %1676 = vperm.xlu1 %5558, %v1638_v32   ;;  %v4921_v14 = vld [vmem:[%s9217_s1 + $0x280] sm:$0xff] }
 0x1bc   :  { %1736 = vperm.xlu2 %5559, %v1650_v60   ;;  %1731 = vperm.xlu0 %5557, %v1649_v50  }
 0x1be   :  { %4872 = vmatmul.msk.f32.gmra.mxu2 %vm116_vm1, %v58_v8  ;;  %4952 = vmatmul.msk.f32.gmra.mxu0 %vm116_vm1, %v4920_v24 }
 0x1bf   :  { %4904 = vmatmul.msk.f32.gmra.mxu3 %vm116_vm1, %v58_v8  ;;  %4984 = vmatmul.msk.f32.gmra.mxu1 %vm116_vm1, %v4920_v24  ;;  %v5001_v8 = vld [vmem:[%s9217_s1 + $0x300] sm:$0xff]  ;;  %v287_v10 = vpop.f32.mrf.mxu0 }
 0x1c1   :  { %v597_v62 = vpop.f32.mrf.mxu2 }
 0x1c2   :  { %v6663_v9 = vadd.f32 %v597_v62, %v6537_v0  ;;  %v710_v46 = vpop.f32.mrf.mxu3  ;;  %v1640_v0 = vld [vmem:[%s9218_s2 + $0x18] sm:$0xff] }
 0x1c3   :  { %v6666_v24 = vadd.f32 %v710_v46, %v6539_v5  ;;  %v1639_v5 = vld [vmem:[%s9218_s2 + $0x10] sm:$0xff]  ;;  %v4922_v46 = vld [vmem:[%s9217_s1 + $0x288] sm:$0xff] }
 0x1c4   :  { %9266 = vst [vmem:[#allocation21_spill] sm:$0xff] %v6663_v9  ;;  %1686 = vperm.xlu2 %5559, %v1640_v0   ;;  %1681 = vperm.xlu0 %5557, %v1639_v5  }
 0x1c5   :  { %9267 = vst [vmem:[#allocation22_spill] sm:$0xff] %v6666_v24 }
 0x1c6   :  { %4953 = vmatmul.msk.f32.gmra.mxu0 %vm116_vm1, %v4921_v14  ;;  %5033 = vmatmul.msk.f32.vlgmr.msra.gmra.mxu2 %vm116_vm1, %v5001_v8 }
 0x1c7   :  { %4985 = vmatmul.msk.f32.gmra.mxu1 %vm116_vm1, %v4921_v14  ;;  %5065 = vmatmul.msk.f32.vlgmr.msra.gmra.mxu3 %vm116_vm1, %v5001_v8  ;;  %v5002_v14 = vld [vmem:[%s9217_s1 + $0x308] sm:$0xff]  ;;  %v290_v8 = vpop.f32.mrf.mxu0 }
 0x1c9   :  { %v600_v32 = vpop.f32.mrf.mxu2 }
 0x1ca   :  { %v6685_v60 = vadd.f32 %v600_v32, %v6568_v42  ;;  %v713_v50 = vpop.f32.mrf.mxu3  ;;  %v1637_v42 = vld [vmem:[%s9218_s2] sm:$0xff] }
 0x1cb   :  { %v6688_v62 = vadd.f32 %v713_v50, %v6581_v1  ;;  %v403_v1 = vpop.f32.mrf.mxu1 }
 0x1cc   :  { %9268 = vst [vmem:[#allocation23_spill] sm:$0xff] %v6685_v60  ;;  %1671 = vperm.xlu2 %5559, %v1637_v42  }
 0x1cd   :  { %9269 = vst [vmem:[#allocation24_spill] sm:$0xff] %v6688_v62 }
 0x1ce   :  { %4954 = vmatmul.msk.f32.gmra.mxu0 %vm116_vm1, %v4922_v46  ;;  %5034 = vmatmul.msk.f32.gmra.mxu2 %vm116_vm1, %v5002_v14 }
 0x1cf   :  { %4986 = vmatmul.msk.f32.gmra.mxu1 %vm116_vm1, %v4922_v46  ;;  %5066 = vmatmul.msk.f32.gmra.mxu3 %vm116_vm1, %v5002_v14  ;;  %v4923_v46 = vld [vmem:[%s9217_s1 + $0x290] sm:$0xff]  ;;  %v293_v42 = vpop.f32.mrf.mxu0 }
 0x1d0   :  { %v5003_v14 = vld [vmem:[%s9217_s1 + $0x310] sm:$0xff] }
 0x1d1   :  { %v603_v0 = vpop.f32.mrf.mxu2 }
 0x1d2   :  { %v6704_v5 = vadd.f32 %v603_v0, %v6608_v13  ;;  %v716_v32 = vpop.f32.mrf.mxu3  ;;  %v1652_v13 = vld [vmem:[%s9218_s2 + $0x78] sm:$0xff] }
 0x1d3   :  { %v6707_v50 = vadd.f32 %v716_v32, %v6610_v48  ;;  %v1641_v48 = vld [vmem:[%s9218_s2 + $0x20] sm:$0xff]  ;;  %1746 = vperm.xlu1 %5558, %v1652_v13   ;;  %v406_v32 = vpop.f32.mrf.mxu1 }
 0x1d4   :  { %9270 = vst [vmem:[#allocation25_spill] sm:$0xff] %v6704_v5  ;;  %1691 = vperm.xlu0 %5557, %v1641_v48   ;;  %v5017_v5 = vld [vmem:[%s9217_s1 + $0x380] sm:$0xff] }
 0x1d5   :  { %9271 = vst [vmem:[#allocation26_spill] sm:$0xff] %v6707_v50 }
 0x1d6   :  { %4955 = vmatmul.msk.f32.gmra.mxu0 %vm116_vm1, %v4923_v46  ;;  %5035 = vmatmul.msk.f32.gmra.mxu2 %vm116_vm1, %v5003_v14 }
 0x1d7   :  { %4987 = vmatmul.msk.f32.gmra.mxu1 %vm116_vm1, %v4923_v46  ;;  %5067 = vmatmul.msk.f32.gmra.mxu3 %vm116_vm1, %v5003_v14  ;;  %v4924_v46 = vld [vmem:[%s9217_s1 + $0x298] sm:$0xff]  ;;  %v296_v48 = vpop.f32.mrf.mxu0 }
 0x1d8   :  { %v5004_v14 = vld [vmem:[%s9217_s1 + $0x318] sm:$0xff] }
 0x1d9   :  { %v606_v0 = vpop.f32.mrf.mxu2 }
 0x1da   :  { %v6725_v44 = vadd.f32 %v606_v0, %v284_v2  ;;  %v719_v41 = vpop.f32.mrf.mxu3 }
 0x1db   :  { %v6727_v39 = vadd.f32 %v719_v41, %v397_v15  ;;  %v1642_v15 = vld [vmem:[%s9218_s2 + $0x28] sm:$0xff] }
 0x1dc   :  { %9272 = vst [vmem:[#allocation27_spill] sm:$0xff] %v6725_v44  ;;  %1696 = vperm.xlu1 %5558, %v1642_v15  }
 0x1dd   :  { %9273 = vst [vmem:[#allocation28_spill] sm:$0xff] %v6727_v39 }
 0x1de   :  { %4956 = vmatmul.msk.f32.gmra.mxu0 %vm116_vm1, %v4924_v46  ;;  %5036 = vmatmul.msk.f32.gmra.mxu2 %vm116_vm1, %v5004_v14 }
 0x1df   :  { %4988 = vmatmul.msk.f32.gmra.mxu1 %vm116_vm1, %v4924_v46  ;;  %5068 = vmatmul.msk.f32.gmra.mxu3 %vm116_vm1, %v5004_v14  ;;  %v5005_v46 = vld [vmem:[%s9217_s1 + $0x320] sm:$0xff]  ;;  %v409_v14 = vpop.f32.mrf.mxu1  ;;  %v299_v29 = vpop.f32.mrf.mxu0 }
 0x1e1   :  { %v609_v41 = vpop.f32.mrf.mxu2 }
 0x1e2   :  { %v6742_v2 = vadd.f32 %v609_v41, %v287_v10  ;;  %v722_v13 = vpop.f32.mrf.mxu3 }
 0x1e3   :  { %v6744_v0 = vadd.f32 %v722_v13, %v400_v45  ;;  %v4926_v13 = vld [vmem:[%s9217_s1 + $0x2a8] sm:$0xff] }
 0x1e4   :  { %9274 = vst [vmem:[#allocation29_spill] sm:$0xff] %v6742_v2 }
 0x1e5   :  { %9275 = vst [vmem:[#allocation30_spill] sm:$0xff] %v6744_v0  ;;  %v5016_v0 = vld [vmem:[%s9217_s1 + $0x378] sm:$0xff] }
 0x1e6   :  { %4957 = vmatmul.msk.f32.gmra.mxu0 %vm116_vm1, %v4925_v35  ;;  %5037 = vmatmul.msk.f32.gmra.mxu2 %vm116_vm1, %v5005_v46 }
 0x1e7   :  { %4989 = vmatmul.msk.f32.gmra.mxu1 %vm116_vm1, %v4925_v35  ;;  %5069 = vmatmul.msk.f32.gmra.mxu3 %vm116_vm1, %v5005_v46  ;;  %v412_v28 = vpop.f32.mrf.mxu1  ;;  %v1644_v35 = vld [vmem:[%s9218_s2 + $0x38] sm:$0xff] }
 0x1e8   :  { %1706 = vperm.xlu1 %5558, %v1644_v35  }
 0x1e9   :  { %v612_v10 = vpop.f32.mrf.mxu2 }
 0x1ea   :  { %v6756_v45 = vadd.f32 %v612_v10, %v290_v8  ;;  %v725_v15 = vpop.f32.mrf.mxu3 }
 0x1eb   :  { %v6758_v41 = vadd.f32 %v725_v15, %v403_v1  ;;  %v4927_v15 = vld [vmem:[%s9217_s1 + $0x2b0] sm:$0xff] }
 0x1ec   :  { %9276 = vst [vmem:[#allocation31_spill] sm:$0xff] %v6756_v45 }
 0x1ed   :  { %9277 = vst [vmem:[#allocation32_spill] sm:$0xff] %v6758_v41  ;;  %v5015_v41 = vld [vmem:[%s9217_s1 + $0x370] sm:$0xff] }
 0x1ee   :  { %4958 = vmatmul.msk.f32.gmra.mxu0 %vm116_vm1, %v4926_v13  ;;  %5038 = vmatmul.msk.f32.gmra.mxu2 %vm116_vm1, %v5006_v34 }
 0x1ef   :  { %4990 = vmatmul.msk.f32.gmra.mxu1 %vm116_vm1, %v4926_v13  ;;  %5070 = vmatmul.msk.f32.gmra.mxu3 %vm116_vm1, %v5006_v34  ;;  %v5007_v13 = vld [vmem:[%s9217_s1 + $0x330] sm:$0xff]  ;;  %v6785_v34 = vpop.f32.mrf.mxu0 }
 0x1f1   :  { %v615_v8 = vpop.f32.mrf.mxu2 }
 0x1f2   :  { %v6773_v1 = vadd.f32 %v615_v8, %v293_v42  ;;  %v728_v46 = vpop.f32.mrf.mxu3  ;;  %v1651_v42 = vld [vmem:[%s9218_s2 + $0x70] sm:$0xff]  ;;  %v6794_v8 = vpop.permute.xlu2 %1791 }
 0x1f3   :  { %v6775_v10 = vadd.f32 %v728_v46, %v406_v32  ;;  %v6792_v32 = vpop.f32.mrf.mxu1  ;;  %1741 = vperm.xlu2 %5559, %v1651_v42   ;;  %9280 = vst [vmem:[#allocation35_spill] sm:$0xff] %v6794_v8 }
 0x1f4   :  { %9278 = vst [vmem:[#allocation33_spill] sm:$0xff] %v6773_v1 }
 0x1f5   :  { %9279 = vst [vmem:[#allocation34_spill] sm:$0xff] %v6775_v10  ;;  %v4934_v10 = vld [vmem:[%s9217_s1 + $0x2e8] sm:$0xff] }
 0x1f6   :  { %4959 = vmatmul.msk.f32.gmra.mxu0 %vm116_vm1, %v4927_v15  ;;  %5039 = vmatmul.msk.f32.gmra.mxu2 %vm116_vm1, %v5007_v13 }
 0x1f7   :  { %4991 = vmatmul.msk.f32.gmra.mxu1 %vm116_vm1, %v4927_v15  ;;  %5071 = vmatmul.msk.f32.gmra.mxu3 %vm116_vm1, %v5007_v13  ;;  %v4928_v15 = vld [vmem:[%s9217_s1 + $0x2b8] sm:$0xff] }
 0x1f8   :  { %v5008_v13 = vld [vmem:[%s9217_s1 + $0x338] sm:$0xff] }
 0x1f9   :  { %v618_v35 = vpop.f32.mrf.mxu2 }
 0x1fa   :  { %v6796_v46 = vadd.f32 %v618_v35, %v296_v48  ;;  %v731_v18 = vpop.f32.mrf.mxu3  ;;  %v6813_v48 = vpop.f32.mrf.mxu0 }
 0x1fb   :  { %v6798_v16 = vadd.f32 %v731_v18, %v409_v14  ;;  %v1643_v18 = vld [vmem:[%s9218_s2 + $0x30] sm:$0xff]  ;;  %v6815_v42 = vpop.f32.mrf.mxu1  ;;  %v6827_v59 = vpop.permute.xlu2 %1816 }
 0x1fc   :  { %9281 = vst [vmem:[#allocation36_spill] sm:$0xff] %v6796_v46  ;;  %1701 = vperm.xlu2 %5559, %v1643_v18   ;;  %v4930_v18 = vld [vmem:[%s9217_s1 + $0x2c8] sm:$0xff] }
 0x1fd   :  { %9282 = vst [vmem:[#allocation37_spill] sm:$0xff] %v6798_v16 }
 0x1fe   :  { %4960 = vmatmul.msk.f32.gmra.mxu0 %vm116_vm1, %v4928_v15  ;;  %5040 = vmatmul.msk.f32.gmra.mxu2 %vm116_vm1, %v5008_v13  ;;  %9285 = vst [vmem:[#allocation40_spill] sm:$0xff] %v6827_v59 }
 0x1ff   :  { %4992 = vmatmul.msk.f32.gmra.mxu1 %vm116_vm1, %v4928_v15  ;;  %5072 = vmatmul.msk.f32.gmra.mxu3 %vm116_vm1, %v5008_v13  ;;  %v4929_v15 = vld [vmem:[%s9217_s1 + $0x2c0] sm:$0xff] }
 0x200   :  { %v5009_v13 = vld [vmem:[%s9217_s1 + $0x340] sm:$0xff] }
 0x201   :  { %v621_v14 = vpop.f32.mrf.mxu2 }
 0x202   :  { %v6817_v35 = vadd.f32 %v621_v14, %v299_v29  ;;  %v734_v61 = vpop.f32.mrf.mxu3  ;;  %v5010_v14 = vld [vmem:[%s9217_s1 + $0x348] sm:$0xff]  ;;  %v6845_v59 = vpop.f32.mrf.mxu0 }
 0x203   :  { %v6819_v8 = vadd.f32 %v734_v61, %v412_v28  ;;  %v6835_v28 = vpop.permute.xlu0 %1796  ;;  %v6847_v4 = vpop.f32.mrf.mxu1 }
 0x204   :  { %9283 = vst [vmem:[#allocation38_spill] sm:$0xff] %v6817_v35 }
 0x205   :  { %9284 = vst [vmem:[#allocation39_spill] sm:$0xff] %v6819_v8  ;;  %v5012_v8 = vld [vmem:[%s9217_s1 + $0x358] sm:$0xff] }
 0x206   :  { %4961 = vmatmul.msk.f32.gmra.mxu0 %vm116_vm1, %v4929_v15  ;;  %5041 = vmatmul.msk.f32.gmra.mxu2 %vm116_vm1, %v5009_v13  ;;  %9287 = vst [vmem:[#allocation42_spill] sm:$0xff] %v6835_v28 }
 0x207   :  { %4993 = vmatmul.msk.f32.gmra.mxu1 %vm116_vm1, %v4929_v15  ;;  %5073 = vmatmul.msk.f32.gmra.mxu3 %vm116_vm1, %v5009_v13  ;;  %v6849_v15 = vpop.permute.xlu2 %1811 }
 0x208   :  { %9289 = vst [vmem:[#allocation44_spill] sm:$0xff] %v6849_v15  ;;  %v5011_v15 = vld [vmem:[%s9217_s1 + $0x350] sm:$0xff] }
 0x209   :  { %v6833_v61 = vpop.f32.mrf.mxu2 }
 0x20a   :  { %9286 = vst [vmem:[#allocation41_spill] sm:$0xff] %v6833_v61  ;;  %v6837_v29 = vpop.f32.mrf.mxu3  ;;  %v6867_v55 = vpop.f32.mrf.mxu0 }
 0x20b   :  { %9288 = vst [vmem:[#allocation43_spill] sm:$0xff] %v6837_v29  ;;  %v6865_v29 = vpop.permute.xlu0 %1756  ;;  %v6869_v61 = vpop.f32.mrf.mxu1 }
 0x20c   :  { %9292 = vst [vmem:[#allocation47_spill] sm:$0xff] %v6865_v29  ;;  %v4936_v29 = vld [vmem:[%s9217_s1 + $0x2f8] sm:$0xff] }
 0x20e   :  { %4962 = vmatmul.msk.f32.gmra.mxu0 %vm116_vm1, %v4930_v18  ;;  %5042 = vmatmul.msk.f32.gmra.mxu2 %vm116_vm1, %v5010_v14 }
 0x20f   :  { %4994 = vmatmul.msk.f32.gmra.mxu1 %vm116_vm1, %v4930_v18  ;;  %5074 = vmatmul.msk.f32.gmra.mxu3 %vm116_vm1, %v5010_v14  ;;  %v6875_v18 = vpop.permute.xlu2 %1761 }
 0x210   :  { %9293 = vst [vmem:[#allocation48_spill] sm:$0xff] %v6875_v18 }
 0x211   :  { %v6855_v13 = vpop.f32.mrf.mxu2 }
 0x212   :  { %9290 = vst [vmem:[#allocation45_spill] sm:$0xff] %v6855_v13  ;;  %v6857_v28 = vpop.f32.mrf.mxu3 }
 0x213   :  { %9291 = vst [vmem:[#allocation46_spill] sm:$0xff] %v6857_v28  ;;  %v6879_v28 = vpop.permute.xlu1 %1806  ;;  %v6889_v35 = vpop.permute.xlu0 %1826 }
 0x214   :  { %9295 = vst [vmem:[#allocation50_spill] sm:$0xff] %v6879_v28 }
 0x215   :  { %9297 = vst [vmem:[#allocation52_spill] sm:$0xff] %v6889_v35  ;;  %v4933_v35 = vld [vmem:[%s9217_s1 + $0x2e0] sm:$0xff] }
 0x216   :  { %4963 = vmatmul.msk.f32.gmra.mxu0 %vm116_vm1, %v4931_v3  ;;  %5043 = vmatmul.msk.f32.gmra.mxu2 %vm116_vm1, %v5011_v15 }
 0x217   :  { %4995 = vmatmul.msk.f32.gmra.mxu1 %vm116_vm1, %v4931_v3  ;;  %5075 = vmatmul.msk.f32.gmra.mxu3 %vm116_vm1, %v5011_v15  ;;  %v6895_v3 = vpop.f32.mrf.mxu0  ;;  %v6897_v15 = vpop.f32.mrf.mxu1 }
 0x219   :  { %v6877_v14 = vpop.f32.mrf.mxu2 }
 0x21a   :  { %9294 = vst [vmem:[#allocation49_spill] sm:$0xff] %v6877_v14  ;;  %v6881_v13 = vpop.f32.mrf.mxu3 }
 0x21b   :  { %9296 = vst [vmem:[#allocation51_spill] sm:$0xff] %v6881_v13  ;;  %v6901_v13 = vpop.permute.xlu2 %1716  ;;  %v6905_v16 = vpop.permute.xlu1 %1801 }
 0x21c   :  { %9300 = vst [vmem:[#allocation55_spill] sm:$0xff] %v6905_v16 }
 0x21e   :  { %4964 = vmatmul.msk.f32.gmra.mxu0 %vm116_vm1, %v4932_v54  ;;  %5044 = vmatmul.msk.f32.gmra.mxu2 %vm116_vm1, %v5012_v8 }
 0x21f   :  { %4996 = vmatmul.msk.f32.gmra.mxu1 %vm116_vm1, %v4932_v54  ;;  %5076 = vmatmul.msk.f32.gmra.mxu3 %vm116_vm1, %v5012_v8  ;;  %v5013_v54 = vld [vmem:[%s9217_s1 + $0x360] sm:$0xff]  ;;  %v6917_v8 = vpop.permute.xlu0 %1776  ;;  %v6925_v46 = vpop.f32.mrf.mxu1 }
 0x220   :  { %9301 = vst [vmem:[#allocation56_spill] sm:$0xff] %v6917_v8 }
 0x221   :  { %v6899_v28 = vpop.f32.mrf.mxu2 }
 0x222   :  { %9298 = vst [vmem:[#allocation53_spill] sm:$0xff] %v6899_v28  ;;  %v6903_v14 = vpop.f32.mrf.mxu3  ;;  %v6921_v28 = vpop.f32.mrf.mxu0 }
 0x223   :  { %9299 = vst [vmem:[#allocation54_spill] sm:$0xff] %v6903_v14  ;;  %v6933_v1 = vpop.permute.xlu2 %1786 }
 0x224   :  { %9304 = vst [vmem:[#allocation59_spill] sm:$0xff] %v6933_v1  ;;  %v4935_v1 = vld [vmem:[%s9217_s1 + $0x2f0] sm:$0xff] }
 0x226   :  { %4965 = vmatmul.msk.f32.gmra.mxu0 %vm116_vm1, %v4933_v35  ;;  %5045 = vmatmul.msk.f32.gmra.mxu2 %vm116_vm1, %v5013_v54 }
 0x227   :  { %4997 = vmatmul.msk.f32.gmra.mxu1 %vm116_vm1, %v4933_v35  ;;  %5077 = vmatmul.msk.f32.gmra.mxu3 %vm116_vm1, %v5013_v54  ;;  %v5014_v35 = vld [vmem:[%s9217_s1 + $0x368] sm:$0xff]  ;;  %v6935_v54 = vpop.permute.xlu1 %1766 }
 0x228   :  { %9305 = vst [vmem:[#allocation60_spill] sm:$0xff] %v6935_v54  ;;  %v6955_v54 = vpop.f32.mrf.mxu1 }
 0x229   :  { %v6919_v14 = vpop.f32.mrf.mxu2 }
 0x22a   :  { %9302 = vst [vmem:[#allocation57_spill] sm:$0xff] %v6919_v14  ;;  %v6923_v16 = vpop.f32.mrf.mxu3  ;;  %v6943_v14 = vpop.permute.xlu0 %1726 }
 0x22b   :  { %9303 = vst [vmem:[#allocation58_spill] sm:$0xff] %v6923_v16  ;;  %v6953_v45 = vpop.f32.mrf.mxu0 }
 0x22e   :  { %4966 = vmatmul.msk.f32.gmra.mxu0 %vm116_vm1, %v4934_v10  ;;  %5046 = vmatmul.msk.f32.gmra.mxu2 %vm116_vm1, %v5014_v35 }
 0x22f   :  { %4998 = vmatmul.msk.f32.gmra.mxu1 %vm116_vm1, %v4934_v10  ;;  %5078 = vmatmul.msk.f32.gmra.mxu3 %vm116_vm1, %v5014_v35  ;;  %v6957_v10 = vpop.permute.xlu2 %1736  ;;  %v6961_v35 = vpop.permute.xlu1 %1751 }
 0x230   :  { %9308 = vst [vmem:[#allocation63_spill] sm:$0xff] %v6961_v35 }
 0x231   :  { %v6941_v16 = vpop.f32.mrf.mxu2 }
 0x232   :  { %9306 = vst [vmem:[#allocation61_spill] sm:$0xff] %v6941_v16  ;;  %v6945_v8 = vpop.f32.mrf.mxu3  ;;  %v6975_v2 = vpop.permute.xlu0 %1711 }
 0x233   :  { %9307 = vst [vmem:[#allocation62_spill] sm:$0xff] %v6945_v8  ;;  %v6977_v50 = vpop.f32.mrf.mxu0 }
 0x236   :  { %4967 = vmatmul.msk.f32.gmra.mxu0 %vm116_vm1, %v4935_v1  ;;  %5047 = vmatmul.msk.f32.gmra.mxu2 %vm116_vm1, %v5015_v41 }
 0x237   :  { %4999 = vmatmul.msk.f32.gmra.mxu1 %vm116_vm1, %v4935_v1  ;;  %5079 = vmatmul.msk.f32.gmra.mxu3 %vm116_vm1, %v5015_v41  ;;  %v6981_v41 = vpop.f32.mrf.mxu1  ;;  %v6985_v1 = vpop.permute.xlu2 %1686 }
 0x239   :  { %v6965_v8 = vpop.f32.mrf.mxu2 }
 0x23a   :  { %9309 = vst [vmem:[#allocation64_spill] sm:$0xff] %v6965_v8  ;;  %v6967_v16 = vpop.f32.mrf.mxu3  ;;  %v6996_v35 = vpop.permute.xlu0 %1781 }
 0x23b   :  { %9310 = vst [vmem:[#allocation65_spill] sm:$0xff] %v6967_v16  ;;  %v6987_v16 = vpop.permute.xlu1 %1821 }
 0x23c   :  { %9311 = vst [vmem:[#allocation66_spill] sm:$0xff] %v6987_v16 }
 0x23d   :  { %9314 = vst [vmem:[#allocation69_spill] sm:$0xff] %v6996_v35  ;;  %v5018_v35 = vld [vmem:[%s9217_s1 + $0x388] sm:$0xff] }
 0x23e   :  { %4968 = vmatmul.msk.f32.gmra.mxu0 %vm116_vm1, %v4936_v29  ;;  %5048 = vmatmul.msk.f32.gmra.mxu2 %vm116_vm1, %v5016_v0 }
 0x23f   :  { %5000 = vmatmul.msk.f32.gmra.mxu1 %vm116_vm1, %v4936_v29  ;;  %5080 = vmatmul.msk.f32.gmra.mxu3 %vm116_vm1, %v5016_v0  ;;  %v1135_v0 = vadd.f32 %v6785_v34, %v6296_v51  ;;  %v1136_v29 = vadd.f32 %v6792_v32, %v6299_v57  ;;  %v1137_v57 = vadd.f32 %v6813_v48, %v6316_v53 }
 0x240   :  { %v1139_v53 = vadd.f32 %v6845_v59, %v6336_v19  ;;  %v1140_v48 = vadd.f32 %v6847_v4, %v6339_v21  ;;  %v1141_v4 = vadd.f32 %v6867_v55, %v6356_v26 }
 0x241   :  { %v6989_v8 = vpop.f32.mrf.mxu2 }
 0x242   :  { %9312 = vst [vmem:[#allocation67_spill] sm:$0xff] %v6989_v8  ;;  %v6991_v18 = vpop.f32.mrf.mxu3  ;;  %v1672_v8 = vpop.permute.xlu2 %1671 }
 0x243   :  { %9313 = vst [vmem:[#allocation68_spill] sm:$0xff] %v6991_v18  ;;  %v7004_v44 = vpop.permute.xlu1 %1771  ;;  %v7011_v51 = vpop.permute.xlu0 %1731 }
 0x244   :  { %9315 = vst [vmem:[#allocation70_spill] sm:$0xff] %v7004_v44 }
 0x246   :  { %5049 = vmatmul.msk.f32.gmra.mxu2 %vm116_vm1, %v5017_v5 }
 0x247   :  { %5081 = vmatmul.msk.f32.gmra.mxu3 %vm116_vm1, %v5017_v5 }
 0x249   :  { %v1364_v16 = vpop.f32.mrf.mxu2 }
 0x24a   :  { %v1573_v39 = vadd.f32 %v1364_v16, %v1135_v0  ;;  %v1477_v18 = vpop.f32.mrf.mxu3  ;;  %v1138_v16 = vadd.f32 %v6815_v42, %v6319_v12  ;;  %v7028_v12 = vpop.f32.mrf.mxu1 }
 0x24b   :  { %v1574_v62 = vadd.f32 %v1477_v18, %v1136_v29 }
 0x24c   :  { %v1829_v60 = vadd.f32 %v1672_v8, %v1573_v39  ;;  %v5019_v39 = vld [vmem:[%s9217_s1 + $0x390] sm:$0xff] }
 0x24d   :  { %v1830_v24 = vadd.f32 %v1672_v8, %v1574_v62  ;;  %v7020_v62 = vpop.permute.xlu1 %1721  ;;  %v7023_v8 = vpop.f32.mrf.mxu0 }
 0x24e   :  { %5050 = vmatmul.msk.f32.gmra.mxu2 %vm116_vm1, %v5018_v35 }
 0x24f   :  { %5082 = vmatmul.msk.f32.gmra.mxu3 %vm116_vm1, %v5018_v35  ;;  %v1682_v35 = vpop.permute.xlu0 %1681  ;;  %v1894_v59 = vmax.f32 %v1830_v24, 0.0 }
 0x251   :  { %v1367_v5 = vpop.f32.mrf.mxu2 }
 0x252   :  { %v1575_v34 = vadd.f32 %v1367_v5, %v1137_v57  ;;  %v1480_v32 = vpop.f32.mrf.mxu3 }
 0x253   :  { %v1576_v18 = vadd.f32 %v1480_v32, %v1138_v16  ;;  %v5020_v16 = vld [vmem:[%s9217_s1 + $0x398] sm:$0xff] }
 0x255   :  { %v1677_v19 = vpop.permute.xlu1 %1676 }
 0x256   :  { %5051 = vmatmul.msk.f32.gmra.mxu2 %vm116_vm1, %v5019_v39 }
 0x257   :  { %5083 = vmatmul.msk.f32.gmra.mxu3 %vm116_vm1, %v5019_v39  ;;  %v1893_v39 = vmax.f32 %v1829_v60, 0.0  ;;  %v7043_v60 = vpop.f32.mrf.mxu1 }
 0x259   :  { %v1370_v42 = vpop.f32.mrf.mxu2 }
 0x25a   :  { %v1577_v0 = vadd.f32 %v1370_v42, %v1139_v53  ;;  %v1483_v29 = vpop.f32.mrf.mxu3  ;;  %v1142_v53 = vadd.f32 %v6869_v61, %v6359_v31 }
 0x25b   :  { %v1578_v57 = vadd.f32 %v1483_v29, %v1140_v48  ;;  %v7041_v48 = vpop.f32.mrf.mxu0 }
 0x25c   :  { %v1833_v5 = vadd.f32 %v1682_v35, %v1577_v0  ;;  %v1831_v0 = vadd.f32 %v1677_v19, %v1575_v34 }
 0x25d   :  { %v1834_v32 = vadd.f32 %v1682_v35, %v1578_v57  ;;  %v1832_v57 = vadd.f32 %v1677_v19, %v1576_v18  ;;  %v7052_v34 = vpop.permute.xlu1 %1746  ;;  %v1143_v18 = vadd.f32 %v6895_v3, %v6372_v27  ;;  %v1692_v19 = vpop.permute.xlu0 %1691 }
 0x25e   :  { %v1897_v44 = vmax.f32 %v1833_v5, 0.0  ;;  %5052 = vmatmul.msk.f32.gmra.mxu2 %vm116_vm1, %v5020_v16  ;;  %v1895_v26 = vmax.f32 %v1831_v0, 0.0 }
 0x25f   :  { %v1898_v9 = vmax.f32 %v1834_v32, 0.0  ;;  %5084 = vmatmul.msk.f32.gmra.mxu3 %vm116_vm1, %v5020_v16  ;;  %v5021_v16 = vld [vmem:[%s9217_s1 + $0x3a0] sm:$0xff] }
 0x260   :  { %v1957_v21 = vmax.f32 %v1893_v39, %v1897_v44  ;;  %v1144_v39 = vadd.f32 %v6897_v15, %v6377_v47  ;;  %v7067_v15 = vpop.permute.xlu2 %1741 }
 0x261   :  { %v1958_v42 = vmax.f32 %v1894_v59, %v1898_v9  ;;  %v1373_v35 = vpop.f32.mrf.mxu2  ;;  %v1896_v9 = vmax.f32 %v1832_v57, 0.0 }
 0x262   :  { %v1579_v29 = vadd.f32 %v1373_v35, %v1141_v4  ;;  %v1486_v24 = vpop.f32.mrf.mxu3 }
 0x263   :  { %v1580_v5 = vadd.f32 %v1486_v24, %v1142_v53  ;;  %v7058_v35 = vpop.f32.mrf.mxu0  ;;  %v7063_v24 = vpop.f32.mrf.mxu1 }
 0x264   :  { %v1835_v55 = vadd.f32 %v6985_v1, %v1579_v29  ;;  %v5022_v29 = vld [vmem:[%s9217_s1 + $0x3a8] sm:$0xff] }
 0x265   :  { %v1836_v44 = vadd.f32 %v6985_v1, %v1580_v5  ;;  %v1145_v5 = vadd.f32 %v6921_v28, %v6392_v33 }
 0x266   :  { %v1899_v31 = vmax.f32 %v1835_v55, 0.0  ;;  %5053 = vmatmul.msk.f32.gmra.mxu2 %vm116_vm1, %v5021_v16  ;;  %v1146_v55 = vadd.f32 %v6925_v46, %v6395_v63  ;;  %v1147_v46 = vadd.f32 %v6953_v45, %v6412_v40 }
 0x267   :  { %v1900_v61 = vmax.f32 %v1836_v44, 0.0  ;;  %5085 = vmatmul.msk.f32.gmra.mxu3 %vm116_vm1, %v5021_v16 }
 0x268   :  { %v1959_v32 = vmax.f32 %v1895_v26, %v1899_v31  ;;  %v1697_v31 = vpop.permute.xlu1 %1696 }
 0x269   :  { %v1376_v59 = vpop.f32.mrf.mxu2  ;;  %v1960_v1 = vmax.f32 %v1896_v9, %v1900_v61 }
 0x26a   :  { %v1581_v4 = vadd.f32 %v1376_v59, %v1143_v18  ;;  %v1489_v53 = vpop.f32.mrf.mxu3 }
 0x26b   :  { %v1582_v0 = vadd.f32 %v1489_v53, %v1144_v39  ;;  %v5023_v39 = vld [vmem:[%s9217_s1 + $0x3b0] sm:$0xff]  ;;  %v7078_v53 = vpop.f32.mrf.mxu1 }
 0x26c   :  { %v1837_v57 = vadd.f32 %v1692_v19, %v1581_v4 }
 0x26d   :  { %v1838_v27 = vadd.f32 %v1692_v19, %v1582_v0  ;;  %v7076_v19 = vpop.f32.mrf.mxu0 }
 0x26e   :  { %v1901_v3 = vmax.f32 %v1837_v57, 0.0  ;;  %5054 = vmatmul.msk.f32.gmra.mxu2 %vm116_vm1, %v5022_v29 }
 0x26f   :  { %v1902_v47 = vmax.f32 %v1838_v27, 0.0  ;;  %5086 = vmatmul.msk.f32.gmra.mxu3 %vm116_vm1, %v5022_v29  ;;  %v1702_v29 = vpop.permute.xlu2 %1701 }
 0x270   :  { %v1961_v16 = vmax.f32 %v1957_v21, %v1901_v3  ;;  %v1148_v21 = vadd.f32 %v6955_v54, %v6415_v20  ;;  %v1149_v20 = vadd.f32 %v6977_v50, %v6432_v30 }
 0x271   :  { %v1962_v44 = vmax.f32 %v1958_v42, %v1902_v47  ;;  %v1379_v26 = vpop.f32.mrf.mxu2  ;;  %v5024_v47 = vld [vmem:[%s9217_s1 + $0x3b8] sm:$0xff] }
 0x272   :  { %v1583_v9 = vadd.f32 %v1379_v26, %v1145_v5  ;;  %v1492_v61 = vpop.f32.mrf.mxu3 }
 0x273   :  { %v1584_v18 = vadd.f32 %v1492_v61, %v1146_v55  ;;  %v7095_v54 = vpop.f32.mrf.mxu1  ;;  %v1707_v61 = vpop.permute.xlu1 %1706 }
 0x274   :  { %v1839_v59 = vadd.f32 %v1697_v31, %v1583_v9 }
 0x275   :  { %v1840_v4 = vadd.f32 %v1697_v31, %v1584_v18  ;;  %v7090_v40 = vpop.f32.mrf.mxu0 }
 0x276   :  { %v1903_v33 = vmax.f32 %v1839_v59, 0.0  ;;  %5055 = vmatmul.msk.f32.gmra.mxu2 %vm116_vm1, %v5023_v39 }
 0x277   :  { %v1904_v63 = vmax.f32 %v1840_v4, 0.0  ;;  %5087 = vmatmul.msk.f32.gmra.mxu3 %vm116_vm1, %v5023_v39  ;;  %v5025_v4 = vld [vmem:[%s9217_s1 + $0x3c0] sm:$0xff] }
 0x278   :  { %v1963_v28 = vmax.f32 %v1959_v32, %v1903_v33 }
 0x279   :  { %v1964_v42 = vmax.f32 %v1960_v1, %v1904_v63  ;;  %v1382_v0 = vpop.f32.mrf.mxu2  ;;  %v1150_v1 = vadd.f32 %v6981_v41, %v6435_v37 }
 0x27a   :  { %v1585_v57 = vadd.f32 %v1382_v0, %v1147_v46  ;;  %v1495_v27 = vpop.f32.mrf.mxu3  ;;  %v5026_v0 = vld [vmem:[%s9217_s1 + $0x3c8] sm:$0xff] }
 0x27b   :  { %v1586_v3 = vadd.f32 %v1495_v27, %v1148_v21  ;;  %v7114_v46 = vpop.f32.mrf.mxu1  ;;  %v1151_v27 = vadd.f32 %v7023_v8, %v6458_v52 }
 0x27c   :  { %v1841_v5 = vadd.f32 %v1702_v29, %v1585_v57 }
 0x27d   :  { %v1842_v55 = vadd.f32 %v1702_v29, %v1586_v3  ;;  %v7110_v41 = vpop.f32.mrf.mxu0 }
 0x27e   :  { %v1905_v26 = vmax.f32 %v1841_v5, 0.0  ;;  %5056 = vmatmul.msk.f32.gmra.mxu2 %vm116_vm1, %v5024_v47 }
 0x27f   :  { %v1906_v45 = vmax.f32 %v1842_v55, 0.0  ;;  %5088 = vmatmul.msk.f32.gmra.mxu3 %vm116_vm1, %v5024_v47  ;;  %v1152_v47 = vadd.f32 %v7028_v12, %v6461_v38  ;;  %v5028_v12 = vld [vmem:[%s9217_s1 + $0x3d8] sm:$0xff] }
 0x280   :  { %v7097_v32 = vmax.f32 %v1961_v16, %v1905_v26  ;;  %v1155_v26 = vadd.f32 %v7058_v35, %v6526_v36 }
 0x281   :  { %v7101_v31 = vmax.f32 %v1962_v44, %v1906_v45  ;;  %v1385_v9 = vpop.f32.mrf.mxu2  ;;  %v1156_v45 = vadd.f32 %v7063_v24, %v6529_v6  ;;  %v1154_v6 = vadd.f32 %v7043_v60, %v6494_v11 }
 0x282   :  { %v1587_v18 = vadd.f32 %v1385_v9, %v1149_v20  ;;  %v1498_v39 = vpop.f32.mrf.mxu3 }
 0x283   :  { %v1588_v59 = vadd.f32 %v1498_v39, %v1150_v1  ;;  %v7128_v3 = vpop.f32.mrf.mxu1 }
 0x284   :  { %v1843_v33 = vadd.f32 %v1707_v61, %v1587_v18 }
 0x285   :  { %v1844_v30 = vadd.f32 %v1707_v61, %v1588_v59  ;;  %v1153_v61 = vadd.f32 %v7041_v48, %v6489_v7  ;;  %v1157_v7 = vadd.f32 %v7076_v19, %v6555_v17  ;;  %v1158_v48 = vadd.f32 %v7078_v53, %v6558_v23 }
 0x286   :  { %v1907_v50 = vmax.f32 %v1843_v33, 0.0  ;;  %5057 = vmatmul.msk.f32.gmra.mxu2 %vm116_vm1, %v5025_v4 }
 0x287   :  { %v1908_v16 = vmax.f32 %v1844_v30, 0.0  ;;  %5089 = vmatmul.msk.f32.gmra.mxu3 %vm116_vm1, %v5025_v4 }
 0x288   :  { %v7108_v37 = vmax.f32 %v1963_v28, %v1907_v50  ;;  %v7121_v28 = vpop.f32.mrf.mxu0 }
 0x289   :  { %v7112_v44 = vmax.f32 %v1964_v42, %v1908_v16  ;;  %v1388_v63 = vpop.f32.mrf.mxu2  ;;  %v5027_v42 = vld [vmem:[%s9217_s1 + $0x3d0] sm:$0xff] }
 0x28a   :  { %v1501_v21 = vpop.f32.mrf.mxu3  ;;  %v1589_v5 = vadd.f32 %v1388_v63, %v1151_v27 }
 0x28b   :  { %v1590_v55 = vadd.f32 %v1501_v21, %v1152_v47  ;;  %v7151_v18 = vpop.f32.mrf.mxu1 }
 0x28c   :  { %v1845_v52 = vadd.f32 %v6975_v2, %v1589_v5 }
 0x28d   :  { %v1846_v9 = vadd.f32 %v6975_v2, %v1590_v55  ;;  %v1160_v55 = vadd.f32 %v7095_v54, %v6587_v25  ;;  %v1161_v25 = vadd.f32 %v7110_v41, %v6613_v43 }
 0x28e   :  { %5058 = vmatmul.msk.f32.gmra.mxu2 %vm116_vm1, %v5026_v0  ;;  %v1909_v2 = vmax.f32 %v1845_v52, 0.0 }
 0x28f   :  { %5090 = vmatmul.msk.f32.gmra.mxu3 %vm116_vm1, %v5026_v0  ;;  %v1910_v4 = vmax.f32 %v1846_v9, 0.0 }
 0x290   :  { %v7148_v35 = vpop.f32.mrf.mxu0 }
 0x291   :  { %v1391_v29 = vpop.f32.mrf.mxu2 }
 0x292   :  { %v1504_v57 = vpop.f32.mrf.mxu3  ;;  %v1591_v39 = vadd.f32 %v1391_v29, %v1153_v61  ;;  %v5029_v29 = vld [vmem:[%s9217_s1 + $0x3e0] sm:$0xff] }
 0x293   :  { %v1592_v33 = vadd.f32 %v1504_v57, %v1154_v6  ;;  %v7172_v47 = vpop.f32.mrf.mxu1 }
 0x294   :  { %v1847_v50 = vadd.f32 %v6901_v13, %v1591_v39  ;;  %v5031_v39 = vld [vmem:[%s9217_s1 + $0x3f0] sm:$0xff] }
 0x295   :  { %v1848_v21 = vadd.f32 %v6901_v13, %v1592_v33  ;;  %v1159_v13 = vadd.f32 %v7090_v40, %v6584_v56  ;;  %v1164_v33 = vadd.f32 %v7128_v3, %v6641_v22  ;;  %v9316_v22 = vld [vmem:[#allocation21_spill] sm:$0xff] }
 0x296   :  { %5059 = vmatmul.msk.f32.gmra.mxu2 %vm116_vm1, %v5027_v42  ;;  %v1911_v19 = vmax.f32 %v1847_v50, 0.0  ;;  %v1165_v3 = vadd.f32 %v7148_v35, %v9316_v22 }
 0x297   :  { %5091 = vmatmul.msk.f32.gmra.mxu3 %vm116_vm1, %v5027_v42  ;;  %v1912_v53 = vmax.f32 %v1848_v21, 0.0 }
 0x298   :  { %v7167_v23 = vpop.f32.mrf.mxu0 }
 0x299   :  { %v1394_v20 = vpop.f32.mrf.mxu2 }
 0x29a   :  { %v1593_v8 = vadd.f32 %v1394_v20, %v1155_v26  ;;  %v1507_v1 = vpop.f32.mrf.mxu3 }
 0x29b   :  { %v1594_v38 = vadd.f32 %v1507_v1, %v1156_v45  ;;  %v7189_v6 = vpop.f32.mrf.mxu1 }
 0x29c   :  { %v1849_v36 = vadd.f32 %v7020_v62, %v1593_v8  ;;  %v5030_v8 = vld [vmem:[%s9217_s1 + $0x3e8] sm:$0xff] }
 0x29d   :  { %v1850_v24 = vadd.f32 %v7020_v62, %v1594_v38  ;;  %v1162_v38 = vadd.f32 %v7114_v46, %v6616_v58  ;;  %v1163_v46 = vadd.f32 %v7121_v28, %v6638_v49 }
 0x29e   :  { %v1913_v59 = vmax.f32 %v1849_v36, 0.0  ;;  %5060 = vmatmul.msk.f32.gmra.mxu2 %vm116_vm1, %v5028_v12 }
 0x29f   :  { %v1914_v30 = vmax.f32 %v1850_v24, 0.0  ;;  %5092 = vmatmul.msk.f32.gmra.mxu3 %vm116_vm1, %v5028_v12 }
 0x2a0   :  { %v1969_v11 = vmax.f32 %v1909_v2, %v1913_v59  ;;  %v7187_v12 = vpop.f32.mrf.mxu0 }
 0x2a1   :  { %v1970_v62 = vmax.f32 %v1910_v4, %v1914_v30  ;;  %v1397_v60 = vpop.f32.mrf.mxu2 }
 0x2a2   :  { %v1595_v16 = vadd.f32 %v1397_v60, %v1157_v7  ;;  %v1510_v63 = vpop.f32.mrf.mxu3 }
 0x2a3   :  { %v1596_v0 = vadd.f32 %v1510_v63, %v1158_v48  ;;  %v1093_v50 = vpop.f32.mrf.mxu1 }
 0x2a4   :  { %v1851_v57 = vadd.f32 %v6943_v14, %v1595_v16 }
 0x2a5   :  { %v1852_v17 = vadd.f32 %v6943_v14, %v1596_v0  ;;  %v9317_v0 = vld [vmem:[#allocation22_spill] sm:$0xff] }
 0x2a6   :  { %v1915_v42 = vmax.f32 %v1851_v57, 0.0  ;;  %5061 = vmatmul.msk.f32.gmra.mxu2 %vm116_vm1, %v5029_v29 }
 0x2a7   :  { %v1916_v27 = vmax.f32 %v1852_v17, 0.0  ;;  %5093 = vmatmul.msk.f32.gmra.mxu3 %vm116_vm1, %v5029_v29  ;;  %v1166_v29 = vadd.f32 %v7151_v18, %v9317_v0 }
 0x2a8   :  { %v1971_v5 = vmax.f32 %v1911_v19, %v1915_v42 }
 0x2a9   :  { %v1972_v14 = vmax.f32 %v1912_v53, %v1916_v27  ;;  %v1400_v26 = vpop.f32.mrf.mxu2 }
 0x2aa   :  { %v1597_v45 = vadd.f32 %v1400_v26, %v1159_v13  ;;  %v1513_v20 = vpop.f32.mrf.mxu3 }
 0x2ab   :  { %v1598_v52 = vadd.f32 %v1513_v20, %v1160_v55 }
 0x2ac   :  { %v1853_v1 = vadd.f32 %v7011_v51, %v1597_v45 }
 0x2ad   :  { %v1854_v9 = vadd.f32 %v7011_v51, %v1598_v52 }
 0x2ae   :  { %v1917_v56 = vmax.f32 %v1853_v1, 0.0  ;;  %5062 = vmatmul.msk.f32.gmra.mxu2 %vm116_vm1, %v5030_v8 }
 0x2af   :  { %v1918_v40 = vmax.f32 %v1854_v9, 0.0  ;;  %5094 = vmatmul.msk.f32.gmra.mxu3 %vm116_vm1, %v5030_v8  ;;  %v9318_v9 = vld [vmem:[#allocation23_spill] sm:$0xff] }
 0x2b0   :  { %v1973_v54 = vmax.f32 %v1969_v11, %v1917_v56  ;;  %v1167_v56 = vadd.f32 %v7167_v23, %v9318_v9  ;;  %v9323_v23 = vld [vmem:[#allocation25_spill] sm:$0xff] }
 0x2b1   :  { %v1974_v61 = vmax.f32 %v1970_v62, %v1918_v40  ;;  %v1403_v36 = vpop.f32.mrf.mxu2  ;;  %v980_v62 = vpop.f32.mrf.mxu0  ;;  %v9319_v40 = vld [vmem:[#allocation24_spill] sm:$0xff] }
 0x2b2   :  { %v1599_v51 = vadd.f32 %v1403_v36, %v1161_v25  ;;  %v1516_v24 = vpop.f32.mrf.mxu3  ;;  %v1168_v25 = vadd.f32 %v7172_v47, %v9319_v40  ;;  %v9321_v36 = vld [vmem:[#allocation28_spill] sm:$0xff] }
 0x2b3   :  { %v1600_v2 = vadd.f32 %v1516_v24, %v1162_v38  ;;  %v9320_v38 = vld [vmem:[#allocation27_spill] sm:$0xff]  ;;  %v9324_v47 = vld [vmem:[#allocation48_spill] sm:$0xff] }
 0x2b4   :  { %v1855_v59 = vadd.f32 %v6957_v10, %v1599_v51  ;;  %v1172_v51 = vadd.f32 %v1093_v50, %v9321_v36 }
 0x2b5   :  { %v1856_v43 = vadd.f32 %v6957_v10, %v1600_v2  ;;  %v5032_v10 = vld [vmem:[%s9217_s1 + $0x3f8] sm:$0xff] }
 0x2b6   :  { %v1919_v41 = vmax.f32 %v1855_v59, 0.0  ;;  %5063 = vmatmul.msk.f32.gmra.mxu2 %vm116_vm1, %v5031_v39  ;;  %v9322_v59 = vld [vmem:[#allocation63_spill] sm:$0xff] }
 0x2b7   :  { %v1920_v58 = vmax.f32 %v1856_v43, 0.0  ;;  %5095 = vmatmul.msk.f32.gmra.mxu3 %vm116_vm1, %v5031_v39 }
 0x2b8   :  { %v1975_v4 = vmax.f32 %v1971_v5, %v1919_v41  ;;  %v1096_v5 = vpop.f32.mrf.mxu1 }
 0x2b9   :  { %v1976_v30 = vmax.f32 %v1972_v14, %v1920_v58  ;;  %v1406_v7 = vpop.f32.mrf.mxu2  ;;  %v983_v27 = vpop.f32.mrf.mxu0 }
 0x2ba   :  { %v1601_v11 = vadd.f32 %v1406_v7, %v1163_v46  ;;  %v1519_v48 = vpop.f32.mrf.mxu3  ;;  %v9325_v7 = vld [vmem:[#allocation26_spill] sm:$0xff] }
 0x2bb   :  { %v1602_v60 = vadd.f32 %v1519_v48, %v1164_v33  ;;  %v1169_v33 = vadd.f32 %v7187_v12, %v9323_v23  ;;  %v9333_v23 = vld [vmem:[#allocation33_spill] sm:$0xff] }
 0x2bc   :  { %v1857_v16 = vadd.f32 %v7067_v15, %v1601_v11  ;;  %v1170_v11 = vadd.f32 %v7189_v6, %v9325_v7 }
 0x2bd   :  { %v1858_v63 = vadd.f32 %v7067_v15, %v1602_v60 }
 0x2be   :  { %v1921_v49 = vmax.f32 %v1857_v16, 0.0  ;;  %5064 = vmatmul.msk.f32.gmra.mxu2 %vm116_vm1, %v5032_v10 }
 0x2bf   :  { %v1922_v28 = vmax.f32 %v1858_v63, 0.0  ;;  %5096 = vmatmul.msk.f32.gmra.mxu3 %vm116_vm1, %v5032_v10 }
 0x2c0   :  { %v7211_v21 = vmax.f32 %v1973_v54, %v1921_v49  ;;  %v1099_v52 = vpop.f32.mrf.mxu1  ;;  %v9326_v49 = vld [vmem:[#allocation29_spill] sm:$0xff] }
 0x2c1   :  { %v7215_v57 = vmax.f32 %v1974_v61, %v1922_v28  ;;  %v1409_v17 = vpop.f32.mrf.mxu2  ;;  %v986_v20 = vpop.f32.mrf.mxu0  ;;  %v1171_v61 = vadd.f32 %v980_v62, %v9320_v38  ;;  %v1173_v28 = vadd.f32 %v983_v27, %v9326_v49 }
 0x2c2   :  { %v1603_v19 = vadd.f32 %v1409_v17, %v1165_v3  ;;  %v1522_v42 = vpop.f32.mrf.mxu3  ;;  %v9327_v3 = vld [vmem:[#allocation30_spill] sm:$0xff]  ;;  %v9328_v17 = vld [vmem:[#allocation47_spill] sm:$0xff] }
 0x2c3   :  { %v1604_v15 = vadd.f32 %v1522_v42, %v1166_v29  ;;  %v1174_v0 = vadd.f32 %v1096_v5, %v9327_v3  ;;  %v9330_v5 = vld [vmem:[#allocation31_spill] sm:$0xff] }
 0x2c4   :  { %v1859_v53 = vadd.f32 %v7052_v34, %v1603_v19 }
 0x2c5   :  { %v1860_v13 = vadd.f32 %v7052_v34, %v1604_v15 }
 0x2c6   :  { %v1923_v55 = vmax.f32 %v1859_v53, 0.0 }
 0x2c7   :  { %v1924_v14 = vmax.f32 %v1860_v13, 0.0 }
 0x2c8   :  { %v7219_v35 = vmax.f32 %v1975_v4, %v1923_v55  ;;  %v1102_v39 = vpop.f32.mrf.mxu1 }
 0x2c9   :  { %v7221_v26 = vmax.f32 %v1976_v30, %v1924_v14  ;;  %v1412_v45 = vpop.f32.mrf.mxu2  ;;  %v989_v24 = vpop.f32.mrf.mxu0  ;;  %v9329_v14 = vld [vmem:[#allocation60_spill] sm:$0xff] }
 0x2ca   :  { %v1525_v18 = vpop.f32.mrf.mxu3  ;;  %v1605_v34 = vadd.f32 %v1412_v45, %v1167_v56  ;;  %v1175_v56 = vadd.f32 %v986_v20, %v9330_v5  ;;  %v9334_v20 = vld [vmem:[#allocation34_spill] sm:$0xff] }
 0x2cb   :  { %v1606_v54 = vadd.f32 %v1525_v18, %v1168_v25  ;;  %v9331_v25 = vld [vmem:[#allocation32_spill] sm:$0xff] }
 0x2cc   :  { %v1861_v43 = vadd.f32 %v9322_v59, %v1605_v34  ;;  %v1176_v34 = vadd.f32 %v1099_v52, %v9331_v25 }
 0x2cd   :  { %v1862_v46 = vadd.f32 %v9322_v59, %v1606_v54 }
 0x2ce   :  { %v1925_v62 = vmax.f32 %v1861_v43, 0.0 }
 0x2cf   :  { %v1926_v50 = vmax.f32 %v1862_v46, 0.0 }
 0x2d0   :  { %v1105_v55 = vpop.f32.mrf.mxu1 }
 0x2d1   :  { %v1415_v8 = vpop.f32.mrf.mxu2  ;;  %v992_v6 = vpop.f32.mrf.mxu0 }
 0x2d2   :  { %v1528_v1 = vpop.f32.mrf.mxu3  ;;  %v1607_v60 = vadd.f32 %v1415_v8, %v1169_v33  ;;  %v1177_v33 = vadd.f32 %v989_v24, %v9333_v23  ;;  %v9337_v24 = vld [vmem:[#allocation37_spill] sm:$0xff] }
 0x2d3   :  { %v1608_v16 = vadd.f32 %v1528_v1, %v1170_v11 }
 0x2d4   :  { %v1863_v19 = vadd.f32 %v9328_v17, %v1607_v60  ;;  %v9335_v60 = vld [vmem:[#allocation56_spill] sm:$0xff] }
 0x2d5   :  { %v1864_v53 = vadd.f32 %v9328_v17, %v1608_v16 }
 0x2d6   :  { %v1927_v8 = vmax.f32 %v1863_v19, 0.0 }
 0x2d7   :  { %v1928_v1 = vmax.f32 %v1864_v53, 0.0 }
 0x2d9   :  { %v1418_v2 = vpop.f32.mrf.mxu2  ;;  %v995_v43 = vpop.f32.mrf.mxu0 }
 0x2da   :  { %v1609_v41 = vadd.f32 %v1418_v2, %v1171_v61  ;;  %v1531_v58 = vpop.f32.mrf.mxu3  ;;  %v9332_v2 = vld [vmem:[#allocation70_spill] sm:$0xff] }
 0x2db   :  { %v1610_v4 = vadd.f32 %v1531_v58, %v1172_v51  ;;  %v1108_v58 = vpop.f32.mrf.mxu1 }
 0x2dc   :  { %v1865_v30 = vadd.f32 %v9324_v47, %v1609_v41 }
 0x2dd   :  { %v1866_v48 = vadd.f32 %v9324_v47, %v1610_v4 }
 0x2de   :  { %v1929_v10 = vmax.f32 %v1865_v30, 0.0  ;;  %v1178_v30 = vadd.f32 %v1102_v39, %v9334_v20 }
 0x2df   :  { %v1930_v63 = vmax.f32 %v1866_v48, 0.0 }
 0x2e0   :  { %v1981_v22 = vmax.f32 %v1925_v62, %v1929_v10 }
 0x2e1   :  { %v1982_v29 = vmax.f32 %v1926_v50, %v1930_v63  ;;  %v1421_v12 = vpop.f32.mrf.mxu2  ;;  %v998_v63 = vpop.f32.mrf.mxu0 }
 0x2e2   :  { %v1611_v42 = vadd.f32 %v1421_v12, %v1173_v28  ;;  %v1534_v15 = vpop.f32.mrf.mxu3  ;;  %v9336_v28 = vld [vmem:[#allocation36_spill] sm:$0xff] }
 0x2e3   :  { %v1612_v13 = vadd.f32 %v1534_v15, %v1174_v0  ;;  %v1179_v3 = vadd.f32 %v992_v6, %v9336_v28  ;;  %v1111_v0 = vpop.f32.mrf.mxu1  ;;  %v9338_v15 = vld [vmem:[#allocation69_spill] sm:$0xff]  ;;  %v9340_v6 = vld [vmem:[#allocation39_spill] sm:$0xff] }
 0x2e4   :  { %v1867_v45 = vadd.f32 %v9329_v14, %v1611_v42 }
 0x2e5   :  { %v1868_v18 = vadd.f32 %v9329_v14, %v1612_v13 }
 0x2e6   :  { %v1931_v27 = vmax.f32 %v1867_v45, 0.0 }
 0x2e7   :  { %v1932_v9 = vmax.f32 %v1868_v18, 0.0  ;;  %v9339_v18 = vld [vmem:[#allocation38_spill] sm:$0xff] }
 0x2e8   :  { %v1983_v40 = vmax.f32 %v1927_v8, %v1931_v27  ;;  %v1181_v8 = vadd.f32 %v995_v43, %v9339_v18  ;;  %v9352_v18 = vld [vmem:[#allocation35_spill] sm:$0xff] }
 0x2e9   :  { %v1984_v54 = vmax.f32 %v1928_v1, %v1932_v9  ;;  %v1424_v38 = vpop.f32.mrf.mxu2  ;;  %v1182_v1 = vadd.f32 %v1108_v58, %v9340_v6  ;;  %v1001_v9 = vpop.f32.mrf.mxu0 }
 0x2ea   :  { %v1613_v61 = vadd.f32 %v1424_v38, %v1175_v56  ;;  %v1537_v36 = vpop.f32.mrf.mxu3 }
 0x2eb   :  { %v1614_v51 = vadd.f32 %v1537_v36, %v1176_v34  ;;  %v1114_v56 = vpop.f32.mrf.mxu1 }
 0x2ec   :  { %v1869_v59 = vadd.f32 %v9332_v2, %v1613_v61  ;;  %v2005_v61 = vld [vmem:[%s9219_s5] sm:$0x3]  ;;  %s5885_s5 = smov 126  }
 0x2ed   :  { %v1870_v41 = vadd.f32 %v9332_v2, %v1614_v51 }
 0x2ee   :  { %v1933_v46 = vmax.f32 %v1869_v59, 0.0  ;;  %v7266_v59 = vperm.slane %v2005_v61, 0 }
 0x2ef   :  { %v1934_v4 = vmax.f32 %v1870_v41, 0.0  ;;  %v7268_v41 = vperm.slane %v2005_v61, 1  ;;  %v9355_v61 = vld [vmem:[#allocation55_spill] sm:$0xff] }
 0x2f0   :  { %v1985_v47 = vmax.f32 %v1981_v22, %v1933_v46  ;;  %v1180_v22 = vadd.f32 %v1105_v55, %v9337_v24 }
 0x2f1   :  { %v1986_v7 = vmax.f32 %v1982_v29, %v1934_v4  ;;  %v1427_v52 = vpop.f32.mrf.mxu2 }
 0x2f2   :  { %v1615_v11 = vadd.f32 %v1427_v52, %v1177_v33  ;;  %v1540_v48 = vpop.f32.mrf.mxu3  ;;  %v1004_v33 = vpop.f32.mrf.mxu0  ;;  %v7288_v52 = vmul.f32 %v7268_v41, %v7215_v57 }
 0x2f3   :  { %v1616_v62 = vadd.f32 %v1540_v48, %v1178_v30  ;;  %v1117_v20 = vpop.f32.mrf.mxu1  ;;  %v9342_v48 = vld [vmem:[#allocation3_spill] sm:$0xff] }
 0x2f4   :  { %v1871_v10 = vadd.f32 %v9335_v60, %v1615_v11 }
 0x2f5   :  { %v1872_v50 = vadd.f32 %v9335_v60, %v1616_v62  ;;  %v9343_v62 = vld [vmem:[#allocation41_spill] sm:$0xff] }
 0x2f6   :  { %v1935_v16 = vmax.f32 %v1871_v10, 0.0  ;;  %v625_v60 = vadd.f32 %v9343_v62, %v9342_v48  ;;  %v9358_v48 = vld [vmem:[#allocation11_spill] sm:$0xff]  ;;  %v9359_v62 = vld [vmem:[#allocation54_spill] sm:$0xff] }
 0x2f7   :  { %v1936_v49 = vmax.f32 %v1872_v50, 0.0  ;;  %v9344_v50 = vld [vmem:[#allocation4_spill] sm:$0xff] }
 0x2f8   :  { %v1987_v12 = vmax.f32 %v1983_v40, %v1935_v16  ;;  %v9345_v16 = vld [vmem:[#allocation43_spill] sm:$0xff]  ;;  %v1183_v28 = vadd.f32 %v998_v63, %v625_v60  ;;  %v747_v60 = vadd.f32 %v9359_v62, %v9358_v48 }
 0x2f9   :  { %v1988_v17 = vmax.f32 %v1984_v54, %v1936_v49  ;;  %v1430_v39 = vpop.f32.mrf.mxu2  ;;  %v9341_v54 = vld [vmem:[#allocation59_spill] sm:$0xff]  ;;  %v738_v49 = vadd.f32 %v9345_v16, %v9344_v50 }
 0x2fa   :  { %v1617_v29 = vadd.f32 %v1430_v39, %v1179_v3  ;;  %v1543_v19 = vpop.f32.mrf.mxu3  ;;  %v9369_v62 = vld [vmem:[#allocation15_spill] sm:$0xff] }
 0x2fb   :  { %v1618_v42 = vadd.f32 %v1543_v19, %v1180_v22  ;;  %v1184_v3 = vadd.f32 %v1111_v0, %v738_v49  ;;  %v9347_v22 = vld [vmem:[#allocation49_spill] sm:$0xff]  ;;  %v1120_v57 = vpop.f32.mrf.mxu1  ;;  %v9349_v19 = vld [vmem:[#allocation51_spill] sm:$0xff] }
 0x2fc   :  { %v1873_v53 = vadd.f32 %v9338_v15, %v1617_v29  ;;  %v9348_v29 = vld [vmem:[#allocation8_spill] sm:$0xff] }
 0x2fd   :  { %v1874_v13 = vadd.f32 %v9338_v15, %v1618_v42  ;;  %v744_v42 = vadd.f32 %v9349_v19, %v9348_v29 }
 0x2fe   :  { %v1937_v14 = vmax.f32 %v1873_v53, 0.0 }
 0x2ff   :  { %v1938_v45 = vmax.f32 %v1874_v13, 0.0  ;;  %v1188_v63 = vadd.f32 %v1117_v20, %v744_v42  ;;  %v9350_v13 = vld [vmem:[#allocation5_spill] sm:$0xff] }
 0x300   :  { %v7256_v27 = vmax.f32 %v1985_v47, %v1937_v14  ;;  %v9351_v14 = vld [vmem:[#allocation45_spill] sm:$0xff] }
 0x301   :  { %v7259_v5 = vmax.f32 %v1986_v7, %v1938_v45  ;;  %v1433_v55 = vpop.f32.mrf.mxu2  ;;  %v7284_v7 = vmul.f32 %v7266_v59, %v7211_v21  ;;  %v9346_v21 = vld [vmem:[#allocation7_spill] sm:$0xff]  ;;  %v628_v45 = vadd.f32 %v9351_v14, %v9350_v13  ;;  %v9362_v13 = vld [vmem:[#allocation12_spill] sm:$0xff] }
 0x302   :  { %v1619_v40 = vadd.f32 %v1433_v55, %v1181_v8  ;;  %v1546_v25 = vpop.f32.mrf.mxu3  ;;  %v9353_v55 = vld [vmem:[#allocation6_spill] sm:$0xff] }
 0x303   :  { %v1620_v34 = vadd.f32 %v1546_v25, %v1182_v1  ;;  %v7296_v24 = vpack.i.bf16 %v7288_v52, %v7284_v7 }
 0x304   :  { %v1875_v38 = vadd.f32 %v9341_v54, %v1619_v40  ;;  %v9354_v40 = vld [vmem:[#allocation46_spill] sm:$0xff] }
 0x305   :  { %v1876_v36 = vadd.f32 %v9341_v54, %v1620_v34  ;;  %v741_v25 = vadd.f32 %v9354_v40, %v9353_v55 }
 0x306   :  { %v1939_v51 = vmax.f32 %v1875_v38, 0.0  ;;  %v1185_v38 = vadd.f32 %v1001_v9, %v628_v45  ;;  %v1123_v9 = vpop.f32.mrf.mxu1 }
 0x307   :  { %v1940_v2 = vmax.f32 %v1876_v36, 0.0 }
 0x308   :  { %v1991_v43 = vmax.f32 %v1987_v12, %v1939_v51  ;;  %v1007_v12 = vpop.f32.mrf.mxu0  ;;  %v1186_v51 = vadd.f32 %v1114_v56, %v741_v25 }
 0x309   :  { %v1992_v58 = vmax.f32 %v1988_v17, %v1940_v2  ;;  %v1436_v46 = vpop.f32.mrf.mxu2  ;;  %v631_v17 = vadd.f32 %v9347_v22, %v9346_v21  ;;  %v1190_v22 = vadd.f32 %v1120_v57, %v747_v60  ;;  %v9365_v57 = vld [vmem:[#allocation58_spill] sm:$0xff] }
 0x30a   :  { %v7271_v4 = vmul.f32 %v7266_v59, %v1991_v43  ;;  %v1549_v23 = vpop.f32.mrf.mxu3  ;;  %v1621_v39 = vadd.f32 %v1436_v46, %v1183_v28  ;;  %v9356_v43 = vld [vmem:[#allocation10_spill] sm:$0xff] }
 0x30b   :  { %v7274_v47 = vmul.f32 %v7268_v41, %v1992_v58  ;;  %v1622_v15 = vadd.f32 %v1549_v23, %v1184_v3  ;;  %v1187_v53 = vadd.f32 %v1004_v33, %v631_v17  ;;  %v9357_v58 = vld [vmem:[#allocation53_spill] sm:$0xff]  ;;  %v9370_v60 = vld [vmem:[#allocation62_spill] sm:$0xff] }
 0x30c   :  { %v1877_v8 = vadd.f32 %v9352_v18, %v1621_v39  ;;  %v634_v46 = vadd.f32 %v9357_v58, %v9356_v43  ;;  %v9360_v39 = vld [vmem:[#allocation42_spill] sm:$0xff]  ;;  %v9366_v43 = vld [vmem:[#allocation44_spill] sm:$0xff] }
 0x30d   :  { %v7278_v30 = vpack.i.bf16 %v7274_v47, %v7271_v4  ;;  %v1878_v34 = vadd.f32 %v9352_v18, %v1622_v15  ;;  %v9364_v18 = vld [vmem:[#allocation13_spill] sm:$0xff] }
 0x30e   :  { %v1941_v23 = vmax.f32 %v1877_v8, 0.0  ;;  %v1189_v3 = vadd.f32 %v1007_v12, %v634_v46  ;;  %v750_v8 = vadd.f32 %v9365_v57, %v9364_v18 }
 0x30f   :  { %5561 = vrot.lane.b32.xlu2 %v7278_v30, %s5881_s25  ;;  %v1942_v16 = vmax.f32 %v1878_v34, 0.0 }
 0x310   :  { %v1010_v50 = vpop.f32.mrf.mxu0  ;;  %v1192_v25 = vadd.f32 %v1123_v9, %v750_v8 }
 0x311   :  { %v1439_v11 = vpop.f32.mrf.mxu2 }
 0x312   :  { %v1552_v10 = vpop.f32.mrf.mxu3  ;;  %v1623_v33 = vadd.f32 %v1439_v11, %v1185_v38 }
 0x313   :  { %v1624_v49 = vadd.f32 %v1552_v10, %v1186_v51  ;;  %v9363_v10 = vld [vmem:[#allocation57_spill] sm:$0xff] }
 0x314   :  { %v1879_v29 = vadd.f32 %v9360_v39, %v1623_v33  ;;  %v637_v14 = vadd.f32 %v9363_v10, %v9362_v13  ;;  %v9368_v33 = vld [vmem:[#allocation61_spill] sm:$0xff] }
 0x315   :  { %v1880_v11 = vadd.f32 %v9360_v39, %v1624_v49 }
 0x316   :  { %v1943_v12 = vmax.f32 %v1879_v29, 0.0  ;;  %v1191_v55 = vadd.f32 %v1010_v50, %v637_v14  ;;  %v753_v50 = vadd.f32 %v9370_v60, %v9369_v62  ;;  %v9374_v14 = vld [vmem:[#allocation17_spill] sm:$0xff] }
 0x317   :  { %5586 = vrot.lane.b32.xlu2 %v7296_v24, %s5881_s25 }
 0x318   :  { %v1013_v34 = vpop.f32.mrf.mxu0 }
 0x319   :  { %v1442_v0 = vpop.f32.mrf.mxu2 }
 0x31a   :  { %v1625_v6 = vadd.f32 %v1442_v0, %v1187_v53  ;;  %v1555_v1 = vpop.f32.mrf.mxu3  ;;  %v9361_v53 = vld [vmem:[#allocation50_spill] sm:$0xff] }
 0x31b   :  { %v1626_v54 = vadd.f32 %v1555_v1, %v1188_v63 }
 0x31c   :  { %v1881_v36 = vadd.f32 %v9355_v61, %v1625_v6  ;;  %v1944_v6 = vmax.f32 %v1880_v11, 0.0  ;;  %v9371_v11 = vld [vmem:[#allocation40_spill] sm:$0xff] }
 0x31d   :  { %v1882_v2 = vadd.f32 %v9355_v61, %v1626_v54  ;;  %v1126_v61 = vpop.f32.mrf.mxu1 }
 0x31e   :  { %v1945_v20 = vmax.f32 %v1881_v36, 0.0 }
 0x31f   :  { %v1946_v28 = vmax.f32 %v1882_v2, 0.0 }
 0x320   :  { %v1993_v21 = vmax.f32 %v1941_v23, %v1945_v20  ;;  %v9367_v23 = vld [vmem:[#allocation14_spill] sm:$0xff]  ;;  %v1016_v29 = vpop.f32.mrf.mxu0 }
 0x321   :  { %v1994_v56 = vmax.f32 %v1942_v16, %v1946_v28  ;;  %v1445_v17 = vpop.f32.mrf.mxu2  ;;  %v640_v20 = vadd.f32 %v9368_v33, %v9367_v23  ;;  %v9379_v23 = vld [vmem:[#allocation19_spill] sm:$0xff]  ;;  %v9380_v33 = vld [vmem:[#allocation68_spill] sm:$0xff] }
 0x322   :  { %v1627_v19 = vadd.f32 %v1445_v17, %v1189_v3  ;;  %v1558_v42 = vpop.f32.mrf.mxu3  ;;  %v1194_v3 = vadd.f32 %v1126_v61, %v753_v50 }
 0x323   :  { %v1628_v15 = vadd.f32 %v1558_v42, %v1190_v22  ;;  %v1193_v49 = vadd.f32 %v1013_v34, %v640_v20  ;;  %v9376_v34 = vld [vmem:[#allocation66_spill] sm:$0xff]  ;;  %v759_v20 = vadd.f32 %v9380_v33, %v9379_v23 }
 0x324   :  { %v1883_v63 = vadd.f32 %v9361_v53, %v1627_v19  ;;  %v9383_v33 = vld [vmem:[#allocation2_spill] sm:$0xff] }
 0x325   :  { %v1884_v0 = vadd.f32 %v9361_v53, %v1628_v15  ;;  %v1129_v42 = vpop.f32.mrf.mxu1 }
 0x326   :  { %v1947_v45 = vmax.f32 %v1883_v63, 0.0  ;;  %v9372_v63 = vld [vmem:[#allocation16_spill] sm:$0xff] }
 0x327   :  { %v1948_v1 = vmax.f32 %v1884_v0, 0.0  ;;  %v9373_v0 = vld [vmem:[#allocation64_spill] sm:$0xff] }
 0x328   :  { %v1995_v40 = vmax.f32 %v1943_v12, %v1947_v45  ;;  %v643_v13 = vadd.f32 %v9373_v0, %v9372_v63  ;;  %v9375_v12 = vld [vmem:[#allocation65_spill] sm:$0xff]  ;;  %v1019_v61 = vpop.f32.mrf.mxu0 }
 0x329   :  { %v1996_v54 = vmax.f32 %v1944_v6, %v1948_v1  ;;  %v1448_v38 = vpop.f32.mrf.mxu2  ;;  %v756_v45 = vadd.f32 %v9375_v12, %v9374_v14  ;;  %v9382_v14 = vmov 0.0  }
 0x32a   :  { %v1629_v36 = vadd.f32 %v1448_v38, %v1191_v55  ;;  %v1561_v51 = vpop.f32.mrf.mxu3  ;;  %v1195_v18 = vadd.f32 %v1016_v29, %v643_v13 }
 0x32b   :  { %v1630_v2 = vadd.f32 %v1561_v51, %v1192_v25  ;;  %v1196_v57 = vadd.f32 %v1129_v42, %v756_v45  ;;  %v9377_v51 = vld [vmem:[#allocation18_spill] sm:$0xff] }
 0x32c   :  { %v1885_v58 = vadd.f32 %v9366_v43, %v1629_v36 }
 0x32d   :  { %v1886_v46 = vadd.f32 %v9366_v43, %v1630_v2  ;;  %v9378_v2 = vld [vmem:[#allocation67_spill] sm:$0xff] }
 0x32e   :  { %v1949_v48 = vmax.f32 %v1885_v58, 0.0  ;;  %v646_v43 = vadd.f32 %v9378_v2, %v9377_v51  ;;  %v1132_v58 = vpop.f32.mrf.mxu1 }
 0x32f   :  { %v1950_v16 = vmax.f32 %v1886_v46, 0.0  ;;  %v1198_v62 = vadd.f32 %v1132_v58, %v759_v20 }
 0x330   :  { %v1997_v28 = vmax.f32 %v1993_v21, %v1949_v48  ;;  %v1197_v48 = vadd.f32 %v1019_v61, %v646_v43  ;;  %v2029_v43 = vld [vmem:[%s9220_s3 + $0x10] sm:$0xff] }
 0x331   :  { %v1998_v9 = vmax.f32 %v1994_v56, %v1950_v16  ;;  %v1451_v22 = vpop.f32.mrf.mxu2 }
 0x332   :  { %v1631_v17 = vadd.f32 %v1451_v22, %v1193_v49  ;;  %v1564_v39 = vpop.f32.mrf.mxu3 }
 0x333   :  { %v1632_v19 = vadd.f32 %v1564_v39, %v1194_v3  ;;  %v9381_v39 = vld [vmem:[#allocation52_spill] sm:$0xff] }
 0x334   :  { %v1887_v15 = vadd.f32 %v9371_v11, %v1631_v17 }
 0x335   :  { %v1888_v53 = vadd.f32 %v9371_v11, %v1632_v19 }
 0x336   :  { %v1951_v10 = vmax.f32 %v1887_v15, 0.0 }
 0x337   :  { %v1952_v21 = vmax.f32 %v1888_v53, 0.0 }
 0x338   :  { %v1999_v56 = vmax.f32 %v1995_v40, %v1951_v10 }
 0x339   :  { %v2000_v8 = vmax.f32 %v1996_v54, %v1952_v21  ;;  %v1454_v6 = vpop.f32.mrf.mxu2 }
 0x33a   :  { %v1633_v1 = vadd.f32 %v1454_v6, %v1195_v18  ;;  %v1567_v55 = vpop.f32.mrf.mxu3  ;;  %v7372_v18 = vmul.f32 %v7268_v41, %v7101_v31  ;;  %v2014_v31 = vmul.f32 %v7268_v41, %v7112_v44 }
 0x33b   :  { %v1634_v25 = vadd.f32 %v1567_v55, %v1196_v57  ;;  %v2028_v55 = vld [vmem:[%s9220_s3 + $0x8] sm:$0xff] }
 0x33c   :  { %v1889_v38 = vadd.f32 %v9376_v34, %v1633_v1 }
 0x33d   :  { %v1890_v36 = vadd.f32 %v9376_v34, %v1634_v25 }
 0x33e   :  { %v1953_v46 = vmax.f32 %v1889_v38, 0.0 }
 0x33f   :  { %v1954_v40 = vmax.f32 %v1890_v36, 0.0 }
 0x340   :  { %v2001_v54 = vmax.f32 %v1997_v28, %v1953_v46  ;;  %v2017_v28 = vmul.f32 %v7266_v59, %v7219_v35  ;;  %v2019_v35 = vmul.f32 %v7266_v59, %v7256_v27 }
 0x341   :  { %v2002_v60 = vmax.f32 %v1998_v9, %v1954_v40  ;;  %v1457_v50 = vpop.f32.mrf.mxu2  ;;  %v2018_v9 = vmul.f32 %v7268_v41, %v7221_v26  ;;  %v2011_v26 = vmul.f32 %v7266_v59, %v7097_v32  ;;  %v2013_v32 = vmul.f32 %v7266_v59, %v7108_v37 }
 0x342   :  { %v2023_v16 = vmul.f32 %v7266_v59, %v2001_v54  ;;  %v1635_v49 = vadd.f32 %v1457_v50, %v1197_v48  ;;  %v1570_v3 = vpop.f32.mrf.mxu3  ;;  %v7378_v27 = vpack.i.bf16 %v2019_v35, %v7274_v47 }
 0x343   :  { %v2024_v22 = vmul.f32 %v7268_v41, %v2002_v60  ;;  %v1636_v17 = vadd.f32 %v1570_v3, %v1198_v62  ;;  %v5580_v10 = vpack.i.bf16 %v2018_v9, %v2017_v28  ;;  %v5595_v57 = vpack.i.bf16 %v7372_v18, %v2011_v26 }
 0x344   :  { %v1891_v29 = vadd.f32 %v9381_v39, %v1635_v49  ;;  %v7393_v37 = vpack.i.bf16 %v2013_v32, %v7288_v52  ;;  %v7404_v44 = vpack.i.bf16 %v7284_v7, %v2018_v9 }
 0x345   :  { %v1892_v19 = vadd.f32 %v9381_v39, %v1636_v17  ;;  %v7346_v42 = vpack.i.bf16 %v2024_v22, %v2023_v16  ;;  %v2030_v39 = vld [vmem:[%s9220_s3 + $0x18] sm:$0xff] }
 0x346   :  { %v1955_v11 = vmax.f32 %v1891_v29, 0.0 }
 0x347   :  { %v1956_v15 = vmax.f32 %v1892_v19, 0.0  ;;  %5566 = vrot.lane.b32.xlu1 %v7346_v42, %s5881_s25 }
 0x348   :  { %v2003_v53 = vmax.f32 %v1999_v56, %v1955_v11  ;;  %v2020_v56 = vmul.f32 %v7268_v41, %v7259_v5  ;;  %v7396_v5 = vpack.i.bf16 %v7271_v4, %v2024_v22 }
 0x349   :  { %v2004_v63 = vmax.f32 %v2000_v8, %v1956_v15 }
 0x34a   :  { %v2025_v0 = vmul.f32 %v7266_v59, %v2003_v53  ;;  %v5575_v8 = vpack.i.bf16 %v2020_v56, %v2019_v35  ;;  %v5590_v59 = vpack.i.bf16 %v2014_v31, %v2013_v32 }
 0x34b   :  { %v2026_v13 = vmul.f32 %v7268_v41, %v2004_v63  ;;  %v7411_v41 = vpack.i.bf16 %v2017_v28, %v2020_v56 }
 0x34c   :  { %2375 = vmatpush.msrb.mxu2 %v2025_v0  ;;  %v7357_v12 = vpack.i.bf16 %v2025_v0, %v9382_v14 }
 0x34d   :  { %2440 = vmatpush.msrb.mxu3 %v2026_v13  ;;  %v5570_v45 = vpack.i.bf16 %v2026_v13, %v2025_v0  ;;  %v7359_v21 = vpack.i.bf16 %v2023_v16, %v2026_v13 }
 0x34e   :  { %2376 = vmatpush.msrb.mxu2 %v2023_v16  ;;  %5606 = vrot.lane.b32.xlu2 %v7357_v12, %s5885_s5 }
 0x34f   :  { %2441 = vmatpush.msrb.mxu3 %v2024_v22  ;;  %5581 = vrot.lane.b32.xlu1 %v5580_v10, %s5881_s25 }
 0x350   :  { %5571 = vrot.lane.b32.xlu0 %v5570_v45, %s5881_s25  ;;  %2377 = vmatpush.msrb.mxu2 %v7271_v4  ;;  %v7419_v4 = vpack.i.bf16 %v2011_v26, %v2014_v31 }
 0x351   :  { %2442 = vmatpush.msrb.mxu3 %v7274_v47 }
 0x352   :  { %2378 = vmatpush.msrb.mxu2 %v2019_v35 }
 0x353   :  { %2443 = vmatpush.msrb.mxu3 %v2020_v56 }
 0x354   :  { %2379 = vmatpush.msrb.mxu2 %v2017_v28 }
 0x355   :  { %2444 = vmatpush.msrb.mxu3 %v2018_v9 }
 0x356   :  { %5611 = vrot.lane.b32.xlu2 %v7378_v27, %s5885_s5  ;;  %2380 = vmatpush.msrb.mxu2 %v7284_v7 }
 0x357   :  { %2445 = vmatpush.msrb.mxu3 %v7288_v52  ;;  %5596 = vrot.lane.b32.xlu1 %v5595_v57, %s5881_s25 }
 0x358   :  { %5576 = vrot.lane.b32.xlu0 %v5575_v8, %s5881_s25  ;;  %2381 = vmatpush.msrb.mxu2 %v2013_v32  ;;  %v9384_v32 = vld [vmem:[#allocation9_spill] sm:$0xff] }
 0x359   :  { %2446 = vmatpush.msrb.mxu3 %v2014_v31  ;;  %v2031_v31 = vld [vmem:[%s9220_s3 + $0x20] sm:$0xff] }
 0x35a   :  { %2382 = vmatpush.msrb.mxu2 %v2011_v26 }
 0x35b   :  { %2447 = vmatpush.msrb.mxu3 %v7372_v18 }
 0x35e   :  { %5631 = vrot.lane.b32.xlu2 %v7393_v37, %s5885_s5 }
 0x35f   :  { %5601 = vrot.lane.b32.xlu1 %v7396_v5, %s5885_s5 }
 0x360   :  { %5591 = vrot.lane.b32.xlu0 %v5590_v59, %s5881_s25  ;;  %s5886_s25 = smov 116  }
 0x366   :  { %5651 = vrot.lane.b32.xlu2 %v5575_v8, %s5883_s27 }
 0x367   :  { %5626 = vrot.lane.b32.xlu1 %v7404_v44, %s5885_s5 }
 0x368   :  { %5616 = vrot.lane.b32.xlu0 %v7359_v21, %s5885_s5 }
 0x369   :  { %v7438_v47 = vpop.permute.xlu2 %5561 }
 0x36a   :  { %v5564_v58 = vunpack.i.h.bf16 %v7438_v47  ;;  %v5563_v46 = vunpack.i.l.bf16 %v7438_v47 }
 0x36c   :  { %v2118_v60 = vsel %vm107_vm0, %v5563_v46, %v5564_v58  ;;  %v2119_v50 = vsel %vm107_vm0, %v5564_v58, %v9383_v33 }
 0x36e   :  { %5661 = vrot.lane.b32.xlu2 %v7296_v24, %s5883_s27 }
 0x36f   :  { %2516 = vrot.lane.b32.xlu1 %v7372_v18, %s5885_s5 }
 0x370   :  { %5621 = vrot.lane.b32.xlu0 %v7411_v41, %s5885_s5 }
 0x376   :  { %5676 = vrot.lane.b32.xlu2 %v5570_v45, %s5883_s27 }
 0x377   :  { %5646 = vrot.lane.b32.xlu1 %v7278_v30, %s5883_s27 }
 0x378   :  { %5636 = vrot.lane.b32.xlu0 %v7419_v4, %s5885_s5 }
 0x37e   :  { %5681 = vrot.lane.b32.xlu2 %v7278_v30, %s5882_s21  ;;  %v7448_v30 = vpop.permute.xlu2 %5586 }
 0x37f   :  { %5671 = vrot.lane.b32.xlu1 %v5590_v59, %s5883_s27  ;;  %v5589_v29 = vunpack.i.h.bf16 %v7448_v30  ;;  %v5588_v19 = vunpack.i.l.bf16 %v7448_v30  ;;  %v5097_v30 = vld [vmem:[%s9220_s3 + $0x80] sm:$0xff] }
 0x380   :  { %5641 = vrot.lane.b32.xlu0 %v7346_v42, %s5883_s27 }
 0x381   :  { %v2112_v13 = vsel %vm107_vm0, %v5588_v19, %v5589_v29 }
 0x386   :  { %5701 = vrot.lane.b32.xlu2 %v5580_v10, %s5882_s21 }
 0x387   :  { %5691 = vrot.lane.b32.xlu1 %v5570_v45, %s5882_s21 }
 0x388   :  { %5656 = vrot.lane.b32.xlu0 %v5580_v10, %s5883_s27  ;;  %v2113_v10 = vsel %vm107_vm0, %v5589_v29, %v9383_v33  ;;  %v5099_v29 = vld [vmem:[%s9220_s3 + $0x90] sm:$0xff] }
 0x38e   :  { %5716 = vrot.lane.b32.xlu2 %v5595_v57, %s5882_s21 }
 0x38f   :  { %5696 = vrot.lane.b32.xlu1 %v5575_v8, %s5882_s21 }
 0x390   :  { %5666 = vrot.lane.b32.xlu0 %v7346_v42, %s5882_s21 }
 0x396   :  { %5721 = vrot.lane.b32.xlu2 %v7396_v5, %s5886_s25 }
 0x397   :  { %5711 = vrot.lane.b32.xlu1 %v5590_v59, %s5882_s21 }
 0x398   :  { %5686 = vrot.lane.b32.xlu0 %v5595_v57, %s5883_s27  ;;  %s5887_s27 = smov 108  }
 0x39e   :  { %5736 = vrot.lane.b32.xlu2 %v7404_v44, %s5886_s25 }
 0x39f   :  { %5731 = vrot.lane.b32.xlu1 %v7411_v41, %s5886_s25 }
 0x3a0   :  { %5706 = vrot.lane.b32.xlu0 %v7296_v24, %s5882_s21  ;;  %v2027_v24 = vld [vmem:[%s9220_s3] sm:$0xff] }
 0x3a1   :  { %5145 = vmatmul.msk.f32.vlgmr.msrb.gmra.mxu2 %vm2140_vm4, %v2027_v24  ;;  %5161 = vmatmul.msk.f32.vlgmr.msrb.gmra.mxu3 %vm2140_vm4, %v2027_v24 }
 0x3a6   :  { %5741 = vrot.lane.b32.xlu2 %v7393_v37, %s5886_s25 }
 0x3a7   :  { %5751 = vrot.lane.b32.xlu1 %v7419_v4, %s5886_s25 }
 0x3a8   :  { %5726 = vrot.lane.b32.xlu0 %v7378_v27, %s5886_s25  ;;  %v7458_v7 = vpop.permute.xlu2 %5606 }
 0x3a9   :  { %5146 = vmatmul.msk.f32.gmra.mxu2 %vm2140_vm4, %v2028_v55  ;;  %5162 = vmatmul.msk.f32.gmra.mxu3 %vm2140_vm4, %v2028_v55 }
 0x3ae   :  { %5756 = vrot.lane.b32.xlu2 %v7378_v27, %s5887_s27 }
 0x3af   :  { %5766 = vrot.lane.b32.xlu1 %v7359_v21, %s5886_s25 }
 0x3b0   :  { %5746 = vrot.lane.b32.xlu0 %v7396_v5, %s5887_s27  ;;  %v7466_v52 = vpop.permute.xlu2 %5611 }
 0x3b1   :  { %5147 = vmatmul.msk.f32.gmra.mxu2 %vm2140_vm4, %v2029_v43  ;;  %5163 = vmatmul.msk.f32.gmra.mxu3 %vm2140_vm4, %v2029_v43  ;;  %v2032_v43 = vld [vmem:[%s9220_s3 + $0x28] sm:$0xff] }
 0x3b6   :  { %5786 = vrot.lane.b32.xlu2 %v7404_v44, %s5887_s27 }
 0x3b7   :  { %5776 = vrot.lane.b32.xlu1 %v7359_v21, %s5887_s27 }
 0x3b8   :  { %5761 = vrot.lane.b32.xlu0 %v7357_v12, %s5886_s25  ;;  %v7479_v6 = vpop.permute.xlu2 %5631 }
 0x3b9   :  { %v5567_v1 = vpop.permute.xlu1 %5566  ;;  %5148 = vmatmul.msk.f32.gmra.mxu2 %vm2140_vm4, %v2030_v39  ;;  %5164 = vmatmul.msk.f32.gmra.mxu3 %vm2140_vm4, %v2030_v39 }
 0x3ba   :  { %v5569_v61 = vunpack.i.h.bf16 %v5567_v1  ;;  %v5568_v36 = vunpack.i.l.bf16 %v5567_v1 }
 0x3bc   :  { %v2120_v40 = vsel %vm107_vm0, %v5568_v36, %v5569_v61  ;;  %v2121_v48 = vsel %vm107_vm0, %v5569_v61, %v9383_v33  ;;  %v7569_v61 = vunpack.i.l.bf16 %v7458_v7 }
 0x3be   :  { %3686 = vrot.lane.b32.xlu2 %v7372_v18, %s5887_s27 }
 0x3bf   :  { %5781 = vrot.lane.b32.xlu1 %v7411_v41, %s5887_s27 }
 0x3c0   :  { %5771 = vrot.lane.b32.xlu0 %v7357_v12, %s5887_s27  ;;  %v7492_v25 = vpop.permute.xlu2 %5651 }
 0x3c1   :  { %v5582_v34 = vpop.permute.xlu1 %5581  ;;  %5149 = vmatmul.msk.f32.gmra.mxu2 %vm2140_vm4, %v2031_v31  ;;  %5165 = vmatmul.msk.f32.gmra.mxu3 %vm2140_vm4, %v2031_v31  ;;  %v2035_v31 = vld [vmem:[%s9220_s3 + $0x40] sm:$0xff] }
 0x3c2   :  { %v5572_v38 = vpop.permute.xlu0 %5571  ;;  %v5584_v49 = vunpack.i.h.bf16 %v5582_v34  ;;  %v5583_v3 = vunpack.i.l.bf16 %v5582_v34  ;;  %v5609_v34 = vunpack.i.h.bf16 %v7458_v7  ;;  %v5613_v7 = vunpack.i.l.bf16 %v7466_v52 }
 0x3c3   :  { %v5574_v51 = vunpack.i.h.bf16 %v5572_v38  ;;  %v5573_v2 = vunpack.i.l.bf16 %v5572_v38 }
 0x3c4   :  { %v2114_v15 = vsel %vm107_vm0, %v5583_v3, %v5584_v49  ;;  %v2115_v28 = vsel %vm107_vm0, %v5584_v49, %v9383_v33 }
 0x3c5   :  { %v2122_v23 = vsel %vm107_vm0, %v5573_v2, %v5574_v51  ;;  %v2123_v20 = vsel %vm107_vm0, %v5574_v51, %v9383_v33 }
 0x3c6   :  { %2197 = vmatpush.msra.mxu0 %v2122_v23  ;;  %2262 = vmatpush.msra.mxu1 %v2123_v20 }
 0x3c7   :  { %5796 = vrot.lane.b32.xlu1 %v7419_v4, %s5887_s27  ;;  %5801 = vrot.lane.b32.xlu2 %v7396_v5, %s5888_s20 }
 0x3c8   :  { %2198 = vmatpush.msra.mxu0 %v2120_v40  ;;  %2263 = vmatpush.msra.mxu1 %v2121_v48  ;;  %v7511_v54 = vpop.permute.xlu2 %5661 }
 0x3c9   :  { %3392 = vrot.lane.b32.xlu0 %v7372_v18, %s5886_s25  ;;  %v5597_v62 = vpop.permute.xlu1 %5596  ;;  %5150 = vmatmul.msk.f32.gmra.mxu2 %vm2140_vm4, %v2032_v43 }
 0x3ca   :  { %v5577_v16 = vpop.permute.xlu0 %5576  ;;  %2199 = vmatpush.msra.mxu0 %v2118_v60  ;;  %2264 = vmatpush.msra.mxu1 %v2119_v50  ;;  %v5599_v14 = vunpack.i.h.bf16 %v5597_v62  ;;  %v5598_v45 = vunpack.i.l.bf16 %v5597_v62  ;;  %v5614_v50 = vunpack.i.h.bf16 %v7466_v52  ;;  %v5633_v52 = vunpack.i.l.bf16 %v7479_v6 }
 0x3cb   :  { %v5579_v22 = vunpack.i.h.bf16 %v5577_v16  ;;  %v5578_v17 = vunpack.i.l.bf16 %v5577_v16  ;;  %5166 = vmatmul.msk.f32.gmra.mxu3 %vm2140_vm4, %v2032_v43  ;;  %v5663_v43 = vunpack.i.l.bf16 %v7511_v54 }
 0x3cc   :  { %v2108_v24 = vsel %vm107_vm0, %v5598_v45, %v5599_v14  ;;  %v2109_v1 = vsel %vm107_vm0, %v5599_v14, %v9383_v33 }
 0x3cd   :  { %v2116_v42 = vsel %vm107_vm0, %v5578_v17, %v5579_v22  ;;  %v2117_v11 = vsel %vm107_vm0, %v5579_v22, %v9383_v33 }
 0x3ce   :  { %2200 = vmatpush.msra.mxu0 %v2116_v42  ;;  %2265 = vmatpush.msra.mxu1 %v2117_v11 }
 0x3cf   :  { %5811 = vrot.lane.b32.xlu1 %v7411_v41, %s5888_s20  ;;  %5816 = vrot.lane.b32.xlu2 %v7404_v44, %s5888_s20 }
 0x3d0   :  { %2201 = vmatpush.msra.mxu0 %v2114_v15  ;;  %2266 = vmatpush.msra.mxu1 %v2115_v28  ;;  %v5677_v9 = vpop.permute.xlu2 %5676  ;;  %v5634_v28 = vunpack.i.h.bf16 %v7479_v6  ;;  %v5100_v6 = vld [vmem:[%s9220_s3 + $0x98] sm:$0xff] }
 0x3d1   :  { %5791 = vrot.lane.b32.xlu0 %v7393_v37, %s5887_s27  ;;  %v7537_v53 = vpop.permute.xlu1 %5601  ;;  %v5679_v63 = vunpack.i.h.bf16 %v5677_v9  ;;  %v5678_v0 = vunpack.i.l.bf16 %v5677_v9 }
 0x3d2   :  { %v5592_v35 = vpop.permute.xlu0 %5591  ;;  %2202 = vmatpush.msra.mxu0 %v2112_v13  ;;  %2267 = vmatpush.msra.mxu1 %v2113_v10  ;;  %v5603_v36 = vunpack.i.l.bf16 %v7537_v53  ;;  %v5604_v58 = vunpack.i.h.bf16 %v7537_v53 }
 0x3d3   :  { %v5594_v26 = vunpack.i.h.bf16 %v5592_v35  ;;  %v5593_v56 = vunpack.i.l.bf16 %v5592_v35  ;;  %v2854_v57 = vsel %vm804_vm2, %v5678_v0, %v5679_v63  ;;  %v2855_v8 = vsel %vm804_vm2, %v5679_v63, %v9384_v32  ;;  %v2034_v63 = vld [vmem:[%s9220_s3 + $0x38] sm:$0xff] }
 0x3d4   :  { %2928 = vmatpush.msra.mxu2 %v2854_v57  ;;  %2993 = vmatpush.msra.mxu3 %v2855_v8  ;;  %v2562_v40 = vsel %vm2548_vm5, %v5603_v36, %v7569_v61  ;;  %v2559_v62 = vsel %vm2548_vm5, %v5604_v58, %v5613_v7 }
 0x3d5   :  { %v2110_v59 = vsel %vm107_vm0, %v5593_v56, %v5594_v26  ;;  %v2111_v47 = vsel %vm107_vm0, %v5594_v26, %v9383_v33  ;;  %v5098_v33 = vld [vmem:[%s9220_s3 + $0x88] sm:$0xff] }
 0x3d6   :  { %2203 = vmatpush.msra.mxu0 %v2110_v59  ;;  %2268 = vmatpush.msra.mxu1 %v2111_v47  ;;  %v5654_v59 = vunpack.i.h.bf16 %v7492_v25  ;;  %v5653_v47 = vunpack.i.l.bf16 %v7492_v25 }
 0x3d7   :  { %5831 = vrot.lane.b32.xlu1 %v7419_v4, %s5888_s20  ;;  %5821 = vrot.lane.b32.xlu2 %v7393_v37, %s5888_s20 }
 0x3d8   :  { %2204 = vmatpush.msra.mxu0 %v2108_v24  ;;  %2269 = vmatpush.msra.mxu1 %v2109_v1  ;;  %v7651_v35 = vpop.permute.xlu2 %5681  ;;  %v5101_v1 = vld [vmem:[%s9220_s3 + $0xa0] sm:$0xff] }
 0x3d9   :  { %5806 = vrot.lane.b32.xlu0 %v7378_v27, %s5888_s20  ;;  %5113 = vmatmul.msk.f32.vlgmr.msra.gmra.mxu0 %vm2140_vm4, %v5097_v30  ;;  %v5627_v55 = vpop.permute.xlu1 %5626 }
 0x3da   :  { %5129 = vmatmul.msk.f32.vlgmr.msra.gmra.mxu1 %vm2140_vm4, %v5097_v30  ;;  %v5617_v38 = vpop.permute.xlu0 %5616  ;;  %v5628_v16 = vunpack.i.l.bf16 %v5627_v55  ;;  %v5629_v22 = vunpack.i.h.bf16 %v5627_v55 }
 0x3db   :  { %v5619_v51 = vunpack.i.h.bf16 %v5617_v38  ;;  %v5618_v2 = vunpack.i.l.bf16 %v5617_v38  ;;  %v2848_v38 = vsel %vm804_vm2, %v5653_v47, %v5654_v59 }
 0x3dc   :  { %v2556_v42 = vsel %vm2548_vm5, %v5628_v16, %v7569_v61  ;;  %v2553_v15 = vsel %vm2548_vm5, %v5629_v22, %v5633_v52 }
 0x3dd   :  { %v2563_v46 = vsel %vm2548_vm5, %v5609_v34, %v5618_v2  ;;  %v2564_v23 = vsel %vm2548_vm5, %v5618_v2, %v7569_v61  ;;  %v2561_v20 = vsel %vm2548_vm5, %v5619_v51, %v5603_v36  ;;  %v2849_v51 = vsel %vm804_vm2, %v5654_v59, %v9384_v32 }
 0x3de   :  { %2637 = vmatpush.msrb.mxu0 %v2563_v46  ;;  %2702 = vmatpush.msrb.mxu1 %v2564_v23  ;;  %v5664_v2 = vunpack.i.h.bf16 %v7511_v54  ;;  %v9385_v23 = vld [vmem:[#allocation20_spill] sm:$0xff] }
 0x3df   :  { %5846 = vrot.lane.b32.xlu1 %v7359_v21, %s5888_s20  ;;  %5836 = vrot.lane.b32.xlu2 %v7378_v27, %s5889_s8  ;;  %v2560_v27 = vsel %vm2548_vm5, %v5613_v7, %v7569_v61 }
 0x3e0   :  { %2638 = vmatpush.msrb.mxu0 %v2561_v20  ;;  %2703 = vmatpush.msrb.mxu1 %v2562_v40  ;;  %v4554_v20 = vld [vmem:[%s9221_s4 + $0x28] sm:$0xff]  ;;  %v7692_v40 = vpop.permute.xlu2 %5701 }
 0x3e1   :  { %5826 = vrot.lane.b32.xlu0 %v7396_v5, %s5889_s8  ;;  %5114 = vmatmul.msk.f32.gmra.mxu0 %vm2140_vm4, %v5098_v33  ;;  %v2517_v48 = vpop.permute.xlu1 %2516  ;;  %v2033_v5 = vld [vmem:[%s9220_s3 + $0x30] sm:$0xff] }
 0x3e2   :  { %5130 = vmatmul.msk.f32.gmra.mxu1 %vm2140_vm4, %v5098_v33  ;;  %v5622_v60 = vpop.permute.xlu0 %5621  ;;  %2639 = vmatpush.msrb.mxu0 %v2559_v62  ;;  %v2550_v14 = vsel %vm2548_vm5, %v2517_v48, %v7569_v61  ;;  %v4550_v33 = vld [vmem:[%s9221_s4 + $0x8] sm:$0xff] }
 0x3e3   :  { %v5624_v49 = vunpack.i.h.bf16 %v5622_v60  ;;  %v5623_v3 = vunpack.i.l.bf16 %v5622_v60  ;;  %2704 = vmatpush.msrb.mxu1 %v2560_v27  ;;  %5151 = vmatmul.msk.f32.gmra.mxu2 %vm2140_vm4, %v2033_v5  ;;  %v5102_v27 = vld [vmem:[%s9220_s3 + $0xa8] sm:$0xff] }
 0x3e4   :  { %5167 = vmatmul.msk.f32.gmra.mxu3 %vm2140_vm4, %v2033_v5 }
 0x3e5   :  { %v2557_v17 = vsel %vm2548_vm5, %v5614_v50, %v5623_v3  ;;  %v2558_v39 = vsel %vm2548_vm5, %v5623_v3, %v7569_v61  ;;  %v2555_v19 = vsel %vm2548_vm5, %v5624_v49, %v5628_v16  ;;  %v2844_v50 = vsel %vm804_vm2, %v5663_v43, %v5664_v2  ;;  %v2036_v49 = vld [vmem:[%s9220_s3 + $0x48] sm:$0xff] }
 0x3e6   :  { %2640 = vmatpush.msrb.mxu0 %v2557_v17  ;;  %2705 = vmatpush.msrb.mxu1 %v2558_v39  ;;  %v2845_v16 = vsel %vm804_vm2, %v5664_v2, %v9384_v32  ;;  %v5684_v39 = vunpack.i.h.bf16 %v7651_v35 }
 0x3e7   :  { %5856 = vrot.lane.b32.xlu1 %v7359_v21, %s5889_s8  ;;  %5866 = vrot.lane.b32.xlu2 %v7404_v44, %s5889_s8  ;;  %v2554_v44 = vsel %vm2548_vm5, %v5633_v52, %v7569_v61  ;;  %v5683_v52 = vunpack.i.l.bf16 %v7651_v35 }
 0x3e8   :  { %2641 = vmatpush.msrb.mxu0 %v2555_v19  ;;  %2706 = vmatpush.msrb.mxu1 %v2556_v42  ;;  %v4557_v42 = vld [vmem:[%s9221_s4 + $0x40] sm:$0xff] }
 0x3e9   :  { %5841 = vrot.lane.b32.xlu0 %v7357_v12, %s5888_s20  ;;  %5115 = vmatmul.msk.f32.gmra.mxu0 %vm2140_vm4, %v5099_v29  ;;  %v5647_v11 = vpop.permute.xlu1 %5646 }
 0x3ea   :  { %5131 = vmatmul.msk.f32.gmra.mxu1 %vm2140_vm4, %v5099_v29  ;;  %v5637_v21 = vpop.permute.xlu0 %5636  ;;  %2642 = vmatpush.msrb.mxu0 %v2553_v15  ;;  %v5649_v26 = vunpack.i.h.bf16 %v5647_v11  ;;  %v5648_v56 = vunpack.i.l.bf16 %v5647_v11 }
 0x3eb   :  { %v5639_v9 = vunpack.i.h.bf16 %v5637_v21  ;;  %v5638_v53 = vunpack.i.l.bf16 %v5637_v21  ;;  %2707 = vmatpush.msrb.mxu1 %v2554_v44  ;;  %5152 = vmatmul.msk.f32.gmra.mxu2 %vm2140_vm4, %v2034_v63 }
 0x3ec   :  { %5168 = vmatmul.msk.f32.gmra.mxu3 %vm2140_vm4, %v2034_v63  ;;  %v2850_v25 = vsel %vm804_vm2, %v5648_v56, %v5649_v26  ;;  %v2851_v55 = vsel %vm804_vm2, %v5649_v26, %v9384_v32  ;;  %v5703_v63 = vunpack.i.l.bf16 %v7692_v40 }
 0x3ed   :  { %v2551_v0 = vsel %vm2548_vm5, %v5634_v28, %v5638_v53  ;;  %v2552_v13 = vsel %vm2548_vm5, %v5638_v53, %v7569_v61  ;;  %v2549_v10 = vsel %vm2548_vm5, %v5639_v9, %v2517_v48  ;;  %v4549_v28 = vld [vmem:[%s9221_s4] sm:$0xff]  ;;  %v5103_v9 = vld [vmem:[%s9220_s3 + $0xb0] sm:$0xff]  ;;  %v5704_v53 = vunpack.i.h.bf16 %v7692_v40 }
 0x3ee   :  { %2643 = vmatpush.msrb.mxu0 %v2551_v0  ;;  %2708 = vmatpush.msrb.mxu1 %v2552_v13  ;;  %v7736_v0 = vpop.permute.xlu2 %5716  ;;  %v3141_v13 = vsel %vm1242_vm3, %v5683_v52, %v5684_v39  ;;  %v2039_v40 = vld [vmem:[%s9220_s3 + $0x60] sm:$0xff]  ;;  %v2041_v52 = vld [vmem:[%s9220_s3 + $0x70] sm:$0xff] }
 0x3ef   :  { %5861 = vrot.lane.b32.xlu1 %v7411_v41, %s5889_s8  ;;  %4274 = vrot.lane.b32.xlu2 %v7372_v18, %s5889_s8  ;;  %v5719_v2 = vunpack.i.h.bf16 %v7736_v0  ;;  %v5718_v43 = vunpack.i.l.bf16 %v7736_v0 }
 0x3f0   :  { %2644 = vmatpush.msrb.mxu0 %v2549_v10  ;;  %2709 = vmatpush.msrb.mxu1 %v2550_v14  ;;  %v2037_v10 = vld [vmem:[%s9220_s3 + $0x50] sm:$0xff] }
 0x3f1   :  { %5851 = vrot.lane.b32.xlu0 %v7357_v12, %s5889_s8  ;;  %5116 = vmatmul.msk.f32.gmra.mxu0 %vm2140_vm4, %v5100_v6  ;;  %v7648_v45 = vpop.permute.xlu1 %5671  ;;  %v4551_v12 = vld [vmem:[%s9221_s4 + $0x10] sm:$0xff] }
 0x3f2   :  { %5132 = vmatmul.msk.f32.gmra.mxu1 %vm2140_vm4, %v5100_v6  ;;  %v5642_v41 = vpop.permute.xlu0 %5641  ;;  %v5674_v54 = vunpack.i.h.bf16 %v7648_v45  ;;  %v5673_v48 = vunpack.i.l.bf16 %v7648_v45  ;;  %v3142_v6 = vsel %vm1242_vm3, %v5684_v39, %v9385_v23  ;;  %v5107_v39 = vld [vmem:[%s9220_s3 + $0xd0] sm:$0xff] }
 0x3f3   :  { %v5644_v57 = vunpack.i.h.bf16 %v5642_v41  ;;  %v5643_v8 = vunpack.i.l.bf16 %v5642_v41  ;;  %5153 = vmatmul.msk.f32.gmra.mxu2 %vm2140_vm4, %v2035_v31 }
 0x3f4   :  { %5169 = vmatmul.msk.f32.gmra.mxu3 %vm2140_vm4, %v2035_v31  ;;  %v2842_v5 = vsel %vm804_vm2, %v5673_v48, %v5674_v54  ;;  %v2843_v17 = vsel %vm804_vm2, %v5674_v54, %v9384_v32  ;;  %v4556_v31 = vld [vmem:[%s9221_s4 + $0x38] sm:$0xff]  ;;  %v3131_v48 = vsel %vm1242_vm3, %v5718_v43, %v5719_v2 }
 0x3f5   :  { %v2852_v30 = vsel %vm804_vm2, %v5643_v8, %v5644_v57  ;;  %v2853_v24 = vsel %vm804_vm2, %v5644_v57, %v9384_v32  ;;  %v3137_v57 = vsel %vm1242_vm3, %v5703_v63, %v5704_v53  ;;  %v3138_v8 = vsel %vm1242_vm3, %v5704_v53, %v9385_v23  ;;  %v4564_v53 = vld [vmem:[%s9221_s4 + $0x78] sm:$0xff] }
 0x3f6   :  { %2929 = vmatpush.msra.mxu2 %v2852_v30  ;;  %2994 = vmatpush.msra.mxu3 %v2853_v24  ;;  %v4552_v30 = vld [vmem:[%s9221_s4 + $0x18] sm:$0xff] }
 0x3f7   :  { %5876 = vrot.lane.b32.xlu1 %v7419_v4, %s5889_s8  ;;  %4577 = vperm.xlu2 %5559, %v4551_v12   ;;  %v4560_v12 = vld [vmem:[%s9221_s4 + $0x58] sm:$0xff] }
 0x3f8   :  { %2930 = vmatpush.msra.mxu2 %v2850_v25  ;;  %2995 = vmatpush.msra.mxu3 %v2851_v55  ;;  %v5104_v24 = vld [vmem:[%s9220_s3 + $0xb8] sm:$0xff]  ;;  %v7772_v25 = vpop.permute.xlu2 %5721 }
 0x3f9   :  { %3980 = vrot.lane.b32.xlu0 %v7372_v18, %s5888_s20  ;;  %5117 = vmatmul.msk.f32.gmra.mxu0 %vm2140_vm4, %v5101_v1  ;;  %v5692_v34 = vpop.permute.xlu1 %5691  ;;  %v5108_v63 = vld [vmem:[%s9220_s3 + $0xd8] sm:$0xff]  ;;  %v5724_v0 = vunpack.i.h.bf16 %v7772_v25 }
 0x3fa   :  { %5133 = vmatmul.msk.f32.gmra.mxu1 %vm2140_vm4, %v5101_v1  ;;  %v5657_v61 = vpop.permute.xlu0 %5656  ;;  %v5694_v4 = vunpack.i.h.bf16 %v5692_v34  ;;  %v5693_v36 = vunpack.i.l.bf16 %v5692_v34  ;;  %2931 = vmatpush.msra.mxu2 %v2848_v38  ;;  %v2038_v1 = vld [vmem:[%s9220_s3 + $0x58] sm:$0xff] }
 0x3fb   :  { %v5659_v58 = vunpack.i.h.bf16 %v5657_v61  ;;  %v5658_v18 = vunpack.i.l.bf16 %v5657_v61  ;;  %2996 = vmatpush.msra.mxu3 %v2849_v51  ;;  %5154 = vmatmul.msk.f32.gmra.mxu2 %vm2140_vm4, %v2036_v49  ;;  %v4563_v51 = vld [vmem:[%s9221_s4 + $0x70] sm:$0xff] }
 0x3fc   :  { %v3145_v46 = vsel %vm1242_vm3, %v5693_v36, %v5694_v4  ;;  %v3146_v7 = vsel %vm1242_vm3, %v5694_v4, %v9385_v23  ;;  %5170 = vmatmul.msk.f32.gmra.mxu3 %vm2140_vm4, %v2036_v49  ;;  %v4559_v36 = vld [vmem:[%s9221_s4 + $0x50] sm:$0xff]  ;;  %v5106_v49 = vld [vmem:[%s9220_s3 + $0xc8] sm:$0xff] }
 0x3fd   :  { %v2846_v62 = vsel %vm804_vm2, %v5658_v18, %v5659_v58  ;;  %v2847_v60 = vsel %vm804_vm2, %v5659_v58, %v9384_v32  ;;  %3219 = vmatpush.msra.mxu0 %v3145_v46  ;;  %3284 = vmatpush.msra.mxu1 %v3146_v7  ;;  %v4555_v46 = vld [vmem:[%s9221_s4 + $0x30] sm:$0xff]  ;;  %v5105_v7 = vld [vmem:[%s9220_s3 + $0xc0] sm:$0xff] }
 0x3fe   :  { %2932 = vmatpush.msra.mxu2 %v2846_v62  ;;  %2997 = vmatpush.msra.mxu3 %v2847_v60  ;;  %v3132_v60 = vsel %vm1242_vm3, %v5719_v2, %v9385_v23 }
 0x3ff   :  { %4572 = vperm.xlu1 %5558, %v4550_v33   ;;  %4592 = vperm.xlu2 %5559, %v4554_v20  }
 0x400   :  { %2933 = vmatpush.msra.mxu2 %v2844_v50  ;;  %2998 = vmatpush.msra.mxu3 %v2845_v16  ;;  %v4562_v50 = vld [vmem:[%s9221_s4 + $0x68] sm:$0xff] }
 0x401   :  { %5871 = vrot.lane.b32.xlu0 %v7393_v37, %s5889_s8  ;;  %5118 = vmatmul.msk.f32.gmra.mxu0 %vm2140_vm4, %v5102_v27  ;;  %v5697_v3 = vpop.permute.xlu1 %5696  ;;  %v4553_v37 = vld [vmem:[%s9221_s4 + $0x20] sm:$0xff]  ;;  %v4558_v16 = vld [vmem:[%s9221_s4 + $0x48] sm:$0xff] }
 0x402   :  { %5134 = vmatmul.msk.f32.gmra.mxu1 %vm2140_vm4, %v5102_v27  ;;  %v5667_v22 = vpop.permute.xlu0 %5666  ;;  %2934 = vmatpush.msra.mxu2 %v2842_v5  ;;  %v5699_v11 = vunpack.i.h.bf16 %v5697_v3  ;;  %v5698_v15 = vunpack.i.l.bf16 %v5697_v3  ;;  %v7812_v27 = vpop.permute.xlu2 %5736 }
 0x403   :  { %v5669_v29 = vunpack.i.h.bf16 %v5667_v22  ;;  %v5668_v19 = vunpack.i.l.bf16 %v5667_v22  ;;  %2999 = vmatpush.msra.mxu3 %v2843_v17  ;;  %5155 = vmatmul.msk.f32.gmra.mxu2 %vm2140_vm4, %v2037_v10  ;;  %v4561_v17 = vld [vmem:[%s9221_s4 + $0x60] sm:$0xff] }
 0x404   :  { %v3139_v45 = vsel %vm1242_vm3, %v5698_v15, %v5699_v11  ;;  %v3140_v35 = vsel %vm1242_vm3, %v5699_v11, %v9385_v23  ;;  %5171 = vmatmul.msk.f32.gmra.mxu3 %vm2140_vm4, %v2037_v10 }
 0x405   :  { %v3143_v21 = vsel %vm1242_vm3, %v5668_v19, %v5669_v29  ;;  %v3144_v44 = vsel %vm1242_vm3, %v5669_v29, %v9385_v23 }
 0x406   :  { %3220 = vmatpush.msra.mxu0 %v3143_v21  ;;  %3285 = vmatpush.msra.mxu1 %v3144_v44  ;;  %v5723_v21 = vunpack.i.l.bf16 %v7772_v25 }
 0x407   :  { %4587 = vperm.xlu1 %5558, %v4553_v37   ;;  %4607 = vperm.xlu2 %5559, %v4557_v42  }
 0x408   :  { %3221 = vmatpush.msra.mxu0 %v3141_v13  ;;  %3286 = vmatpush.msra.mxu1 %v3142_v6 }
 0x409   :  { %4567 = vperm.xlu0 %5557, %v4549_v28   ;;  %5119 = vmatmul.msk.f32.gmra.mxu0 %vm2140_vm4, %v5103_v9  ;;  %v5712_v14 = vpop.permute.xlu1 %5711 }
 0x40a   :  { %5135 = vmatmul.msk.f32.gmra.mxu1 %vm2140_vm4, %v5103_v9  ;;  %v5687_v41 = vpop.permute.xlu0 %5686  ;;  %3222 = vmatpush.msra.mxu0 %v3139_v45  ;;  %v5714_v34 = vunpack.i.h.bf16 %v5712_v14  ;;  %v5713_v38 = vunpack.i.l.bf16 %v5712_v14  ;;  %v7834_v22 = vpop.permute.xlu2 %5741  ;;  %v2042_v45 = vld [vmem:[%s9220_s3 + $0x78] sm:$0xff] }
 0x40b   :  { %v5689_v26 = vunpack.i.h.bf16 %v5687_v41  ;;  %v5688_v56 = vunpack.i.l.bf16 %v5687_v41  ;;  %3287 = vmatpush.msra.mxu1 %v3140_v35  ;;  %5156 = vmatmul.msk.f32.gmra.mxu2 %vm2140_vm4, %v2038_v1 }
 0x40c   :  { %3223 = vmatpush.msra.mxu0 %v3137_v57  ;;  %5172 = vmatmul.msk.f32.gmra.mxu3 %vm2140_vm4, %v2038_v1  ;;  %v3133_v33 = vsel %vm1242_vm3, %v5713_v38, %v5714_v34  ;;  %v3134_v20 = vsel %vm1242_vm3, %v5714_v34, %v9385_v23 }
 0x40d   :  { %3288 = vmatpush.msra.mxu1 %v3138_v8  ;;  %v2840_v59 = vsel %vm804_vm2, %v5688_v56, %v5689_v26  ;;  %v2841_v47 = vsel %vm804_vm2, %v5689_v26, %v9384_v32 }
 0x40e   :  { %2935 = vmatpush.msra.mxu2 %v2840_v59  ;;  %3000 = vmatpush.msra.mxu3 %v2841_v47 }
 0x40f   :  { %4602 = vperm.xlu1 %5558, %v4556_v31   ;;  %4622 = vperm.xlu2 %5559, %v4560_v12   ;;  %v5738_v31 = vunpack.i.l.bf16 %v7812_v27  ;;  %v5743_v12 = vunpack.i.l.bf16 %v7834_v22 }
 0x411   :  { %4582 = vperm.xlu0 %5557, %v4552_v30   ;;  %5120 = vmatmul.msk.f32.gmra.mxu0 %vm2140_vm4, %v5104_v24  ;;  %v7775_v32 = vpop.permute.xlu1 %5731  ;;  %v5739_v30 = vunpack.i.h.bf16 %v7812_v27 }
 0x412   :  { %5136 = vmatmul.msk.f32.gmra.mxu1 %vm2140_vm4, %v5104_v24  ;;  %v5707_v55 = vpop.permute.xlu0 %5706  ;;  %v7865_v13 = vpop.permute.xlu2 %5756  ;;  %v5734_v41 = vunpack.i.h.bf16 %v7775_v32  ;;  %v5733_v35 = vunpack.i.l.bf16 %v7775_v32  ;;  %v5109_v32 = vld [vmem:[%s9220_s3 + $0xe0] sm:$0xff] }
 0x413   :  { %v5709_v61 = vunpack.i.h.bf16 %v5707_v55  ;;  %v5708_v4 = vunpack.i.l.bf16 %v5707_v55  ;;  %5157 = vmatmul.msk.f32.gmra.mxu2 %vm2140_vm4, %v2039_v40  ;;  %v5744_v55 = vunpack.i.h.bf16 %v7834_v22  ;;  %v3429_v34 = vsel %vm3424_vm6, %v5739_v30, %v5743_v12 }
 0x414   :  { %5173 = vmatmul.msk.f32.gmra.mxu3 %vm2140_vm4, %v2039_v40  ;;  %v3431_v1 = vsel %vm3424_vm6, %v5734_v41, %v5738_v31  ;;  %v5226_v40 = vld [vmem:[%s9220_s3 + $0x188] sm:$0xff] }
 0x415   :  { %v3135_v58 = vsel %vm1242_vm3, %v5708_v4, %v5709_v61  ;;  %v3136_v18 = vsel %vm1242_vm3, %v5709_v61, %v9385_v23  ;;  %v2040_v23 = vld [vmem:[%s9220_s3 + $0x68] sm:$0xff] }
 0x416   :  { %3224 = vmatpush.msra.mxu0 %v3135_v58  ;;  %3289 = vmatpush.msra.mxu1 %v3136_v18 }
 0x417   :  { %4617 = vperm.xlu1 %5558, %v4559_v36   ;;  %4637 = vperm.xlu2 %5559, %v4563_v51   ;;  %v5225_v36 = vld [vmem:[%s9220_s3 + $0x180] sm:$0xff] }
 0x418   :  { %3225 = vmatpush.msra.mxu0 %v3133_v33  ;;  %3290 = vmatpush.msra.mxu1 %v3134_v20  ;;  %v5110_v20 = vld [vmem:[%s9220_s3 + $0xe8] sm:$0xff] }
 0x419   :  { %4597 = vperm.xlu0 %5557, %v4555_v46   ;;  %5121 = vmatmul.msk.f32.gmra.mxu0 %vm2140_vm4, %v5105_v7  ;;  %v7804_v54 = vpop.permute.xlu1 %5751 }
 0x41a   :  { %5137 = vmatmul.msk.f32.gmra.mxu1 %vm2140_vm4, %v5105_v7  ;;  %v7808_v62 = vpop.permute.xlu0 %5726  ;;  %3226 = vmatpush.msra.mxu0 %v3131_v48  ;;  %v5753_v24 = vunpack.i.l.bf16 %v7804_v54  ;;  %v7911_v51 = vpop.permute.xlu2 %5786  ;;  %v5754_v43 = vunpack.i.h.bf16 %v7804_v54 }
 0x41b   :  { %3291 = vmatpush.msra.mxu1 %v3132_v60  ;;  %5158 = vmatmul.msk.f32.gmra.mxu2 %vm2140_vm4, %v2040_v23  ;;  %v5728_v44 = vunpack.i.l.bf16 %v7808_v62  ;;  %v5729_v6 = vunpack.i.h.bf16 %v7808_v62 }
 0x41c   :  { %5174 = vmatmul.msk.f32.gmra.mxu3 %vm2140_vm4, %v2040_v23  ;;  %v3427_v2 = vsel %vm3424_vm6, %v5744_v55, %v5753_v24 }
 0x41d   :  { %v3435_v56 = vsel %vm3424_vm6, %v5724_v0, %v5728_v44  ;;  %v3433_v59 = vsel %vm3424_vm6, %v5729_v6, %v5733_v35  ;;  %v5229_v0 = vld [vmem:[%s9220_s3 + $0x1a0] sm:$0xff] }
 0x41f   :  { %4632 = vperm.xlu1 %5558, %v4562_v50   ;;  %v5111_v50 = vld [vmem:[%s9220_s3 + $0xf0] sm:$0xff] }
 0x421   :  { %4612 = vperm.xlu0 %5557, %v4558_v16   ;;  %5122 = vmatmul.msk.f32.gmra.mxu0 %vm2140_vm4, %v5106_v49  ;;  %v5767_v3 = vpop.permute.xlu1 %5766  ;;  %v5227_v16 = vld [vmem:[%s9220_s3 + $0x190] sm:$0xff] }
 0x422   :  { %5138 = vmatmul.msk.f32.gmra.mxu1 %vm2140_vm4, %v5106_v49  ;;  %v7830_v5 = vpop.permute.xlu0 %5746  ;;  %v5769_v37 = vunpack.i.h.bf16 %v5767_v3  ;;  %v5768_v42 = vunpack.i.l.bf16 %v5767_v3  ;;  %v7938_v62 = vpop.permute.xlu2 %3686 }
 0x423   :  { %5159 = vmatmul.msk.f32.gmra.mxu2 %vm2140_vm4, %v2041_v52  ;;  %v5749_v6 = vunpack.i.h.bf16 %v7830_v5 }
 0x424   :  { %5175 = vmatmul.msk.f32.gmra.mxu3 %vm2140_vm4, %v2041_v52  ;;  %v3437_v10 = vsel %vm3424_vm6, %v5769_v37, %v5723_v21  ;;  %v7902_v38 = vpop.f32.mrf.mxu2  ;;  %v7904_v61 = vpop.f32.mrf.mxu3  ;;  %v5228_v52 = vld [vmem:[%s9220_s3 + $0x198] sm:$0xff] }
 0x429   :  { %4627 = vperm.xlu0 %5557, %v4561_v17   ;;  %5123 = vmatmul.msk.f32.gmra.mxu0 %vm2140_vm4, %v5107_v39  ;;  %v7846_v29 = vpop.permute.xlu1 %5776  ;;  %v5112_v17 = vld [vmem:[%s9220_s3 + $0xf8] sm:$0xff] }
 0x42a   :  { %5139 = vmatmul.msk.f32.gmra.mxu1 %vm2140_vm4, %v5107_v39  ;;  %v5762_v19 = vpop.permute.xlu0 %5761  ;;  %v7962_v22 = vpop.permute.xlu2 %5801 }
 0x42b   :  { %v5764_v11 = vunpack.i.h.bf16 %v5762_v19  ;;  %v7849_v15 = vunpack.i.l.bf16 %v5762_v19  ;;  %5160 = vmatmul.msk.f32.gmra.mxu2 %vm2140_vm4, %v2042_v45 }
 0x42c   :  { %5176 = vmatmul.msk.f32.gmra.mxu3 %vm2140_vm4, %v2042_v45  ;;  %v7932_v54 = vpop.f32.mrf.mxu2  ;;  %v7934_v48 = vpop.f32.mrf.mxu3 }
 0x42d   :  { %v3439_v28 = vsel %vm3424_vm6, %v5764_v11, %v5768_v42  ;;  %v3440_v9 = vsel %vm3424_vm6, %v5768_v42, %v7849_v15  ;;  %v3438_v14 = vsel %vm3424_vm6, %v5723_v21, %v7849_v15  ;;  %v3436_v8 = vsel %vm3424_vm6, %v5728_v44, %v7849_v15  ;;  %v5177_v44 = vld [vmem:[%s9220_s3 + $0x100] sm:$0xff] }
 0x42e   :  { %3513 = vmatpush.msrb.mxu2 %v3439_v28  ;;  %3578 = vmatpush.msrb.mxu3 %v3440_v9  ;;  %v3434_v47 = vsel %vm3424_vm6, %v5733_v35, %v7849_v15  ;;  %v3432_v25 = vsel %vm3424_vm6, %v5738_v31, %v7849_v15  ;;  %v3430_v4 = vsel %vm3424_vm6, %v5743_v12, %v7849_v15  ;;  %v5779_v28 = vunpack.i.h.bf16 %v7846_v29 }
 0x42f   :  { %v3428_v58 = vsel %vm3424_vm6, %v5753_v24, %v7849_v15  ;;  %v5778_v9 = vunpack.i.l.bf16 %v7846_v29  ;;  %v5759_v24 = vunpack.i.h.bf16 %v7865_v13 }
 0x430   :  { %3514 = vmatpush.msrb.mxu2 %v3437_v10  ;;  %3579 = vmatpush.msrb.mxu3 %v3438_v14  ;;  %v5748_v10 = vunpack.i.l.bf16 %v7830_v5 }
 0x431   :  { %4642 = vperm.xlu0 %5557, %v4564_v53   ;;  %5124 = vmatmul.msk.f32.gmra.mxu0 %vm2140_vm4, %v5108_v63  ;;  %v7877_v26 = vpop.permute.xlu1 %5781 }
 0x432   :  { %5140 = vmatmul.msk.f32.gmra.mxu1 %vm2140_vm4, %v5108_v63  ;;  %v7881_v57 = vpop.permute.xlu0 %5771  ;;  %3515 = vmatpush.msrb.mxu2 %v3435_v56  ;;  %v7993_v53 = vpop.permute.xlu2 %5816  ;;  %v5758_v56 = vunpack.i.l.bf16 %v7865_v13  ;;  %v5789_v13 = vunpack.i.h.bf16 %v7911_v51 }
 0x433   :  { %3580 = vmatpush.msrb.mxu3 %v3436_v8  ;;  %5241 = vmatmul.msk.f32.vlgmr.msra.gmra.mxu2 %vm2140_vm4, %v5225_v36  ;;  %v5774_v11 = vunpack.i.h.bf16 %v7881_v57  ;;  %v3731_v8 = vsel %vm3718_vm7, %v5779_v28, %v5748_v10 }
 0x434   :  { %3516 = vmatpush.msrb.mxu2 %v3433_v59  ;;  %5257 = vmatmul.msk.f32.vlgmr.msra.gmra.mxu3 %vm2140_vm4, %v5225_v36  ;;  %v7954_v49 = vpop.f32.mrf.mxu2  ;;  %v7956_v23 = vpop.f32.mrf.mxu3 }
 0x435   :  { %3581 = vmatpush.msrb.mxu3 %v3434_v47  ;;  %9386 = vst [vmem:[#allocation21_spill] sm:$0xff] %v7954_v49  ;;  %v3733_v45 = vsel %vm3718_vm7, %v5774_v11, %v5778_v9 }
 0x436   :  { %3517 = vmatpush.msrb.mxu2 %v3431_v1  ;;  %9387 = vst [vmem:[#allocation22_spill] sm:$0xff] %v7956_v23  ;;  %v5803_v1 = vunpack.i.l.bf16 %v7962_v22 }
 0x437   :  { %3582 = vmatpush.msrb.mxu3 %v3432_v25  ;;  %v3729_v25 = vsel %vm3718_vm7, %v5749_v6, %v5758_v56 }
 0x438   :  { %3518 = vmatpush.msrb.mxu2 %v3429_v34 }
 0x439   :  { %3583 = vmatpush.msrb.mxu3 %v3430_v4  ;;  %5125 = vmatmul.msk.f32.gmra.mxu0 %vm2140_vm4, %v5109_v32  ;;  %v7919_v46 = vpop.permute.xlu1 %5796 }
 0x43a   :  { %5141 = vmatmul.msk.f32.gmra.mxu1 %vm2140_vm4, %v5109_v32  ;;  %3519 = vmatpush.msrb.mxu2 %v3427_v2  ;;  %v5784_v32 = vunpack.i.h.bf16 %v7877_v26 }
 0x43b   :  { %v3393_v18 = vpop.permute.xlu0 %3392  ;;  %3584 = vmatpush.msrb.mxu3 %v3428_v58  ;;  %5242 = vmatmul.msk.f32.gmra.mxu2 %vm2140_vm4, %v5226_v40  ;;  %v5178_v58 = vld [vmem:[%s9220_s3 + $0x108] sm:$0xff] }
 0x43c   :  { %v3425_v7 = vsel %vm3424_vm6, %v5754_v43, %v3393_v18  ;;  %v3426_v33 = vsel %vm3424_vm6, %v3393_v18, %v7849_v15  ;;  %5258 = vmatmul.msk.f32.gmra.mxu3 %vm2140_vm4, %v5226_v40  ;;  %v7974_v19 = vpop.f32.mrf.mxu2  ;;  %v7976_v37 = vpop.f32.mrf.mxu3  ;;  %v7984_v15 = vunpack.i.l.bf16 %v7881_v57  ;;  %v5783_v57 = vunpack.i.l.bf16 %v7877_v26 }
 0x43d   :  { %3520 = vmatpush.msrb.mxu2 %v3425_v7  ;;  %3585 = vmatpush.msrb.mxu3 %v3426_v33  ;;  %9388 = vst [vmem:[#allocation23_spill] sm:$0xff] %v7974_v19  ;;  %v5788_v18 = vunpack.i.l.bf16 %v7911_v51  ;;  %v5804_v40 = vunpack.i.h.bf16 %v7962_v22  ;;  %v5273_v19 = vld [vmem:[%s9220_s3 + $0x200] sm:$0xff] }
 0x43e   :  { %9389 = vst [vmem:[#allocation24_spill] sm:$0xff] %v7976_v37  ;;  %v3734_v29 = vsel %vm3718_vm7, %v5778_v9, %v7984_v15  ;;  %v3732_v31 = vsel %vm3718_vm7, %v5748_v10, %v7984_v15  ;;  %v3730_v55 = vsel %vm3718_vm7, %v5758_v56, %v7984_v15  ;;  %v3727_v26 = vsel %vm3718_vm7, %v5759_v24, %v5783_v57 }
 0x43f   :  { %v3728_v33 = vsel %vm3718_vm7, %v5783_v57, %v7984_v15  ;;  %v3725_v22 = vsel %vm3718_vm7, %v5784_v32, %v5788_v18  ;;  %v5798_v9 = vunpack.i.l.bf16 %v7919_v46 }
 0x441   :  { %5126 = vmatmul.msk.f32.gmra.mxu0 %vm2140_vm4, %v5110_v20  ;;  %v7944_v27 = vpop.permute.xlu1 %5811  ;;  %v3722_v24 = vsel %vm3718_vm7, %v5798_v9, %v7984_v15 }
 0x442   :  { %5142 = vmatmul.msk.f32.gmra.mxu1 %vm2140_vm4, %v5110_v20  ;;  %v5813_v6 = vunpack.i.l.bf16 %v7944_v27 }
 0x443   :  { %v7940_v60 = vpop.permute.xlu0 %5791  ;;  %5243 = vmatmul.msk.f32.gmra.mxu2 %vm2140_vm4, %v5227_v16 }
 0x444   :  { %5259 = vmatmul.msk.f32.gmra.mxu3 %vm2140_vm4, %v5227_v16  ;;  %v8007_v41 = vpop.f32.mrf.mxu2  ;;  %v8009_v35 = vpop.f32.mrf.mxu3  ;;  %v5793_v7 = vunpack.i.l.bf16 %v7940_v60  ;;  %v5794_v11 = vunpack.i.h.bf16 %v7940_v60 }
 0x445   :  { %9390 = vst [vmem:[#allocation27_spill] sm:$0xff] %v8007_v41  ;;  %v8046_v16 = vpop.permute.xlu2 %5821 }
 0x446   :  { %9391 = vst [vmem:[#allocation28_spill] sm:$0xff] %v8009_v35  ;;  %v3724_v56 = vsel %vm3718_vm7, %v5793_v7, %v7984_v15  ;;  %v5323_v35 = vld [vmem:[%s9220_s3 + $0x290] sm:$0xff] }
 0x449   :  { %5127 = vmatmul.msk.f32.gmra.mxu0 %vm2140_vm4, %v5111_v50  ;;  %v7967_v39 = vpop.permute.xlu1 %5831 }
 0x44a   :  { %5143 = vmatmul.msk.f32.gmra.mxu1 %vm2140_vm4, %v5111_v50  ;;  %v5818_v50 = vunpack.i.l.bf16 %v7993_v53 }
 0x44b   :  { %v7958_v3 = vpop.permute.xlu0 %5806  ;;  %5244 = vmatmul.msk.f32.gmra.mxu2 %vm2140_vm4, %v5228_v52 }
 0x44c   :  { %5260 = vmatmul.msk.f32.gmra.mxu3 %vm2140_vm4, %v5228_v52  ;;  %v5808_v2 = vunpack.i.l.bf16 %v7958_v3  ;;  %v5799_v52 = vunpack.i.h.bf16 %v7919_v46  ;;  %v8057_v28 = vpop.f32.mrf.mxu2 }
 0x44d   :  { %9392 = vst [vmem:[#allocation63_spill] sm:$0xff] %v8057_v28  ;;  %v5837_v41 = vpop.permute.xlu2 %5836 }
 0x44e   :  { %v4023_v10 = vsel %vm4012_vm8, %v5804_v40, %v5808_v2 }
 0x451   :  { %5128 = vmatmul.msk.f32.gmra.mxu0 %vm2140_vm4, %v5112_v17  ;;  %v5847_v14 = vpop.permute.xlu1 %5846 }
 0x452   :  { %5144 = vmatmul.msk.f32.gmra.mxu1 %vm2140_vm4, %v5112_v17  ;;  %v5849_v12 = vunpack.i.h.bf16 %v5847_v14  ;;  %v5848_v59 = vunpack.i.l.bf16 %v5847_v14  ;;  %v5809_v17 = vunpack.i.h.bf16 %v7958_v3  ;;  %v8059_v3 = vpop.f32.mrf.mxu3 }
 0x453   :  { %v7978_v42 = vpop.permute.xlu0 %5826  ;;  %5245 = vmatmul.msk.f32.gmra.mxu2 %vm2140_vm4, %v5229_v0  ;;  %9393 = vst [vmem:[#allocation25_spill] sm:$0xff] %v8059_v3 }
 0x454   :  { %5261 = vmatmul.msk.f32.gmra.mxu3 %vm2140_vm4, %v5229_v0  ;;  %v4025_v20 = vsel %vm4012_vm8, %v5849_v12, %v5803_v1  ;;  %v5814_v0 = vunpack.i.h.bf16 %v7944_v27  ;;  %v9246_v14 = vunpack.i.l.bf16 %v7978_v42  ;;  %v5823_v27 = vunpack.i.l.bf16 %v8046_v16 }
 0x455   :  { %v4021_v57 = vsel %vm4012_vm8, %v5809_v17, %v5813_v6  ;;  %v5231_v17 = vld [vmem:[%s9220_s3 + $0x1b0] sm:$0xff]  ;;  %v9415_v49 = vunpack.i.l.bf16 %v7978_v42 }
 0x456   :  { %v7986_v21 = vpop.f32.mrf.mxu0 }
 0x457   :  { %v7995_v63 = vpop.f32.mrf.mxu1 }
 0x459   :  { %5193 = vmatmul.msk.f32.vlgmr.msrb.gmra.mxu0 %vm2140_vm4, %v5177_v44 }
 0x45a   :  { %5209 = vmatmul.msk.f32.vlgmr.msrb.gmra.mxu1 %vm2140_vm4, %v5177_v44  ;;  %3807 = vmatpush.msrb.mxu0 %v3733_v45  ;;  %v3726_v44 = vsel %vm3718_vm7, %v5788_v18, %v7984_v15 }
 0x45b   :  { %3872 = vmatpush.msrb.mxu1 %v3734_v29  ;;  %v5842_v5 = vpop.permute.xlu0 %5841  ;;  %v3723_v29 = vsel %vm3718_vm7, %v5789_v13, %v5793_v7 }
 0x45c   :  { %v5844_v47 = vunpack.i.h.bf16 %v5842_v5  ;;  %v8017_v30 = vunpack.i.l.bf16 %v5842_v5  ;;  %3808 = vmatpush.msrb.mxu0 %v3731_v8  ;;  %v3721_v8 = vsel %vm3718_vm7, %v5794_v11, %v5798_v9 }
 0x45d   :  { %3873 = vmatpush.msrb.mxu1 %v3732_v31 }
 0x45e   :  { %3809 = vmatpush.msrb.mxu0 %v3729_v25  ;;  %v8026_v34 = vpop.f32.mrf.mxu0  ;;  %v4027_v4 = vsel %vm4012_vm8, %v5844_v47, %v5848_v59  ;;  %v4028_v36 = vsel %vm4012_vm8, %v5848_v59, %v8017_v30  ;;  %v4026_v51 = vsel %vm4012_vm8, %v5803_v1, %v8017_v30  ;;  %v4024_v46 = vsel %vm4012_vm8, %v5808_v2, %v8017_v30 }
 0x45f   :  { %3874 = vmatpush.msrb.mxu1 %v3730_v55  ;;  %v8033_v43 = vpop.f32.mrf.mxu1  ;;  %4101 = vmatpush.msra.mxu2 %v4027_v4  ;;  %v4022_v5 = vsel %vm4012_vm8, %v5813_v6, %v8017_v30  ;;  %v5819_v59 = vunpack.i.h.bf16 %v7993_v53  ;;  %v5833_v47 = vunpack.i.l.bf16 %v7967_v39  ;;  %v4019_v25 = vsel %vm4012_vm8, %v5814_v0, %v5818_v50  ;;  %v5179_v53 = vld [vmem:[%s9220_s3 + $0x110] sm:$0xff] }
 0x460   :  { %4166 = vmatpush.msra.mxu3 %v4028_v36  ;;  %3810 = vmatpush.msrb.mxu0 %v3727_v26  ;;  %v4020_v32 = vsel %vm4012_vm8, %v5818_v50, %v8017_v30  ;;  %v3719_v55 = vsel %vm3718_vm7, %v5799_v52, %v7938_v62  ;;  %v5824_v4 = vunpack.i.h.bf16 %v8046_v16  ;;  %v3720_v36 = vsel %vm3718_vm7, %v7938_v62, %v7984_v15  ;;  %v5180_v16 = vld [vmem:[%s9220_s3 + $0x118] sm:$0xff] }
 0x461   :  { %3875 = vmatpush.msrb.mxu1 %v3728_v33  ;;  %4102 = vmatpush.msra.mxu2 %v4025_v20  ;;  %v4017_v13 = vsel %vm4012_vm8, %v5819_v59, %v5823_v27  ;;  %v5834_v2 = vunpack.i.h.bf16 %v7967_v39  ;;  %v4018_v26 = vsel %vm4012_vm8, %v5823_v27, %v8017_v30  ;;  %v4016_v39 = vsel %vm4012_vm8, %v5833_v47, %v8017_v30  ;;  %v5234_v59 = vld [vmem:[%s9220_s3 + $0x1c8] sm:$0xff] }
 0x462   :  { %4167 = vmatpush.msra.mxu3 %v4026_v51  ;;  %5194 = vmatmul.msk.f32.gmra.mxu0 %vm2140_vm4, %v5178_v58  ;;  %v4015_v15 = vsel %vm4012_vm8, %v5824_v4, %v5833_v47 }
 0x463   :  { %5210 = vmatmul.msk.f32.gmra.mxu1 %vm2140_vm4, %v5178_v58  ;;  %3811 = vmatpush.msrb.mxu0 %v3725_v22  ;;  %v8065_v60 = vpop.permute.xlu0 %5851  ;;  %v5230_v58 = vld [vmem:[%s9220_s3 + $0x1a8] sm:$0xff]  ;;  %v5181_v22 = vld [vmem:[%s9220_s3 + $0x120] sm:$0xff] }
 0x464   :  { %3876 = vmatpush.msrb.mxu1 %v3726_v44  ;;  %v8070_v45 = vunpack.i.l.bf16 %v8065_v60  ;;  %4103 = vmatpush.msra.mxu2 %v4023_v10  ;;  %v5232_v44 = vld [vmem:[%s9220_s3 + $0x1b8] sm:$0xff] }
 0x465   :  { %4168 = vmatpush.msra.mxu3 %v4024_v46  ;;  %3812 = vmatpush.msrb.mxu0 %v3723_v29  ;;  %v5182_v46 = vld [vmem:[%s9220_s3 + $0x128] sm:$0xff]  ;;  %v5233_v29 = vld [vmem:[%s9220_s3 + $0x1c0] sm:$0xff] }
 0x466   :  { %3877 = vmatpush.msrb.mxu1 %v3724_v56  ;;  %4104 = vmatpush.msra.mxu2 %v4021_v57  ;;  %v8082_v31 = vpop.f32.mrf.mxu0  ;;  %v8088_v12 = vsel %vm4306_vm9, %v9246_v14, %v8070_v45  ;;  %v8115_v18 = vpop.f32.mrf.mxu2 }
 0x467   :  { %9394 = vst [vmem:[#allocation48_spill] sm:$0xff] %v8082_v31  ;;  %4169 = vmatpush.msra.mxu3 %v4022_v5  ;;  %3813 = vmatpush.msrb.mxu0 %v3721_v8  ;;  %v8094_v1 = vpop.f32.mrf.mxu1  ;;  %v8117_v7 = vpop.f32.mrf.mxu3  ;;  %v5183_v8 = vld [vmem:[%s9220_s3 + $0x130] sm:$0xff] }
 0x468   :  { %9395 = vst [vmem:[#allocation26_spill] sm:$0xff] %v8094_v1  ;;  %3878 = vmatpush.msrb.mxu1 %v3722_v24  ;;  %4105 = vmatpush.msra.mxu2 %v4019_v25  ;;  %v5838_v1 = vunpack.i.l.bf16 %v5837_v41 }
 0x469   :  { %4170 = vmatpush.msra.mxu3 %v4020_v32  ;;  %3814 = vmatpush.msrb.mxu0 %v3719_v55  ;;  %9396 = vst [vmem:[#allocation29_spill] sm:$0xff] %v8115_v18  ;;  %v5184_v55 = vld [vmem:[%s9220_s3 + $0x138] sm:$0xff]  ;;  %v5191_v18 = vld [vmem:[%s9220_s3 + $0x170] sm:$0xff] }
 0x46a   :  { %3879 = vmatpush.msrb.mxu1 %v3720_v36  ;;  %4106 = vmatpush.msra.mxu2 %v4017_v13  ;;  %9397 = vst [vmem:[#allocation30_spill] sm:$0xff] %v8117_v7  ;;  %v5190_v7 = vld [vmem:[%s9220_s3 + $0x168] sm:$0xff] }
 0x46b   :  { %4171 = vmatpush.msra.mxu3 %v4018_v26  ;;  %5195 = vmatmul.msk.f32.gmra.mxu0 %vm2140_vm4, %v5179_v53  ;;  %v3981_v62 = vpop.permute.xlu0 %3980  ;;  %v5185_v26 = vld [vmem:[%s9220_s3 + $0x140] sm:$0xff] }
 0x46c   :  { %5211 = vmatmul.msk.f32.gmra.mxu1 %vm2140_vm4, %v5179_v53  ;;  %4107 = vmatpush.msra.mxu2 %v4015_v15  ;;  %v4013_v33 = vsel %vm4012_vm8, %v5834_v2, %v3981_v62  ;;  %v4014_v20 = vsel %vm4012_vm8, %v3981_v62, %v8017_v30  ;;  %v5235_v53 = vld [vmem:[%s9220_s3 + $0x1d0] sm:$0xff] }
 0x46d   :  { %4172 = vmatpush.msra.mxu3 %v4016_v39  ;;  %5246 = vmatmul.msk.f32.gmra.mxu2 %vm2140_vm4, %v5230_v58 }
 0x46e   :  { %4108 = vmatpush.msra.mxu2 %v4013_v33  ;;  %v8128_v40 = vpop.f32.mrf.mxu0  ;;  %5262 = vmatmul.msk.f32.gmra.mxu3 %vm2140_vm4, %v5230_v58  ;;  %v8139_v30 = vpop.f32.mrf.mxu2  ;;  %v5236_v58 = vld [vmem:[%s9220_s3 + $0x1d8] sm:$0xff] }
 0x46f   :  { %9398 = vst [vmem:[#allocation47_spill] sm:$0xff] %v8128_v40  ;;  %4173 = vmatpush.msra.mxu3 %v4014_v20  ;;  %v8131_v50 = vpop.f32.mrf.mxu1  ;;  %v8142_v51 = vpop.f32.mrf.mxu3  ;;  %v5186_v20 = vld [vmem:[%s9220_s3 + $0x148] sm:$0xff] }
 0x470   :  { %9399 = vst [vmem:[#allocation60_spill] sm:$0xff] %v8131_v50 }
 0x471   :  { %9400 = vst [vmem:[#allocation31_spill] sm:$0xff] %v8139_v30 }
 0x472   :  { %9401 = vst [vmem:[#allocation32_spill] sm:$0xff] %v8142_v51  ;;  %v5189_v51 = vld [vmem:[%s9220_s3 + $0x160] sm:$0xff] }
 0x473   :  { %5196 = vmatmul.msk.f32.gmra.mxu0 %vm2140_vm4, %v5180_v16 }
 0x474   :  { %5212 = vmatmul.msk.f32.gmra.mxu1 %vm2140_vm4, %v5180_v16  ;;  %v5237_v16 = vld [vmem:[%s9220_s3 + $0x1e0] sm:$0xff] }
 0x475   :  { %5247 = vmatmul.msk.f32.gmra.mxu2 %vm2140_vm4, %v5231_v17 }
 0x476   :  { %v8146_v52 = vpop.f32.mrf.mxu0  ;;  %5263 = vmatmul.msk.f32.gmra.mxu3 %vm2140_vm4, %v5231_v17  ;;  %v8159_v9 = vpop.f32.mrf.mxu2 }
 0x477   :  { %9402 = vst [vmem:[#allocation70_spill] sm:$0xff] %v8146_v52  ;;  %v8149_v11 = vpop.f32.mrf.mxu1  ;;  %v8162_v0 = vpop.f32.mrf.mxu3  ;;  %v5854_v52 = vunpack.i.h.bf16 %v8065_v60 }
 0x478   :  { %9403 = vst [vmem:[#allocation33_spill] sm:$0xff] %v8149_v11 }
 0x47b   :  { %5197 = vmatmul.msk.f32.gmra.mxu0 %vm2140_vm4, %v5181_v22 }
 0x47c   :  { %5213 = vmatmul.msk.f32.gmra.mxu1 %vm2140_vm4, %v5181_v22 }
 0x47d   :  { %5248 = vmatmul.msk.f32.gmra.mxu2 %vm2140_vm4, %v5232_v44 }
 0x47e   :  { %v8164_v6 = vpop.f32.mrf.mxu0  ;;  %5264 = vmatmul.msk.f32.gmra.mxu3 %vm2140_vm4, %v5232_v44  ;;  %v8181_v56 = vpop.f32.mrf.mxu2 }
 0x47f   :  { %9404 = vst [vmem:[#allocation34_spill] sm:$0xff] %v8164_v6  ;;  %v8167_v10 = vpop.f32.mrf.mxu1  ;;  %v8185_v5 = vpop.f32.mrf.mxu3  ;;  %v5192_v6 = vld [vmem:[%s9220_s3 + $0x178] sm:$0xff] }
 0x480   :  { %9405 = vst [vmem:[#allocation56_spill] sm:$0xff] %v8167_v10  ;;  %v5857_v10 = vpop.permute.xlu1 %5856 }
 0x481   :  { %v5859_v40 = vunpack.i.h.bf16 %v5857_v10 }
 0x483   :  { %5198 = vmatmul.msk.f32.gmra.mxu0 %vm2140_vm4, %v5182_v46  ;;  %v4319_v31 = vsel %vm4306_vm9, %v5859_v40, %v9415_v49  ;;  %v4318_v49 = vsel %vm4306_vm9, %v5838_v1, %v8070_v45 }
 0x484   :  { %5214 = vmatmul.msk.f32.gmra.mxu1 %vm2140_vm4, %v5182_v46 }
 0x485   :  { %5249 = vmatmul.msk.f32.gmra.mxu2 %vm2140_vm4, %v5233_v29 }
 0x486   :  { %v8178_v27 = vpop.f32.mrf.mxu0  ;;  %5265 = vmatmul.msk.f32.gmra.mxu3 %vm2140_vm4, %v5233_v29  ;;  %v8199_v24 = vpop.f32.mrf.mxu2  ;;  %v5187_v29 = vld [vmem:[%s9220_s3 + $0x150] sm:$0xff] }
 0x487   :  { %9406 = vst [vmem:[#allocation36_spill] sm:$0xff] %v8178_v27  ;;  %v8183_v57 = vpop.f32.mrf.mxu1  ;;  %v8203_v32 = vpop.f32.mrf.mxu3 }
 0x488   :  { %9407 = vst [vmem:[#allocation37_spill] sm:$0xff] %v8183_v57  ;;  %v5862_v37 = vpop.permute.xlu1 %5861 }
 0x48b   :  { %5199 = vmatmul.msk.f32.gmra.mxu0 %vm2140_vm4, %v5183_v8 }
 0x48c   :  { %5215 = vmatmul.msk.f32.gmra.mxu1 %vm2140_vm4, %v5183_v8  ;;  %v5238_v8 = vld [vmem:[%s9220_s3 + $0x1e8] sm:$0xff] }
 0x48d   :  { %5250 = vmatmul.msk.f32.gmra.mxu2 %vm2140_vm4, %v5234_v59 }
 0x48e   :  { %v8196_v47 = vpop.f32.mrf.mxu0  ;;  %5266 = vmatmul.msk.f32.gmra.mxu3 %vm2140_vm4, %v5234_v59  ;;  %v8217_v36 = vpop.f32.mrf.mxu2 }
 0x48f   :  { %9408 = vst [vmem:[#allocation69_spill] sm:$0xff] %v8196_v47  ;;  %v8201_v25 = vpop.f32.mrf.mxu1  ;;  %v8221_v2 = vpop.f32.mrf.mxu3 }
 0x490   :  { %9409 = vst [vmem:[#allocation38_spill] sm:$0xff] %v8201_v25 }
 0x493   :  { %5200 = vmatmul.msk.f32.gmra.mxu0 %vm2140_vm4, %v5184_v55 }
 0x494   :  { %5216 = vmatmul.msk.f32.gmra.mxu1 %vm2140_vm4, %v5184_v55 }
 0x495   :  { %5251 = vmatmul.msk.f32.gmra.mxu2 %vm2140_vm4, %v5235_v53 }
 0x496   :  { %v8214_v4 = vpop.f32.mrf.mxu0  ;;  %5267 = vmatmul.msk.f32.gmra.mxu3 %vm2140_vm4, %v5235_v53  ;;  %v8235_v15 = vpop.f32.mrf.mxu2 }
 0x497   :  { %v8219_v13 = vpop.f32.mrf.mxu1  ;;  %v8239_v33 = vpop.f32.mrf.mxu3 }
 0x49b   :  { %5201 = vmatmul.msk.f32.gmra.mxu0 %vm2140_vm4, %v5185_v26 }
 0x49c   :  { %5217 = vmatmul.msk.f32.gmra.mxu1 %vm2140_vm4, %v5185_v26 }
 0x49d   :  { %5252 = vmatmul.msk.f32.gmra.mxu2 %vm2140_vm4, %v5236_v58 }
 0x49e   :  { %v8232_v62 = vpop.f32.mrf.mxu0  ;;  %5268 = vmatmul.msk.f32.gmra.mxu3 %vm2140_vm4, %v5236_v58  ;;  %v8253_v22 = vpop.f32.mrf.mxu2  ;;  %v5188_v58 = vld [vmem:[%s9220_s3 + $0x158] sm:$0xff] }
 0x49f   :  { %v8237_v39 = vpop.f32.mrf.mxu1  ;;  %v8257_v46 = vpop.f32.mrf.mxu3 }
 0x4a3   :  { %5202 = vmatmul.msk.f32.gmra.mxu0 %vm2140_vm4, %v5186_v20 }
 0x4a4   :  { %5218 = vmatmul.msk.f32.gmra.mxu1 %vm2140_vm4, %v5186_v20  ;;  %v5239_v20 = vld [vmem:[%s9220_s3 + $0x1f0] sm:$0xff] }
 0x4a5   :  { %5253 = vmatmul.msk.f32.gmra.mxu2 %vm2140_vm4, %v5237_v16 }
 0x4a6   :  { %v8250_v17 = vpop.f32.mrf.mxu0  ;;  %5269 = vmatmul.msk.f32.gmra.mxu3 %vm2140_vm4, %v5237_v16  ;;  %v8271_v55 = vpop.f32.mrf.mxu2 }
 0x4a7   :  { %v8255_v44 = vpop.f32.mrf.mxu1  ;;  %v8275_v26 = vpop.f32.mrf.mxu3 }
 0x4ab   :  { %5203 = vmatmul.msk.f32.gmra.mxu0 %vm2140_vm4, %v5187_v29 }
 0x4ac   :  { %5219 = vmatmul.msk.f32.gmra.mxu1 %vm2140_vm4, %v5187_v29 }
 0x4ad   :  { %5254 = vmatmul.msk.f32.gmra.mxu2 %vm2140_vm4, %v5238_v8 }
 0x4ae   :  { %v8268_v59 = vpop.f32.mrf.mxu0  ;;  %5270 = vmatmul.msk.f32.gmra.mxu3 %vm2140_vm4, %v5238_v8  ;;  %v8289_v29 = vpop.f32.mrf.mxu2 }
 0x4af   :  { %v8273_v53 = vpop.f32.mrf.mxu1  ;;  %v8293_v14 = vpop.f32.mrf.mxu3 }
 0x4b3   :  { %5204 = vmatmul.msk.f32.gmra.mxu0 %vm2140_vm4, %v5188_v58 }
 0x4b4   :  { %5220 = vmatmul.msk.f32.gmra.mxu1 %vm2140_vm4, %v5188_v58  ;;  %v5240_v58 = vld [vmem:[%s9220_s3 + $0x1f8] sm:$0xff] }
 0x4b5   :  { %5255 = vmatmul.msk.f32.gmra.mxu2 %vm2140_vm4, %v5239_v20 }
 0x4b6   :  { %v8286_v16 = vpop.f32.mrf.mxu0  ;;  %5271 = vmatmul.msk.f32.gmra.mxu3 %vm2140_vm4, %v5239_v20  ;;  %v8307_v25 = vpop.f32.mrf.mxu2 }
 0x4b7   :  { %v8291_v8 = vpop.f32.mrf.mxu1  ;;  %v8311_v47 = vpop.f32.mrf.mxu3 }
 0x4bb   :  { %5205 = vmatmul.msk.f32.gmra.mxu0 %vm2140_vm4, %v5189_v51 }
 0x4bc   :  { %5221 = vmatmul.msk.f32.gmra.mxu1 %vm2140_vm4, %v5189_v51  ;;  %v5321_v51 = vld [vmem:[%s9220_s3 + $0x280] sm:$0xff] }
 0x4bd   :  { %5256 = vmatmul.msk.f32.gmra.mxu2 %vm2140_vm4, %v5240_v58 }
 0x4be   :  { %v8304_v20 = vpop.f32.mrf.mxu0  ;;  %5272 = vmatmul.msk.f32.gmra.mxu3 %vm2140_vm4, %v5240_v58  ;;  %v8330_v27 = vpop.f32.mrf.mxu2 }
 0x4bf   :  { %v8309_v30 = vpop.f32.mrf.mxu1  ;;  %9410 = vst [vmem:[#allocation39_spill] sm:$0xff] %v8330_v27  ;;  %v8332_v3 = vpop.f32.mrf.mxu3 }
 0x4c0   :  { %9411 = vst [vmem:[#allocation59_spill] sm:$0xff] %v8332_v3  ;;  %v5872_v27 = vpop.permute.xlu0 %5871 }
 0x4c3   :  { %5206 = vmatmul.msk.f32.gmra.mxu0 %vm2140_vm4, %v5190_v7 }
 0x4c4   :  { %5222 = vmatmul.msk.f32.gmra.mxu1 %vm2140_vm4, %v5190_v7  ;;  %v5322_v7 = vld [vmem:[%s9220_s3 + $0x288] sm:$0xff] }
 0x4c5   :  { %5337 = vmatmul.msk.f32.vlgmr.msrb.gmra.mxu2 %vm2140_vm4, %v5321_v51 }
 0x4c6   :  { %v8322_v58 = vpop.f32.mrf.mxu0  ;;  %5353 = vmatmul.msk.f32.vlgmr.msrb.gmra.mxu3 %vm2140_vm4, %v5321_v51  ;;  %v8351_v11 = vpop.f32.mrf.mxu2 }
 0x4c7   :  { %v8325_v57 = vpop.f32.mrf.mxu1  ;;  %9412 = vst [vmem:[#allocation3_spill] sm:$0xff] %v8351_v11  ;;  %v5829_v11 = vunpack.i.h.bf16 %v7978_v42 }
 0x4cb   :  { %5207 = vmatmul.msk.f32.gmra.mxu0 %vm2140_vm4, %v5191_v18 }
 0x4cc   :  { %5223 = vmatmul.msk.f32.gmra.mxu1 %vm2140_vm4, %v5191_v18  ;;  %v8354_v18 = vpop.f32.mrf.mxu3 }
 0x4cd   :  { %5338 = vmatmul.msk.f32.gmra.mxu2 %vm2140_vm4, %v5322_v7  ;;  %9413 = vst [vmem:[#allocation41_spill] sm:$0xff] %v8354_v18  ;;  %v5858_v18 = vunpack.i.l.bf16 %v5857_v10  ;;  %v5863_v10 = vunpack.i.l.bf16 %v5862_v37 }
 0x4ce   :  { %v8340_v51 = vpop.f32.mrf.mxu0  ;;  %5354 = vmatmul.msk.f32.gmra.mxu3 %vm2140_vm4, %v5322_v7  ;;  %v8376_v23 = vpop.f32.mrf.mxu2 }
 0x4cf   :  { %v8343_v28 = vpop.f32.mrf.mxu1  ;;  %v4322_v60 = vsel %vm4306_vm9, %v5858_v18, %v8070_v45  ;;  %9414 = vst [vmem:[#allocation4_spill] sm:$0xff] %v8376_v23 }
 0x4d3   :  { %5208 = vmatmul.msk.f32.gmra.mxu0 %vm2140_vm4, %v5192_v6 }
 0x4d4   :  { %5224 = vmatmul.msk.f32.gmra.mxu1 %vm2140_vm4, %v5192_v6  ;;  %v5324_v6 = vld [vmem:[%s9220_s3 + $0x298] sm:$0xff]  ;;  %v8382_v3 = vpop.f32.mrf.mxu3 }
 0x4d5   :  { %5339 = vmatmul.msk.f32.gmra.mxu2 %vm2140_vm4, %v5323_v35  ;;  %9416 = vst [vmem:[#allocation43_spill] sm:$0xff] %v8382_v3 }
 0x4d6   :  { %v8358_v7 = vpop.f32.mrf.mxu0  ;;  %5355 = vmatmul.msk.f32.gmra.mxu3 %vm2140_vm4, %v5323_v35  ;;  %v4321_v35 = vsel %vm4306_vm9, %v5854_v52, %v5858_v18  ;;  %v5867_v52 = vpop.permute.xlu2 %5866  ;;  %v5864_v18 = vunpack.i.h.bf16 %v5862_v37 }
 0x4d7   :  { %v8362_v50 = vpop.f32.mrf.mxu1  ;;  %v5868_v40 = vunpack.i.l.bf16 %v5867_v52 }
 0x4d9   :  { %v4313_v3 = vsel %vm4306_vm9, %v5864_v18, %v5868_v40 }
 0x4db   :  { %5289 = vmatmul.msk.f32.vlgmr.msra.gmra.mxu0 %vm2140_vm4, %v5273_v19 }
 0x4dc   :  { %5305 = vmatmul.msk.f32.vlgmr.msra.gmra.mxu1 %vm2140_vm4, %v5273_v19  ;;  %4395 = vmatpush.msra.mxu0 %v4321_v35  ;;  %v5839_v19 = vunpack.i.h.bf16 %v5837_v41  ;;  %v4317_v35 = vsel %vm4306_vm9, %v5829_v11, %v5838_v1  ;;  %v5873_v41 = vunpack.i.l.bf16 %v5872_v27  ;;  %v5325_v1 = vld [vmem:[%s9220_s3 + $0x2a0] sm:$0xff]  ;;  %v5869_v11 = vunpack.i.h.bf16 %v5867_v52  ;;  %v8412_v52 = vpop.f32.mrf.mxu2  ;;  %v8415_v18 = vpop.f32.mrf.mxu3 }
 0x4dd   :  { %4460 = vmatpush.msra.mxu1 %v4322_v60  ;;  %5340 = vmatmul.msk.f32.gmra.mxu2 %vm2140_vm4, %v5324_v6  ;;  %9417 = vst [vmem:[#allocation7_spill] sm:$0xff] %v8412_v52 }
 0x4de   :  { %4396 = vmatpush.msra.mxu0 %v4319_v31  ;;  %5356 = vmatmul.msk.f32.gmra.mxu3 %vm2140_vm4, %v5324_v6  ;;  %v5274_v31 = vld [vmem:[%s9220_s3 + $0x208] sm:$0xff]  ;;  %v5877_v6 = vpop.permute.xlu1 %5876  ;;  %v4315_v37 = vsel %vm4306_vm9, %v5839_v19, %v5863_v10  ;;  %v4314_v19 = vsel %vm4306_vm9, %v5868_v40, %v8070_v45  ;;  %9418 = vst [vmem:[#allocation49_spill] sm:$0xff] %v8415_v18 }
 0x4df   :  { %4461 = vmatpush.msra.mxu1 %v8088_v12  ;;  %v8387_v60 = vpop.f32.mrf.mxu0  ;;  %v4316_v12 = vsel %vm4306_vm9, %v5863_v10, %v8070_v45  ;;  %v5878_v23 = vunpack.i.l.bf16 %v5877_v6  ;;  %v4311_v10 = vsel %vm4306_vm9, %v5869_v11, %v5873_v41  ;;  %v5326_v11 = vld [vmem:[%s9220_s3 + $0x2a8] sm:$0xff] }
 0x4e0   :  { %4397 = vmatpush.msra.mxu0 %v4317_v35  ;;  %v8391_v42 = vpop.f32.mrf.mxu1  ;;  %v5874_v35 = vunpack.i.h.bf16 %v5872_v27  ;;  %v4312_v27 = vsel %vm4306_vm9, %v5873_v41, %v8070_v45  ;;  %v5275_v41 = vld [vmem:[%s9220_s3 + $0x210] sm:$0xff] }
 0x4e1   :  { %4462 = vmatpush.msra.mxu1 %v4318_v49  ;;  %v5879_v49 = vunpack.i.h.bf16 %v5877_v6  ;;  %v4310_v40 = vsel %vm4306_vm9, %v5878_v23, %v8070_v45 }
 0x4e2   :  { %4398 = vmatpush.msra.mxu0 %v4315_v37 }
 0x4e3   :  { %4463 = vmatpush.msra.mxu1 %v4316_v12  ;;  %5290 = vmatmul.msk.f32.gmra.mxu0 %vm2140_vm4, %v5274_v31 }
 0x4e4   :  { %5306 = vmatmul.msk.f32.gmra.mxu1 %vm2140_vm4, %v5274_v31  ;;  %4399 = vmatpush.msra.mxu0 %v4313_v3  ;;  %v4309_v3 = vsel %vm4306_vm9, %v5874_v35, %v5878_v23  ;;  %v4275_v31 = vpop.permute.xlu2 %4274  ;;  %v5276_v35 = vld [vmem:[%s9220_s3 + $0x218] sm:$0xff] }
 0x4e5   :  { %4464 = vmatpush.msra.mxu1 %v4314_v19  ;;  %5341 = vmatmul.msk.f32.gmra.mxu2 %vm2140_vm4, %v5325_v1  ;;  %v4307_v12 = vsel %vm4306_vm9, %v5879_v49, %v4275_v31 }
 0x4e6   :  { %4400 = vmatpush.msra.mxu0 %v4311_v10  ;;  %5357 = vmatmul.msk.f32.gmra.mxu3 %vm2140_vm4, %v5325_v1  ;;  %v4308_v1 = vsel %vm4306_vm9, %v4275_v31, %v8070_v45  ;;  %v5327_v10 = vld [vmem:[%s9220_s3 + $0x2b0] sm:$0xff] }
 0x4e7   :  { %4465 = vmatpush.msra.mxu1 %v4312_v27 }
 0x4e8   :  { %4401 = vmatpush.msra.mxu0 %v4309_v3  ;;  %v8419_v6 = vpop.f32.mrf.mxu0  ;;  %v5277_v3 = vld [vmem:[%s9220_s3 + $0x220] sm:$0xff] }
 0x4e9   :  { %4466 = vmatpush.msra.mxu1 %v4310_v40  ;;  %v8424_v37 = vpop.f32.mrf.mxu1 }
 0x4ea   :  { %4402 = vmatpush.msra.mxu0 %v4307_v12  ;;  %v5328_v12 = vld [vmem:[%s9220_s3 + $0x2b8] sm:$0xff] }
 0x4eb   :  { %4467 = vmatpush.msra.mxu1 %v4308_v1  ;;  %5291 = vmatmul.msk.f32.gmra.mxu0 %vm2140_vm4, %v5275_v41 }
 0x4ec   :  { %5307 = vmatmul.msk.f32.gmra.mxu1 %vm2140_vm4, %v5275_v41 }
 0x4ed   :  { %5342 = vmatmul.msk.f32.gmra.mxu2 %vm2140_vm4, %v5326_v11 }
 0x4ee   :  { %5358 = vmatmul.msk.f32.gmra.mxu3 %vm2140_vm4, %v5326_v11  ;;  %v5278_v11 = vld [vmem:[%s9220_s3 + $0x228] sm:$0xff] }
 0x4f0   :  { %v8436_v23 = vpop.f32.mrf.mxu0  ;;  %v8441_v45 = vpop.f32.mrf.mxu2 }
 0x4f1   :  { %9419 = vst [vmem:[#allocation8_spill] sm:$0xff] %v8441_v45  ;;  %v8443_v19 = vpop.f32.mrf.mxu1  ;;  %v8445_v49 = vpop.f32.mrf.mxu3  ;;  %v5330_v45 = vld [vmem:[%s9220_s3 + $0x2c8] sm:$0xff] }
 0x4f2   :  { %9420 = vst [vmem:[#allocation51_spill] sm:$0xff] %v8443_v19 }
 0x4f3   :  { %9421 = vst [vmem:[#allocation5_spill] sm:$0xff] %v8445_v49  ;;  %5292 = vmatmul.msk.f32.gmra.mxu0 %vm2140_vm4, %v5276_v35 }
 0x4f4   :  { %5308 = vmatmul.msk.f32.gmra.mxu1 %vm2140_vm4, %v5276_v35 }
 0x4f5   :  { %5343 = vmatmul.msk.f32.gmra.mxu2 %vm2140_vm4, %v5327_v10 }
 0x4f6   :  { %5359 = vmatmul.msk.f32.gmra.mxu3 %vm2140_vm4, %v5327_v10 }
 0x4f8   :  { %v8454_v27 = vpop.f32.mrf.mxu0  ;;  %v8459_v31 = vpop.f32.mrf.mxu2 }
 0x4f9   :  { %9422 = vst [vmem:[#allocation45_spill] sm:$0xff] %v8454_v27  ;;  %v8461_v40 = vpop.f32.mrf.mxu1  ;;  %v8463_v41 = vpop.f32.mrf.mxu3 }
 0x4fa   :  { %9423 = vst [vmem:[#allocation35_spill] sm:$0xff] %v8459_v31 }
 0x4fb   :  { %9424 = vst [vmem:[#allocation6_spill] sm:$0xff] %v8461_v40  ;;  %5293 = vmatmul.msk.f32.gmra.mxu0 %vm2140_vm4, %v5277_v3 }
 0x4fc   :  { %9425 = vst [vmem:[#allocation46_spill] sm:$0xff] %v8463_v41  ;;  %5309 = vmatmul.msk.f32.gmra.mxu1 %vm2140_vm4, %v5277_v3  ;;  %v5329_v3 = vld [vmem:[%s9220_s3 + $0x2c0] sm:$0xff] }
 0x4fd   :  { %5344 = vmatmul.msk.f32.gmra.mxu2 %vm2140_vm4, %v5328_v12 }
 0x4fe   :  { %5360 = vmatmul.msk.f32.gmra.mxu3 %vm2140_vm4, %v5328_v12 }
 0x500   :  { %v8472_v1 = vpop.f32.mrf.mxu0  ;;  %v8477_v35 = vpop.f32.mrf.mxu2 }
 0x501   :  { %9426 = vst [vmem:[#allocation55_spill] sm:$0xff] %v8472_v1  ;;  %v8479_v10 = vpop.f32.mrf.mxu1  ;;  %v8481_v41 = vpop.f32.mrf.mxu3  ;;  %v5331_v1 = vld [vmem:[%s9220_s3 + $0x2d0] sm:$0xff] }
 0x502   :  { %9427 = vst [vmem:[#allocation10_spill] sm:$0xff] %v8477_v35  ;;  %v5279_v35 = vld [vmem:[%s9220_s3 + $0x230] sm:$0xff] }
 0x503   :  { %9428 = vst [vmem:[#allocation53_spill] sm:$0xff] %v8479_v10  ;;  %5294 = vmatmul.msk.f32.gmra.mxu0 %vm2140_vm4, %v5278_v11 }
 0x504   :  { %9429 = vst [vmem:[#allocation11_spill] sm:$0xff] %v8481_v41  ;;  %5310 = vmatmul.msk.f32.gmra.mxu1 %vm2140_vm4, %v5278_v11 }
 0x505   :  { %5345 = vmatmul.msk.f32.gmra.mxu2 %vm2140_vm4, %v5329_v3 }
 0x506   :  { %5361 = vmatmul.msk.f32.gmra.mxu3 %vm2140_vm4, %v5329_v3  ;;  %v5280_v3 = vld [vmem:[%s9220_s3 + $0x238] sm:$0xff] }
 0x508   :  { %v8490_v12 = vpop.f32.mrf.mxu0  ;;  %v2961_v31 = vpop.f32.mrf.mxu2 }
 0x509   :  { %9430 = vst [vmem:[#allocation54_spill] sm:$0xff] %v8490_v12  ;;  %v8495_v41 = vpop.f32.mrf.mxu1  ;;  %v3026_v49 = vpop.f32.mrf.mxu3 }
 0x50a   :  { %9431 = vst [vmem:[#allocation42_spill] sm:$0xff] %v8495_v41 }
 0x50b   :  { %5295 = vmatmul.msk.f32.gmra.mxu0 %vm2140_vm4, %v5279_v35 }
 0x50c   :  { %5311 = vmatmul.msk.f32.gmra.mxu1 %vm2140_vm4, %v5279_v35  ;;  %v2474_v35 = vadd.f32 %v8162_v0, %v8219_v13  ;;  %v2412_v0 = vadd.f32 %v8181_v56, %v8232_v62  ;;  %v2480_v62 = vadd.f32 %v8203_v32, %v8255_v44  ;;  %v2418_v32 = vadd.f32 %v8217_v36, %v8268_v59 }
 0x50d   :  { %5346 = vmatmul.msk.f32.gmra.mxu2 %vm2140_vm4, %v5330_v45  ;;  %v2486_v59 = vadd.f32 %v8239_v33, %v8291_v8  ;;  %v2424_v33 = vadd.f32 %v8253_v22, %v8304_v20 }
 0x50e   :  { %5362 = vmatmul.msk.f32.gmra.mxu3 %vm2140_vm4, %v5330_v45  ;;  %v2409_v45 = vadd.f32 %v8159_v9, %v8214_v4  ;;  %v2477_v4 = vadd.f32 %v8185_v5, %v8237_v39  ;;  %v2415_v5 = vadd.f32 %v8199_v24, %v8250_v17  ;;  %v2483_v17 = vadd.f32 %v8221_v2, %v8273_v53 }
 0x50f   :  { %v2421_v2 = vadd.f32 %v8235_v15, %v8286_v16  ;;  %v2489_v16 = vadd.f32 %v8257_v46, %v8309_v30  ;;  %v2427_v30 = vadd.f32 %v8271_v55, %v8322_v58  ;;  %v2492_v46 = vadd.f32 %v8275_v26, %v8325_v57 }
 0x510   :  { %v8504_v11 = vpop.f32.mrf.mxu0  ;;  %v2964_v41 = vpop.f32.mrf.mxu2  ;;  %v2430_v57 = vadd.f32 %v8289_v29, %v8340_v51  ;;  %v2495_v26 = vadd.f32 %v8293_v14, %v8343_v28  ;;  %v5419_v28 = vld [vmem:[%s9220_s3 + $0x390] sm:$0xff] }
 0x511   :  { %9432 = vst [vmem:[#allocation50_spill] sm:$0xff] %v8504_v11  ;;  %v8509_v12 = vpop.f32.mrf.mxu1  ;;  %v3029_v10 = vpop.f32.mrf.mxu3  ;;  %v5281_v11 = vld [vmem:[%s9220_s3 + $0x240] sm:$0xff] }
 0x512   :  { %9433 = vst [vmem:[#allocation12_spill] sm:$0xff] %v8509_v12 }
 0x513   :  { %5296 = vmatmul.msk.f32.gmra.mxu0 %vm2140_vm4, %v5280_v3 }
 0x514   :  { %5312 = vmatmul.msk.f32.gmra.mxu1 %vm2140_vm4, %v5280_v3 }
 0x515   :  { %5347 = vmatmul.msk.f32.gmra.mxu2 %vm2140_vm4, %v5331_v1 }
 0x516   :  { %5363 = vmatmul.msk.f32.gmra.mxu3 %vm2140_vm4, %v5331_v1  ;;  %v5332_v1 = vld [vmem:[%s9220_s3 + $0x2d8] sm:$0xff] }
 0x518   :  { %v2670_v12 = vpop.f32.mrf.mxu0  ;;  %v2967_v18 = vpop.f32.mrf.mxu2 }
 0x519   :  { %v2775_v52 = vadd.f32 %v2670_v12, %v2409_v45  ;;  %v2735_v40 = vpop.f32.mrf.mxu1  ;;  %v3032_v27 = vpop.f32.mrf.mxu3  ;;  %v5333_v45 = vld [vmem:[%s9220_s3 + $0x2e0] sm:$0xff] }
 0x51a   :  { %v2776_v3 = vadd.f32 %v2735_v40, %v2474_v35 }
 0x51b   :  { %v8528_v19 = vadd.f32 %v2961_v31, %v2775_v52  ;;  %5297 = vmatmul.msk.f32.gmra.mxu0 %vm2140_vm4, %v5281_v11  ;;  %v5282_v52 = vld [vmem:[%s9220_s3 + $0x248] sm:$0xff] }
 0x51c   :  { %v8531_v9 = vadd.f32 %v3026_v49, %v2776_v3  ;;  %5313 = vmatmul.msk.f32.gmra.mxu1 %vm2140_vm4, %v5281_v11 }
 0x51d   :  { %5348 = vmatmul.msk.f32.gmra.mxu2 %vm2140_vm4, %v5332_v1 }
 0x51e   :  { %5364 = vmatmul.msk.f32.gmra.mxu3 %vm2140_vm4, %v5332_v1 }
 0x520   :  { %v2673_v13 = vpop.f32.mrf.mxu0  ;;  %v2970_v31 = vpop.f32.mrf.mxu2 }
 0x521   :  { %v2777_v49 = vadd.f32 %v2673_v13, %v2412_v0  ;;  %v2738_v40 = vpop.f32.mrf.mxu1  ;;  %v3035_v12 = vpop.f32.mrf.mxu3  ;;  %v5334_v13 = vld [vmem:[%s9220_s3 + $0x2e8] sm:$0xff] }
 0x522   :  { %v2778_v11 = vadd.f32 %v2738_v40, %v2477_v4 }
 0x523   :  { %v8546_v35 = vadd.f32 %v2964_v41, %v2777_v49  ;;  %5298 = vmatmul.msk.f32.gmra.mxu0 %vm2140_vm4, %v5282_v52  ;;  %v5283_v41 = vld [vmem:[%s9220_s3 + $0x250] sm:$0xff] }
 0x524   :  { %v8549_v56 = vadd.f32 %v3029_v10, %v2778_v11  ;;  %5314 = vmatmul.msk.f32.gmra.mxu1 %vm2140_vm4, %v5282_v52 }
 0x525   :  { %5349 = vmatmul.msk.f32.gmra.mxu2 %vm2140_vm4, %v5333_v45 }
 0x526   :  { %5365 = vmatmul.msk.f32.gmra.mxu3 %vm2140_vm4, %v5333_v45 }
 0x528   :  { %v2676_v39 = vpop.f32.mrf.mxu0  ;;  %v2973_v3 = vpop.f32.mrf.mxu2 }
 0x529   :  { %v2779_v10 = vadd.f32 %v2676_v39, %v2415_v5  ;;  %v2741_v1 = vpop.f32.mrf.mxu1  ;;  %v3038_v0 = vpop.f32.mrf.mxu3  ;;  %v5335_v5 = vld [vmem:[%s9220_s3 + $0x2f0] sm:$0xff] }
 0x52a   :  { %v2780_v4 = vadd.f32 %v2741_v1, %v2480_v62 }
 0x52b   :  { %v8564_v52 = vadd.f32 %v2967_v18, %v2779_v10  ;;  %5299 = vmatmul.msk.f32.gmra.mxu0 %vm2140_vm4, %v5283_v41  ;;  %v5284_v18 = vld [vmem:[%s9220_s3 + $0x258] sm:$0xff] }
 0x52c   :  { %v8567_v24 = vadd.f32 %v3032_v27, %v2780_v4  ;;  %5315 = vmatmul.msk.f32.gmra.mxu1 %vm2140_vm4, %v5283_v41  ;;  %v5336_v4 = vld [vmem:[%s9220_s3 + $0x2f8] sm:$0xff] }
 0x52d   :  { %5350 = vmatmul.msk.f32.gmra.mxu2 %vm2140_vm4, %v5334_v13 }
 0x52e   :  { %5366 = vmatmul.msk.f32.gmra.mxu3 %vm2140_vm4, %v5334_v13 }
 0x530   :  { %v2679_v44 = vpop.f32.mrf.mxu0  ;;  %v2976_v49 = vpop.f32.mrf.mxu2 }
 0x531   :  { %v2781_v27 = vadd.f32 %v2679_v44, %v2418_v32  ;;  %v2744_v40 = vpop.f32.mrf.mxu1  ;;  %v3041_v11 = vpop.f32.mrf.mxu3 }
 0x532   :  { %v2782_v45 = vadd.f32 %v2744_v40, %v2483_v17 }
 0x533   :  { %v8582_v62 = vadd.f32 %v2970_v31, %v2781_v27  ;;  %5300 = vmatmul.msk.f32.gmra.mxu0 %vm2140_vm4, %v5284_v18  ;;  %v5285_v31 = vld [vmem:[%s9220_s3 + $0x260] sm:$0xff] }
 0x534   :  { %v8585_v36 = vadd.f32 %v3035_v12, %v2782_v45  ;;  %5316 = vmatmul.msk.f32.gmra.mxu1 %vm2140_vm4, %v5284_v18  ;;  %v5417_v27 = vld [vmem:[%s9220_s3 + $0x380] sm:$0xff] }
 0x535   :  { %5351 = vmatmul.msk.f32.gmra.mxu2 %vm2140_vm4, %v5335_v5 }
 0x536   :  { %5367 = vmatmul.msk.f32.gmra.mxu3 %vm2140_vm4, %v5335_v5 }
 0x538   :  { %v2682_v53 = vpop.f32.mrf.mxu0  ;;  %v2979_v39 = vpop.f32.mrf.mxu2 }
 0x539   :  { %v2783_v12 = vadd.f32 %v2682_v53, %v2421_v2  ;;  %v2747_v41 = vpop.f32.mrf.mxu1  ;;  %v3044_v10 = vpop.f32.mrf.mxu3  ;;  %v5418_v53 = vld [vmem:[%s9220_s3 + $0x388] sm:$0xff] }
 0x53a   :  { %v2784_v1 = vadd.f32 %v2747_v41, %v2486_v59  ;;  %v2385_v41 = vadd.f32 %v7902_v38, %v7986_v21 }
 0x53b   :  { %v8600_v13 = vadd.f32 %v2973_v3, %v2783_v12  ;;  %5301 = vmatmul.msk.f32.gmra.mxu0 %vm2140_vm4, %v5285_v31  ;;  %v5286_v3 = vld [vmem:[%s9220_s3 + $0x268] sm:$0xff] }
 0x53c   :  { %v8603_v15 = vadd.f32 %v3038_v0, %v2784_v1  ;;  %5317 = vmatmul.msk.f32.gmra.mxu1 %vm2140_vm4, %v5285_v31  ;;  %v2759_v14 = vadd.f32 %v8358_v7, %v2385_v41  ;;  %v5369_v7 = vld [vmem:[%s9220_s3 + $0x300] sm:$0xff] }
 0x53d   :  { %5352 = vmatmul.msk.f32.gmra.mxu2 %vm2140_vm4, %v5336_v4 }
 0x53e   :  { %5368 = vmatmul.msk.f32.gmra.mxu3 %vm2140_vm4, %v5336_v4 }
 0x540   :  { %v2685_v8 = vpop.f32.mrf.mxu0  ;;  %v2982_v32 = vpop.f32.mrf.mxu2 }
 0x541   :  { %v2785_v0 = vadd.f32 %v2685_v8, %v2424_v33  ;;  %v2750_v17 = vpop.f32.mrf.mxu1  ;;  %v3047_v44 = vpop.f32.mrf.mxu3  ;;  %v2450_v33 = vadd.f32 %v7904_v61, %v7995_v63  ;;  %v3050_v61 = vadd.f32 %v8307_v25, %v2759_v14 }
 0x542   :  { %v2786_v18 = vadd.f32 %v2750_v17, %v2489_v16  ;;  %v2453_v17 = vadd.f32 %v7934_v48, %v8033_v43  ;;  %v9434_v48 = vld [vmem:[#allocation39_spill] sm:$0xff] }
 0x543   :  { %v8618_v40 = vadd.f32 %v2976_v49, %v2785_v0  ;;  %5302 = vmatmul.msk.f32.gmra.mxu0 %vm2140_vm4, %v5286_v3  ;;  %v5287_v49 = vld [vmem:[%s9220_s3 + $0x270] sm:$0xff]  ;;  %v2760_v51 = vadd.f32 %v8362_v50, %v2450_v33  ;;  %v2388_v50 = vadd.f32 %v7932_v54, %v8026_v34  ;;  %v9435_v43 = vld [vmem:[#allocation59_spill] sm:$0xff] }
 0x544   :  { %v8621_v22 = vadd.f32 %v3041_v11, %v2786_v18  ;;  %5318 = vmatmul.msk.f32.gmra.mxu1 %vm2140_vm4, %v5286_v3  ;;  %v9440_v33 = vld [vmem:[#allocation3_spill] sm:$0xff] }
 0x545   :  { %5433 = vmatmul.msk.f32.vlgmr.msra.gmra.mxu2 %vm2140_vm4, %v5417_v27  ;;  %v3051_v21 = vadd.f32 %v8311_v47, %v2760_v51  ;;  %v5420_v47 = vld [vmem:[%s9220_s3 + $0x398] sm:$0xff]  ;;  %v2761_v25 = vadd.f32 %v8387_v60, %v2388_v50  ;;  %v5370_v60 = vld [vmem:[%s9220_s3 + $0x308] sm:$0xff]  ;;  %v9444_v50 = vld [vmem:[#allocation60_spill] sm:$0xff] }
 0x546   :  { %5449 = vmatmul.msk.f32.vlgmr.msra.gmra.mxu3 %vm2140_vm4, %v5417_v27  ;;  %v2762_v27 = vadd.f32 %v8391_v42, %v2453_v17  ;;  %v9437_v42 = vld [vmem:[#allocation21_spill] sm:$0xff] }
 0x547   :  { %v3052_v34 = vadd.f32 %v9434_v48, %v2761_v25 }
 0x548   :  { %v2688_v20 = vpop.f32.mrf.mxu0  ;;  %v3522_v45 = vpop.f32.mrf.mxu2 }
 0x549   :  { %v2787_v11 = vadd.f32 %v2688_v20, %v2427_v30  ;;  %v2753_v5 = vpop.f32.mrf.mxu1  ;;  %v3587_v2 = vpop.f32.mrf.mxu3  ;;  %v3053_v30 = vadd.f32 %v9435_v43, %v2762_v27  ;;  %v9446_v27 = vld [vmem:[#allocation51_spill] sm:$0xff]  ;;  %v9447_v43 = vld [vmem:[#allocation4_spill] sm:$0xff] }
 0x54a   :  { %v2788_v59 = vadd.f32 %v2753_v5, %v2492_v46 }
 0x54b   :  { %v8636_v31 = vadd.f32 %v2979_v39, %v2787_v11  ;;  %5303 = vmatmul.msk.f32.gmra.mxu0 %vm2140_vm4, %v5287_v49  ;;  %v5288_v39 = vld [vmem:[%s9220_s3 + $0x278] sm:$0xff] }
 0x54c   :  { %v8639_v55 = vadd.f32 %v3044_v10, %v2788_v59  ;;  %5319 = vmatmul.msk.f32.gmra.mxu1 %vm2140_vm4, %v5287_v49  ;;  %v9436_v49 = vld [vmem:[#allocation48_spill] sm:$0xff]  ;;  %v9438_v59 = vld [vmem:[#allocation26_spill] sm:$0xff] }
 0x54d   :  { %5434 = vmatmul.msk.f32.gmra.mxu2 %vm2140_vm4, %v5418_v53 }
 0x54e   :  { %5450 = vmatmul.msk.f32.gmra.mxu3 %vm2140_vm4, %v5418_v53  ;;  %v9439_v53 = vld [vmem:[#allocation22_spill] sm:$0xff] }
 0x550   :  { %v2691_v58 = vpop.f32.mrf.mxu0  ;;  %v3525_v12 = vpop.f32.mrf.mxu2 }
 0x551   :  { %v2789_v10 = vadd.f32 %v2691_v58, %v2430_v57  ;;  %v2756_v1 = vpop.f32.mrf.mxu1  ;;  %v3590_v4 = vpop.f32.mrf.mxu3  ;;  %v2456_v57 = vadd.f32 %v9439_v53, %v9438_v59  ;;  %v5421_v58 = vld [vmem:[%s9220_s3 + $0x3a0] sm:$0xff]  ;;  %v9451_v53 = vld [vmem:[#allocation33_spill] sm:$0xff] }
 0x552   :  { %v2790_v16 = vadd.f32 %v2756_v1, %v2495_v26 }
 0x553   :  { %v8659_v29 = vadd.f32 %v2982_v32, %v2789_v10  ;;  %5304 = vmatmul.msk.f32.gmra.mxu0 %vm2140_vm4, %v5288_v39  ;;  %v2764_v10 = vadd.f32 %v8424_v37, %v2456_v57  ;;  %v9443_v37 = vld [vmem:[#allocation23_spill] sm:$0xff]  ;;  %v9452_v57 = vld [vmem:[#allocation28_spill] sm:$0xff] }
 0x554   :  { %v8663_v38 = vadd.f32 %v3047_v44, %v2790_v16  ;;  %5320 = vmatmul.msk.f32.gmra.mxu1 %vm2140_vm4, %v5288_v39 }
 0x555   :  { %5435 = vmatmul.msk.f32.gmra.mxu2 %vm2140_vm4, %v5419_v28 }
 0x556   :  { %5451 = vmatmul.msk.f32.gmra.mxu3 %vm2140_vm4, %v5419_v28  ;;  %v9441_v28 = vld [vmem:[#allocation41_spill] sm:$0xff] }
 0x557   :  { %v3055_v14 = vadd.f32 %v9441_v28, %v2764_v10  ;;  %v9453_v10 = vld [vmem:[#allocation45_spill] sm:$0xff]  ;;  %v9454_v28 = vld [vmem:[#allocation6_spill] sm:$0xff] }
 0x558   :  { %v3228_v63 = vpop.f32.mrf.mxu0  ;;  %v3528_v8 = vpop.f32.mrf.mxu2 }
 0x559   :  { %v3341_v3 = vadd.f32 %v3228_v63, %v3050_v61  ;;  %v3293_v32 = vpop.f32.mrf.mxu1  ;;  %v3593_v0 = vpop.f32.mrf.mxu3  ;;  %v9442_v61 = vld [vmem:[#allocation47_spill] sm:$0xff] }
 0x55a   :  { %v3342_v44 = vadd.f32 %v3293_v32, %v3051_v21 }
 0x55b   :  { %v8681_v18 = vadd.f32 %v3522_v45, %v3341_v3  ;;  %5385 = vmatmul.msk.f32.vlgmr.msrb.gmra.mxu0 %vm2140_vm4, %v5369_v7  ;;  %v2391_v45 = vadd.f32 %v9437_v42, %v9436_v49  ;;  %v9445_v3 = vld [vmem:[#allocation24_spill] sm:$0xff]  ;;  %v9449_v42 = vld [vmem:[#allocation70_spill] sm:$0xff] }
 0x55c   :  { %v8685_v54 = vadd.f32 %v3587_v2, %v3342_v44  ;;  %5401 = vmatmul.msk.f32.vlgmr.msrb.gmra.mxu1 %vm2140_vm4, %v5369_v7  ;;  %v2459_v32 = vadd.f32 %v9445_v3, %v9444_v50  ;;  %v5422_v44 = vld [vmem:[%s9220_s3 + $0x3a8] sm:$0xff]  ;;  %v9457_v50 = vld [vmem:[#allocation34_spill] sm:$0xff] }
 0x55d   :  { %5436 = vmatmul.msk.f32.gmra.mxu2 %vm2140_vm4, %v5420_v47  ;;  %v2763_v39 = vadd.f32 %v8419_v6, %v2391_v45  ;;  %v5371_v6 = vld [vmem:[%s9220_s3 + $0x310] sm:$0xff]  ;;  %v9450_v45 = vld [vmem:[#allocation27_spill] sm:$0xff] }
 0x55e   :  { %5452 = vmatmul.msk.f32.gmra.mxu3 %vm2140_vm4, %v5420_v47  ;;  %v2766_v48 = vadd.f32 %v9446_v27, %v2459_v32  ;;  %v9458_v3 = vld [vmem:[#allocation63_spill] sm:$0xff]  ;;  %v9460_v27 = vld [vmem:[#allocation25_spill] sm:$0xff] }
 0x55f   :  { %v3054_v16 = vadd.f32 %v9440_v33, %v2763_v39  ;;  %v5423_v39 = vld [vmem:[%s9220_s3 + $0x3b0] sm:$0xff] }
 0x560   :  { %v3231_v46 = vpop.f32.mrf.mxu0  ;;  %v3531_v20 = vpop.f32.mrf.mxu2 }
 0x561   :  { %v3343_v11 = vadd.f32 %v3231_v46, %v3052_v34  ;;  %v3296_v5 = vpop.f32.mrf.mxu1  ;;  %v3596_v2 = vpop.f32.mrf.mxu3  ;;  %v9448_v46 = vld [vmem:[#allocation43_spill] sm:$0xff] }
 0x562   :  { %v3344_v26 = vadd.f32 %v3296_v5, %v3053_v30 }
 0x563   :  { %v8703_v41 = vadd.f32 %v3525_v12, %v3343_v11  ;;  %5386 = vmatmul.msk.f32.gmra.mxu0 %vm2140_vm4, %v5370_v60 }
 0x564   :  { %v8707_v1 = vadd.f32 %v3590_v4, %v3344_v26  ;;  %5402 = vmatmul.msk.f32.gmra.mxu1 %vm2140_vm4, %v5370_v60  ;;  %v2394_v4 = vadd.f32 %v9443_v37, %v9442_v61  ;;  %v3057_v60 = vadd.f32 %v9448_v46, %v2766_v48  ;;  %v2462_v26 = vadd.f32 %v9452_v57, %v9451_v53  ;;  %v9456_v37 = vld [vmem:[#allocation49_spill] sm:$0xff]  ;;  %v9461_v46 = vld [vmem:[#allocation55_spill] sm:$0xff] }
 0x565   :  { %5437 = vmatmul.msk.f32.gmra.mxu2 %vm2140_vm4, %v5421_v58 }
 0x566   :  { %5453 = vmatmul.msk.f32.gmra.mxu3 %vm2140_vm4, %v5421_v58  ;;  %v2765_v47 = vadd.f32 %v8436_v23, %v2394_v4  ;;  %v5372_v23 = vld [vmem:[%s9220_s3 + $0x318] sm:$0xff] }
 0x568   :  { %v3234_v51 = vpop.f32.mrf.mxu0  ;;  %v3534_v12 = vpop.f32.mrf.mxu2  ;;  %v3056_v30 = vadd.f32 %v9447_v43, %v2765_v47  ;;  %v9459_v47 = vld [vmem:[#allocation56_spill] sm:$0xff] }
 0x569   :  { %v3345_v21 = vadd.f32 %v3234_v51, %v3054_v16  ;;  %v3299_v63 = vpop.f32.mrf.mxu1  ;;  %v3599_v7 = vpop.f32.mrf.mxu3  ;;  %v2465_v48 = vadd.f32 %v9460_v27, %v9459_v47  ;;  %v9472_v27 = vld [vmem:[#allocation46_spill] sm:$0xff] }
 0x56a   :  { %v3346_v17 = vadd.f32 %v3299_v63, %v3055_v14  ;;  %v2768_v14 = vadd.f32 %v9454_v28, %v2462_v26 }
 0x56b   :  { %v8725_v25 = vadd.f32 %v3528_v8, %v3345_v21  ;;  %5387 = vmatmul.msk.f32.gmra.mxu0 %vm2140_vm4, %v5371_v6 }
 0x56c   :  { %v8729_v34 = vadd.f32 %v3593_v0, %v3346_v17  ;;  %5403 = vmatmul.msk.f32.gmra.mxu1 %vm2140_vm4, %v5371_v6  ;;  %v2397_v0 = vadd.f32 %v9450_v45, %v9449_v42  ;;  %v9455_v6 = vld [vmem:[#allocation7_spill] sm:$0xff]  ;;  %v3059_v4 = vadd.f32 %v9456_v37, %v2768_v14  ;;  %v9467_v14 = vld [vmem:[#allocation37_spill] sm:$0xff] }
 0x56d   :  { %5438 = vmatmul.msk.f32.gmra.mxu2 %vm2140_vm4, %v5422_v44 }
 0x56e   :  { %5454 = vmatmul.msk.f32.gmra.mxu3 %vm2140_vm4, %v5422_v44  ;;  %v2767_v33 = vadd.f32 %v9453_v10, %v2397_v0  ;;  %v9463_v0 = vld [vmem:[#allocation8_spill] sm:$0xff] }
 0x570   :  { %v3237_v49 = vpop.f32.mrf.mxu0  ;;  %v3537_v8 = vpop.f32.mrf.mxu2  ;;  %v3058_v61 = vadd.f32 %v9455_v6, %v2767_v33  ;;  %v9468_v6 = vld [vmem:[#allocation30_spill] sm:$0xff] }
 0x571   :  { %v3347_v11 = vadd.f32 %v3237_v49, %v3056_v30  ;;  %v3302_v5 = vpop.f32.mrf.mxu1  ;;  %v3602_v59 = vpop.f32.mrf.mxu3  ;;  %v5424_v30 = vld [vmem:[%s9220_s3 + $0x3b8] sm:$0xff] }
 0x572   :  { %v3348_v58 = vadd.f32 %v3302_v5, %v3057_v60  ;;  %v9464_v5 = vld [vmem:[#allocation5_spill] sm:$0xff] }
 0x573   :  { %v8747_v16 = vadd.f32 %v3531_v20, %v3347_v11  ;;  %5388 = vmatmul.msk.f32.gmra.mxu0 %vm2140_vm4, %v5372_v23  ;;  %v5373_v20 = vld [vmem:[%s9220_s3 + $0x320] sm:$0xff] }
 0x574   :  { %v8751_v51 = vadd.f32 %v3596_v2, %v3348_v58  ;;  %5404 = vmatmul.msk.f32.gmra.mxu1 %vm2140_vm4, %v5372_v23  ;;  %v2400_v2 = vadd.f32 %v9458_v3, %v9457_v50  ;;  %v9462_v23 = vld [vmem:[#allocation53_spill] sm:$0xff]  ;;  %v9465_v58 = vld [vmem:[#allocation36_spill] sm:$0xff]  ;;  %v9470_v3 = vld [vmem:[#allocation42_spill] sm:$0xff] }
 0x575   :  { %5439 = vmatmul.msk.f32.gmra.mxu2 %vm2140_vm4, %v5423_v39  ;;  %v2770_v42 = vadd.f32 %v9462_v23, %v2465_v48 }
 0x576   :  { %5455 = vmatmul.msk.f32.gmra.mxu3 %vm2140_vm4, %v5423_v39  ;;  %v2769_v60 = vadd.f32 %v9461_v46, %v2400_v2  ;;  %v9466_v39 = vld [vmem:[#allocation29_spill] sm:$0xff] }
 0x577   :  { %v3061_v53 = vadd.f32 %v9464_v5, %v2770_v42  ;;  %v9473_v46 = vld [vmem:[#allocation69_spill] sm:$0xff]  ;;  %v9476_v5 = vld [vmem:[#allocation32_spill] sm:$0xff] }
 0x578   :  { %v3240_v21 = vpop.f32.mrf.mxu0  ;;  %v3540_v63 = vpop.f32.mrf.mxu2  ;;  %v3060_v11 = vadd.f32 %v9463_v0, %v2769_v60  ;;  %v9474_v60 = vld [vmem:[#allocation31_spill] sm:$0xff] }
 0x579   :  { %v3349_v32 = vadd.f32 %v3240_v21, %v3058_v61  ;;  %v3305_v17 = vpop.f32.mrf.mxu1  ;;  %v3605_v44 = vpop.f32.mrf.mxu3  ;;  %v2468_v61 = vadd.f32 %v9468_v6, %v9467_v14  ;;  %v9469_v21 = vld [vmem:[#allocation54_spill] sm:$0xff] }
 0x57a   :  { %v3350_v43 = vadd.f32 %v3305_v17, %v3059_v4  ;;  %v5425_v4 = vld [vmem:[%s9220_s3 + $0x3c0] sm:$0xff]  ;;  %v9471_v17 = vld [vmem:[#allocation35_spill] sm:$0xff] }
 0x57b   :  { %v8769_v49 = vadd.f32 %v3534_v12, %v3349_v32  ;;  %5389 = vmatmul.msk.f32.gmra.mxu0 %vm2140_vm4, %v5373_v20  ;;  %v5374_v12 = vld [vmem:[%s9220_s3 + $0x328] sm:$0xff]  ;;  %v2772_v2 = vadd.f32 %v9470_v3, %v2468_v61  ;;  %v9479_v6 = vld [vmem:[#allocation10_spill] sm:$0xff] }
 0x57c   :  { %v8773_v45 = vadd.f32 %v3599_v7, %v3350_v43  ;;  %5405 = vmatmul.msk.f32.gmra.mxu1 %vm2140_vm4, %v5373_v20  ;;  %v2403_v7 = vadd.f32 %v9466_v39, %v9465_v58  ;;  %v9477_v58 = vld [vmem:[#allocation50_spill] sm:$0xff] }
 0x57d   :  { %5440 = vmatmul.msk.f32.gmra.mxu2 %vm2140_vm4, %v5424_v30  ;;  %v3063_v48 = vadd.f32 %v9472_v27, %v2772_v2 }
 0x57e   :  { %5456 = vmatmul.msk.f32.gmra.mxu3 %vm2140_vm4, %v5424_v30  ;;  %v2771_v20 = vadd.f32 %v9469_v21, %v2403_v7 }
 0x580   :  { %v3243_v57 = vpop.f32.mrf.mxu0  ;;  %v3543_v26 = vpop.f32.mrf.mxu2  ;;  %v3062_v47 = vadd.f32 %v9471_v17, %v2771_v20 }
 0x581   :  { %v3351_v10 = vadd.f32 %v3243_v57, %v3060_v11  ;;  %v3308_v33 = vpop.f32.mrf.mxu1  ;;  %v3608_v28 = vpop.f32.mrf.mxu3  ;;  %v9475_v11 = vld [vmem:[#allocation38_spill] sm:$0xff] }
 0x582   :  { %v3352_v37 = vadd.f32 %v3308_v33, %v3061_v53  ;;  %v2471_v53 = vadd.f32 %v9476_v5, %v9475_v11 }
 0x583   :  { %v8791_v50 = vadd.f32 %v3537_v8, %v3351_v10  ;;  %5390 = vmatmul.msk.f32.gmra.mxu0 %vm2140_vm4, %v5374_v12  ;;  %v5375_v8 = vld [vmem:[%s9220_s3 + $0x330] sm:$0xff] }
 0x584   :  { %v8795_v32 = vadd.f32 %v3602_v59, %v3352_v37  ;;  %5406 = vmatmul.msk.f32.gmra.mxu1 %vm2140_vm4, %v5374_v12  ;;  %v2406_v59 = vadd.f32 %v9474_v60, %v9473_v46  ;;  %v5426_v12 = vld [vmem:[%s9220_s3 + $0x3c8] sm:$0xff]  ;;  %v9478_v10 = vld [vmem:[#allocation12_spill] sm:$0xff] }
 0x585   :  { %5441 = vmatmul.msk.f32.gmra.mxu2 %vm2140_vm4, %v5425_v4  ;;  %v2774_v33 = vadd.f32 %v9478_v10, %v2471_v53  ;;  %v9480_v37 = vld [vmem:[#allocation11_spill] sm:$0xff] }
 0x586   :  { %5457 = vmatmul.msk.f32.gmra.mxu3 %vm2140_vm4, %v5425_v4  ;;  %v2773_v39 = vadd.f32 %v9477_v58, %v2406_v59 }
 0x587   :  { %v3065_v4 = vadd.f32 %v9480_v37, %v2774_v33  ;;  %v5430_v37 = vld [vmem:[%s9220_s3 + $0x3e8] sm:$0xff] }
 0x588   :  { %v3246_v43 = vpop.f32.mrf.mxu0  ;;  %v3546_v30 = vpop.f32.mrf.mxu2  ;;  %v3064_v61 = vadd.f32 %v9479_v6, %v2773_v39 }
 0x589   :  { %v3353_v23 = vadd.f32 %v3246_v43, %v3062_v47  ;;  %v3311_v42 = vpop.f32.mrf.mxu1  ;;  %v3611_v0 = vpop.f32.mrf.mxu3  ;;  %v5427_v47 = vld [vmem:[%s9220_s3 + $0x3d0] sm:$0xff] }
 0x58a   :  { %v3354_v57 = vadd.f32 %v3311_v42, %v3063_v48 }
 0x58b   :  { %v8813_v7 = vadd.f32 %v3540_v63, %v3353_v23  ;;  %5391 = vmatmul.msk.f32.gmra.mxu0 %vm2140_vm4, %v5375_v8  ;;  %v5376_v63 = vld [vmem:[%s9220_s3 + $0x338] sm:$0xff] }
 0x58c   :  { %v8817_v14 = vadd.f32 %v3605_v44, %v3354_v57  ;;  %5407 = vmatmul.msk.f32.gmra.mxu1 %vm2140_vm4, %v5375_v8  ;;  %v5377_v8 = vld [vmem:[%s9220_s3 + $0x340] sm:$0xff] }
 0x58d   :  { %5442 = vmatmul.msk.f32.gmra.mxu2 %vm2140_vm4, %v5426_v12 }
 0x58e   :  { %5458 = vmatmul.msk.f32.gmra.mxu3 %vm2140_vm4, %v5426_v12 }
 0x590   :  { %v3249_v21 = vpop.f32.mrf.mxu0  ;;  %v3549_v20 = vpop.f32.mrf.mxu2 }
 0x591   :  { %v3355_v3 = vadd.f32 %v3249_v21, %v3064_v61  ;;  %v3314_v2 = vpop.f32.mrf.mxu1  ;;  %v3614_v44 = vpop.f32.mrf.mxu3 }
 0x592   :  { %v3356_v17 = vadd.f32 %v3314_v2, %v3065_v4 }
 0x593   :  { %v8830_v27 = vadd.f32 %v3543_v26, %v3355_v3  ;;  %5392 = vmatmul.msk.f32.gmra.mxu0 %vm2140_vm4, %v5376_v63 }
 0x594   :  { %v8833_v48 = vadd.f32 %v3608_v28, %v3356_v17  ;;  %5408 = vmatmul.msk.f32.gmra.mxu1 %vm2140_vm4, %v5376_v63  ;;  %v5428_v28 = vld [vmem:[%s9220_s3 + $0x3d8] sm:$0xff] }
 0x595   :  { %5443 = vmatmul.msk.f32.gmra.mxu2 %vm2140_vm4, %v5427_v47 }
 0x596   :  { %5459 = vmatmul.msk.f32.gmra.mxu3 %vm2140_vm4, %v5427_v47 }
 0x598   :  { %v3252_v43 = vpop.f32.mrf.mxu0  ;;  %v3552_v46 = vpop.f32.mrf.mxu2 }
 0x599   :  { %v3357_v60 = vadd.f32 %v3252_v43, %v8528_v19  ;;  %v3317_v26 = vpop.f32.mrf.mxu1  ;;  %v3617_v59 = vpop.f32.mrf.mxu3 }
 0x59a   :  { %v3358_v23 = vadd.f32 %v3317_v26, %v8531_v9  ;;  %v5378_v9 = vld [vmem:[%s9220_s3 + $0x348] sm:$0xff] }
 0x59b   :  { %v8846_v42 = vadd.f32 %v3546_v30, %v3357_v60  ;;  %5393 = vmatmul.msk.f32.gmra.mxu0 %vm2140_vm4, %v5377_v8 }
 0x59c   :  { %v8849_v11 = vadd.f32 %v3611_v0, %v3358_v23  ;;  %5409 = vmatmul.msk.f32.gmra.mxu1 %vm2140_vm4, %v5377_v8  ;;  %v5429_v0 = vld [vmem:[%s9220_s3 + $0x3e0] sm:$0xff] }
 0x59d   :  { %5444 = vmatmul.msk.f32.gmra.mxu2 %vm2140_vm4, %v5428_v28 }
 0x59e   :  { %5460 = vmatmul.msk.f32.gmra.mxu3 %vm2140_vm4, %v5428_v28 }
 0x5a0   :  { %v3255_v19 = vpop.f32.mrf.mxu0  ;;  %v3555_v5 = vpop.f32.mrf.mxu2 }
 0x5a1   :  { %v3359_v53 = vadd.f32 %v3255_v19, %v8546_v35  ;;  %v3320_v30 = vpop.f32.mrf.mxu1  ;;  %v3620_v57 = vpop.f32.mrf.mxu3 }
 0x5a2   :  { %v3360_v12 = vadd.f32 %v3320_v30, %v8549_v56  ;;  %v5379_v56 = vld [vmem:[%s9220_s3 + $0x350] sm:$0xff] }
 0x5a3   :  { %v8862_v58 = vadd.f32 %v3549_v20, %v3359_v53  ;;  %5394 = vmatmul.msk.f32.gmra.mxu0 %vm2140_vm4, %v5378_v9 }
 0x5a4   :  { %v8865_v39 = vadd.f32 %v3614_v44, %v3360_v12  ;;  %5410 = vmatmul.msk.f32.gmra.mxu1 %vm2140_vm4, %v5378_v9  ;;  %v5431_v44 = vld [vmem:[%s9220_s3 + $0x3f0] sm:$0xff] }
 0x5a5   :  { %5445 = vmatmul.msk.f32.gmra.mxu2 %vm2140_vm4, %v5429_v0 }
 0x5a6   :  { %5461 = vmatmul.msk.f32.gmra.mxu3 %vm2140_vm4, %v5429_v0 }
 0x5a8   :  { %v3258_v35 = vpop.f32.mrf.mxu0  ;;  %v3558_v61 = vpop.f32.mrf.mxu2 }
 0x5a9   :  { %v3361_v10 = vadd.f32 %v3258_v35, %v8564_v52  ;;  %v3323_v33 = vpop.f32.mrf.mxu1  ;;  %v3623_v21 = vpop.f32.mrf.mxu3  ;;  %v5383_v35 = vld [vmem:[%s9220_s3 + $0x370] sm:$0xff] }
 0x5aa   :  { %v3362_v6 = vadd.f32 %v3323_v33, %v8567_v24  ;;  %v5380_v24 = vld [vmem:[%s9220_s3 + $0x358] sm:$0xff] }
 0x5ab   :  { %v8878_v4 = vadd.f32 %v3552_v46, %v3361_v10  ;;  %5395 = vmatmul.msk.f32.gmra.mxu0 %vm2140_vm4, %v5379_v56 }
 0x5ac   :  { %v8881_v63 = vadd.f32 %v3617_v59, %v3362_v6  ;;  %5411 = vmatmul.msk.f32.gmra.mxu1 %vm2140_vm4, %v5379_v56  ;;  %v5432_v59 = vld [vmem:[%s9220_s3 + $0x3f8] sm:$0xff] }
 0x5ad   :  { %5446 = vmatmul.msk.f32.gmra.mxu2 %vm2140_vm4, %v5430_v37 }
 0x5ae   :  { %5462 = vmatmul.msk.f32.gmra.mxu3 %vm2140_vm4, %v5430_v37 }
 0x5b0   :  { %v3261_v52 = vpop.f32.mrf.mxu0  ;;  %v3561_v43 = vpop.f32.mrf.mxu2 }
 0x5b1   :  { %v3363_v20 = vadd.f32 %v3261_v52, %v8582_v62  ;;  %v3326_v3 = vpop.f32.mrf.mxu1  ;;  %v3626_v8 = vpop.f32.mrf.mxu3 }
 0x5b2   :  { %v3364_v2 = vadd.f32 %v3326_v3, %v8585_v36  ;;  %v5381_v36 = vld [vmem:[%s9220_s3 + $0x360] sm:$0xff] }
 0x5b3   :  { %v8894_v17 = vadd.f32 %v3555_v5, %v3363_v20  ;;  %5396 = vmatmul.msk.f32.gmra.mxu0 %vm2140_vm4, %v5380_v24 }
 0x5b4   :  { %v8897_v47 = vadd.f32 %v3620_v57, %v3364_v2  ;;  %5412 = vmatmul.msk.f32.gmra.mxu1 %vm2140_vm4, %v5380_v24 }
 0x5b5   :  { %5447 = vmatmul.msk.f32.gmra.mxu2 %vm2140_vm4, %v5431_v44 }
 0x5b6   :  { %5463 = vmatmul.msk.f32.gmra.mxu3 %vm2140_vm4, %v5431_v44 }
 0x5b8   :  { %v3264_v62 = vpop.f32.mrf.mxu0  ;;  %v3564_v19 = vpop.f32.mrf.mxu2 }
 0x5b9   :  { %v3365_v46 = vadd.f32 %v3264_v62, %v8600_v13  ;;  %v3329_v60 = vpop.f32.mrf.mxu1  ;;  %v3629_v13 = vpop.f32.mrf.mxu3 }
 0x5ba   :  { %v3366_v26 = vadd.f32 %v3329_v60, %v8603_v15  ;;  %v5382_v15 = vld [vmem:[%s9220_s3 + $0x368] sm:$0xff] }
 0x5bb   :  { %v8910_v23 = vadd.f32 %v3558_v61, %v3365_v46  ;;  %5397 = vmatmul.msk.f32.gmra.mxu0 %vm2140_vm4, %v5381_v36 }
 0x5bc   :  { %v8913_v28 = vadd.f32 %v3623_v21, %v3366_v26  ;;  %5413 = vmatmul.msk.f32.gmra.mxu1 %vm2140_vm4, %v5381_v36  ;;  %v5384_v21 = vld [vmem:[%s9220_s3 + $0x378] sm:$0xff] }
 0x5bd   :  { %5448 = vmatmul.msk.f32.gmra.mxu2 %vm2140_vm4, %v5432_v59 }
 0x5be   :  { %5464 = vmatmul.msk.f32.gmra.mxu3 %vm2140_vm4, %v5432_v59  ;;  %v5466_v59 = vld [vmem:[%s9220_s3 + $0x408] sm:$0xff] }
 0x5c0   :  { %v3267_v9 = vpop.f32.mrf.mxu0  ;;  %v3567_v56 = vpop.f32.mrf.mxu2 }
 0x5c1   :  { %v3367_v5 = vadd.f32 %v3267_v9, %v8618_v40  ;;  %v3332_v53 = vpop.f32.mrf.mxu1  ;;  %v3632_v33 = vpop.f32.mrf.mxu3 }
 0x5c2   :  { %v3368_v30 = vadd.f32 %v3332_v53, %v8621_v22 }
 0x5c3   :  { %v8923_v57 = vadd.f32 %v3561_v43, %v3367_v5  ;;  %5398 = vmatmul.msk.f32.gmra.mxu0 %vm2140_vm4, %v5382_v15  ;;  %v5465_v43 = vld [vmem:[%s9220_s3 + $0x400] sm:$0xff] }
 0x5c4   :  { %v8926_v12 = vadd.f32 %v3626_v8, %v3368_v30  ;;  %5414 = vmatmul.msk.f32.gmra.mxu1 %vm2140_vm4, %v5382_v15  ;;  %v5467_v30 = vld [vmem:[%s9220_s3 + $0x410] sm:$0xff] }
 0x5c8   :  { %v3270_v0 = vpop.f32.mrf.mxu0  ;;  %v4110_v20 = vpop.f32.mrf.mxu2 }
 0x5c9   :  { %v3369_v10 = vadd.f32 %v3270_v0, %v8636_v31  ;;  %v3335_v40 = vpop.f32.mrf.mxu1  ;;  %v4175_v3 = vpop.f32.mrf.mxu3 }
 0x5ca   :  { %v3370_v22 = vadd.f32 %v3335_v40, %v8639_v55 }
 0x5cb   :  { %v8934_v6 = vadd.f32 %v3564_v19, %v3369_v10  ;;  %5399 = vmatmul.msk.f32.gmra.mxu0 %vm2140_vm4, %v5383_v35 }
 0x5cc   :  { %v8937_v61 = vadd.f32 %v3629_v13, %v3370_v22  ;;  %5415 = vmatmul.msk.f32.gmra.mxu1 %vm2140_vm4, %v5383_v35 }
 0x5d0   :  { %v3273_v37 = vpop.f32.mrf.mxu0  ;;  %v4113_v46 = vpop.f32.mrf.mxu2 }
 0x5d1   :  { %v3371_v52 = vadd.f32 %v3273_v37, %v8659_v29  ;;  %v3338_v31 = vpop.f32.mrf.mxu1  ;;  %v4178_v60 = vpop.f32.mrf.mxu3 }
 0x5d2   :  { %v3372_v24 = vadd.f32 %v3338_v31, %v8663_v38 }
 0x5d3   :  { %v8945_v55 = vadd.f32 %v3567_v56, %v3371_v52  ;;  %5400 = vmatmul.msk.f32.gmra.mxu0 %vm2140_vm4, %v5384_v21 }
 0x5d4   :  { %v8948_v2 = vadd.f32 %v3632_v33, %v3372_v24  ;;  %5416 = vmatmul.msk.f32.gmra.mxu1 %vm2140_vm4, %v5384_v21  ;;  %v5468_v33 = vld [vmem:[%s9220_s3 + $0x418] sm:$0xff]  ;;  %v5469_v24 = vld [vmem:[%s9220_s3 + $0x420] sm:$0xff] }
 0x5d8   :  { %v3816_v44 = vpop.f32.mrf.mxu0  ;;  %v4116_v15 = vpop.f32.mrf.mxu2 }
 0x5d9   :  { %v3929_v29 = vadd.f32 %v3816_v44, %v8681_v18  ;;  %v3881_v8 = vpop.f32.mrf.mxu1  ;;  %v4181_v5 = vpop.f32.mrf.mxu3 }
 0x5da   :  { %v3930_v38 = vadd.f32 %v3881_v8, %v8685_v54 }
 0x5db   :  { %v8956_v62 = vadd.f32 %v4110_v20, %v3929_v29  ;;  %5481 = vmatmul.msk.f32.vlgmr.msra.gmra.mxu0 %vm2140_vm4, %v5465_v43 }
 0x5dc   :  { %v8959_v36 = vadd.f32 %v4175_v3, %v3930_v38  ;;  %5497 = vmatmul.msk.f32.vlgmr.msra.gmra.mxu1 %vm2140_vm4, %v5465_v43  ;;  %v5471_v43 = vld [vmem:[%s9220_s3 + $0x430] sm:$0xff]  ;;  %v5472_v38 = vld [vmem:[%s9220_s3 + $0x438] sm:$0xff] }
 0x5e0   :  { %v3819_v26 = vpop.f32.mrf.mxu0  ;;  %v4119_v40 = vpop.f32.mrf.mxu2 }
 0x5e1   :  { %v3931_v18 = vadd.f32 %v3819_v26, %v8703_v41  ;;  %v3884_v19 = vpop.f32.mrf.mxu1  ;;  %v4184_v37 = vpop.f32.mrf.mxu3  ;;  %v5473_v26 = vld [vmem:[%s9220_s3 + $0x440] sm:$0xff] }
 0x5e2   :  { %v3932_v54 = vadd.f32 %v3884_v19, %v8707_v1 }
 0x5e3   :  { %v8967_v13 = vadd.f32 %v4113_v46, %v3931_v18  ;;  %5482 = vmatmul.msk.f32.gmra.mxu0 %vm2140_vm4, %v5466_v59 }
 0x5e4   :  { %v8970_v9 = vadd.f32 %v4178_v60, %v3932_v54  ;;  %5498 = vmatmul.msk.f32.gmra.mxu1 %vm2140_vm4, %v5466_v59 }
 0x5e8   :  { %v3822_v53 = vpop.f32.mrf.mxu0 }
 0x5e9   :  { %v3933_v41 = vadd.f32 %v3822_v53, %v8725_v25  ;;  %v3887_v0 = vpop.f32.mrf.mxu1 }
 0x5ea   :  { %v3934_v1 = vadd.f32 %v3887_v0, %v8729_v34 }
 0x5eb   :  { %v8978_v35 = vadd.f32 %v4116_v15, %v3933_v41  ;;  %5483 = vmatmul.msk.f32.gmra.mxu0 %vm2140_vm4, %v5467_v30  ;;  %v5474_v15 = vld [vmem:[%s9220_s3 + $0x448] sm:$0xff] }
 0x5ec   :  { %v8981_v56 = vadd.f32 %v4181_v5, %v3934_v1  ;;  %5499 = vmatmul.msk.f32.gmra.mxu1 %vm2140_vm4, %v5467_v30  ;;  %v5475_v30 = vld [vmem:[%s9220_s3 + $0x450] sm:$0xff]  ;;  %v5476_v1 = vld [vmem:[%s9220_s3 + $0x458] sm:$0xff] }
 0x5f0   :  { %v3825_v10 = vpop.f32.mrf.mxu0 }
 0x5f1   :  { %v3935_v22 = vadd.f32 %v3825_v10, %v8747_v16  ;;  %v3890_v25 = vpop.f32.mrf.mxu1 }
 0x5f2   :  { %v3936_v34 = vadd.f32 %v3890_v25, %v8751_v51  ;;  %v5470_v51 = vld [vmem:[%s9220_s3 + $0x428] sm:$0xff] }
 0x5f3   :  { %v8989_v21 = vadd.f32 %v4119_v40, %v3935_v22  ;;  %5484 = vmatmul.msk.f32.gmra.mxu0 %vm2140_vm4, %v5468_v33 }
 0x5f4   :  { %v8992_v52 = vadd.f32 %v4184_v37, %v3936_v34  ;;  %5500 = vmatmul.msk.f32.gmra.mxu1 %vm2140_vm4, %v5468_v33  ;;  %v5477_v33 = vld [vmem:[%s9220_s3 + $0x460] sm:$0xff]  ;;  %v5478_v37 = vld [vmem:[%s9220_s3 + $0x468] sm:$0xff] }
 0x5f8   :  { %v8995_v31 = vpop.f32.mrf.mxu0 }
 0x5f9   :  { %v9000_v20 = vpop.f32.mrf.mxu1 }
 0x5fb   :  { %5485 = vmatmul.msk.f32.gmra.mxu0 %vm2140_vm4, %v5469_v24 }
 0x5fc   :  { %5501 = vmatmul.msk.f32.gmra.mxu1 %vm2140_vm4, %v5469_v24 }
 0x600   :  { %v9004_v16 = vpop.f32.mrf.mxu0 }
 0x601   :  { %v9009_v3 = vpop.f32.mrf.mxu1 }
 0x603   :  { %5486 = vmatmul.msk.f32.gmra.mxu0 %vm2140_vm4, %v5470_v51 }
 0x604   :  { %5502 = vmatmul.msk.f32.gmra.mxu1 %vm2140_vm4, %v5470_v51  ;;  %v5479_v51 = vld [vmem:[%s9220_s3 + $0x470] sm:$0xff] }
 0x608   :  { %v9013_v44 = vpop.f32.mrf.mxu0 }
 0x609   :  { %v9018_v29 = vpop.f32.mrf.mxu1 }
 0x60b   :  { %5487 = vmatmul.msk.f32.gmra.mxu0 %vm2140_vm4, %v5471_v43 }
 0x60c   :  { %5503 = vmatmul.msk.f32.gmra.mxu1 %vm2140_vm4, %v5471_v43 }
 0x610   :  { %v9022_v8 = vpop.f32.mrf.mxu0 }
 0x611   :  { %v9027_v46 = vpop.f32.mrf.mxu1 }
 0x613   :  { %5488 = vmatmul.msk.f32.gmra.mxu0 %vm2140_vm4, %v5472_v38 }
 0x614   :  { %5504 = vmatmul.msk.f32.gmra.mxu1 %vm2140_vm4, %v5472_v38 }
 0x618   :  { %v3840_v60 = vpop.f32.mrf.mxu0 }
 0x619   :  { %v9035_v59 = vadd.f32 %v3840_v60, %v8846_v42  ;;  %v3905_v18 = vpop.f32.mrf.mxu1  ;;  %v5480_v60 = vld [vmem:[%s9220_s3 + $0x478] sm:$0xff] }
 0x61a   :  { %v9038_v19 = vadd.f32 %v3905_v18, %v8849_v11 }
 0x61b   :  { %5489 = vmatmul.msk.f32.gmra.mxu0 %vm2140_vm4, %v5473_v26 }
 0x61c   :  { %5505 = vmatmul.msk.f32.gmra.mxu1 %vm2140_vm4, %v5473_v26 }
 0x620   :  { %v3843_v54 = vpop.f32.mrf.mxu0 }
 0x621   :  { %v9046_v5 = vadd.f32 %v3843_v54, %v8862_v58  ;;  %v3908_v53 = vpop.f32.mrf.mxu1 }
 0x622   :  { %v9049_v42 = vadd.f32 %v3908_v53, %v8865_v39 }
 0x623   :  { %5490 = vmatmul.msk.f32.gmra.mxu0 %vm2140_vm4, %v5474_v15 }
 0x624   :  { %5506 = vmatmul.msk.f32.gmra.mxu1 %vm2140_vm4, %v5474_v15 }
 0x628   :  { %v3846_v11 = vpop.f32.mrf.mxu0 }
 0x629   :  { %v9057_v41 = vadd.f32 %v3846_v11, %v8878_v4  ;;  %v3911_v0 = vpop.f32.mrf.mxu1  ;;  %v4122_v11 = vpop.f32.mrf.mxu2 }
 0x62a   :  { %v9060_v58 = vadd.f32 %v3911_v0, %v8881_v63 }
 0x62b   :  { %5491 = vmatmul.msk.f32.gmra.mxu0 %vm2140_vm4, %v5475_v30 }
 0x62c   :  { %5507 = vmatmul.msk.f32.gmra.mxu1 %vm2140_vm4, %v5475_v30  ;;  %v4187_v30 = vpop.f32.mrf.mxu3 }
 0x630   :  { %v3849_v39 = vpop.f32.mrf.mxu0 }
 0x631   :  { %v9068_v10 = vadd.f32 %v3849_v39, %v8894_v17  ;;  %v3914_v40 = vpop.f32.mrf.mxu1 }
 0x632   :  { %v9071_v4 = vadd.f32 %v3914_v40, %v8897_v47 }
 0x633   :  { %5492 = vmatmul.msk.f32.gmra.mxu0 %vm2140_vm4, %v5476_v1 }
 0x634   :  { %5508 = vmatmul.msk.f32.gmra.mxu1 %vm2140_vm4, %v5476_v1 }
 0x638   :  { %v3852_v63 = vpop.f32.mrf.mxu0 }
 0x639   :  { %v9079_v22 = vadd.f32 %v3852_v63, %v8910_v23  ;;  %v3917_v25 = vpop.f32.mrf.mxu1  ;;  %v4190_v63 = vpop.f32.mrf.mxu3 }
 0x63a   :  { %v9082_v17 = vadd.f32 %v3917_v25, %v8913_v28 }
 0x63b   :  { %5493 = vmatmul.msk.f32.gmra.mxu0 %vm2140_vm4, %v5477_v33 }
 0x63c   :  { %5509 = vmatmul.msk.f32.gmra.mxu1 %vm2140_vm4, %v5477_v33 }
 0x640   :  { %v3855_v47 = vpop.f32.mrf.mxu0 }
 0x641   :  { %v9090_v34 = vadd.f32 %v3855_v47, %v8923_v57  ;;  %v3920_v24 = vpop.f32.mrf.mxu1 }
 0x642   :  { %v9093_v23 = vadd.f32 %v3920_v24, %v8926_v12 }
 0x643   :  { %5494 = vmatmul.msk.f32.gmra.mxu0 %vm2140_vm4, %v5478_v37 }
 0x644   :  { %5510 = vmatmul.msk.f32.gmra.mxu1 %vm2140_vm4, %v5478_v37 }
 0x648   :  { %v3858_v28 = vpop.f32.mrf.mxu0 }
 0x649   :  { %v9101_v43 = vadd.f32 %v3858_v28, %v8934_v6  ;;  %v3923_v38 = vpop.f32.mrf.mxu1 }
 0x64a   :  { %v9104_v57 = vadd.f32 %v3923_v38, %v8937_v61  ;;  %v4568_v38 = vpop.permute.xlu0 %4567 }
 0x64b   :  { %5495 = vmatmul.msk.f32.gmra.mxu0 %vm2140_vm4, %v5479_v51 }
 0x64c   :  { %5511 = vmatmul.msk.f32.gmra.mxu1 %vm2140_vm4, %v5479_v51  ;;  %v4193_v51 = vpop.f32.mrf.mxu3 }
 0x650   :  { %v3861_v12 = vpop.f32.mrf.mxu0 }
 0x651   :  { %v9112_v26 = vadd.f32 %v3861_v12, %v8945_v55  ;;  %v3926_v18 = vpop.f32.mrf.mxu1 }
 0x652   :  { %v9115_v6 = vadd.f32 %v3926_v18, %v8948_v2  ;;  %v4125_v2 = vpop.f32.mrf.mxu2 }
 0x653   :  { %5496 = vmatmul.msk.f32.gmra.mxu0 %vm2140_vm4, %v5480_v60 }
 0x654   :  { %5512 = vmatmul.msk.f32.gmra.mxu1 %vm2140_vm4, %v5480_v60 }
 0x658   :  { %v4404_v61 = vpop.f32.mrf.mxu0 }
 0x659   :  { %v4517_v54 = vadd.f32 %v4404_v61, %v8956_v62  ;;  %v4469_v15 = vpop.f32.mrf.mxu1  ;;  %v4573_v62 = vpop.permute.xlu1 %4572 }
 0x65a   :  { %v4518_v53 = vadd.f32 %v4469_v15, %v8959_v36  ;;  %v4128_v28 = vpop.f32.mrf.mxu2 }
 0x65b   :  { %v4645_v61 = vadd.f32 %v4568_v38, %v4517_v54 }
 0x660   :  { %v4407_v0 = vpop.f32.mrf.mxu0 }
 0x661   :  { %v4519_v55 = vadd.f32 %v4407_v0, %v8967_v13  ;;  %v4472_v39 = vpop.f32.mrf.mxu1  ;;  %v4588_v0 = vpop.permute.xlu1 %4587 }
 0x662   :  { %v4520_v1 = vadd.f32 %v4472_v39, %v8970_v9  ;;  %v3937_v9 = vadd.f32 %v8995_v31, %v8769_v49  ;;  %v4646_v39 = vadd.f32 %v4568_v38, %v4518_v53  ;;  %v3940_v49 = vadd.f32 %v9009_v3, %v8795_v32  ;;  %v4131_v31 = vpop.f32.mrf.mxu2 }
 0x664   :  { %v4231_v12 = vadd.f32 %v4122_v11, %v3937_v9  ;;  %v4677_v11 = vmax.f32 %v4645_v61, 0.0  ;;  %v4234_v53 = vadd.f32 %v4190_v63, %v3940_v49  ;;  %v4648_v32 = vadd.f32 %v4573_v62, %v4520_v1 }
 0x665   :  { %v3941_v61 = vadd.f32 %v9013_v44, %v8813_v7 }
 0x668   :  { %v4410_v40 = vpop.f32.mrf.mxu0 }
 0x669   :  { %v4521_v33 = vadd.f32 %v4410_v40, %v8978_v35  ;;  %v4475_v25 = vpop.f32.mrf.mxu1  ;;  %v3938_v35 = vadd.f32 %v9000_v20, %v8773_v45  ;;  %v4196_v20 = vpop.f32.mrf.mxu3 }
 0x66a   :  { %v4522_v47 = vadd.f32 %v4475_v25, %v8981_v56  ;;  %v4578_v56 = vpop.permute.xlu2 %4577  ;;  %v4134_v63 = vpop.f32.mrf.mxu2 }
 0x66b   :  { %v4232_v60 = vadd.f32 %v4187_v30, %v3938_v35  ;;  %v4678_v30 = vmax.f32 %v4646_v39, 0.0  ;;  %v4583_v35 = vpop.permute.xlu0 %4582 }
 0x670   :  { %v4413_v37 = vpop.f32.mrf.mxu0 }
 0x671   :  { %v9126_v36 = vadd.f32 %v4413_v37, %v8989_v21  ;;  %v4478_v24 = vpop.f32.mrf.mxu1 }
 0x672   :  { %v9129_v13 = vadd.f32 %v4478_v24, %v8992_v52  ;;  %v3939_v52 = vadd.f32 %v9004_v16, %v8791_v50  ;;  %v4647_v50 = vadd.f32 %v4573_v62, %v4519_v55  ;;  %v4199_v55 = vpop.f32.mrf.mxu3 }
 0x674   :  { %v4233_v54 = vadd.f32 %v4125_v2, %v3939_v52  ;;  %v3942_v2 = vadd.f32 %v9018_v29, %v8817_v14  ;;  %v3943_v29 = vadd.f32 %v9022_v8, %v8830_v27  ;;  %v4651_v27 = vadd.f32 %v4583_v35, %v9126_v36 }
 0x678   :  { %v4416_v18 = vpop.f32.mrf.mxu0 }
 0x679   :  { %v4525_v21 = vadd.f32 %v4416_v18, %v4231_v12  ;;  %v4481_v15 = vpop.f32.mrf.mxu1  ;;  %v4593_v18 = vpop.permute.xlu2 %4592 }
 0x67a   :  { %v4526_v40 = vadd.f32 %v4481_v15, %v4232_v60 }
 0x67b   :  { %v4653_v25 = vadd.f32 %v4588_v0, %v4525_v21 }
 0x67c   :  { %v4654_v45 = vadd.f32 %v4588_v0, %v4526_v40  ;;  %v4679_v0 = vmax.f32 %v4647_v50, 0.0  ;;  %v4680_v40 = vmax.f32 %v4648_v32, 0.0 }
 0x67d   :  { %v4685_v37 = vmax.f32 %v4653_v25, 0.0  ;;  %v4235_v25 = vadd.f32 %v4128_v28, %v3941_v61  ;;  %v3944_v28 = vadd.f32 %v9027_v46, %v8833_v48  ;;  %v4603_v61 = vpop.permute.xlu1 %4602  ;;  %v4652_v48 = vadd.f32 %v4583_v35, %v9129_v13 }
 0x67e   :  { %v4686_v24 = vmax.f32 %v4654_v45, 0.0  ;;  %v4236_v45 = vadd.f32 %v4193_v51, %v3942_v2 }
 0x67f   :  { %v9139_v9 = vmax.f32 %v4677_v11, %v4685_v37  ;;  %v4649_v11 = vadd.f32 %v4578_v56, %v4521_v33  ;;  %v4598_v37 = vpop.permute.xlu0 %4597  ;;  %v4238_v33 = vadd.f32 %v4196_v20, %v3944_v28  ;;  %v4239_v20 = vadd.f32 %v4134_v63, %v9035_v59 }
 0x680   :  { %v9141_v38 = vmax.f32 %v4678_v30, %v4686_v24  ;;  %v4419_v12 = vpop.f32.mrf.mxu0  ;;  %v4650_v30 = vadd.f32 %v4578_v56, %v4522_v47  ;;  %v4202_v56 = vpop.f32.mrf.mxu3 }
 0x681   :  { %v4527_v16 = vadd.f32 %v4419_v12, %v4233_v54  ;;  %v4484_v60 = vpop.f32.mrf.mxu1  ;;  %v4242_v59 = vadd.f32 %v4202_v56, %v9049_v42 }
 0x682   :  { %v4528_v3 = vadd.f32 %v4484_v60, %v4234_v53  ;;  %v4681_v53 = vmax.f32 %v4649_v11, 0.0  ;;  %v4682_v51 = vmax.f32 %v4650_v30, 0.0  ;;  %v4608_v11 = vpop.permute.xlu2 %4607 }
 0x683   :  { %v4655_v21 = vadd.f32 %v4593_v18, %v4527_v16  ;;  %v4237_v16 = vadd.f32 %v4131_v31, %v3943_v29 }
 0x684   :  { %v4656_v15 = vadd.f32 %v4593_v18, %v4528_v3  ;;  %v4137_v18 = vpop.f32.mrf.mxu2 }
 0x685   :  { %v4687_v39 = vmax.f32 %v4655_v21, 0.0  ;;  %v4241_v29 = vadd.f32 %v4137_v18, %v9046_v5 }
 0x686   :  { %v4688_v52 = vmax.f32 %v4656_v15, 0.0  ;;  %v4683_v15 = vmax.f32 %v4651_v27, 0.0 }
 0x687   :  { %v9147_v49 = vmax.f32 %v4679_v0, %v4687_v39  ;;  %v4684_v0 = vmax.f32 %v4652_v48, 0.0 }
 0x688   :  { %v9149_v1 = vmax.f32 %v4680_v40, %v4688_v52  ;;  %v4422_v62 = vpop.f32.mrf.mxu0  ;;  %v4240_v52 = vadd.f32 %v4199_v55, %v9038_v19  ;;  %v4205_v13 = vpop.f32.mrf.mxu3 }
 0x689   :  { %v4529_v7 = vadd.f32 %v4422_v62, %v4235_v25  ;;  %v4487_v44 = vpop.f32.mrf.mxu1 }
 0x68a   :  { %v4530_v14 = vadd.f32 %v4487_v44, %v4236_v45 }
 0x68b   :  { %v4657_v24 = vadd.f32 %v4598_v37, %v4529_v7 }
 0x68c   :  { %v4658_v54 = vadd.f32 %v4598_v37, %v4530_v14  ;;  %v4140_v7 = vpop.f32.mrf.mxu2 }
 0x68d   :  { %v4689_v12 = vmax.f32 %v4657_v24, 0.0  ;;  %v4243_v27 = vadd.f32 %v4140_v7, %v9057_v41 }
 0x68e   :  { %v4690_v50 = vmax.f32 %v4658_v54, 0.0  ;;  %v4613_v54 = vpop.permute.xlu0 %4612 }
 0x68f   :  { %v9155_v60 = vmax.f32 %v4681_v53, %v4689_v12 }
 0x690   :  { %v9157_v32 = vmax.f32 %v4682_v51, %v4690_v50  ;;  %v4425_v47 = vpop.f32.mrf.mxu0 }
 0x691   :  { %v4531_v8 = vadd.f32 %v4425_v47, %v4237_v16  ;;  %v4490_v3 = vpop.f32.mrf.mxu1  ;;  %v4208_v16 = vpop.f32.mrf.mxu3 }
 0x692   :  { %v4532_v46 = vadd.f32 %v4490_v3, %v4238_v33 }
 0x693   :  { %v4659_v21 = vadd.f32 %v4603_v61, %v4531_v8  ;;  %v4618_v8 = vpop.permute.xlu1 %4617 }
 0x694   :  { %v4660_v2 = vadd.f32 %v4603_v61, %v4532_v46  ;;  %v4143_v51 = vpop.f32.mrf.mxu2 }
 0x695   :  { %v4691_v31 = vmax.f32 %v4659_v21, 0.0 }
 0x696   :  { %v4692_v39 = vmax.f32 %v4660_v2, 0.0 }
 0x697   :  { %v4715_v40 = vmax.f32 %v4683_v15, %v4691_v31  ;;  %v4245_v15 = vadd.f32 %v4143_v51, %v9068_v10 }
 0x698   :  { %v4716_v25 = vmax.f32 %v4684_v0, %v4692_v39  ;;  %v4428_v45 = vpop.f32.mrf.mxu0 }
 0x699   :  { %v4533_v36 = vadd.f32 %v4428_v45, %v4239_v20  ;;  %v4493_v62 = vpop.f32.mrf.mxu1  ;;  %v4211_v31 = vpop.f32.mrf.mxu3 }
 0x69a   :  { %v4534_v44 = vadd.f32 %v4493_v62, %v4240_v52  ;;  %v4623_v20 = vpop.permute.xlu2 %4622 }
 0x69b   :  { %v4661_v35 = vadd.f32 %v4608_v11, %v4533_v36 }
 0x69c   :  { %v4662_v37 = vadd.f32 %v4608_v11, %v4534_v44  ;;  %v4146_v21 = vpop.f32.mrf.mxu2 }
 0x69d   :  { %v4693_v30 = vmax.f32 %v4661_v35, 0.0  ;;  %v4247_v10 = vadd.f32 %v4146_v21, %v9079_v22 }
 0x69e   :  { %v4694_v14 = vmax.f32 %v4662_v37, 0.0 }
 0x69f   :  { %v4717_v24 = vmax.f32 %v9139_v9, %v4693_v30  ;;  %v4244_v9 = vadd.f32 %v4205_v13, %v9060_v58  ;;  %v4246_v58 = vadd.f32 %v4208_v16, %v9071_v4  ;;  %v4628_v30 = vpop.permute.xlu0 %4627 }
 0x6a0   :  { %v4718_v19 = vmax.f32 %v9141_v38, %v4694_v14  ;;  %v4431_v63 = vpop.f32.mrf.mxu0 }
 0x6a1   :  { %v4535_v55 = vadd.f32 %v4431_v63, %v4241_v29  ;;  %v4496_v28 = vpop.f32.mrf.mxu1 }
 0x6a2   :  { %v4536_v53 = vadd.f32 %v4496_v28, %v4242_v59 }
 0x6a3   :  { %v4663_v12 = vadd.f32 %v4613_v54, %v4535_v55 }
 0x6a4   :  { %v4664_v50 = vadd.f32 %v4613_v54, %v4536_v53  ;;  %v4149_v44 = vpop.f32.mrf.mxu2 }
 0x6a5   :  { %v4695_v33 = vmax.f32 %v4663_v12, 0.0  ;;  %v4249_v28 = vadd.f32 %v4149_v44, %v9090_v34  ;;  %v4633_v12 = vpop.permute.xlu1 %4632 }
 0x6a6   :  { %v4696_v47 = vmax.f32 %v4664_v50, 0.0 }
 0x6a7   :  { %v4719_v5 = vmax.f32 %v9147_v49, %v4695_v33 }
 0x6a8   :  { %v4720_v42 = vmax.f32 %v9149_v1, %v4696_v47  ;;  %v4434_v38 = vpop.f32.mrf.mxu0 }
 0x6a9   :  { %v4537_v18 = vadd.f32 %v4434_v38, %v4243_v27  ;;  %v4499_v56 = vpop.f32.mrf.mxu1 }
 0x6aa   :  { %v4538_v3 = vadd.f32 %v4499_v56, %v4244_v9 }
 0x6ab   :  { %v4665_v61 = vadd.f32 %v4618_v8, %v4537_v18 }
 0x6ac   :  { %v4666_v48 = vadd.f32 %v4618_v8, %v4538_v3  ;;  %v4152_v51 = vpop.f32.mrf.mxu2  ;;  %v4638_v8 = vpop.permute.xlu2 %4637 }
 0x6ad   :  { %v4697_v46 = vmax.f32 %v4665_v61, 0.0 }
 0x6ae   :  { %v4698_v2 = vmax.f32 %v4666_v48, 0.0 }
 0x6af   :  { %v9173_v41 = vmax.f32 %v9155_v60, %v4697_v46  ;;  %v4248_v60 = vadd.f32 %v4211_v31, %v9082_v17 }
 0x6b0   :  { %v9177_v49 = vmax.f32 %v9157_v32, %v4698_v2  ;;  %v4437_v1 = vpop.f32.mrf.mxu0  ;;  %v4214_v32 = vpop.f32.mrf.mxu3 }
 0x6b1   :  { %v4539_v0 = vadd.f32 %v4437_v1, %v4245_v15  ;;  %v4502_v39 = vpop.f32.mrf.mxu1  ;;  %v4250_v22 = vadd.f32 %v4214_v32, %v9093_v23 }
 0x6b2   :  { %v4540_v52 = vadd.f32 %v4502_v39, %v4246_v58 }
 0x6b3   :  { %v4667_v45 = vadd.f32 %v4623_v20, %v4539_v0  ;;  %v4643_v0 = vpop.permute.xlu0 %4642 }
 0x6b4   :  { %v4668_v36 = vadd.f32 %v4623_v20, %v4540_v52  ;;  %v4155_v48 = vpop.f32.mrf.mxu2 }
 0x6b5   :  { %v4699_v62 = vmax.f32 %v4667_v45, 0.0 }
 0x6b6   :  { %v4700_v11 = vmax.f32 %v4668_v36, 0.0 }
 0x6b7   :  { %v9180_v7 = vmax.f32 %v4715_v40, %v4699_v62 }
 0x6b8   :  { %v4724_v4 = vmax.f32 %v4716_v25, %v4700_v11  ;;  %v4440_v13 = vpop.f32.mrf.mxu0  ;;  %v4217_v16 = vpop.f32.mrf.mxu3 }
 0x6b9   :  { %v4541_v35 = vadd.f32 %v4440_v13, %v4247_v10  ;;  %v4505_v37 = vpop.f32.mrf.mxu1  ;;  %v4252_v27 = vadd.f32 %v4217_v16, %v9104_v57 }
 0x6ba   :  { %v4542_v14 = vadd.f32 %v4505_v37, %v4248_v60 }
 0x6bb   :  { %v4669_v29 = vadd.f32 %v4628_v30, %v4541_v35 }
 0x6bc   :  { %v4670_v59 = vadd.f32 %v4628_v30, %v4542_v14 }
 0x6bd   :  { %v4701_v63 = vmax.f32 %v4669_v29, 0.0 }
 0x6be   :  { %v4702_v55 = vmax.f32 %v4670_v59, 0.0 }
 0x6bf   :  { %v4725_v54 = vmax.f32 %v4717_v24, %v4701_v63 }
 0x6c0   :  { %v4726_v40 = vmax.f32 %v4718_v19, %v4702_v55  ;;  %v4443_v53 = vpop.f32.mrf.mxu0  ;;  %v4251_v19 = vadd.f32 %v4152_v51, %v9101_v43 }
 0x6c1   :  { %4733 = vst [vmem:[%s9222_s6] sm:$0xff] %v4725_v54  ;;  %v4543_v17 = vadd.f32 %v4443_v53, %v4249_v28  ;;  %v4508_v25 = vpop.f32.mrf.mxu1 }
 0x6c2   :  { %4734 = vst [vmem:[%s9222_s6 + $0x8] sm:$0xff] %v4726_v40  ;;  %v4544_v50 = vadd.f32 %v4508_v25, %v4250_v22 }
 0x6c3   :  { %v4671_v34 = vadd.f32 %v4633_v12, %v4543_v17 }
 0x6c4   :  { %v4672_v24 = vadd.f32 %v4633_v12, %v4544_v50 }
 0x6c5   :  { %v4703_v33 = vmax.f32 %v4671_v34, 0.0 }
 0x6c6   :  { %v4704_v23 = vmax.f32 %v4672_v24, 0.0 }
 0x6c7   :  { %v4727_v47 = vmax.f32 %v4719_v5, %v4703_v33  ;;  %v4220_v5 = vpop.f32.mrf.mxu3 }
 0x6c8   :  { %v4728_v9 = vmax.f32 %v4720_v42, %v4704_v23  ;;  %v4446_v38 = vpop.f32.mrf.mxu0  ;;  %v4253_v42 = vadd.f32 %v4155_v48, %v9112_v26  ;;  %v4254_v2 = vadd.f32 %v4220_v5, %v9115_v6 }
 0x6c9   :  { %4735 = vst [vmem:[%s9222_s6 + $0x10] sm:$0xff] %v4727_v47  ;;  %v4545_v18 = vadd.f32 %v4446_v38, %v4251_v19  ;;  %v4511_v56 = vpop.f32.mrf.mxu1 }
 0x6ca   :  { %4736 = vst [vmem:[%s9222_s6 + $0x18] sm:$0xff] %v4728_v9  ;;  %v4546_v3 = vadd.f32 %v4511_v56, %v4252_v27 }
 0x6cb   :  { %v4673_v61 = vadd.f32 %v4638_v8, %v4545_v18 }
 0x6cc   :  { %v4674_v43 = vadd.f32 %v4638_v8, %v4546_v3 }
 0x6cd   :  { %v4705_v46 = vmax.f32 %v4673_v61, 0.0 }
 0x6ce   :  { %v4706_v57 = vmax.f32 %v4674_v43, 0.0 }
 0x6cf   :  { %v4729_v21 = vmax.f32 %v9173_v41, %v4705_v46 }
 0x6d0   :  { %v4730_v15 = vmax.f32 %v9177_v49, %v4706_v57  ;;  %v4449_v31 = vpop.f32.mrf.mxu0 }
 0x6d1   :  { %4737 = vst [vmem:[%s9222_s6 + $0x20] sm:$0xff] %v4729_v21  ;;  %v4547_v58 = vadd.f32 %v4449_v31, %v4253_v42  ;;  %v4514_v1 = vpop.f32.mrf.mxu1 }
 0x6d2   :  { %4738 = vst [vmem:[%s9222_s6 + $0x28] sm:$0xff] %v4730_v15  ;;  %v4548_v39 = vadd.f32 %v4514_v1, %v4254_v2 }
 0x6d3   :  { %v4675_v26 = vadd.f32 %v4643_v0, %v4547_v58 }
 0x6d4   :  { %v4676_v20 = vadd.f32 %v4643_v0, %v4548_v39 }
 0x6d5   :  { %v4707_v41 = vmax.f32 %v4675_v26, 0.0 }
 0x6d6   :  { %v4708_v52 = vmax.f32 %v4676_v20, 0.0 }
 0x6d7   :  { %v4731_v6 = vmax.f32 %v9180_v7, %v4707_v41 }
 0x6d8   :  { %v4732_v49 = vmax.f32 %v4724_v4, %v4708_v52 }
 0x6d9   :  { %4739 = vst [vmem:[%s9222_s6 + $0x30] sm:$0xff] %v4731_v6 }
 0x6da   :  { %4740 = vst [vmem:[%s9222_s6 + $0x38] sm:$0xff] %v4732_v49 }

</bundles_post_ra>
